<compile_context>
chip_gen: v7x
topology: tpu7x:2x2x1
jax: 0.10.0
libtpu: 0.0.40
codegen_flags: <defaults>
</compile_context>

<pallas_src>
import numpy as np
import jax
import jax.numpy as jnp
from jax.experimental import pallas as pl
from jax.experimental.pallas import tpu as pltpu


# --------------------------------------------------------------------------- #
# In-kernel helpers (activations live in (B, T, N, C) layout)
# --------------------------------------------------------------------------- #
def _time_block(x4, w_ref, bias):
    """Fused TimeBlock: relu(conv1(x) + sigmoid(conv2(x)) + conv3(x)).

    x4:    (B, T, N, Ci) f32 activations.
    w_ref: (3, Ci, 2*Co) bf16 ref, tap-major; columns [0:Co] hold the folded
           conv1+conv3 weights, columns [Co:2Co] the conv2 (gate) weights.
    bias:  (1, 2*Co) f32 with the same column split.
    Returns (B*T*N, Co) f32, rows ordered (b, t, n).  Requires T >= 2.
    """
    B, T, N, Ci = x4.shape
    R = B * T * N
    co = w_ref.shape[-1] // 2
    # One reflect-padded buffer + three static slices (no per-tap copies).
    xp = jnp.concatenate([x4[:, 1:2], x4, x4[:, T - 2:T - 1]], axis=1)

    def tap(k):  # temporal tap t-1 / t / t+1 as a bf16 (R, Ci) matrix
        return xp[:, k:k + T].reshape(R, Ci).astype(jnp.bfloat16)

    acc = bias + jnp.dot(tap(0), w_ref[0], preferred_element_type=jnp.float32)
    acc = acc + jnp.dot(tap(1), w_ref[1], preferred_element_type=jnp.float32)
    acc = acc + jnp.dot(tap(2), w_ref[2], preferred_element_type=jnp.float32)
    return jnp.maximum(acc[:, :co] + jax.nn.sigmoid(acc[:, co:]), 0.0)


def _batch_norm_nodes(t4, gb_ref, eps=1e-5):
    """Training-mode BatchNorm2d(num_nodes): per-node batch stats over (B, T, C).

    t4: (B, T, N, C) f32;  gb_ref: (2, 1, N, 1) f32 = stacked [gamma; beta].
    TODO(synk): running_mean/running_var momentum updates (stateful buffers) are
    not modeled; batch statistics are used, matching module training mode.
    """
    B, T, N, C = t4.shape
    cnt = float(B * T * C)

    def node_sum(v):  # (B, T, N, 1) -> (1, 1, N, 1); leading-dim ops only
        v = v.reshape(B * T, N, 1)
        tot = v[0]
        for q in range(1, B * T):
            tot = tot + v[q]
        return tot.reshape(1, 1, N, 1)

    mean = node_sum(jnp.sum(t4, axis=3, keepdims=True)) / cnt
    cen = t4 - mean
    var = node_sum(jnp.sum(cen * cen, axis=3, keepdims=True)) / cnt
    return cen * jax.lax.rsqrt(var + eps) * gb_ref[0] + gb_ref[1]


def _stgcn_block(h4, ab, wa_ref, ba, th_ref, wb_ref, bb, gb_ref):
    """STGCNBlock: TimeBlock -> Theta1 (commuted) -> graph conv -> relu
    -> TimeBlock -> per-node BatchNorm.   h4: (B, T, N, Ci) f32."""
    B, T, N, _ = h4.shape
    t1 = _time_block(h4, wa_ref, ba)                                   # (R, C1)
    # Theta1 commutes with the (linear) node mixing -> apply it first so the
    # graph conv runs on the narrower spatial_channels slab.
    u = jnp.dot(t1.astype(jnp.bfloat16), th_ref[...],
                preferred_element_type=jnp.float32)                    # (R, Cs)
    cs = u.shape[-1]
    u3 = u.reshape(B * T, N, cs).astype(jnp.bfloat16)
    # Graph convolution, batched over q=(b,t): g[q,n,c] = sum_m A[n,m] u[q,m,c]
    g = jnp.einsum("qnm,qmc->qnc", ab, u3,
                   preferred_element_type=jnp.float32)                 # (BT, N, Cs)
    t2 = jnp.maximum(g, 0.0).reshape(B, T, N, cs)
    t3 = _time_block(t2, wb_ref, bb)                                   # (R, C1)
    t3 = t3.reshape(B, T, N, t3.shape[-1])
    return _batch_norm_nodes(t3, gb_ref)


# --------------------------------------------------------------------------- #
# Fused Pallas kernel
# --------------------------------------------------------------------------- #
def stgcn_ae_kernel(x_ref, ab_ref,
                    w1a_ref, w1b_ref, b1_ref, th1_ref, gb1_ref,
                    w2a_ref, w2b_ref, wl_ref, b2_ref, th2_ref, gb2_ref,
                    wlin_ref, blin_ref, o_ref):
    """Whole stgcn_autoencoder forward, VMEM-resident, single invocation."""
    B, T, N, fo = o_ref.shape
    ab = ab_ref[...]                                                   # (BT, N, N) bf16
    h1 = _stgcn_block(x_ref[...], ab, w1a_ref, b1_ref[0], th1_ref,
                      w1b_ref, b1_ref[1], gb1_ref)
    h2 = _stgcn_block(h1, ab, w2a_ref, b2_ref[0], th2_ref,
                      w2b_ref, b2_ref[1], gb2_ref)
    h3 = _time_block(h2, wl_ref, b2_ref[2])                            # (R, Cin)
    y = jnp.dot(h3.astype(jnp.bfloat16), wlin_ref[...],
                preferred_element_type=jnp.float32) + blin_ref[...]
    o_ref[...] = jax.nn.sigmoid(y).reshape(B, T, N, fo)


# --------------------------------------------------------------------------- #
# Wrapper (weight folding / packing + the two tiny layout permutes)
# --------------------------------------------------------------------------- #
def _fold_time_block(w, b):
    """(3 convs, 3 taps, Ci, Co)/(3, Co) -> bf16 (3, Ci, 2*Co) weights with
    [conv1+conv3 || conv2] columns and the matching f32 (1, 2*Co) bias."""
    w_cat = jnp.concatenate([w[0] + w[2], w[1]], axis=-1)
    b_cat = jnp.concatenate([b[0] + b[2], b[1]], axis=-1)
    return w_cat.astype(jnp.bfloat16), b_cat.reshape(1, -1)


def stgcn_autoencoder_forward(a_hat, x, params):
    """x: (B, N, T, in_feat), a_hat: (N, N) -> (B, N, T, in_feat)."""
    B, N, T, _ = x.shape
    p1, p2 = params["block1"], params["block2"]
    Fo = params["linear"]["w"].shape[1]

    # (B, N, T, C) -> (B, T, N, C): node on the sublane axis so the in-kernel
    # graph conv is a batched 2D matmul with no lane relayout.
    x_btnc = jnp.transpose(x, (0, 2, 1, 3))

    w1a, b1a = _fold_time_block(p1["w1"], p1["b1"])
    w1b, b1b = _fold_time_block(p1["w2"], p1["b2"])
    w2a, b2a = _fold_time_block(p2["w1"], p2["b1"])
    w2b, b2b = _fold_time_block(p2["w2"], p2["b2"])
    wl, bl = _fold_time_block(params["last"]["w"], params["last"]["b"])

    b1 = jnp.stack([b1a, b1b])                                   # (2, 1, 2*C1)
    b2 = jnp.stack([b2a, b2b, bl])                               # (3, 1, 2*Cin)
    gb1 = jnp.stack([p1["gamma"], p1["beta"]]).reshape(2, 1, N, 1)
    gb2 = jnp.stack([p2["gamma"], p2["beta"]]).reshape(2, 1, N, 1)
    a_b = jnp.broadcast_to(a_hat, (B * T, N, N)).astype(jnp.bfloat16)
    th1 = p1["theta"].astype(jnp.bfloat16)
    th2 = p2["theta"].astype(jnp.bfloat16)
    wlin = params["linear"]["w"].astype(jnp.bfloat16)
    blin = params["linear"]["b"].reshape(1, -1)

    vmem = pl.BlockSpec(memory_space=pltpu.MemorySpace.VMEM)
    out = pl.pallas_call(
        stgcn_ae_kernel,
        out_shape=jax.ShapeDtypeStruct((B, T, N, Fo), jnp.float32),
        in_specs=[vmem] * 15,
        out_specs=vmem,
    )(x_btnc, a_b, w1a, w1b, b1, th1, gb1, w2a, w2b, wl, b2, th2, gb2, wlin, blin)

    return jnp.transpose(out, (0, 2, 1, 3))


# --------------------------------------------------------------------------- #
# Pure-JAX reference (mirrors the PyTorch forward semantics, f32 throughout)
# --------------------------------------------------------------------------- #
def _time_block_ref(x, w, b):
    # x: (B, N, T, Ci); w: (3 convs, 3 taps, Ci, Co); b: (3, Co)
    xp = jnp.pad(x, ((0, 0), (0, 0), (1, 1), (0, 0)), mode="reflect")

    def conv(i):
        return (jnp.einsum("bntc,cd->bntd", xp[:, :, 0:-2, :], w[i, 0]) +
                jnp.einsum("bntc,cd->bntd", xp[:, :, 1:-1, :], w[i, 1]) +
                jnp.einsum("bntc,cd->bntd", xp[:, :, 2:, :], w[i, 2]) + b[i])

    return jax.nn.relu(conv(0) + jax.nn.sigmoid(conv(1)) + conv(2))


def _stgcn_block_ref(x, a_hat, p):
    t1 = _time_block_ref(x, p["w1"], p["b1"])
    lfs = jnp.einsum("ij,bjtc->bitc", a_hat, t1)
    t2 = jax.nn.relu(jnp.einsum("bntc,cs->bnts", lfs, p["theta"]))
    t3 = _time_block_ref(t2, p["w2"], p["b2"])
    mean = jnp.mean(t3, axis=(0, 2, 3), keepdims=True)
    var = jnp.mean((t3 - mean) ** 2, axis=(0, 2, 3), keepdims=True)
    g = p["gamma"].reshape(1, -1, 1, 1)
    bb = p["beta"].reshape(1, -1, 1, 1)
    return g * (t3 - mean) * jax.lax.rsqrt(var + 1e-5) + bb


def autoencoder_ref(a_hat, x, params):
    h1 = _stgcn_block_ref(x, a_hat, params["block1"])
    h2 = _stgcn_block_ref(h1, a_hat, params["block2"])
    h3 = _time_block_ref(h2, params["last"]["w"], params["last"]["b"])
    return jax.nn.sigmoid(jnp.einsum("bntc,cf->bntf", h3, params["linear"]["w"]) +
                          params["linear"]["b"])


# --------------------------------------------------------------------------- #
if __name__ == "__main__":
    B, N, T = 2, 16, 8              # batch, num_nodes, time_step
    in_feat, size_step = 8, 2
    Cs = in_feat + 1 * size_step    # spatial_channels = 10
    C1 = in_feat + 4 * size_step    # block1 out_channels = 16

    key = jax.random.PRNGKey(0)
    ks = jax.random.split(key, 20)
    x = jax.random.normal(ks[0], (B, N, T, in_feat), jnp.float32)

    # deterministic normalized adjacency A_hat
    a = jax.random.uniform(ks[1], (N, N), jnp.float32)
    a = 0.5 * (a + a.T) + jnp.eye(N, dtype=jnp.float32)
    a_hat = a / jnp.sum(a, axis=1, keepdims=True)

    def uinit(kk, shape, fan_in):
        bound = 1.0 / np.sqrt(fan_in)
        return jax.random.uniform(kk, shape, jnp.float32, -bound, bound)

    # conv weights stored as (conv_idx, temporal_tap, Ci, Co): PyTorch Conv2d
    # (Co, Ci, 1, 3) rearranged.  Linear weight stored already transposed (in, out).
    params = {
        "block1": {
            "w1": uinit(ks[2], (3, 3, in_feat, C1), 3 * in_feat),
            "b1": uinit(ks[3], (3, C1), 3 * in_feat),
            "theta": uinit(ks[4], (C1, Cs), Cs),
            "w2": uinit(ks[5], (3, 3, Cs, C1), 3 * Cs),
            "b2": uinit(ks[6], (3, C1), 3 * Cs),
            "gamma": 1.0 + 0.1 * jax.random.normal(ks[7], (N,), jnp.float32),
            "beta": 0.1 * jax.random.normal(ks[8], (N,), jnp.float32),
        },
        "block2": {
            "w1": uinit(ks[9], (3, 3, C1, in_feat), 3 * C1),
            "b1": uinit(ks[10], (3, in_feat), 3 * C1),
            "theta": uinit(ks[11], (in_feat, Cs), Cs),
            "w2": uinit(ks[12], (3, 3, Cs, in_feat), 3 * Cs),
            "b2": uinit(ks[13], (3, in_feat), 3 * Cs),
            "gamma": 1.0 + 0.1 * jax.random.normal(ks[14], (N,), jnp.float32),
            "beta": 0.1 * jax.random.normal(ks[15], (N,), jnp.float32),
        },
        "last": {
            "w": uinit(ks[16], (3, 3, in_feat, in_feat), 3 * in_feat),
            "b": uinit(ks[17], (3, in_feat), 3 * in_feat),
        },
        "linear": {
            "w": uinit(ks[18], (in_feat, in_feat), in_feat),
            "b": uinit(ks[19], (in_feat,), in_feat),
        },
    }
    # NOTE: nn.Dropout is constructed by the PyTorch module but never called in
    # forward(), so it is intentionally omitted here.

    out = jax.jit(stgcn_autoencoder_forward)(a_hat, x, params)
    out = jax.block_until_ready(out)

    ref = autoencoder_ref(a_hat, x, params)
    assert out.shape == (B, N, T, in_feat), out.shape
    np.testing.assert_allclose(np.asarray(out), np.asarray(ref), rtol=2e-2, atol=2e-2)
    print("KERNEL_OK")
</pallas_src>

<mosaic_0001>
module attributes {stable_mosaic.version = 11 : i64} {
  func.func @stgcn_ae_kernel(%arg0: memref<2x8x16x8xf32, #tpu.memory_space<vmem>>, %arg1: memref<16x16x16xbf16, #tpu.memory_space<vmem>>, %arg2: memref<3x8x32xbf16, #tpu.memory_space<vmem>>, %arg3: memref<3x10x32xbf16, #tpu.memory_space<vmem>>, %arg4: memref<2x1x32xf32, #tpu.memory_space<vmem>>, %arg5: memref<16x10xbf16, #tpu.memory_space<vmem>>, %arg6: memref<2x1x16x1xf32, #tpu.memory_space<vmem>>, %arg7: memref<3x16x16xbf16, #tpu.memory_space<vmem>>, %arg8: memref<3x10x16xbf16, #tpu.memory_space<vmem>>, %arg9: memref<3x8x16xbf16, #tpu.memory_space<vmem>>, %arg10: memref<3x1x16xf32, #tpu.memory_space<vmem>>, %arg11: memref<8x10xbf16, #tpu.memory_space<vmem>>, %arg12: memref<2x1x16x1xf32, #tpu.memory_space<vmem>>, %arg13: memref<8x8xbf16, #tpu.memory_space<vmem>>, %arg14: memref<1x8xf32, #tpu.memory_space<vmem>>, %arg15: memref<2x8x16x8xf32, #tpu.memory_space<vmem>>) attributes {dimension_semantics = [], scalar_prefetch = 0 : i64, scratch_operands = 0 : i64, tpu.core_type = #tpu.core_type<tc>} {
    %c0 = arith.constant 0 : index
    %c0_0 = arith.constant 0 : index
    %c0_1 = arith.constant 0 : index
    %0 = vector.load %arg1[%c0, %c0_0, %c0_1] : memref<16x16x16xbf16, #tpu.memory_space<vmem>>, vector<16x16x16xbf16>
    %c0_2 = arith.constant 0 : index
    %c0_3 = arith.constant 0 : index
    %c0_4 = arith.constant 0 : index
    %c0_5 = arith.constant 0 : index
    %1 = vector.load %arg0[%c0_2, %c0_3, %c0_4, %c0_5] : memref<2x8x16x8xf32, #tpu.memory_space<vmem>>, vector<2x8x16x8xf32>
    %c0_6 = arith.constant 0 : index
    %c0_7 = arith.constant 0 : index
    %c0_8 = arith.constant 0 : index
    %2 = vector.load %arg4[%c0_6, %c0_7, %c0_8] : memref<2x1x32xf32, #tpu.memory_space<vmem>>, vector<1x1x32xf32>
    %3 = vector.shape_cast %2 : vector<1x1x32xf32> to vector<1x32xf32>
    %c1 = arith.constant 1 : index
    %c0_9 = arith.constant 0 : index
    %c0_10 = arith.constant 0 : index
    %4 = vector.load %arg4[%c1, %c0_9, %c0_10] : memref<2x1x32xf32, #tpu.memory_space<vmem>>, vector<1x1x32xf32>
    %5 = vector.shape_cast %4 : vector<1x1x32xf32> to vector<1x32xf32>
    %6 = vector.extract_strided_slice %1 {offsets = [0, 1, 0, 0], sizes = [2, 1, 16, 8], strides = [1, 1, 1, 1]} : vector<2x8x16x8xf32> to vector<2x1x16x8xf32>
    %7 = vector.extract_strided_slice %1 {offsets = [0, 6, 0, 0], sizes = [2, 1, 16, 8], strides = [1, 1, 1, 1]} : vector<2x8x16x8xf32> to vector<2x1x16x8xf32>
    %8 = tpu.concatenate %6, %1, %7 in 1 : vector<2x1x16x8xf32>, vector<2x8x16x8xf32>, vector<2x1x16x8xf32> -> vector<2x10x16x8xf32>
    %9 = vector.extract_strided_slice %8 {offsets = [0, 0, 0, 0], sizes = [2, 8, 16, 8], strides = [1, 1, 1, 1]} : vector<2x10x16x8xf32> to vector<2x8x16x8xf32>
    %10 = vector.shape_cast %9 : vector<2x8x16x8xf32> to vector<256x8xf32>
    %11 = arith.truncf %10 : vector<256x8xf32> to vector<256x8xbf16>
    %c0_11 = arith.constant 0 : index
    %c0_12 = arith.constant 0 : index
    %c0_13 = arith.constant 0 : index
    %12 = vector.load %arg2[%c0_11, %c0_12, %c0_13] : memref<3x8x32xbf16, #tpu.memory_space<vmem>>, vector<1x8x32xbf16>
    %13 = vector.shape_cast %12 : vector<1x8x32xbf16> to vector<8x32xbf16>
    %cst = arith.constant dense<0.000000e+00> : vector<256x32xf32>
    %14 = tpu.matmul %11, %13, %cst {dimension_numbers = #tpu.dot_dimension_numbers<[1], [0], [0], [1], [0, 0, 1, 1], [], []>} : vector<256x8xbf16>, vector<8x32xbf16>, vector<256x32xf32> -> vector<256x32xf32>
    %15 = vector.broadcast %3 : vector<1x32xf32> to vector<256x32xf32>
    %16 = arith.addf %15, %14 : vector<256x32xf32>
    %17 = vector.extract_strided_slice %8 {offsets = [0, 1, 0, 0], sizes = [2, 8, 16, 8], strides = [1, 1, 1, 1]} : vector<2x10x16x8xf32> to vector<2x8x16x8xf32>
    %18 = vector.shape_cast %17 : vector<2x8x16x8xf32> to vector<256x8xf32>
    %19 = arith.truncf %18 : vector<256x8xf32> to vector<256x8xbf16>
    %c1_14 = arith.constant 1 : index
    %c0_15 = arith.constant 0 : index
    %c0_16 = arith.constant 0 : index
    %20 = vector.load %arg2[%c1_14, %c0_15, %c0_16] : memref<3x8x32xbf16, #tpu.memory_space<vmem>>, vector<1x8x32xbf16>
    %21 = vector.shape_cast %20 : vector<1x8x32xbf16> to vector<8x32xbf16>
    %cst_17 = arith.constant dense<0.000000e+00> : vector<256x32xf32>
    %22 = tpu.matmul %19, %21, %cst_17 {dimension_numbers = #tpu.dot_dimension_numbers<[1], [0], [0], [1], [0, 0, 1, 1], [], []>} : vector<256x8xbf16>, vector<8x32xbf16>, vector<256x32xf32> -> vector<256x32xf32>
    %23 = arith.addf %16, %22 : vector<256x32xf32>
    %24 = vector.extract_strided_slice %8 {offsets = [0, 2, 0, 0], sizes = [2, 8, 16, 8], strides = [1, 1, 1, 1]} : vector<2x10x16x8xf32> to vector<2x8x16x8xf32>
    %25 = vector.shape_cast %24 : vector<2x8x16x8xf32> to vector<256x8xf32>
    %26 = arith.truncf %25 : vector<256x8xf32> to vector<256x8xbf16>
    %c2 = arith.constant 2 : index
    %c0_18 = arith.constant 0 : index
    %c0_19 = arith.constant 0 : index
    %27 = vector.load %arg2[%c2, %c0_18, %c0_19] : memref<3x8x32xbf16, #tpu.memory_space<vmem>>, vector<1x8x32xbf16>
    %28 = vector.shape_cast %27 : vector<1x8x32xbf16> to vector<8x32xbf16>
    %cst_20 = arith.constant dense<0.000000e+00> : vector<256x32xf32>
    %29 = tpu.matmul %26, %28, %cst_20 {dimension_numbers = #tpu.dot_dimension_numbers<[1], [0], [0], [1], [0, 0, 1, 1], [], []>} : vector<256x8xbf16>, vector<8x32xbf16>, vector<256x32xf32> -> vector<256x32xf32>
    %30 = arith.addf %23, %29 : vector<256x32xf32>
    %31 = vector.extract_strided_slice %30 {offsets = [0, 0], sizes = [256, 16], strides = [1, 1]} : vector<256x32xf32> to vector<256x16xf32>
    %32 = vector.extract_strided_slice %30 {offsets = [0, 16], sizes = [256, 16], strides = [1, 1]} : vector<256x32xf32> to vector<256x16xf32>
    %33 = arith.negf %32 : vector<256x16xf32>
    %34 = math.exp %33 : vector<256x16xf32>
    %cst_21 = arith.constant 1.000000e+00 : f32
    %35 = vector.broadcast %cst_21 : f32 to vector<256x16xf32>
    %36 = arith.addf %35, %34 : vector<256x16xf32>
    %37 = arith.divf %35, %36 : vector<256x16xf32>
    %38 = arith.addf %31, %37 : vector<256x16xf32>
    %cst_22 = arith.constant 0.000000e+00 : f32
    %39 = vector.broadcast %cst_22 : f32 to vector<256x16xf32>
    %40 = arith.maximumf %38, %39 : vector<256x16xf32>
    %41 = arith.truncf %40 : vector<256x16xf32> to vector<256x16xbf16>
    %c0_23 = arith.constant 0 : index
    %c0_24 = arith.constant 0 : index
    %42 = vector.load %arg5[%c0_23, %c0_24] : memref<16x10xbf16, #tpu.memory_space<vmem>>, vector<16x10xbf16>
    %cst_25 = arith.constant dense<0.000000e+00> : vector<256x10xf32>
    %43 = tpu.matmul %41, %42, %cst_25 {dimension_numbers = #tpu.dot_dimension_numbers<[1], [0], [0], [1], [0, 0, 1, 1], [], []>} : vector<256x16xbf16>, vector<16x10xbf16>, vector<256x10xf32> -> vector<256x10xf32>
    %44 = vector.shape_cast %43 : vector<256x10xf32> to vector<16x16x10xf32>
    %45 = arith.truncf %44 : vector<16x16x10xf32> to vector<16x16x10xbf16>
    "tpu.trace_start"() <{level = 10 : i32, message = "qnm,qmc->qnc"}> : () -> ()
    %cst_26 = arith.constant dense<0.000000e+00> : vector<16x16x10xf32>
    %46 = tpu.matmul %0, %45, %cst_26 {dimension_numbers = #tpu.dot_dimension_numbers<[2], [1], [1], [2], [0, 0, 0, 1, 1, 2], [0], [0]>} : vector<16x16x16xbf16>, vector<16x16x10xbf16>, vector<16x16x10xf32> -> vector<16x16x10xf32>
    "tpu.trace_stop"() : () -> ()
    %cst_27 = arith.constant 0.000000e+00 : f32
    %47 = vector.broadcast %cst_27 : f32 to vector<16x16x10xf32>
    %48 = arith.maximumf %46, %47 : vector<16x16x10xf32>
    %49 = vector.shape_cast %48 : vector<16x16x10xf32> to vector<2x8x16x10xf32>
    %50 = vector.extract_strided_slice %49 {offsets = [0, 1, 0, 0], sizes = [2, 1, 16, 10], strides = [1, 1, 1, 1]} : vector<2x8x16x10xf32> to vector<2x1x16x10xf32>
    %51 = vector.extract_strided_slice %49 {offsets = [0, 6, 0, 0], sizes = [2, 1, 16, 10], strides = [1, 1, 1, 1]} : vector<2x8x16x10xf32> to vector<2x1x16x10xf32>
    %52 = tpu.concatenate %50, %49, %51 in 1 : vector<2x1x16x10xf32>, vector<2x8x16x10xf32>, vector<2x1x16x10xf32> -> vector<2x10x16x10xf32>
    %53 = vector.extract_strided_slice %52 {offsets = [0, 0, 0, 0], sizes = [2, 8, 16, 10], strides = [1, 1, 1, 1]} : vector<2x10x16x10xf32> to vector<2x8x16x10xf32>
    %54 = vector.shape_cast %53 : vector<2x8x16x10xf32> to vector<256x10xf32>
    %55 = arith.truncf %54 : vector<256x10xf32> to vector<256x10xbf16>
    %c0_28 = arith.constant 0 : index
    %c0_29 = arith.constant 0 : index
    %c0_30 = arith.constant 0 : index
    %56 = vector.load %arg3[%c0_28, %c0_29, %c0_30] : memref<3x10x32xbf16, #tpu.memory_space<vmem>>, vector<1x10x32xbf16>
    %57 = vector.shape_cast %56 : vector<1x10x32xbf16> to vector<10x32xbf16>
    %cst_31 = arith.constant dense<0.000000e+00> : vector<256x32xf32>
    %58 = tpu.matmul %55, %57, %cst_31 {dimension_numbers = #tpu.dot_dimension_numbers<[1], [0], [0], [1], [0, 0, 1, 1], [], []>} : vector<256x10xbf16>, vector<10x32xbf16>, vector<256x32xf32> -> vector<256x32xf32>
    %59 = vector.broadcast %5 : vector<1x32xf32> to vector<256x32xf32>
    %60 = arith.addf %59, %58 : vector<256x32xf32>
    %61 = vector.extract_strided_slice %52 {offsets = [0, 1, 0, 0], sizes = [2, 8, 16, 10], strides = [1, 1, 1, 1]} : vector<2x10x16x10xf32> to vector<2x8x16x10xf32>
    %62 = vector.shape_cast %61 : vector<2x8x16x10xf32> to vector<256x10xf32>
    %63 = arith.truncf %62 : vector<256x10xf32> to vector<256x10xbf16>
    %c1_32 = arith.constant 1 : index
    %c0_33 = arith.constant 0 : index
    %c0_34 = arith.constant 0 : index
    %64 = vector.load %arg3[%c1_32, %c0_33, %c0_34] : memref<3x10x32xbf16, #tpu.memory_space<vmem>>, vector<1x10x32xbf16>
    %65 = vector.shape_cast %64 : vector<1x10x32xbf16> to vector<10x32xbf16>
    %cst_35 = arith.constant dense<0.000000e+00> : vector<256x32xf32>
    %66 = tpu.matmul %63, %65, %cst_35 {dimension_numbers = #tpu.dot_dimension_numbers<[1], [0], [0], [1], [0, 0, 1, 1], [], []>} : vector<256x10xbf16>, vector<10x32xbf16>, vector<256x32xf32> -> vector<256x32xf32>
    %67 = arith.addf %60, %66 : vector<256x32xf32>
    %68 = vector.extract_strided_slice %52 {offsets = [0, 2, 0, 0], sizes = [2, 8, 16, 10], strides = [1, 1, 1, 1]} : vector<2x10x16x10xf32> to vector<2x8x16x10xf32>
    %69 = vector.shape_cast %68 : vector<2x8x16x10xf32> to vector<256x10xf32>
    %70 = arith.truncf %69 : vector<256x10xf32> to vector<256x10xbf16>
    %c2_36 = arith.constant 2 : index
    %c0_37 = arith.constant 0 : index
    %c0_38 = arith.constant 0 : index
    %71 = vector.load %arg3[%c2_36, %c0_37, %c0_38] : memref<3x10x32xbf16, #tpu.memory_space<vmem>>, vector<1x10x32xbf16>
    %72 = vector.shape_cast %71 : vector<1x10x32xbf16> to vector<10x32xbf16>
    %cst_39 = arith.constant dense<0.000000e+00> : vector<256x32xf32>
    %73 = tpu.matmul %70, %72, %cst_39 {dimension_numbers = #tpu.dot_dimension_numbers<[1], [0], [0], [1], [0, 0, 1, 1], [], []>} : vector<256x10xbf16>, vector<10x32xbf16>, vector<256x32xf32> -> vector<256x32xf32>
    %74 = arith.addf %67, %73 : vector<256x32xf32>
    %75 = vector.extract_strided_slice %74 {offsets = [0, 0], sizes = [256, 16], strides = [1, 1]} : vector<256x32xf32> to vector<256x16xf32>
    %76 = vector.extract_strided_slice %74 {offsets = [0, 16], sizes = [256, 16], strides = [1, 1]} : vector<256x32xf32> to vector<256x16xf32>
    %77 = arith.negf %76 : vector<256x16xf32>
    %78 = math.exp %77 : vector<256x16xf32>
    %cst_40 = arith.constant 1.000000e+00 : f32
    %79 = vector.broadcast %cst_40 : f32 to vector<256x16xf32>
    %80 = arith.addf %79, %78 : vector<256x16xf32>
    %81 = arith.divf %79, %80 : vector<256x16xf32>
    %82 = arith.addf %75, %81 : vector<256x16xf32>
    %cst_41 = arith.constant 0.000000e+00 : f32
    %83 = vector.broadcast %cst_41 : f32 to vector<256x16xf32>
    %84 = arith.maximumf %82, %83 : vector<256x16xf32>
    %85 = vector.shape_cast %84 : vector<256x16xf32> to vector<2x8x16x16xf32>
    %cst_42 = arith.constant dense<0.000000e+00> : vector<2x8x16xf32>
    %86 = vector.multi_reduction <add>, %85, %cst_42 [3] : vector<2x8x16x16xf32> to vector<2x8x16xf32>
    %87 = vector.shape_cast %86 : vector<2x8x16xf32> to vector<2x8x16x1xf32>
    %88 = vector.shape_cast %87 : vector<2x8x16x1xf32> to vector<16x16x1xf32>
    %89 = vector.extract_strided_slice %88 {offsets = [0, 0, 0], sizes = [1, 16, 1], strides = [1, 1, 1]} : vector<16x16x1xf32> to vector<1x16x1xf32>
    %90 = vector.shape_cast %89 : vector<1x16x1xf32> to vector<16x1xf32>
    %91 = vector.extract_strided_slice %88 {offsets = [1, 0, 0], sizes = [1, 16, 1], strides = [1, 1, 1]} : vector<16x16x1xf32> to vector<1x16x1xf32>
    %92 = vector.shape_cast %91 : vector<1x16x1xf32> to vector<16x1xf32>
    %93 = arith.addf %90, %92 : vector<16x1xf32>
    %94 = vector.extract_strided_slice %88 {offsets = [2, 0, 0], sizes = [1, 16, 1], strides = [1, 1, 1]} : vector<16x16x1xf32> to vector<1x16x1xf32>
    %95 = vector.shape_cast %94 : vector<1x16x1xf32> to vector<16x1xf32>
    %96 = arith.addf %93, %95 : vector<16x1xf32>
    %97 = vector.extract_strided_slice %88 {offsets = [3, 0, 0], sizes = [1, 16, 1], strides = [1, 1, 1]} : vector<16x16x1xf32> to vector<1x16x1xf32>
    %98 = vector.shape_cast %97 : vector<1x16x1xf32> to vector<16x1xf32>
    %99 = arith.addf %96, %98 : vector<16x1xf32>
    %100 = vector.extract_strided_slice %88 {offsets = [4, 0, 0], sizes = [1, 16, 1], strides = [1, 1, 1]} : vector<16x16x1xf32> to vector<1x16x1xf32>
    %101 = vector.shape_cast %100 : vector<1x16x1xf32> to vector<16x1xf32>
    %102 = arith.addf %99, %101 : vector<16x1xf32>
    %103 = vector.extract_strided_slice %88 {offsets = [5, 0, 0], sizes = [1, 16, 1], strides = [1, 1, 1]} : vector<16x16x1xf32> to vector<1x16x1xf32>
    %104 = vector.shape_cast %103 : vector<1x16x1xf32> to vector<16x1xf32>
    %105 = arith.addf %102, %104 : vector<16x1xf32>
    %106 = vector.extract_strided_slice %88 {offsets = [6, 0, 0], sizes = [1, 16, 1], strides = [1, 1, 1]} : vector<16x16x1xf32> to vector<1x16x1xf32>
    %107 = vector.shape_cast %106 : vector<1x16x1xf32> to vector<16x1xf32>
    %108 = arith.addf %105, %107 : vector<16x1xf32>
    %109 = vector.extract_strided_slice %88 {offsets = [7, 0, 0], sizes = [1, 16, 1], strides = [1, 1, 1]} : vector<16x16x1xf32> to vector<1x16x1xf32>
    %110 = vector.shape_cast %109 : vector<1x16x1xf32> to vector<16x1xf32>
    %111 = arith.addf %108, %110 : vector<16x1xf32>
    %112 = vector.extract_strided_slice %88 {offsets = [8, 0, 0], sizes = [1, 16, 1], strides = [1, 1, 1]} : vector<16x16x1xf32> to vector<1x16x1xf32>
    %113 = vector.shape_cast %112 : vector<1x16x1xf32> to vector<16x1xf32>
    %114 = arith.addf %111, %113 : vector<16x1xf32>
    %115 = vector.extract_strided_slice %88 {offsets = [9, 0, 0], sizes = [1, 16, 1], strides = [1, 1, 1]} : vector<16x16x1xf32> to vector<1x16x1xf32>
    %116 = vector.shape_cast %115 : vector<1x16x1xf32> to vector<16x1xf32>
    %117 = arith.addf %114, %116 : vector<16x1xf32>
    %118 = vector.extract_strided_slice %88 {offsets = [10, 0, 0], sizes = [1, 16, 1], strides = [1, 1, 1]} : vector<16x16x1xf32> to vector<1x16x1xf32>
    %119 = vector.shape_cast %118 : vector<1x16x1xf32> to vector<16x1xf32>
    %120 = arith.addf %117, %119 : vector<16x1xf32>
    %121 = vector.extract_strided_slice %88 {offsets = [11, 0, 0], sizes = [1, 16, 1], strides = [1, 1, 1]} : vector<16x16x1xf32> to vector<1x16x1xf32>
    %122 = vector.shape_cast %121 : vector<1x16x1xf32> to vector<16x1xf32>
    %123 = arith.addf %120, %122 : vector<16x1xf32>
    %124 = vector.extract_strided_slice %88 {offsets = [12, 0, 0], sizes = [1, 16, 1], strides = [1, 1, 1]} : vector<16x16x1xf32> to vector<1x16x1xf32>
    %125 = vector.shape_cast %124 : vector<1x16x1xf32> to vector<16x1xf32>
    %126 = arith.addf %123, %125 : vector<16x1xf32>
    %127 = vector.extract_strided_slice %88 {offsets = [13, 0, 0], sizes = [1, 16, 1], strides = [1, 1, 1]} : vector<16x16x1xf32> to vector<1x16x1xf32>
    %128 = vector.shape_cast %127 : vector<1x16x1xf32> to vector<16x1xf32>
    %129 = arith.addf %126, %128 : vector<16x1xf32>
    %130 = vector.extract_strided_slice %88 {offsets = [14, 0, 0], sizes = [1, 16, 1], strides = [1, 1, 1]} : vector<16x16x1xf32> to vector<1x16x1xf32>
    %131 = vector.shape_cast %130 : vector<1x16x1xf32> to vector<16x1xf32>
    %132 = arith.addf %129, %131 : vector<16x1xf32>
    %133 = vector.extract_strided_slice %88 {offsets = [15, 0, 0], sizes = [1, 16, 1], strides = [1, 1, 1]} : vector<16x16x1xf32> to vector<1x16x1xf32>
    %134 = vector.shape_cast %133 : vector<1x16x1xf32> to vector<16x1xf32>
    %135 = arith.addf %132, %134 : vector<16x1xf32>
    %136 = vector.shape_cast %135 : vector<16x1xf32> to vector<1x1x16x1xf32>
    %cst_43 = arith.constant 2.560000e+02 : f32
    %137 = vector.broadcast %cst_43 : f32 to vector<1x1x16x1xf32>
    %138 = arith.divf %136, %137 : vector<1x1x16x1xf32>
    %139 = vector.broadcast %138 : vector<1x1x16x1xf32> to vector<2x8x16x16xf32>
    %140 = arith.subf %85, %139 : vector<2x8x16x16xf32>
    %141 = arith.mulf %140, %140 : vector<2x8x16x16xf32>
    %cst_44 = arith.constant dense<0.000000e+00> : vector<2x8x16xf32>
    %142 = vector.multi_reduction <add>, %141, %cst_44 [3] : vector<2x8x16x16xf32> to vector<2x8x16xf32>
    %143 = vector.shape_cast %142 : vector<2x8x16xf32> to vector<2x8x16x1xf32>
    %144 = vector.shape_cast %143 : vector<2x8x16x1xf32> to vector<16x16x1xf32>
    %145 = vector.extract_strided_slice %144 {offsets = [0, 0, 0], sizes = [1, 16, 1], strides = [1, 1, 1]} : vector<16x16x1xf32> to vector<1x16x1xf32>
    %146 = vector.shape_cast %145 : vector<1x16x1xf32> to vector<16x1xf32>
    %147 = vector.extract_strided_slice %144 {offsets = [1, 0, 0], sizes = [1, 16, 1], strides = [1, 1, 1]} : vector<16x16x1xf32> to vector<1x16x1xf32>
    %148 = vector.shape_cast %147 : vector<1x16x1xf32> to vector<16x1xf32>
    %149 = arith.addf %146, %148 : vector<16x1xf32>
    %150 = vector.extract_strided_slice %144 {offsets = [2, 0, 0], sizes = [1, 16, 1], strides = [1, 1, 1]} : vector<16x16x1xf32> to vector<1x16x1xf32>
    %151 = vector.shape_cast %150 : vector<1x16x1xf32> to vector<16x1xf32>
    %152 = arith.addf %149, %151 : vector<16x1xf32>
    %153 = vector.extract_strided_slice %144 {offsets = [3, 0, 0], sizes = [1, 16, 1], strides = [1, 1, 1]} : vector<16x16x1xf32> to vector<1x16x1xf32>
    %154 = vector.shape_cast %153 : vector<1x16x1xf32> to vector<16x1xf32>
    %155 = arith.addf %152, %154 : vector<16x1xf32>
    %156 = vector.extract_strided_slice %144 {offsets = [4, 0, 0], sizes = [1, 16, 1], strides = [1, 1, 1]} : vector<16x16x1xf32> to vector<1x16x1xf32>
    %157 = vector.shape_cast %156 : vector<1x16x1xf32> to vector<16x1xf32>
    %158 = arith.addf %155, %157 : vector<16x1xf32>
    %159 = vector.extract_strided_slice %144 {offsets = [5, 0, 0], sizes = [1, 16, 1], strides = [1, 1, 1]} : vector<16x16x1xf32> to vector<1x16x1xf32>
    %160 = vector.shape_cast %159 : vector<1x16x1xf32> to vector<16x1xf32>
    %161 = arith.addf %158, %160 : vector<16x1xf32>
    %162 = vector.extract_strided_slice %144 {offsets = [6, 0, 0], sizes = [1, 16, 1], strides = [1, 1, 1]} : vector<16x16x1xf32> to vector<1x16x1xf32>
    %163 = vector.shape_cast %162 : vector<1x16x1xf32> to vector<16x1xf32>
    %164 = arith.addf %161, %163 : vector<16x1xf32>
    %165 = vector.extract_strided_slice %144 {offsets = [7, 0, 0], sizes = [1, 16, 1], strides = [1, 1, 1]} : vector<16x16x1xf32> to vector<1x16x1xf32>
    %166 = vector.shape_cast %165 : vector<1x16x1xf32> to vector<16x1xf32>
    %167 = arith.addf %164, %166 : vector<16x1xf32>
    %168 = vector.extract_strided_slice %144 {offsets = [8, 0, 0], sizes = [1, 16, 1], strides = [1, 1, 1]} : vector<16x16x1xf32> to vector<1x16x1xf32>
    %169 = vector.shape_cast %168 : vector<1x16x1xf32> to vector<16x1xf32>
    %170 = arith.addf %167, %169 : vector<16x1xf32>
    %171 = vector.extract_strided_slice %144 {offsets = [9, 0, 0], sizes = [1, 16, 1], strides = [1, 1, 1]} : vector<16x16x1xf32> to vector<1x16x1xf32>
    %172 = vector.shape_cast %171 : vector<1x16x1xf32> to vector<16x1xf32>
    %173 = arith.addf %170, %172 : vector<16x1xf32>
    %174 = vector.extract_strided_slice %144 {offsets = [10, 0, 0], sizes = [1, 16, 1], strides = [1, 1, 1]} : vector<16x16x1xf32> to vector<1x16x1xf32>
    %175 = vector.shape_cast %174 : vector<1x16x1xf32> to vector<16x1xf32>
    %176 = arith.addf %173, %175 : vector<16x1xf32>
    %177 = vector.extract_strided_slice %144 {offsets = [11, 0, 0], sizes = [1, 16, 1], strides = [1, 1, 1]} : vector<16x16x1xf32> to vector<1x16x1xf32>
    %178 = vector.shape_cast %177 : vector<1x16x1xf32> to vector<16x1xf32>
    %179 = arith.addf %176, %178 : vector<16x1xf32>
    %180 = vector.extract_strided_slice %144 {offsets = [12, 0, 0], sizes = [1, 16, 1], strides = [1, 1, 1]} : vector<16x16x1xf32> to vector<1x16x1xf32>
    %181 = vector.shape_cast %180 : vector<1x16x1xf32> to vector<16x1xf32>
    %182 = arith.addf %179, %181 : vector<16x1xf32>
    %183 = vector.extract_strided_slice %144 {offsets = [13, 0, 0], sizes = [1, 16, 1], strides = [1, 1, 1]} : vector<16x16x1xf32> to vector<1x16x1xf32>
    %184 = vector.shape_cast %183 : vector<1x16x1xf32> to vector<16x1xf32>
    %185 = arith.addf %182, %184 : vector<16x1xf32>
    %186 = vector.extract_strided_slice %144 {offsets = [14, 0, 0], sizes = [1, 16, 1], strides = [1, 1, 1]} : vector<16x16x1xf32> to vector<1x16x1xf32>
    %187 = vector.shape_cast %186 : vector<1x16x1xf32> to vector<16x1xf32>
    %188 = arith.addf %185, %187 : vector<16x1xf32>
    %189 = vector.extract_strided_slice %144 {offsets = [15, 0, 0], sizes = [1, 16, 1], strides = [1, 1, 1]} : vector<16x16x1xf32> to vector<1x16x1xf32>
    %190 = vector.shape_cast %189 : vector<1x16x1xf32> to vector<16x1xf32>
    %191 = arith.addf %188, %190 : vector<16x1xf32>
    %192 = vector.shape_cast %191 : vector<16x1xf32> to vector<1x1x16x1xf32>
    %cst_45 = arith.constant 2.560000e+02 : f32
    %193 = vector.broadcast %cst_45 : f32 to vector<1x1x16x1xf32>
    %194 = arith.divf %192, %193 : vector<1x1x16x1xf32>
    %cst_46 = arith.constant 9.99999974E-6 : f32
    %195 = vector.broadcast %cst_46 : f32 to vector<1x1x16x1xf32>
    %196 = arith.addf %194, %195 : vector<1x1x16x1xf32>
    %197 = math.rsqrt %196 : vector<1x1x16x1xf32>
    %198 = vector.broadcast %197 : vector<1x1x16x1xf32> to vector<2x8x16x16xf32>
    %199 = arith.mulf %140, %198 : vector<2x8x16x16xf32>
    %c0_47 = arith.constant 0 : index
    %c0_48 = arith.constant 0 : index
    %c0_49 = arith.constant 0 : index
    %c0_50 = arith.constant 0 : index
    %200 = vector.load %arg6[%c0_47, %c0_48, %c0_49, %c0_50] : memref<2x1x16x1xf32, #tpu.memory_space<vmem>>, vector<1x1x16x1xf32>
    %201 = vector.shape_cast %200 : vector<1x1x16x1xf32> to vector<1x16x1xf32>
    %202 = vector.shape_cast %201 : vector<1x16x1xf32> to vector<1x1x16x1xf32>
    %203 = vector.broadcast %202 : vector<1x1x16x1xf32> to vector<2x8x16x16xf32>
    %204 = arith.mulf %199, %203 : vector<2x8x16x16xf32>
    %c1_51 = arith.constant 1 : index
    %c0_52 = arith.constant 0 : index
    %c0_53 = arith.constant 0 : index
    %c0_54 = arith.constant 0 : index
    %205 = vector.load %arg6[%c1_51, %c0_52, %c0_53, %c0_54] : memref<2x1x16x1xf32, #tpu.memory_space<vmem>>, vector<1x1x16x1xf32>
    %206 = vector.shape_cast %205 : vector<1x1x16x1xf32> to vector<1x16x1xf32>
    %207 = vector.shape_cast %206 : vector<1x16x1xf32> to vector<1x1x16x1xf32>
    %208 = vector.broadcast %207 : vector<1x1x16x1xf32> to vector<2x8x16x16xf32>
    %209 = arith.addf %204, %208 : vector<2x8x16x16xf32>
    %c0_55 = arith.constant 0 : index
    %c0_56 = arith.constant 0 : index
    %c0_57 = arith.constant 0 : index
    %210 = vector.load %arg10[%c0_55, %c0_56, %c0_57] : memref<3x1x16xf32, #tpu.memory_space<vmem>>, vector<1x1x16xf32>
    %211 = vector.shape_cast %210 : vector<1x1x16xf32> to vector<1x16xf32>
    %c1_58 = arith.constant 1 : index
    %c0_59 = arith.constant 0 : index
    %c0_60 = arith.constant 0 : index
    %212 = vector.load %arg10[%c1_58, %c0_59, %c0_60] : memref<3x1x16xf32, #tpu.memory_space<vmem>>, vector<1x1x16xf32>
    %213 = vector.shape_cast %212 : vector<1x1x16xf32> to vector<1x16xf32>
    %214 = vector.extract_strided_slice %209 {offsets = [0, 1, 0, 0], sizes = [2, 1, 16, 16], strides = [1, 1, 1, 1]} : vector<2x8x16x16xf32> to vector<2x1x16x16xf32>
    %215 = vector.extract_strided_slice %209 {offsets = [0, 6, 0, 0], sizes = [2, 1, 16, 16], strides = [1, 1, 1, 1]} : vector<2x8x16x16xf32> to vector<2x1x16x16xf32>
    %216 = tpu.concatenate %214, %209, %215 in 1 : vector<2x1x16x16xf32>, vector<2x8x16x16xf32>, vector<2x1x16x16xf32> -> vector<2x10x16x16xf32>
    %217 = vector.extract_strided_slice %216 {offsets = [0, 0, 0, 0], sizes = [2, 8, 16, 16], strides = [1, 1, 1, 1]} : vector<2x10x16x16xf32> to vector<2x8x16x16xf32>
    %218 = vector.shape_cast %217 : vector<2x8x16x16xf32> to vector<256x16xf32>
    %219 = arith.truncf %218 : vector<256x16xf32> to vector<256x16xbf16>
    %c0_61 = arith.constant 0 : index
    %c0_62 = arith.constant 0 : index
    %c0_63 = arith.constant 0 : index
    %220 = vector.load %arg7[%c0_61, %c0_62, %c0_63] : memref<3x16x16xbf16, #tpu.memory_space<vmem>>, vector<1x16x16xbf16>
    %221 = vector.shape_cast %220 : vector<1x16x16xbf16> to vector<16x16xbf16>
    %cst_64 = arith.constant dense<0.000000e+00> : vector<256x16xf32>
    %222 = tpu.matmul %219, %221, %cst_64 {dimension_numbers = #tpu.dot_dimension_numbers<[1], [0], [0], [1], [0, 0, 1, 1], [], []>} : vector<256x16xbf16>, vector<16x16xbf16>, vector<256x16xf32> -> vector<256x16xf32>
    %223 = vector.broadcast %211 : vector<1x16xf32> to vector<256x16xf32>
    %224 = arith.addf %223, %222 : vector<256x16xf32>
    %225 = vector.extract_strided_slice %216 {offsets = [0, 1, 0, 0], sizes = [2, 8, 16, 16], strides = [1, 1, 1, 1]} : vector<2x10x16x16xf32> to vector<2x8x16x16xf32>
    %226 = vector.shape_cast %225 : vector<2x8x16x16xf32> to vector<256x16xf32>
    %227 = arith.truncf %226 : vector<256x16xf32> to vector<256x16xbf16>
    %c1_65 = arith.constant 1 : index
    %c0_66 = arith.constant 0 : index
    %c0_67 = arith.constant 0 : index
    %228 = vector.load %arg7[%c1_65, %c0_66, %c0_67] : memref<3x16x16xbf16, #tpu.memory_space<vmem>>, vector<1x16x16xbf16>
    %229 = vector.shape_cast %228 : vector<1x16x16xbf16> to vector<16x16xbf16>
    %cst_68 = arith.constant dense<0.000000e+00> : vector<256x16xf32>
    %230 = tpu.matmul %227, %229, %cst_68 {dimension_numbers = #tpu.dot_dimension_numbers<[1], [0], [0], [1], [0, 0, 1, 1], [], []>} : vector<256x16xbf16>, vector<16x16xbf16>, vector<256x16xf32> -> vector<256x16xf32>
    %231 = arith.addf %224, %230 : vector<256x16xf32>
    %232 = vector.extract_strided_slice %216 {offsets = [0, 2, 0, 0], sizes = [2, 8, 16, 16], strides = [1, 1, 1, 1]} : vector<2x10x16x16xf32> to vector<2x8x16x16xf32>
    %233 = vector.shape_cast %232 : vector<2x8x16x16xf32> to vector<256x16xf32>
    %234 = arith.truncf %233 : vector<256x16xf32> to vector<256x16xbf16>
    %c2_69 = arith.constant 2 : index
    %c0_70 = arith.constant 0 : index
    %c0_71 = arith.constant 0 : index
    %235 = vector.load %arg7[%c2_69, %c0_70, %c0_71] : memref<3x16x16xbf16, #tpu.memory_space<vmem>>, vector<1x16x16xbf16>
    %236 = vector.shape_cast %235 : vector<1x16x16xbf16> to vector<16x16xbf16>
    %cst_72 = arith.constant dense<0.000000e+00> : vector<256x16xf32>
    %237 = tpu.matmul %234, %236, %cst_72 {dimension_numbers = #tpu.dot_dimension_numbers<[1], [0], [0], [1], [0, 0, 1, 1], [], []>} : vector<256x16xbf16>, vector<16x16xbf16>, vector<256x16xf32> -> vector<256x16xf32>
    %238 = arith.addf %231, %237 : vector<256x16xf32>
    %239 = vector.extract_strided_slice %238 {offsets = [0, 0], sizes = [256, 8], strides = [1, 1]} : vector<256x16xf32> to vector<256x8xf32>
    %240 = vector.extract_strided_slice %238 {offsets = [0, 8], sizes = [256, 8], strides = [1, 1]} : vector<256x16xf32> to vector<256x8xf32>
    %241 = arith.negf %240 : vector<256x8xf32>
    %242 = math.exp %241 : vector<256x8xf32>
    %cst_73 = arith.constant 1.000000e+00 : f32
    %243 = vector.broadcast %cst_73 : f32 to vector<256x8xf32>
    %244 = arith.addf %243, %242 : vector<256x8xf32>
    %245 = arith.divf %243, %244 : vector<256x8xf32>
    %246 = arith.addf %239, %245 : vector<256x8xf32>
    %cst_74 = arith.constant 0.000000e+00 : f32
    %247 = vector.broadcast %cst_74 : f32 to vector<256x8xf32>
    %248 = arith.maximumf %246, %247 : vector<256x8xf32>
    %249 = arith.truncf %248 : vector<256x8xf32> to vector<256x8xbf16>
    %c0_75 = arith.constant 0 : index
    %c0_76 = arith.constant 0 : index
    %250 = vector.load %arg11[%c0_75, %c0_76] : memref<8x10xbf16, #tpu.memory_space<vmem>>, vector<8x10xbf16>
    %cst_77 = arith.constant dense<0.000000e+00> : vector<256x10xf32>
    %251 = tpu.matmul %249, %250, %cst_77 {dimension_numbers = #tpu.dot_dimension_numbers<[1], [0], [0], [1], [0, 0, 1, 1], [], []>} : vector<256x8xbf16>, vector<8x10xbf16>, vector<256x10xf32> -> vector<256x10xf32>
    %252 = vector.shape_cast %251 : vector<256x10xf32> to vector<16x16x10xf32>
    %253 = arith.truncf %252 : vector<16x16x10xf32> to vector<16x16x10xbf16>
    "tpu.trace_start"() <{level = 10 : i32, message = "qnm,qmc->qnc"}> : () -> ()
    %cst_78 = arith.constant dense<0.000000e+00> : vector<16x16x10xf32>
    %254 = tpu.matmul %0, %253, %cst_78 {dimension_numbers = #tpu.dot_dimension_numbers<[2], [1], [1], [2], [0, 0, 0, 1, 1, 2], [0], [0]>} : vector<16x16x16xbf16>, vector<16x16x10xbf16>, vector<16x16x10xf32> -> vector<16x16x10xf32>
    "tpu.trace_stop"() : () -> ()
    %cst_79 = arith.constant 0.000000e+00 : f32
    %255 = vector.broadcast %cst_79 : f32 to vector<16x16x10xf32>
    %256 = arith.maximumf %254, %255 : vector<16x16x10xf32>
    %257 = vector.shape_cast %256 : vector<16x16x10xf32> to vector<2x8x16x10xf32>
    %258 = vector.extract_strided_slice %257 {offsets = [0, 1, 0, 0], sizes = [2, 1, 16, 10], strides = [1, 1, 1, 1]} : vector<2x8x16x10xf32> to vector<2x1x16x10xf32>
    %259 = vector.extract_strided_slice %257 {offsets = [0, 6, 0, 0], sizes = [2, 1, 16, 10], strides = [1, 1, 1, 1]} : vector<2x8x16x10xf32> to vector<2x1x16x10xf32>
    %260 = tpu.concatenate %258, %257, %259 in 1 : vector<2x1x16x10xf32>, vector<2x8x16x10xf32>, vector<2x1x16x10xf32> -> vector<2x10x16x10xf32>
    %261 = vector.extract_strided_slice %260 {offsets = [0, 0, 0, 0], sizes = [2, 8, 16, 10], strides = [1, 1, 1, 1]} : vector<2x10x16x10xf32> to vector<2x8x16x10xf32>
    %262 = vector.shape_cast %261 : vector<2x8x16x10xf32> to vector<256x10xf32>
    %263 = arith.truncf %262 : vector<256x10xf32> to vector<256x10xbf16>
    %c0_80 = arith.constant 0 : index
    %c0_81 = arith.constant 0 : index
    %c0_82 = arith.constant 0 : index
    %264 = vector.load %arg8[%c0_80, %c0_81, %c0_82] : memref<3x10x16xbf16, #tpu.memory_space<vmem>>, vector<1x10x16xbf16>
    %265 = vector.shape_cast %264 : vector<1x10x16xbf16> to vector<10x16xbf16>
    %cst_83 = arith.constant dense<0.000000e+00> : vector<256x16xf32>
    %266 = tpu.matmul %263, %265, %cst_83 {dimension_numbers = #tpu.dot_dimension_numbers<[1], [0], [0], [1], [0, 0, 1, 1], [], []>} : vector<256x10xbf16>, vector<10x16xbf16>, vector<256x16xf32> -> vector<256x16xf32>
    %267 = vector.broadcast %213 : vector<1x16xf32> to vector<256x16xf32>
    %268 = arith.addf %267, %266 : vector<256x16xf32>
    %269 = vector.extract_strided_slice %260 {offsets = [0, 1, 0, 0], sizes = [2, 8, 16, 10], strides = [1, 1, 1, 1]} : vector<2x10x16x10xf32> to vector<2x8x16x10xf32>
    %270 = vector.shape_cast %269 : vector<2x8x16x10xf32> to vector<256x10xf32>
    %271 = arith.truncf %270 : vector<256x10xf32> to vector<256x10xbf16>
    %c1_84 = arith.constant 1 : index
    %c0_85 = arith.constant 0 : index
    %c0_86 = arith.constant 0 : index
    %272 = vector.load %arg8[%c1_84, %c0_85, %c0_86] : memref<3x10x16xbf16, #tpu.memory_space<vmem>>, vector<1x10x16xbf16>
    %273 = vector.shape_cast %272 : vector<1x10x16xbf16> to vector<10x16xbf16>
    %cst_87 = arith.constant dense<0.000000e+00> : vector<256x16xf32>
    %274 = tpu.matmul %271, %273, %cst_87 {dimension_numbers = #tpu.dot_dimension_numbers<[1], [0], [0], [1], [0, 0, 1, 1], [], []>} : vector<256x10xbf16>, vector<10x16xbf16>, vector<256x16xf32> -> vector<256x16xf32>
    %275 = arith.addf %268, %274 : vector<256x16xf32>
    %276 = vector.extract_strided_slice %260 {offsets = [0, 2, 0, 0], sizes = [2, 8, 16, 10], strides = [1, 1, 1, 1]} : vector<2x10x16x10xf32> to vector<2x8x16x10xf32>
    %277 = vector.shape_cast %276 : vector<2x8x16x10xf32> to vector<256x10xf32>
    %278 = arith.truncf %277 : vector<256x10xf32> to vector<256x10xbf16>
    %c2_88 = arith.constant 2 : index
    %c0_89 = arith.constant 0 : index
    %c0_90 = arith.constant 0 : index
    %279 = vector.load %arg8[%c2_88, %c0_89, %c0_90] : memref<3x10x16xbf16, #tpu.memory_space<vmem>>, vector<1x10x16xbf16>
    %280 = vector.shape_cast %279 : vector<1x10x16xbf16> to vector<10x16xbf16>
    %cst_91 = arith.constant dense<0.000000e+00> : vector<256x16xf32>
    %281 = tpu.matmul %278, %280, %cst_91 {dimension_numbers = #tpu.dot_dimension_numbers<[1], [0], [0], [1], [0, 0, 1, 1], [], []>} : vector<256x10xbf16>, vector<10x16xbf16>, vector<256x16xf32> -> vector<256x16xf32>
    %282 = arith.addf %275, %281 : vector<256x16xf32>
    %283 = vector.extract_strided_slice %282 {offsets = [0, 0], sizes = [256, 8], strides = [1, 1]} : vector<256x16xf32> to vector<256x8xf32>
    %284 = vector.extract_strided_slice %282 {offsets = [0, 8], sizes = [256, 8], strides = [1, 1]} : vector<256x16xf32> to vector<256x8xf32>
    %285 = arith.negf %284 : vector<256x8xf32>
    %286 = math.exp %285 : vector<256x8xf32>
    %cst_92 = arith.constant 1.000000e+00 : f32
    %287 = vector.broadcast %cst_92 : f32 to vector<256x8xf32>
    %288 = arith.addf %287, %286 : vector<256x8xf32>
    %289 = arith.divf %287, %288 : vector<256x8xf32>
    %290 = arith.addf %283, %289 : vector<256x8xf32>
    %cst_93 = arith.constant 0.000000e+00 : f32
    %291 = vector.broadcast %cst_93 : f32 to vector<256x8xf32>
    %292 = arith.maximumf %290, %291 : vector<256x8xf32>
    %293 = vector.shape_cast %292 : vector<256x8xf32> to vector<2x8x16x8xf32>
    %cst_94 = arith.constant dense<0.000000e+00> : vector<2x8x16xf32>
    %294 = vector.multi_reduction <add>, %293, %cst_94 [3] : vector<2x8x16x8xf32> to vector<2x8x16xf32>
    %295 = vector.shape_cast %294 : vector<2x8x16xf32> to vector<2x8x16x1xf32>
    %296 = vector.shape_cast %295 : vector<2x8x16x1xf32> to vector<16x16x1xf32>
    %297 = vector.extract_strided_slice %296 {offsets = [0, 0, 0], sizes = [1, 16, 1], strides = [1, 1, 1]} : vector<16x16x1xf32> to vector<1x16x1xf32>
    %298 = vector.shape_cast %297 : vector<1x16x1xf32> to vector<16x1xf32>
    %299 = vector.extract_strided_slice %296 {offsets = [1, 0, 0], sizes = [1, 16, 1], strides = [1, 1, 1]} : vector<16x16x1xf32> to vector<1x16x1xf32>
    %300 = vector.shape_cast %299 : vector<1x16x1xf32> to vector<16x1xf32>
    %301 = arith.addf %298, %300 : vector<16x1xf32>
    %302 = vector.extract_strided_slice %296 {offsets = [2, 0, 0], sizes = [1, 16, 1], strides = [1, 1, 1]} : vector<16x16x1xf32> to vector<1x16x1xf32>
    %303 = vector.shape_cast %302 : vector<1x16x1xf32> to vector<16x1xf32>
    %304 = arith.addf %301, %303 : vector<16x1xf32>
    %305 = vector.extract_strided_slice %296 {offsets = [3, 0, 0], sizes = [1, 16, 1], strides = [1, 1, 1]} : vector<16x16x1xf32> to vector<1x16x1xf32>
    %306 = vector.shape_cast %305 : vector<1x16x1xf32> to vector<16x1xf32>
    %307 = arith.addf %304, %306 : vector<16x1xf32>
    %308 = vector.extract_strided_slice %296 {offsets = [4, 0, 0], sizes = [1, 16, 1], strides = [1, 1, 1]} : vector<16x16x1xf32> to vector<1x16x1xf32>
    %309 = vector.shape_cast %308 : vector<1x16x1xf32> to vector<16x1xf32>
    %310 = arith.addf %307, %309 : vector<16x1xf32>
    %311 = vector.extract_strided_slice %296 {offsets = [5, 0, 0], sizes = [1, 16, 1], strides = [1, 1, 1]} : vector<16x16x1xf32> to vector<1x16x1xf32>
    %312 = vector.shape_cast %311 : vector<1x16x1xf32> to vector<16x1xf32>
    %313 = arith.addf %310, %312 : vector<16x1xf32>
    %314 = vector.extract_strided_slice %296 {offsets = [6, 0, 0], sizes = [1, 16, 1], strides = [1, 1, 1]} : vector<16x16x1xf32> to vector<1x16x1xf32>
    %315 = vector.shape_cast %314 : vector<1x16x1xf32> to vector<16x1xf32>
    %316 = arith.addf %313, %315 : vector<16x1xf32>
    %317 = vector.extract_strided_slice %296 {offsets = [7, 0, 0], sizes = [1, 16, 1], strides = [1, 1, 1]} : vector<16x16x1xf32> to vector<1x16x1xf32>
    %318 = vector.shape_cast %317 : vector<1x16x1xf32> to vector<16x1xf32>
    %319 = arith.addf %316, %318 : vector<16x1xf32>
    %320 = vector.extract_strided_slice %296 {offsets = [8, 0, 0], sizes = [1, 16, 1], strides = [1, 1, 1]} : vector<16x16x1xf32> to vector<1x16x1xf32>
    %321 = vector.shape_cast %320 : vector<1x16x1xf32> to vector<16x1xf32>
    %322 = arith.addf %319, %321 : vector<16x1xf32>
    %323 = vector.extract_strided_slice %296 {offsets = [9, 0, 0], sizes = [1, 16, 1], strides = [1, 1, 1]} : vector<16x16x1xf32> to vector<1x16x1xf32>
    %324 = vector.shape_cast %323 : vector<1x16x1xf32> to vector<16x1xf32>
    %325 = arith.addf %322, %324 : vector<16x1xf32>
    %326 = vector.extract_strided_slice %296 {offsets = [10, 0, 0], sizes = [1, 16, 1], strides = [1, 1, 1]} : vector<16x16x1xf32> to vector<1x16x1xf32>
    %327 = vector.shape_cast %326 : vector<1x16x1xf32> to vector<16x1xf32>
    %328 = arith.addf %325, %327 : vector<16x1xf32>
    %329 = vector.extract_strided_slice %296 {offsets = [11, 0, 0], sizes = [1, 16, 1], strides = [1, 1, 1]} : vector<16x16x1xf32> to vector<1x16x1xf32>
    %330 = vector.shape_cast %329 : vector<1x16x1xf32> to vector<16x1xf32>
    %331 = arith.addf %328, %330 : vector<16x1xf32>
    %332 = vector.extract_strided_slice %296 {offsets = [12, 0, 0], sizes = [1, 16, 1], strides = [1, 1, 1]} : vector<16x16x1xf32> to vector<1x16x1xf32>
    %333 = vector.shape_cast %332 : vector<1x16x1xf32> to vector<16x1xf32>
    %334 = arith.addf %331, %333 : vector<16x1xf32>
    %335 = vector.extract_strided_slice %296 {offsets = [13, 0, 0], sizes = [1, 16, 1], strides = [1, 1, 1]} : vector<16x16x1xf32> to vector<1x16x1xf32>
    %336 = vector.shape_cast %335 : vector<1x16x1xf32> to vector<16x1xf32>
    %337 = arith.addf %334, %336 : vector<16x1xf32>
    %338 = vector.extract_strided_slice %296 {offsets = [14, 0, 0], sizes = [1, 16, 1], strides = [1, 1, 1]} : vector<16x16x1xf32> to vector<1x16x1xf32>
    %339 = vector.shape_cast %338 : vector<1x16x1xf32> to vector<16x1xf32>
    %340 = arith.addf %337, %339 : vector<16x1xf32>
    %341 = vector.extract_strided_slice %296 {offsets = [15, 0, 0], sizes = [1, 16, 1], strides = [1, 1, 1]} : vector<16x16x1xf32> to vector<1x16x1xf32>
    %342 = vector.shape_cast %341 : vector<1x16x1xf32> to vector<16x1xf32>
    %343 = arith.addf %340, %342 : vector<16x1xf32>
    %344 = vector.shape_cast %343 : vector<16x1xf32> to vector<1x1x16x1xf32>
    %cst_95 = arith.constant 1.280000e+02 : f32
    %345 = vector.broadcast %cst_95 : f32 to vector<1x1x16x1xf32>
    %346 = arith.divf %344, %345 : vector<1x1x16x1xf32>
    %347 = vector.broadcast %346 : vector<1x1x16x1xf32> to vector<2x8x16x8xf32>
    %348 = arith.subf %293, %347 : vector<2x8x16x8xf32>
    %349 = arith.mulf %348, %348 : vector<2x8x16x8xf32>
    %cst_96 = arith.constant dense<0.000000e+00> : vector<2x8x16xf32>
    %350 = vector.multi_reduction <add>, %349, %cst_96 [3] : vector<2x8x16x8xf32> to vector<2x8x16xf32>
    %351 = vector.shape_cast %350 : vector<2x8x16xf32> to vector<2x8x16x1xf32>
    %352 = vector.shape_cast %351 : vector<2x8x16x1xf32> to vector<16x16x1xf32>
    %353 = vector.extract_strided_slice %352 {offsets = [0, 0, 0], sizes = [1, 16, 1], strides = [1, 1, 1]} : vector<16x16x1xf32> to vector<1x16x1xf32>
    %354 = vector.shape_cast %353 : vector<1x16x1xf32> to vector<16x1xf32>
    %355 = vector.extract_strided_slice %352 {offsets = [1, 0, 0], sizes = [1, 16, 1], strides = [1, 1, 1]} : vector<16x16x1xf32> to vector<1x16x1xf32>
    %356 = vector.shape_cast %355 : vector<1x16x1xf32> to vector<16x1xf32>
    %357 = arith.addf %354, %356 : vector<16x1xf32>
    %358 = vector.extract_strided_slice %352 {offsets = [2, 0, 0], sizes = [1, 16, 1], strides = [1, 1, 1]} : vector<16x16x1xf32> to vector<1x16x1xf32>
    %359 = vector.shape_cast %358 : vector<1x16x1xf32> to vector<16x1xf32>
    %360 = arith.addf %357, %359 : vector<16x1xf32>
    %361 = vector.extract_strided_slice %352 {offsets = [3, 0, 0], sizes = [1, 16, 1], strides = [1, 1, 1]} : vector<16x16x1xf32> to vector<1x16x1xf32>
    %362 = vector.shape_cast %361 : vector<1x16x1xf32> to vector<16x1xf32>
    %363 = arith.addf %360, %362 : vector<16x1xf32>
    %364 = vector.extract_strided_slice %352 {offsets = [4, 0, 0], sizes = [1, 16, 1], strides = [1, 1, 1]} : vector<16x16x1xf32> to vector<1x16x1xf32>
    %365 = vector.shape_cast %364 : vector<1x16x1xf32> to vector<16x1xf32>
    %366 = arith.addf %363, %365 : vector<16x1xf32>
    %367 = vector.extract_strided_slice %352 {offsets = [5, 0, 0], sizes = [1, 16, 1], strides = [1, 1, 1]} : vector<16x16x1xf32> to vector<1x16x1xf32>
    %368 = vector.shape_cast %367 : vector<1x16x1xf32> to vector<16x1xf32>
    %369 = arith.addf %366, %368 : vector<16x1xf32>
    %370 = vector.extract_strided_slice %352 {offsets = [6, 0, 0], sizes = [1, 16, 1], strides = [1, 1, 1]} : vector<16x16x1xf32> to vector<1x16x1xf32>
    %371 = vector.shape_cast %370 : vector<1x16x1xf32> to vector<16x1xf32>
    %372 = arith.addf %369, %371 : vector<16x1xf32>
    %373 = vector.extract_strided_slice %352 {offsets = [7, 0, 0], sizes = [1, 16, 1], strides = [1, 1, 1]} : vector<16x16x1xf32> to vector<1x16x1xf32>
    %374 = vector.shape_cast %373 : vector<1x16x1xf32> to vector<16x1xf32>
    %375 = arith.addf %372, %374 : vector<16x1xf32>
    %376 = vector.extract_strided_slice %352 {offsets = [8, 0, 0], sizes = [1, 16, 1], strides = [1, 1, 1]} : vector<16x16x1xf32> to vector<1x16x1xf32>
    %377 = vector.shape_cast %376 : vector<1x16x1xf32> to vector<16x1xf32>
    %378 = arith.addf %375, %377 : vector<16x1xf32>
    %379 = vector.extract_strided_slice %352 {offsets = [9, 0, 0], sizes = [1, 16, 1], strides = [1, 1, 1]} : vector<16x16x1xf32> to vector<1x16x1xf32>
    %380 = vector.shape_cast %379 : vector<1x16x1xf32> to vector<16x1xf32>
    %381 = arith.addf %378, %380 : vector<16x1xf32>
    %382 = vector.extract_strided_slice %352 {offsets = [10, 0, 0], sizes = [1, 16, 1], strides = [1, 1, 1]} : vector<16x16x1xf32> to vector<1x16x1xf32>
    %383 = vector.shape_cast %382 : vector<1x16x1xf32> to vector<16x1xf32>
    %384 = arith.addf %381, %383 : vector<16x1xf32>
    %385 = vector.extract_strided_slice %352 {offsets = [11, 0, 0], sizes = [1, 16, 1], strides = [1, 1, 1]} : vector<16x16x1xf32> to vector<1x16x1xf32>
    %386 = vector.shape_cast %385 : vector<1x16x1xf32> to vector<16x1xf32>
    %387 = arith.addf %384, %386 : vector<16x1xf32>
    %388 = vector.extract_strided_slice %352 {offsets = [12, 0, 0], sizes = [1, 16, 1], strides = [1, 1, 1]} : vector<16x16x1xf32> to vector<1x16x1xf32>
    %389 = vector.shape_cast %388 : vector<1x16x1xf32> to vector<16x1xf32>
    %390 = arith.addf %387, %389 : vector<16x1xf32>
    %391 = vector.extract_strided_slice %352 {offsets = [13, 0, 0], sizes = [1, 16, 1], strides = [1, 1, 1]} : vector<16x16x1xf32> to vector<1x16x1xf32>
    %392 = vector.shape_cast %391 : vector<1x16x1xf32> to vector<16x1xf32>
    %393 = arith.addf %390, %392 : vector<16x1xf32>
    %394 = vector.extract_strided_slice %352 {offsets = [14, 0, 0], sizes = [1, 16, 1], strides = [1, 1, 1]} : vector<16x16x1xf32> to vector<1x16x1xf32>
    %395 = vector.shape_cast %394 : vector<1x16x1xf32> to vector<16x1xf32>
    %396 = arith.addf %393, %395 : vector<16x1xf32>
    %397 = vector.extract_strided_slice %352 {offsets = [15, 0, 0], sizes = [1, 16, 1], strides = [1, 1, 1]} : vector<16x16x1xf32> to vector<1x16x1xf32>
    %398 = vector.shape_cast %397 : vector<1x16x1xf32> to vector<16x1xf32>
    %399 = arith.addf %396, %398 : vector<16x1xf32>
    %400 = vector.shape_cast %399 : vector<16x1xf32> to vector<1x1x16x1xf32>
    %cst_97 = arith.constant 1.280000e+02 : f32
    %401 = vector.broadcast %cst_97 : f32 to vector<1x1x16x1xf32>
    %402 = arith.divf %400, %401 : vector<1x1x16x1xf32>
    %cst_98 = arith.constant 9.99999974E-6 : f32
    %403 = vector.broadcast %cst_98 : f32 to vector<1x1x16x1xf32>
    %404 = arith.addf %402, %403 : vector<1x1x16x1xf32>
    %405 = math.rsqrt %404 : vector<1x1x16x1xf32>
    %406 = vector.broadcast %405 : vector<1x1x16x1xf32> to vector<2x8x16x8xf32>
    %407 = arith.mulf %348, %406 : vector<2x8x16x8xf32>
    %c0_99 = arith.constant 0 : index
    %c0_100 = arith.constant 0 : index
    %c0_101 = arith.constant 0 : index
    %c0_102 = arith.constant 0 : index
    %408 = vector.load %arg12[%c0_99, %c0_100, %c0_101, %c0_102] : memref<2x1x16x1xf32, #tpu.memory_space<vmem>>, vector<1x1x16x1xf32>
    %409 = vector.shape_cast %408 : vector<1x1x16x1xf32> to vector<1x16x1xf32>
    %410 = vector.shape_cast %409 : vector<1x16x1xf32> to vector<1x1x16x1xf32>
    %411 = vector.broadcast %410 : vector<1x1x16x1xf32> to vector<2x8x16x8xf32>
    %412 = arith.mulf %407, %411 : vector<2x8x16x8xf32>
    %c1_103 = arith.constant 1 : index
    %c0_104 = arith.constant 0 : index
    %c0_105 = arith.constant 0 : index
    %c0_106 = arith.constant 0 : index
    %413 = vector.load %arg12[%c1_103, %c0_104, %c0_105, %c0_106] : memref<2x1x16x1xf32, #tpu.memory_space<vmem>>, vector<1x1x16x1xf32>
    %414 = vector.shape_cast %413 : vector<1x1x16x1xf32> to vector<1x16x1xf32>
    %415 = vector.shape_cast %414 : vector<1x16x1xf32> to vector<1x1x16x1xf32>
    %416 = vector.broadcast %415 : vector<1x1x16x1xf32> to vector<2x8x16x8xf32>
    %417 = arith.addf %412, %416 : vector<2x8x16x8xf32>
    %c2_107 = arith.constant 2 : index
    %c0_108 = arith.constant 0 : index
    %c0_109 = arith.constant 0 : index
    %418 = vector.load %arg10[%c2_107, %c0_108, %c0_109] : memref<3x1x16xf32, #tpu.memory_space<vmem>>, vector<1x1x16xf32>
    %419 = vector.shape_cast %418 : vector<1x1x16xf32> to vector<1x16xf32>
    %420 = vector.extract_strided_slice %417 {offsets = [0, 1, 0, 0], sizes = [2, 1, 16, 8], strides = [1, 1, 1, 1]} : vector<2x8x16x8xf32> to vector<2x1x16x8xf32>
    %421 = vector.extract_strided_slice %417 {offsets = [0, 6, 0, 0], sizes = [2, 1, 16, 8], strides = [1, 1, 1, 1]} : vector<2x8x16x8xf32> to vector<2x1x16x8xf32>
    %422 = tpu.concatenate %420, %417, %421 in 1 : vector<2x1x16x8xf32>, vector<2x8x16x8xf32>, vector<2x1x16x8xf32> -> vector<2x10x16x8xf32>
    %423 = vector.extract_strided_slice %422 {offsets = [0, 0, 0, 0], sizes = [2, 8, 16, 8], strides = [1, 1, 1, 1]} : vector<2x10x16x8xf32> to vector<2x8x16x8xf32>
    %424 = vector.shape_cast %423 : vector<2x8x16x8xf32> to vector<256x8xf32>
    %425 = arith.truncf %424 : vector<256x8xf32> to vector<256x8xbf16>
    %c0_110 = arith.constant 0 : index
    %c0_111 = arith.constant 0 : index
    %c0_112 = arith.constant 0 : index
    %426 = vector.load %arg9[%c0_110, %c0_111, %c0_112] : memref<3x8x16xbf16, #tpu.memory_space<vmem>>, vector<1x8x16xbf16>
    %427 = vector.shape_cast %426 : vector<1x8x16xbf16> to vector<8x16xbf16>
    %cst_113 = arith.constant dense<0.000000e+00> : vector<256x16xf32>
    %428 = tpu.matmul %425, %427, %cst_113 {dimension_numbers = #tpu.dot_dimension_numbers<[1], [0], [0], [1], [0, 0, 1, 1], [], []>} : vector<256x8xbf16>, vector<8x16xbf16>, vector<256x16xf32> -> vector<256x16xf32>
    %429 = vector.broadcast %419 : vector<1x16xf32> to vector<256x16xf32>
    %430 = arith.addf %429, %428 : vector<256x16xf32>
    %431 = vector.extract_strided_slice %422 {offsets = [0, 1, 0, 0], sizes = [2, 8, 16, 8], strides = [1, 1, 1, 1]} : vector<2x10x16x8xf32> to vector<2x8x16x8xf32>
    %432 = vector.shape_cast %431 : vector<2x8x16x8xf32> to vector<256x8xf32>
    %433 = arith.truncf %432 : vector<256x8xf32> to vector<256x8xbf16>
    %c1_114 = arith.constant 1 : index
    %c0_115 = arith.constant 0 : index
    %c0_116 = arith.constant 0 : index
    %434 = vector.load %arg9[%c1_114, %c0_115, %c0_116] : memref<3x8x16xbf16, #tpu.memory_space<vmem>>, vector<1x8x16xbf16>
    %435 = vector.shape_cast %434 : vector<1x8x16xbf16> to vector<8x16xbf16>
    %cst_117 = arith.constant dense<0.000000e+00> : vector<256x16xf32>
    %436 = tpu.matmul %433, %435, %cst_117 {dimension_numbers = #tpu.dot_dimension_numbers<[1], [0], [0], [1], [0, 0, 1, 1], [], []>} : vector<256x8xbf16>, vector<8x16xbf16>, vector<256x16xf32> -> vector<256x16xf32>
    %437 = arith.addf %430, %436 : vector<256x16xf32>
    %438 = vector.extract_strided_slice %422 {offsets = [0, 2, 0, 0], sizes = [2, 8, 16, 8], strides = [1, 1, 1, 1]} : vector<2x10x16x8xf32> to vector<2x8x16x8xf32>
    %439 = vector.shape_cast %438 : vector<2x8x16x8xf32> to vector<256x8xf32>
    %440 = arith.truncf %439 : vector<256x8xf32> to vector<256x8xbf16>
    %c2_118 = arith.constant 2 : index
    %c0_119 = arith.constant 0 : index
    %c0_120 = arith.constant 0 : index
    %441 = vector.load %arg9[%c2_118, %c0_119, %c0_120] : memref<3x8x16xbf16, #tpu.memory_space<vmem>>, vector<1x8x16xbf16>
    %442 = vector.shape_cast %441 : vector<1x8x16xbf16> to vector<8x16xbf16>
    %cst_121 = arith.constant dense<0.000000e+00> : vector<256x16xf32>
    %443 = tpu.matmul %440, %442, %cst_121 {dimension_numbers = #tpu.dot_dimension_numbers<[1], [0], [0], [1], [0, 0, 1, 1], [], []>} : vector<256x8xbf16>, vector<8x16xbf16>, vector<256x16xf32> -> vector<256x16xf32>
    %444 = arith.addf %437, %443 : vector<256x16xf32>
    %445 = vector.extract_strided_slice %444 {offsets = [0, 0], sizes = [256, 8], strides = [1, 1]} : vector<256x16xf32> to vector<256x8xf32>
    %446 = vector.extract_strided_slice %444 {offsets = [0, 8], sizes = [256, 8], strides = [1, 1]} : vector<256x16xf32> to vector<256x8xf32>
    %447 = arith.negf %446 : vector<256x8xf32>
    %448 = math.exp %447 : vector<256x8xf32>
    %cst_122 = arith.constant 1.000000e+00 : f32
    %449 = vector.broadcast %cst_122 : f32 to vector<256x8xf32>
    %450 = arith.addf %449, %448 : vector<256x8xf32>
    %451 = arith.divf %449, %450 : vector<256x8xf32>
    %452 = arith.addf %445, %451 : vector<256x8xf32>
    %cst_123 = arith.constant 0.000000e+00 : f32
    %453 = vector.broadcast %cst_123 : f32 to vector<256x8xf32>
    %454 = arith.maximumf %452, %453 : vector<256x8xf32>
    %455 = arith.truncf %454 : vector<256x8xf32> to vector<256x8xbf16>
    %c0_124 = arith.constant 0 : index
    %c0_125 = arith.constant 0 : index
    %456 = vector.load %arg13[%c0_124, %c0_125] : memref<8x8xbf16, #tpu.memory_space<vmem>>, vector<8x8xbf16>
    %cst_126 = arith.constant dense<0.000000e+00> : vector<256x8xf32>
    %457 = tpu.matmul %455, %456, %cst_126 {dimension_numbers = #tpu.dot_dimension_numbers<[1], [0], [0], [1], [0, 0, 1, 1], [], []>} : vector<256x8xbf16>, vector<8x8xbf16>, vector<256x8xf32> -> vector<256x8xf32>
    %c0_127 = arith.constant 0 : index
    %c0_128 = arith.constant 0 : index
    %458 = vector.load %arg14[%c0_127, %c0_128] : memref<1x8xf32, #tpu.memory_space<vmem>>, vector<1x8xf32>
    %459 = vector.broadcast %458 : vector<1x8xf32> to vector<256x8xf32>
    %460 = arith.addf %457, %459 : vector<256x8xf32>
    %461 = arith.negf %460 : vector<256x8xf32>
    %462 = math.exp %461 : vector<256x8xf32>
    %cst_129 = arith.constant 1.000000e+00 : f32
    %463 = vector.broadcast %cst_129 : f32 to vector<256x8xf32>
    %464 = arith.addf %463, %462 : vector<256x8xf32>
    %465 = arith.divf %463, %464 : vector<256x8xf32>
    %466 = vector.shape_cast %465 : vector<256x8xf32> to vector<2x8x16x8xf32>
    %c0_130 = arith.constant 0 : index
    %c0_131 = arith.constant 0 : index
    %c0_132 = arith.constant 0 : index
    %c0_133 = arith.constant 0 : index
    %467 = vector.load %arg15[%c0_130, %c0_131, %c0_132, %c0_133] : memref<2x8x16x8xf32, #tpu.memory_space<vmem>>, vector<2x8x16x8xf32>
    tpu.vector_store %arg15[%c0_130, %c0_131, %c0_132, %c0_133], %466 {strides = array<i32>} : memref<2x8x16x8xf32, #tpu.memory_space<vmem>>, vector<2x8x16x8xf32>,
    return
  }
}

</mosaic_0001>

<bundles_post_ra>
// kernel: stgcn_autoencoder_forward.1
= control target key start
LH: loop header
LB: loop body
LE: loop exit
PB: predicated region body
PF: predicated region fallthrough
CT: control target
= control target key end

     0   :  { %vm176_vm0 = vcmask 1043456   ;;  %vm133_vm1 = vcmask 64512   ;;  %vm1191_vm2 = vcmask 130048   ;;  %vm11830_vm3 = vmmov 0   ;;  %s11832_s28 = smov 120   ;;  %s15283_s2 = inlined_call_operand.vmem [shape: bf16[3,8,32], index: 2, kind: input, shape index: {}]   ;;  %s15284_s0 = inlined_call_operand.vmem [shape: f32[2,8,16,8], index: 0, kind: input, shape index: {}]   ;;  %s15285_s4 = inlined_call_operand.vmem [shape: f32[2,1,32], index: 4, kind: input, shape index: {}]   ;;  %s15286_s5 = inlined_call_operand.vmem [shape: bf16[16,10], index: 5, kind: input, shape index: {}]   ;;  %s15287_s1 = inlined_call_operand.vmem [shape: bf16[16,16,16], index: 1, kind: input, shape index: {}]   ;;  %s15288_s3 = inlined_call_operand.vmem [shape: bf16[3,10,32], index: 3, kind: input, shape index: {}]   ;;  %s15289_s6 = inlined_call_operand.vmem [shape: f32[2,1,16,1], index: 6, kind: input, shape index: {}]   ;;  %s15290_s7 = inlined_call_operand.vmem [shape: bf16[3,16,16], index: 7, kind: input, shape index: {}]   ;;  %s15291_s10 = inlined_call_operand.vmem [shape: f32[3,1,16], index: 10, kind: input, shape index: {}]   ;;  %s15292_s11 = inlined_call_operand.vmem [shape: bf16[8,10], index: 11, kind: input, shape index: {}]   ;;  %s15293_s8 = inlined_call_operand.vmem [shape: bf16[3,10,16], index: 8, kind: input, shape index: {}]   ;;  %s15294_s12 = inlined_call_operand.vmem [shape: f32[2,1,16,1], index: 12, kind: input, shape index: {}]   ;;  %s15295_s9 = inlined_call_operand.vmem [shape: bf16[3,8,16], index: 9, kind: input, shape index: {}]   ;;  %s15296_s13 = inlined_call_operand.vmem [shape: bf16[8,8], index: 13, kind: input, shape index: {}]   ;;  %s15297_s14 = inlined_call_operand.vmem [shape: f32[1,8], index: 14, kind: input, shape index: {}]   ;;  %s15298_s15 = inlined_call_operand.vmem [shape: f32[2,8,16,8], index: 15, kind: output, shape index: {}]  }
   0x1   :  { %v132_v0 = vld [vmem:[%s15283_s2] sm:$0xf]  ;;  %v85_v1 = vld [vmem:[%s15284_s0 + $0x10] sm:$0xff]  ;;  %v86_v2 = vld [vmem:[%s15284_s0 + $0x18] sm:$0xff]  ;;  %vm2297_vm4 = vcmask 1044480   ;;  %vm2254_vm5 = vcmask 80896  }
   0x2   :  { %10988 = vmatprep.subr.msk.bf16.mxu0 %vm176_vm0, %v132_v0  ;;  %v178_v3 = vsel %vm176_vm0, %v132_v0, 0  ;;  %v11924_v4 = vpack.c.bf16 %v86_v2, %v85_v1  ;;  %v83_v5 = vld [vmem:[%s15284_s0] sm:$0xff]  ;;  %v84_v6 = vld [vmem:[%s15284_s0 + $0x8] sm:$0xff]  ;;  %10989 = vmatprep.subr.msk.bf16.mxu1 %vm176_vm0, %v132_v0  ;;  %v101_v14 = vld [vmem:[%s15284_s0 + $0x90] sm:$0xff] }
   0x3   :  { %9703 = vmatpush3.bf16.msra.mxu0 %v178_v3  ;;  %v119_v7 = vpack.c.bf16 %v84_v6, %v83_v5  ;;  %10507 = vmatpush3.bf16.msra.mxu1 %v178_v3  ;;  %v87_v8 = vld [vmem:[%s15284_s0 + $0x20] sm:$0xff]  ;;  %v88_v9 = vld [vmem:[%s15284_s0 + $0x28] sm:$0xff]  ;;  %v89_v15 = vld [vmem:[%s15284_s0 + $0x30] sm:$0xff] }
   0x4   :  { %9704 = vmatprep.mubr.msk.bf16.mxu0 %vm133_vm1, %v11924_v4  ;;  %v8783_v10 = vld [vmem:[%s15283_s2 + $0x4] sm:$0xf]  ;;  %v100_v13 = vld [vmem:[%s15284_s0 + $0x88] sm:$0xff]  ;;  %v90_v16 = vld [vmem:[%s15284_s0 + $0x38] sm:$0xff]  ;;  %v11969_v19 = vpack.c.bf16 %v88_v9, %v87_v8 }
   0x5   :  { %10990 = vmatprep.subr.msk.bf16.mxu0 %vm176_vm0, %v8783_v10  ;;  %v390_v11 = vsel %vm176_vm0, %v8783_v10, 0  ;;  %v99_v12 = vld [vmem:[%s15284_s0 + $0x80] sm:$0xff]  ;;  %v102_v17 = vld [vmem:[%s15284_s0 + $0x98] sm:$0xff]  ;;  %v11971_v21 = vpack.c.bf16 %v90_v16, %v89_v15  ;;  %v8800_v22 = vld [vmem:[%s15283_s2 + $0x8] sm:$0xf] }
   0x6   :  { %9705 = vmatmul.mubr.msk.bf16.vlgmr.msra.gmra.mrb[0].mxu0 %vm133_vm1, %v119_v7  ;;  %v11967_v18 = vpack.c.bf16 %v102_v17, %v101_v14  ;;  %v126_v20 = vpack.c.bf16 %v100_v13, %v99_v12  ;;  %v91_v23 = vld [vmem:[%s15284_s0 + $0x40] sm:$0xff]  ;;  %v92_v24 = vld [vmem:[%s15284_s0 + $0x48] sm:$0xff]  ;;  %v93_v25 = vld [vmem:[%s15284_s0 + $0x50] sm:$0xff]  ;;  %v588_v47 = vsel %vm176_vm0, %v8800_v22, 0 }
   0x7   :  { %9708 = vmatprep.mubr.msk.bf16.mxu0 %vm133_vm1, %v11924_v4  ;;  %9737 = vmatpush3.bf16.msra.mxu0 %v390_v11  ;;  %v103_v26 = vld [vmem:[%s15284_s0 + $0xa0] sm:$0xff]  ;;  %v104_v27 = vld [vmem:[%s15284_s0 + $0xa8] sm:$0xff]  ;;  %v94_v28 = vld [vmem:[%s15284_s0 + $0x58] sm:$0xff]  ;;  %v122_v31 = vpack.c.bf16 %v92_v24, %v91_v23 }
   0x8   :  { %9720 = vmatprep.mubr.msk.bf16.mxu1 %vm133_vm1, %v11967_v18  ;;  %10991 = vmatprep.subr.msk.bf16.mxu0 %vm176_vm0, %v8800_v22  ;;  %v105_v29 = vld [vmem:[%s15284_s0 + $0xb0] sm:$0xff]  ;;  %v106_v30 = vld [vmem:[%s15284_s0 + $0xb8] sm:$0xff]  ;;  %v127_v32 = vpack.c.bf16 %v104_v27, %v103_v26  ;;  %v123_v33 = vpack.c.bf16 %v94_v28, %v93_v25  ;;  %v95_v35 = vld [vmem:[%s15284_s0 + $0x60] sm:$0xff] }
   0x9   :  { %9721 = vmatmul.mubr.msk.bf16.vlgmr.msra.gmra.mrb[0].mxu1 %vm133_vm1, %v126_v20  ;;  %v128_v34 = vpack.c.bf16 %v106_v30, %v105_v29  ;;  %v96_v36 = vld [vmem:[%s15284_s0 + $0x68] sm:$0xff]  ;;  %v107_v37 = vld [vmem:[%s15284_s0 + $0xc0] sm:$0xff]  ;;  %v109_v39 = vld [vmem:[%s15284_s0 + $0xd0] sm:$0xff] }
   0xa   :  { %9724 = vmatprep.mubr.msk.bf16.mxu1 %vm133_vm1, %v11967_v18  ;;  %v108_v38 = vld [vmem:[%s15284_s0 + $0xc8] sm:$0xff]  ;;  %v110_v40 = vld [vmem:[%s15284_s0 + $0xd8] sm:$0xff]  ;;  %v124_v41 = vpack.c.bf16 %v96_v36, %v95_v35  ;;  %v111_v44 = vld [vmem:[%s15284_s0 + $0xe0] sm:$0xff] }
   0xb   :  { %v129_v42 = vpack.c.bf16 %v108_v38, %v107_v37  ;;  %v130_v43 = vpack.c.bf16 %v110_v40, %v109_v39  ;;  %v112_v45 = vld [vmem:[%s15284_s0 + $0xe8] sm:$0xff]  ;;  %v97_v48 = vld [vmem:[%s15284_s0 + $0x70] sm:$0xff]  ;;  %v98_v49 = vld [vmem:[%s15284_s0 + $0x78] sm:$0xff] }
   0xc   :  { %v131_v46 = vpack.c.bf16 %v112_v45, %v111_v44  ;;  %v379_v50 = vpack.c.bf16 %v98_v49, %v97_v48  ;;  %v113_v51 = vld [vmem:[%s15284_s0 + $0xf0] sm:$0xff]  ;;  %v114_v52 = vld [vmem:[%s15284_s0 + $0xf8] sm:$0xff] }
   0xd   :  { %v380_v53 = vpack.c.bf16 %v114_v52, %v113_v51 }
   0xe   :  { %9709 = vmatmul.mubr.msk.bf16.gmra.mrb[4].mxu0 %vm133_vm1, %v11969_v19 }
   0xf   :  { %9712 = vmatprep.mubr.msk.bf16.mxu0 %vm133_vm1, %v11971_v21 }
  0x11   :  { %9725 = vmatmul.mubr.msk.bf16.gmra.mrb[4].mxu1 %vm133_vm1, %v127_v32 }
  0x12   :  { %9728 = vmatprep.mubr.msk.bf16.mxu1 %vm133_vm1, %v128_v34 }
  0x16   :  { %9713 = vmatmul.mubr.msk.bf16.gmra.mrb[8].mxu0 %vm133_vm1, %v122_v31 }
  0x17   :  { %9716 = vmatprep.mubr.msk.bf16.mxu0 %vm133_vm1, %v123_v33 }
  0x19   :  { %9729 = vmatmul.mubr.msk.bf16.gmra.mrb[8].mxu1 %vm133_vm1, %v129_v42 }
  0x1a   :  { %9732 = vmatprep.mubr.msk.bf16.mxu1 %vm133_vm1, %v130_v43 }
  0x1e   :  { %9717 = vmatmul.mubr.msk.bf16.gmra.mrb[12].mxu0 %vm133_vm1, %v124_v41 }
  0x1f   :  { %9738 = vmatprep.mubr.msk.bf16.mxu0 %vm133_vm1, %v119_v7 }
  0x21   :  { %9733 = vmatmul.mubr.msk.bf16.gmra.mrb[12].mxu1 %vm133_vm1, %v131_v46 }
  0x26   :  { %9739 = vmatmul.mubr.msk.bf16.vlgmr.msra.gmra.mrb[0].mxu0 %vm133_vm1, %v11924_v4 }
  0x27   :  { %9742 = vmatprep.mubr.msk.bf16.mxu0 %vm133_vm1, %v11969_v19  ;;  %9771 = vmatpush3.bf16.msra.mxu0 %v588_v47 }
  0x2e   :  { %9743 = vmatmul.mubr.msk.bf16.gmra.mrb[4].mxu0 %vm133_vm1, %v11971_v21 }
  0x2f   :  { %9746 = vmatprep.mubr.msk.bf16.mxu0 %vm133_vm1, %v122_v31 }
  0x36   :  { %9747 = vmatmul.mubr.msk.bf16.gmra.mrb[8].mxu0 %vm133_vm1, %v123_v33 }
  0x37   :  { %9750 = vmatprep.mubr.msk.bf16.mxu0 %vm133_vm1, %v124_v41 }
  0x3e   :  { %9751 = vmatmul.mubr.msk.bf16.gmra.mrb[12].mxu0 %vm133_vm1, %v379_v50 }
  0x3f   :  { %9754 = vmatprep.mubr.msk.bf16.mxu0 %vm133_vm1, %v126_v20 }
  0x46   :  { %9755 = vmatmul.mubr.msk.bf16.gmra.mrb[16].mxu0 %vm133_vm1, %v11967_v18 }
  0x47   :  { %9758 = vmatprep.mubr.msk.bf16.mxu0 %vm133_vm1, %v127_v32 }
  0x4e   :  { %9759 = vmatmul.mubr.msk.bf16.gmra.mrb[20].mxu0 %vm133_vm1, %v128_v34 }
  0x4f   :  { %9762 = vmatprep.mubr.msk.bf16.mxu0 %vm133_vm1, %v129_v42 }
  0x56   :  { %9763 = vmatmul.mubr.msk.bf16.gmra.mrb[24].mxu0 %vm133_vm1, %v130_v43 }
  0x57   :  { %9766 = vmatprep.mubr.msk.bf16.mxu0 %vm133_vm1, %v131_v46 }
  0x5e   :  { %9767 = vmatmul.mubr.msk.bf16.gmra.mrb[28].mxu0 %vm133_vm1, %v380_v53 }
  0x5f   :  { %9772 = vmatprep.mubr.msk.bf16.mxu0 %vm133_vm1, %v11924_v4  ;;  %v12126_v4 = vld [vmem:[%s15285_s4] ss:$0 sm:$0xff] }
  0x66   :  { %9773 = vmatmul.mubr.msk.bf16.vlgmr.msra.gmra.mrb[0].mxu0 %vm133_vm1, %v11969_v19 }
  0x67   :  { %9776 = vmatprep.mubr.msk.bf16.mxu0 %vm133_vm1, %v11971_v21 }
  0x6e   :  { %9777 = vmatmul.mubr.msk.bf16.gmra.mrb[4].mxu0 %vm133_vm1, %v122_v31 }
  0x6f   :  { %9780 = vmatprep.mubr.msk.bf16.mxu0 %vm133_vm1, %v123_v33 }
  0x76   :  { %9781 = vmatmul.mubr.msk.bf16.gmra.mrb[8].mxu0 %vm133_vm1, %v124_v41 }
  0x77   :  { %9784 = vmatprep.mubr.msk.bf16.mxu0 %vm133_vm1, %v379_v50 }
  0x7e   :  { %9785 = vmatmul.mubr.msk.bf16.gmra.mrb[12].mxu0 %vm133_vm1, %v124_v41 }
  0x7f   :  { %9788 = vmatprep.mubr.msk.bf16.mxu0 %vm133_vm1, %v11967_v18 }
  0x86   :  { %9789 = vmatmul.mubr.msk.bf16.gmra.mrb[16].mxu0 %vm133_vm1, %v127_v32 }
  0x87   :  { %9792 = vmatprep.mubr.msk.bf16.mxu0 %vm133_vm1, %v128_v34 }
  0x8e   :  { %9793 = vmatmul.mubr.msk.bf16.gmra.mrb[20].mxu0 %vm133_vm1, %v129_v42 }
  0x8f   :  { %9796 = vmatprep.mubr.msk.bf16.mxu0 %vm133_vm1, %v130_v43 }
  0x96   :  { %9797 = vmatmul.mubr.msk.bf16.gmra.mrb[24].mxu0 %vm133_vm1, %v131_v46 }
  0x97   :  { %9800 = vmatprep.mubr.msk.bf16.mxu0 %vm133_vm1, %v380_v53 }
  0x9e   :  { %9801 = vmatmul.mubr.msk.bf16.gmra.mrb[28].mxu0 %vm133_vm1, %v131_v46 }
  0xdc   :  { %v12095_v54 = vpop.f32.mrb[0].mxu1 }
  0xdd   :  { %v12097_v55 = vpop.f32.mrb[1].mxu1 }
  0xde   :  { %v12099_v56 = vpop.f32.mrb[2].mxu1 }
  0xdf   :  { %v12101_v57 = vpop.f32.mrb[3].mxu1 }
  0xe4   :  { %v12103_v58 = vpop.f32.mrb[4].mxu1 }
  0xe5   :  { %v12105_v59 = vpop.f32.mrb[5].mxu1 }
  0xe6   :  { %v12107_v60 = vpop.f32.mrb[6].mxu1 }
  0xe7   :  { %v12109_v61 = vpop.f32.mrb[7].mxu1 }
  0xec   :  { %v12111_v62 = vpop.f32.mrb[8].mxu1 }
  0xed   :  { %v12113_v63 = vpop.f32.mrb[9].mxu1 }
  0xee   :  { %v12115_v0 = vpop.f32.mrb[10].mxu1 }
  0xef   :  { %v12117_v1 = vpop.f32.mrb[11].mxu1 }
  0xf4   :  { %v12119_v2 = vpop.f32.mrb[12].mxu1 }
  0xf5   :  { %v12121_v3 = vpop.f32.mrb[13].mxu1 }
  0xf6   :  { %v9735_v5 = vpop.f32.mrb[14].mxu1 }
  0xf7   :  { %v12129_v6 = vadd.f32 %v9735_v5, %v12126_v4  ;;  %v12131_v7 = vpop.f32.mrb[15].mxu1 }
 0x139   :  { %v9774_v8 = vpop.f32.mrb[0].mxu0 }
 0x13a   :  { %v12134_v9 = vadd.f32 %v9774_v8, %v12126_v4  ;;  %v624_v10 = vpop.f32.mrb[1].mxu0 }
 0x13b   :  { %v12137_v11 = vadd.f32 %v12126_v4, %v624_v10  ;;  %v9775_v12 = vpop.f32.mrb[2].mxu0 }
 0x13c   :  { %v8819_v13 = vmul.f32 -1.442695, %v12134_v9  ;;  %v12141_v14 = vadd.f32 %v9775_v12, %v12126_v4  ;;  %v627_v15 = vpop.f32.mrb[3].mxu0 }
 0x13d   :  { %v8817_v16 = vmul.f32 -1.442695, %v12137_v11  ;;  %v12145_v17 = vadd.f32 %v12126_v4, %v627_v15 }
 0x13e   :  { %11036 = vpow2.f32 %v8819_v13  ;;  %v8820_v18 = vmul.f32 -1.442695, %v12141_v14 }
 0x13f   :  { %11038 = vpow2.f32 %v8817_v16  ;;  %v8818_v19 = vmul.f32 -1.442695, %v12145_v17 }
 0x140   :  { %11040 = vpow2.f32 %v8820_v18 }
 0x141   :  { %11042 = vpow2.f32 %v8818_v19  ;;  %v9778_v20 = vpop.f32.mrb[4].mxu0 }
 0x142   :  { %v12150_v21 = vadd.f32 %v9778_v20, %v12126_v4  ;;  %v640_v22 = vpop.f32.mrb[5].mxu0 }
 0x143   :  { %v12153_v23 = vadd.f32 %v12126_v4, %v640_v22  ;;  %v9779_v24 = vpop.f32.mrb[6].mxu0  ;;  %v11010_v22 = vld [vmem:[%s15286_s5] sm:$0xff]   ;;  %s11828_s5 = smov 112  }
 0x144   :  { %v8823_v25 = vmul.f32 -1.442695, %v12150_v21  ;;  %v12157_v26 = vadd.f32 %v9779_v24, %v12126_v4  ;;  %v643_v27 = vpop.f32.mrb[7].mxu0  ;;  %9804 = vmatprep.subr.bf16.mxu1 %v11010_v22 }
 0x145   :  { %v8821_v28 = vmul.f32 -1.442695, %v12153_v23  ;;  %v12161_v29 = vadd.f32 %v12126_v4, %v643_v27  ;;  %9805 = vmatpush3.bf16.msra.mxu1 %v11010_v22 }
 0x146   :  { %11044 = vpow2.f32 %v8823_v25  ;;  %v8824_v30 = vmul.f32 -1.442695, %v12157_v26 }
 0x147   :  { %11046 = vpow2.f32 %v8821_v28  ;;  %v8822_v31 = vmul.f32 -1.442695, %v12161_v29 }
 0x148   :  { %v11037_v32 = vpop.eup %11036  ;;  %11048 = vpow2.f32 %v8824_v30 }
 0x149   :  { %v11039_v33 = vpop.eup %11038  ;;  %v881_v34 = vadd.f32 1.0, %v11037_v32  ;;  %11050 = vpow2.f32 %v8822_v31  ;;  %v9782_v35 = vpop.f32.mrb[8].mxu0 }
 0x14a   :  { %v11041_v36 = vpop.eup %11040  ;;  %v879_v37 = vadd.f32 1.0, %v11039_v33  ;;  %v12166_v38 = vadd.f32 %v9782_v35, %v12126_v4  ;;  %v656_v39 = vpop.f32.mrb[9].mxu0  ;;  %v365_v35 = vadd.f32 %v12095_v54, %v12126_v4  ;;  %v364_v54 = vadd.f32 %v12126_v4, %v12101_v57 }
 0x14b   :  { %v11043_v40 = vpop.eup %11042  ;;  %11052 = vrcp.f32 %v881_v34  ;;  %v882_v41 = vadd.f32 1.0, %v11041_v36  ;;  %v12169_v42 = vadd.f32 %v12126_v4, %v656_v39  ;;  %v9783_v43 = vpop.f32.mrb[10].mxu0  ;;  %v363_v39 = vadd.f32 %v12126_v4, %v12097_v55 }
 0x14c   :  { %11054 = vrcp.f32 %v879_v37  ;;  %v880_v44 = vadd.f32 1.0, %v11043_v40  ;;  %v8827_v45 = vmul.f32 -1.442695, %v12166_v38  ;;  %v12173_v46 = vadd.f32 %v9783_v43, %v12126_v4  ;;  %v659_v47 = vpop.f32.mrb[11].mxu0 }
 0x14d   :  { %11056 = vrcp.f32 %v882_v41  ;;  %v8825_v48 = vmul.f32 -1.442695, %v12169_v42  ;;  %v12177_v49 = vadd.f32 %v12126_v4, %v659_v47  ;;  %v366_v41 = vadd.f32 %v12099_v56, %v12126_v4 }
 0x14e   :  { %11058 = vrcp.f32 %v880_v44  ;;  %v8828_v50 = vmul.f32 -1.442695, %v12173_v46 }
 0x14f   :  { %11060 = vpow2.f32 %v8827_v45  ;;  %v8826_v51 = vmul.f32 -1.442695, %v12177_v49 }
 0x150   :  { %v11045_v52 = vpop.eup %11044  ;;  %11062 = vpow2.f32 %v8825_v48 }
 0x151   :  { %v11047_v53 = vpop.eup %11046  ;;  %v885_v5 = vadd.f32 1.0, %v11045_v52  ;;  %11064 = vpow2.f32 %v8828_v50  ;;  %v9786_v8 = vpop.f32.mrb[12].mxu0 }
 0x152   :  { %v11049_v10 = vpop.eup %11048  ;;  %v883_v12 = vadd.f32 1.0, %v11047_v53  ;;  %11066 = vpow2.f32 %v8826_v51  ;;  %v12182_v13 = vadd.f32 %v9786_v8, %v12126_v4  ;;  %v672_v15 = vpop.f32.mrb[13].mxu0 }
 0x153   :  { %v11051_v16 = vpop.eup %11050  ;;  %11068 = vrcp.f32 %v885_v5  ;;  %v886_v18 = vadd.f32 1.0, %v11049_v10  ;;  %v12185_v19 = vadd.f32 %v12126_v4, %v672_v15  ;;  %v9787_v20 = vpop.f32.mrb[14].mxu0 }
 0x154   :  { %11070 = vrcp.f32 %v883_v12  ;;  %v884_v24 = vadd.f32 1.0, %v11051_v16  ;;  %v8831_v25 = vmul.f32 -1.442695, %v12182_v13  ;;  %v12192_v27 = vadd.f32 %v9787_v20, %v12126_v4  ;;  %v675_v28 = vpop.f32.mrb[15].mxu0 }
 0x155   :  { %v11053_v30 = vpop.eup %11052  ;;  %11072 = vrcp.f32 %v886_v18  ;;  %v8829_v31 = vmul.f32 -1.442695, %v12185_v19  ;;  %v12196_v32 = vadd.f32 %v12126_v4, %v675_v28 }
 0x156   :  { %v11055_v33 = vpop.eup %11054  ;;  %11074 = vrcp.f32 %v884_v24  ;;  %v8832_v34 = vmul.f32 -1.442695, %v12192_v27  ;;  %1011 = vrot.lane.b32.xlu1 %v11053_v30, %s11828_s5  ;;  %v369_v24 = vadd.f32 %v12103_v58, %v12126_v4  ;;  %v367_v30 = vadd.f32 %v12126_v4, %v12105_v59 }
 0x157   :  { %v11057_v36 = vpop.eup %11056  ;;  %11076 = vpow2.f32 %v8831_v25  ;;  %v8830_v37 = vmul.f32 -1.442695, %v12196_v32  ;;  %1007 = vrot.lane.b32.xlu0 %v11055_v33, %s11828_s5  ;;  %v370_v33 = vadd.f32 %v12107_v60, %v12126_v4  ;;  %v368_v58 = vadd.f32 %v12126_v4, %v12109_v61 }
 0x158   :  { %v11059_v40 = vpop.eup %11058  ;;  %11078 = vpow2.f32 %v8829_v31 }
 0x159   :  { %v11061_v43 = vpop.eup %11060  ;;  %11080 = vpow2.f32 %v8832_v34  ;;  %v9790_v44 = vpop.f32.mrb[16].mxu0 }
 0x15a   :  { %v11063_v45 = vpop.eup %11062  ;;  %v889_v47 = vadd.f32 1.0, %v11061_v43  ;;  %11082 = vpow2.f32 %v8830_v37  ;;  %v12210_v48 = vadd.f32 %v9790_v44, %v365_v35  ;;  %1013 = vrot.lane.b32.xlu1 %v11057_v36, %s11828_s5  ;;  %v688_v50 = vpop.f32.mrb[17].mxu0 }
 0x15b   :  { %v11065_v55 = vpop.eup %11064  ;;  %v887_v51 = vadd.f32 1.0, %v11063_v45  ;;  %v12213_v52 = vadd.f32 %v688_v50, %v363_v39  ;;  %1009 = vrot.lane.b32.xlu0 %v11059_v40, %s11828_s5  ;;  %v9791_v56 = vpop.f32.mrb[18].mxu0 }
 0x15c   :  { %v11067_v53 = vpop.eup %11066  ;;  %11084 = vrcp.f32 %v889_v47  ;;  %v890_v5 = vadd.f32 1.0, %v11065_v55  ;;  %v8835_v57 = vmul.f32 -1.442695, %v12210_v48  ;;  %v12217_v8 = vadd.f32 %v9791_v56, %v366_v41  ;;  %v691_v10 = vpop.f32.mrb[19].mxu0 }
 0x15d   :  { %v11069_v12 = vpop.eup %11068  ;;  %11086 = vrcp.f32 %v887_v51  ;;  %v888_v15 = vadd.f32 1.0, %v11067_v53  ;;  %v8833_v16 = vmul.f32 -1.442695, %v12213_v52  ;;  %v12220_v18 = vadd.f32 %v691_v10, %v364_v54 }
 0x15e   :  { %v11071_v20 = vpop.eup %11070  ;;  %11088 = vrcp.f32 %v890_v5  ;;  %v8836_v22 = vmul.f32 -1.442695, %v12217_v8  ;;  %v373_v5 = vadd.f32 %v12111_v62, %v12126_v4  ;;  %v372_v62 = vadd.f32 %v12126_v4, %v12117_v1 }
 0x15f   :  { %v11073_v25 = vpop.eup %11072  ;;  %11090 = vrcp.f32 %v888_v15  ;;  %v8834_v28 = vmul.f32 -1.442695, %v12220_v18  ;;  %1015 = vrot.lane.b32.xlu0 %v11071_v20, %s11828_s5 }
 0x160   :  { %v11075_v31 = vpop.eup %11074  ;;  %11092 = vpow2.f32 %v8835_v57 }
 0x161   :  { %v11077_v34 = vpop.eup %11076  ;;  %11094 = vpow2.f32 %v8833_v16  ;;  %1017 = vrot.lane.b32.xlu1 %v11075_v31, %s11828_s5  ;;  %v9794_v35 = vpop.f32.mrb[20].mxu0  ;;  %v374_v16 = vadd.f32 %v12115_v0, %v12126_v4 }
 0x162   :  { %v11079_v36 = vpop.eup %11078  ;;  %v893_v37 = vadd.f32 1.0, %v11077_v34  ;;  %11096 = vpow2.f32 %v8836_v22  ;;  %v12234_v39 = vadd.f32 %v9794_v35, %v369_v24  ;;  %v704_v40 = vpop.f32.mrb[21].mxu0 }
 0x163   :  { %v11081_v59 = vpop.eup %11080  ;;  %v891_v41 = vadd.f32 1.0, %v11079_v36  ;;  %11098 = vpow2.f32 %v8834_v28  ;;  %v12236_v43 = vadd.f32 %v704_v40, %v367_v30  ;;  %1019 = vrot.lane.b32.xlu0 %v11069_v12, %s11828_s5  ;;  %v9795_v60 = vpop.f32.mrb[22].mxu0  ;;  %v371_v12 = vadd.f32 %v12126_v4, %v12113_v63 }
 0x164   :  { %v11083_v44 = vpop.eup %11082  ;;  %11100 = vrcp.f32 %v893_v37  ;;  %v894_v54 = vadd.f32 1.0, %v11081_v59  ;;  %v8839_v45 = vmul.f32 -1.442695, %v12234_v39  ;;  %v12240_v61 = vadd.f32 %v9795_v60, %v370_v33  ;;  %v707_v47 = vpop.f32.mrb[23].mxu0 }
 0x165   :  { %11102 = vrcp.f32 %v891_v41  ;;  %v892_v50 = vadd.f32 1.0, %v11083_v44  ;;  %v8837_v55 = vmul.f32 -1.442695, %v12236_v43  ;;  %v12243_v51 = vadd.f32 %v707_v47, %v368_v58  ;;  %1021 = vrot.lane.b32.xlu1 %v11073_v25, %s11828_s5 }
 0x166   :  { %v11085_v56 = vpop.eup %11084  ;;  %11104 = vrcp.f32 %v894_v54  ;;  %v8840_v53 = vmul.f32 -1.442695, %v12240_v61  ;;  %v377_v44 = vadd.f32 %v12119_v2, %v12126_v4  ;;  %v375_v47 = vadd.f32 %v12126_v4, %v12121_v3 }
 0x167   :  { %v11087_v57 = vpop.eup %11086  ;;  %11106 = vrcp.f32 %v892_v50  ;;  %v8838_v10 = vmul.f32 -1.442695, %v12243_v51 }
 0x168   :  { %v11089_v15 = vpop.eup %11088  ;;  %11108 = vpow2.f32 %v8839_v45  ;;  %1023 = vrot.lane.b32.xlu0 %v11087_v57, %s11828_s5 }
 0x169   :  { %v11091_v20 = vpop.eup %11090  ;;  %11110 = vpow2.f32 %v8837_v55  ;;  %v9798_v22 = vpop.f32.mrb[24].mxu0 }
 0x16a   :  { %v11093_v24 = vpop.eup %11092  ;;  %11112 = vpow2.f32 %v8840_v53  ;;  %1025 = vrot.lane.b32.xlu1 %v11091_v20, %s11828_s5  ;;  %v12258_v25 = vadd.f32 %v9798_v22, %v373_v5  ;;  %v720_v63 = vpop.f32.mrb[25].mxu0  ;;  %v376_v5 = vadd.f32 %v12126_v4, %v12131_v7 }
 0x16b   :  { %v11095_v28 = vpop.eup %11094  ;;  %v897_v30 = vadd.f32 1.0, %v11093_v24  ;;  %11114 = vpow2.f32 %v8838_v10  ;;  %v12260_v31 = vadd.f32 %v720_v63, %v371_v12  ;;  %v9799_v33 = vpop.f32.mrb[26].mxu0 }
 0x16c   :  { %v11097_v0 = vpop.eup %11096  ;;  %v895_v34 = vadd.f32 1.0, %v11095_v28  ;;  %1027 = vrot.lane.b32.xlu0 %v11085_v56, %s11828_s5  ;;  %v12263_v35 = vadd.f32 %v9799_v33, %v374_v16  ;;  %v723_v1 = vpop.f32.mrb[27].mxu0  ;;  %v8843_v37 = vmul.f32 -1.442695, %v12258_v25 }
 0x16d   :  { %v11099_v58 = vpop.eup %11098  ;;  %11116 = vrcp.f32 %v897_v30  ;;  %v898_v36 = vadd.f32 1.0, %v11097_v0  ;;  %v12266_v40 = vadd.f32 %v723_v1, %v372_v62  ;;  %v8841_v60 = vmul.f32 -1.442695, %v12260_v31 }
 0x16e   :  { %v11101_v59 = vpop.eup %11100  ;;  %11118 = vrcp.f32 %v895_v34  ;;  %v896_v41 = vadd.f32 1.0, %v11099_v58  ;;  %1029 = vrot.lane.b32.xlu1 %v11089_v15, %s11828_s5  ;;  %v8844_v45 = vmul.f32 -1.442695, %v12263_v35 }
 0x16f   :  { %v11103_v54 = vpop.eup %11102  ;;  %11120 = vrcp.f32 %v898_v36  ;;  %v8842_v55 = vmul.f32 -1.442695, %v12266_v40 }
 0x170   :  { %v11105_v50 = vpop.eup %11104  ;;  %11122 = vrcp.f32 %v896_v41  ;;  %1031 = vrot.lane.b32.xlu0 %v11103_v54, %s11828_s5 }
 0x171   :  { %v11107_v56 = vpop.eup %11106  ;;  %11124 = vpow2.f32 %v8843_v37  ;;  %v9802_v53 = vpop.f32.mrb[28].mxu0 }
 0x172   :  { %v11109_v2 = vpop.eup %11108  ;;  %11126 = vpow2.f32 %v8841_v60  ;;  %1033 = vrot.lane.b32.xlu1 %v11107_v56, %s11828_s5  ;;  %v12280_v57 = vadd.f32 %v9802_v53, %v377_v44  ;;  %v736_v10 = vpop.f32.mrb[29].mxu0 }
 0x173   :  { %v11111_v3 = vpop.eup %11110  ;;  %v901_v12 = vadd.f32 1.0, %v11109_v2  ;;  %11128 = vpow2.f32 %v8844_v45  ;;  %v12282_v15 = vadd.f32 %v736_v10, %v375_v47  ;;  %v9803_v16 = vpop.f32.mrb[30].mxu0 }
 0x174   :  { %v11113_v20 = vpop.eup %11112  ;;  %v899_v22 = vadd.f32 1.0, %v11111_v3  ;;  %11130 = vpow2.f32 %v8842_v55  ;;  %1035 = vrot.lane.b32.xlu0 %v11101_v59, %s11828_s5  ;;  %v12286_v4 = vadd.f32 %v9803_v16, %v12129_v6  ;;  %v739_v7 = vpop.f32.mrb[31].mxu0  ;;  %v8847_v63 = vmul.f32 -1.442695, %v12280_v57 }
 0x175   :  { %v11115_v62 = vpop.eup %11114  ;;  %11132 = vrcp.f32 %v901_v12  ;;  %v902_v24 = vadd.f32 1.0, %v11113_v20  ;;  %v12289_v28 = vadd.f32 %v739_v7, %v376_v5  ;;  %v8845_v33 = vmul.f32 -1.442695, %v12282_v15 }
 0x176   :  { %11134 = vrcp.f32 %v899_v22  ;;  %v900_v30 = vadd.f32 1.0, %v11115_v62  ;;  %1037 = vrot.lane.b32.xlu1 %v11105_v50, %s11828_s5  ;;  %v8848_v34 = vmul.f32 -1.442695, %v12286_v4 }
 0x177   :  { %v11117_v0 = vpop.eup %11116  ;;  %11136 = vrcp.f32 %v902_v24  ;;  %v8846_v1 = vmul.f32 -1.442695, %v12289_v28 }
 0x178   :  { %v11119_v6 = vpop.eup %11118  ;;  %11138 = vrcp.f32 %v900_v30 }
 0x179   :  { %v11121_v58 = vpop.eup %11120  ;;  %11140 = vpow2.f32 %v8847_v63  ;;  %1039 = vrot.lane.b32.xlu0 %v11119_v6, %s11828_s5 }
 0x17a   :  { %v11123_v36 = vpop.eup %11122  ;;  %11142 = vpow2.f32 %v8845_v33 }
 0x17b   :  { %v11125_v37 = vpop.eup %11124  ;;  %11144 = vpow2.f32 %v8848_v34  ;;  %1041 = vrot.lane.b32.xlu1 %v11123_v36, %s11828_s5 }
 0x17c   :  { %v11127_v59 = vpop.eup %11126  ;;  %11146 = vpow2.f32 %v8846_v1  ;;  %v905_v45 = vadd.f32 1.0, %v11125_v37 }
 0x17d   :  { %v11129_v41 = vpop.eup %11128  ;;  %v903_v60 = vadd.f32 1.0, %v11127_v59  ;;  %1043 = vrot.lane.b32.xlu0 %v11117_v0, %s11828_s5 }
 0x17e   :  { %v11131_v44 = vpop.eup %11130  ;;  %v906_v56 = vadd.f32 1.0, %v11129_v41 }
 0x17f   :  { %v11133_v54 = vpop.eup %11132  ;;  %11148 = vrcp.f32 %v903_v60  ;;  %v904_v47 = vadd.f32 1.0, %v11131_v44  ;;  %1045 = vrot.lane.b32.xlu1 %v11121_v58, %s11828_s5 }
 0x180   :  { %v11135_v50 = vpop.eup %11134 }
 0x181   :  { %v11137_v55 = vpop.eup %11136  ;;  %11150 = vrcp.f32 %v904_v47  ;;  %1047 = vrot.lane.b32.xlu0 %v11135_v50, %s11828_s5 }
 0x182   :  { %v11139_v53 = vpop.eup %11138  ;;  %11152 = vrcp.f32 %v905_v45 }
 0x183   :  { %v11141_v5 = vpop.eup %11140  ;;  %1049 = vrot.lane.b32.xlu1 %v11139_v53, %s11828_s5  ;;  %11154 = vrcp.f32 %v906_v56 }
 0x184   :  { %v11143_v2 = vpop.eup %11142  ;;  %v909_v16 = vadd.f32 1.0, %v11141_v5 }
 0x185   :  { %v11145_v10 = vpop.eup %11144  ;;  %v907_v3 = vadd.f32 1.0, %v11143_v2  ;;  %1051 = vrot.lane.b32.xlu0 %v11133_v54, %s11828_s5 }
 0x186   :  { %v11147_v12 = vpop.eup %11146  ;;  %v910_v7 = vadd.f32 1.0, %v11145_v10 }
 0x187   :  { %11156 = vrcp.f32 %v907_v3  ;;  %v908_v20 = vadd.f32 1.0, %v11147_v12  ;;  %1053 = vrot.lane.b32.xlu1 %v11137_v55, %s11828_s5 }
 0x189   :  { %v11149_v22 = vpop.eup %11148  ;;  %11158 = vrcp.f32 %v908_v20 }
 0x18a   :  { %1055 = vrot.lane.b32.xlu0 %v11149_v22, %s11828_s5  ;;  %11160 = vrcp.f32 %v909_v16 }
 0x18b   :  { %v11151_v62 = vpop.eup %11150  ;;  %11162 = vrcp.f32 %v910_v7 }
 0x18c   :  { %1057 = vrot.lane.b32.xlu1 %v11151_v62, %s11828_s5  ;;  %v11153_v24 = vpop.eup %11152 }
 0x18d   :  { %v11155_v63 = vpop.eup %11154 }
 0x18e   :  { %1059 = vrot.lane.b32.xlu0 %v11153_v24, %s11828_s5 }
 0x190   :  { %1061 = vrot.lane.b32.xlu1 %v11155_v63, %s11828_s5 }
 0x191   :  { %v11157_v30 = vpop.eup %11156 }
 0x192   :  { %1063 = vrot.lane.b32.xlu0 %v11157_v30, %s11828_s5 }
 0x193   :  { %v11159_v33 = vpop.eup %11158 }
 0x194   :  { %1065 = vrot.lane.b32.xlu1 %v11159_v33, %s11828_s5  ;;  %v11161_v0 = vpop.eup %11160 }
 0x195   :  { %v11163_v34 = vpop.eup %11162 }
 0x196   :  { %1067 = vrot.lane.b32.xlu0 %v11161_v0, %s11828_s5 }
 0x198   :  { %1069 = vrot.lane.b32.xlu1 %v11163_v34, %s11828_s5 }
 0x1c8   :  { %v1012_v6 = vpop.permute.xlu1 %1011 }
 0x1c9   :  { %v1008_v1 = vpop.permute.xlu0 %1007  ;;  %v1105_v37 = vadd.f32 %v12134_v9, %v1012_v6 }
 0x1ca   :  { %v1103_v58 = vadd.f32 %v12137_v11, %v1008_v1 }
 0x1cb   :  { %v1137_v47 = vmax.f32 %v1105_v37, 0.0 }
 0x1cc   :  { %v1014_v36 = vpop.permute.xlu1 %1013  ;;  %v1135_v54 = vmax.f32 %v1103_v58, 0.0 }
 0x1cd   :  { %v1106_v59 = vadd.f32 %v12141_v14, %v1014_v36  ;;  %v1010_v41 = vpop.permute.xlu0 %1009 }
 0x1ce   :  { %v1104_v60 = vadd.f32 %v12145_v17, %v1010_v41 }
 0x1cf   :  { %v1138_v44 = vmax.f32 %v1106_v59, 0.0 }
 0x1d0   :  { %v1136_v45 = vmax.f32 %v1104_v60, 0.0 }
 0x1d1   :  { %v1016_v50 = vpop.permute.xlu0 %1015  ;;  %v1168_v53 = vpack.c.bf16 %v1138_v44, %v1137_v47 }
 0x1d2   :  { %v1167_v55 = vpack.c.bf16 %v1136_v45, %v1135_v54  ;;  %v1107_v56 = vadd.f32 %v12153_v23, %v1016_v50 }
 0x1d3   :  { %v1018_v5 = vpop.permute.xlu1 %1017 }
 0x1d4   :  { %v1108_v11 = vadd.f32 %v12161_v29, %v1018_v5  ;;  %9806 = vmatprep.mubr.msk.bf16.mxu1 %vm1191_vm2, %v1167_v55  ;;  %v1139_v14 = vmax.f32 %v1107_v56, 0.0 }
 0x1d5   :  { %9807 = vmatmul.mubr.msk.bf16.vlgmr.msra.gmra.mrb[16].mxu1 %vm1191_vm2, %v1168_v53  ;;  %v1020_v9 = vpop.permute.xlu0 %1019 }
 0x1d6   :  { %v1140_v17 = vmax.f32 %v1108_v11, 0.0  ;;  %v1109_v2 = vadd.f32 %v12150_v21, %v1020_v9 }
 0x1d7   :  { %v1022_v10 = vpop.permute.xlu1 %1021 }
 0x1d8   :  { %v1169_v3 = vpack.c.bf16 %v1140_v17, %v1139_v14  ;;  %v1110_v12 = vadd.f32 %v12157_v26, %v1022_v10  ;;  %v1141_v16 = vmax.f32 %v1109_v2, 0.0 }
 0x1da   :  { %v1142_v20 = vmax.f32 %v1110_v12, 0.0  ;;  %v1024_v23 = vpop.permute.xlu0 %1023  ;;  %9810 = vmatprep.mubr.msk.bf16.mxu1 %vm1191_vm2, %v1169_v3 }
 0x1db   :  { %v1111_v29 = vadd.f32 %v12169_v42, %v1024_v23 }
 0x1dc   :  { %v1170_v22 = vpack.c.bf16 %v1142_v20, %v1141_v16  ;;  %v1026_v7 = vpop.permute.xlu1 %1025 }
 0x1dd   :  { %v1112_v62 = vadd.f32 %v12177_v49, %v1026_v7  ;;  %v1143_v63 = vmax.f32 %v1111_v29, 0.0 }
 0x1de   :  { %v1028_v24 = vpop.permute.xlu0 %1027  ;;  %9811 = vmatmul.mubr.msk.bf16.gmra.mrb[20].mxu1 %vm1191_vm2, %v1170_v22 }
 0x1df   :  { %v1144_v21 = vmax.f32 %v1112_v62, 0.0  ;;  %v1113_v30 = vadd.f32 %v12166_v38, %v1028_v24 }
 0x1e0   :  { %v1030_v33 = vpop.permute.xlu1 %1029 }
 0x1e1   :  { %v1171_v26 = vpack.c.bf16 %v1144_v21, %v1143_v63  ;;  %v1114_v0 = vadd.f32 %v12173_v46, %v1030_v33  ;;  %v1145_v6 = vmax.f32 %v1113_v30, 0.0 }
 0x1e2   :  { %v1032_v34 = vpop.permute.xlu0 %1031 }
 0x1e3   :  { %v1146_v1 = vmax.f32 %v1114_v0, 0.0  ;;  %v1115_v42 = vadd.f32 %v12185_v19, %v1032_v34  ;;  %9814 = vmatprep.mubr.msk.bf16.mxu1 %vm1191_vm2, %v1171_v26 }
 0x1e4   :  { %v1034_v58 = vpop.permute.xlu1 %1033 }
 0x1e5   :  { %v1172_v49 = vpack.c.bf16 %v1146_v1, %v1145_v6  ;;  %v1116_v36 = vadd.f32 %v12196_v32, %v1034_v58  ;;  %v1147_v59 = vmax.f32 %v1115_v42, 0.0 }
 0x1e6   :  { %v1036_v37 = vpop.permute.xlu0 %1035 }
 0x1e7   :  { %v1148_v41 = vmax.f32 %v1116_v36, 0.0  ;;  %v1117_v38 = vadd.f32 %v12182_v13, %v1036_v37  ;;  %9815 = vmatmul.mubr.msk.bf16.gmra.mrb[24].mxu1 %vm1191_vm2, %v1172_v49 }
 0x1e8   :  { %v1038_v60 = vpop.permute.xlu1 %1037 }
 0x1e9   :  { %v1173_v46 = vpack.c.bf16 %v1148_v41, %v1147_v59  ;;  %v1118_v44 = vadd.f32 %v12192_v27, %v1038_v60  ;;  %v1149_v54 = vmax.f32 %v1117_v38, 0.0 }
 0x1eb   :  { %v1150_v45 = vmax.f32 %v1118_v44, 0.0  ;;  %v1040_v19 = vpop.permute.xlu0 %1039  ;;  %9818 = vmatprep.mubr.msk.bf16.mxu1 %vm1191_vm2, %v1173_v46  ;;  %v15299_v46 = vmov 0.0  }
 0x1ec   :  { %v1119_v47 = vadd.f32 %v12213_v52, %v1040_v19  ;;  %9838 = vmatprep.subr.bf16.mxu1 %v15299_v46  ;;  %v11011_v19 = vld [vmem:[%s15287_s1] sm:$0xff]  }
 0x1ed   :  { %v1174_v50 = vpack.c.bf16 %v1150_v45, %v1149_v54  ;;  %v1042_v32 = vpop.permute.xlu1 %1041 }
 0x1ee   :  { %v1120_v55 = vadd.f32 %v12220_v18, %v1042_v32  ;;  %v1151_v13 = vmax.f32 %v1119_v47, 0.0 }
 0x1ef   :  { %v1044_v56 = vpop.permute.xlu0 %1043  ;;  %9819 = vmatmul.mubr.msk.bf16.gmra.mrb[28].mxu1 %vm1191_vm2, %v1174_v50 }
 0x1f0   :  { %v1152_v53 = vmax.f32 %v1120_v55, 0.0  ;;  %v1121_v5 = vadd.f32 %v12210_v48, %v1044_v56 }
 0x1f1   :  { %v1046_v11 = vpop.permute.xlu1 %1045 }
 0x1f2   :  { %v1175_v27 = vpack.c.bf16 %v1152_v53, %v1151_v13  ;;  %v1122_v9 = vadd.f32 %v12217_v8, %v1046_v11  ;;  %v1153_v17 = vmax.f32 %v1121_v5, 0.0  ;;  %v11012_v53 = vld [vmem:[%s15287_s1 + $0x8] sm:$0xff]  }
 0x1f3   :  { %v1048_v14 = vpop.permute.xlu0 %1047 }
 0x1f4   :  { %v1154_v2 = vmax.f32 %v1122_v9, 0.0  ;;  %v1123_v52 = vadd.f32 %v12236_v43, %v1048_v14  ;;  %9822 = vmatprep.mubr.msk.bf16.mxu1 %vm1191_vm2, %v1175_v27 }
 0x1f5   :  { %v1050_v10 = vpop.permute.xlu1 %1049 }
 0x1f6   :  { %v1176_v18 = vpack.c.bf16 %v1154_v2, %v1153_v17  ;;  %v1124_v3 = vadd.f32 %v12243_v51, %v1050_v10  ;;  %v1155_v16 = vmax.f32 %v1123_v52, 0.0  ;;  %v11013_v17 = vld [vmem:[%s15287_s1 + $0x10] sm:$0xff]  }
 0x1f7   :  { %v1052_v12 = vpop.permute.xlu0 %1051 }
 0x1f8   :  { %v1156_v20 = vmax.f32 %v1124_v3, 0.0  ;;  %v1125_v48 = vadd.f32 %v12234_v39, %v1052_v12  ;;  %9823 = vmatmul.mubr.msk.bf16.gmra.mrb[32].mxu1 %vm1191_vm2, %v1176_v18 }
 0x1f9   :  { %v1054_v23 = vpop.permute.xlu1 %1053 }
 0x1fa   :  { %v1177_v8 = vpack.c.bf16 %v1156_v20, %v1155_v16  ;;  %v1126_v29 = vadd.f32 %v12240_v61, %v1054_v23  ;;  %v1157_v22 = vmax.f32 %v1125_v48, 0.0  ;;  %v11014_v16 = vld [vmem:[%s15287_s1 + $0x18] sm:$0xff]  }
 0x1fc   :  { %v1158_v7 = vmax.f32 %v1126_v29, 0.0  ;;  %v1056_v43 = vpop.permute.xlu0 %1055  ;;  %9826 = vmatprep.mubr.msk.bf16.mxu1 %vm1191_vm2, %v1177_v8  ;;  %v11015_v29 = vld [vmem:[%s15287_s1 + $0x20] sm:$0xff]  }
 0x1fd   :  { %v1127_v62 = vadd.f32 %v12260_v31, %v1056_v43 }
 0x1fe   :  { %v1178_v24 = vpack.c.bf16 %v1158_v7, %v1157_v22  ;;  %v1058_v51 = vpop.permute.xlu1 %1057 }
 0x1ff   :  { %v1128_v63 = vadd.f32 %v12266_v40, %v1058_v51  ;;  %v1159_v39 = vmax.f32 %v1127_v62, 0.0 }
 0x200   :  { %v1060_v21 = vpop.permute.xlu0 %1059  ;;  %9827 = vmatmul.mubr.msk.bf16.gmra.mrb[36].mxu1 %vm1191_vm2, %v1178_v24 }
 0x201   :  { %v1160_v30 = vmax.f32 %v1128_v63, 0.0  ;;  %v1129_v33 = vadd.f32 %v12258_v25, %v1060_v21  ;;  %v11016_v63 = vld [vmem:[%s15287_s1 + $0x28] sm:$0xff]  }
 0x202   :  { %v1062_v26 = vpop.permute.xlu1 %1061 }
 0x203   :  { %v1179_v61 = vpack.c.bf16 %v1160_v30, %v1159_v39  ;;  %v1130_v0 = vadd.f32 %v12263_v35, %v1062_v26  ;;  %v1161_v6 = vmax.f32 %v1129_v33, 0.0 }
 0x204   :  { %v1064_v34 = vpop.permute.xlu0 %1063 }
 0x205   :  { %v1162_v1 = vmax.f32 %v1130_v0, 0.0  ;;  %v1131_v31 = vadd.f32 %v12282_v15, %v1064_v34  ;;  %9830 = vmatprep.mubr.msk.bf16.mxu1 %vm1191_vm2, %v1179_v61  ;;  %v11017_v61 = vld [vmem:[%s15287_s1 + $0x30] sm:$0xff]  }
 0x206   :  { %v1066_v42 = vpop.permute.xlu1 %1065 }
 0x207   :  { %v1180_v40 = vpack.c.bf16 %v1162_v1, %v1161_v6  ;;  %v1132_v58 = vadd.f32 %v12289_v28, %v1066_v42  ;;  %v1163_v36 = vmax.f32 %v1131_v31, 0.0 }
 0x208   :  { %v1068_v49 = vpop.permute.xlu0 %1067 }
 0x209   :  { %v1164_v37 = vmax.f32 %v1132_v58, 0.0  ;;  %v1133_v25 = vadd.f32 %v12280_v57, %v1068_v49  ;;  %9831 = vmatmul.mubr.msk.bf16.gmra.mrb[40].mxu1 %vm1191_vm2, %v1180_v40  ;;  %v11018_v40 = vld [vmem:[%s15287_s1 + $0x38] sm:$0xff]  }
 0x20a   :  { %v1070_v59 = vpop.permute.xlu1 %1069 }
 0x20b   :  { %v1181_v35 = vpack.c.bf16 %v1164_v37, %v1163_v36  ;;  %v1134_v41 = vadd.f32 %v12286_v4, %v1070_v59  ;;  %v1165_v38 = vmax.f32 %v1133_v25, 0.0  ;;  %v11019_v25 = vld [vmem:[%s15287_s1 + $0x40] sm:$0xff]   ;;  %v11020_v59 = vld [vmem:[%s15287_s1 + $0x48] sm:$0xff]  }
 0x20d   :  { %v1166_v60 = vmax.f32 %v1134_v41, 0.0  ;;  %9834 = vmatprep.mubr.msk.bf16.mxu1 %vm1191_vm2, %v1181_v35  ;;  %v11021_v35 = vld [vmem:[%s15287_s1 + $0x50] sm:$0xff]   ;;  %v11022_v41 = vld [vmem:[%s15287_s1 + $0x58] sm:$0xff]  }
 0x20f   :  { %v1182_v15 = vpack.c.bf16 %v1166_v60, %v1165_v38  ;;  %v11023_v38 = vld [vmem:[%s15287_s1 + $0x60] sm:$0xff]  }
 0x210   :  { %v11027_v60 = vld [vmem:[%s15288_s3] sm:$0x1f]  }
 0x211   :  { %9835 = vmatmul.mubr.msk.bf16.gmra.mrb[44].mxu1 %vm1191_vm2, %v1182_v15  ;;  %10992 = vmatprep.subr.msk.bf16.mxu0 %vm2297_vm4, %v11027_v60  ;;  %v2299_v15 = vsel %vm2297_vm4, %v11027_v60, 0 }
 0x212   :  { %9840 = vmatprep.mubr.msk.bf16.mxu1 %vm11830_vm3, %v15299_v46  ;;  %9935 = vmatpush3.bf16.msra.mxu0 %v2299_v15 }
 0x2a8   :  { %v9808_v57 = vpop.f32.mrb[16].mxu1 }
 0x2a9   :  { %v1274_v28 = vpop.f32.mrb[17].mxu1 }
 0x2aa   :  { %v9809_v44 = vpop.f32.mrb[18].mxu1 }
 0x2ab   :  { %v1402_v54 = vpack.c.bf16 %v9809_v44, %v9808_v57  ;;  %v1277_v45 = vpop.f32.mrb[19].mxu1  ;;  %v11024_v57 = vld [vmem:[%s15287_s1 + $0x68] sm:$0xff]   ;;  %v11026_v44 = vld [vmem:[%s15287_s1 + $0x78] sm:$0xff]  }
 0x2ac   :  { %v1401_v4 = vpack.c.bf16 %v1277_v45, %v1274_v28  ;;  %v11025_v28 = vld [vmem:[%s15287_s1 + $0x70] sm:$0xff]  }
 0x2ae   :  { %9839 = vmatpush3.bf16.msra.mxu1 %v1401_v4 }
 0x2af   :  { %9844 = vmatprep.subr.bf16.mxu1 %v15299_v46 }
 0x2b1   :  { %v9812_v47 = vpop.f32.mrb[20].mxu1  ;;  %9841 = vmatmul.mubr.msk.bf16.vlgmr.msra.gmra.mrb[48].mxu1 %vm1191_vm2, %v11011_v19 }
 0x2b2   :  { %v1290_v50 = vpop.f32.mrb[21].mxu1  ;;  %9845 = vmatpush3.bf16.msra.mxu1 %v1402_v54  ;;  %9846 = vmatprep.mubr.msk.bf16.mxu1 %vm11830_vm3, %v15299_v46  ;;  %v11028_v54 = vld [vmem:[%s15288_s3 + $0x8] sm:$0x1f]  }
 0x2b3   :  { %v9813_v32 = vpop.f32.mrb[22].mxu1  ;;  %9850 = vmatprep.subr.bf16.mxu1 %v15299_v46  ;;  %10993 = vmatprep.subr.msk.bf16.mxu0 %vm2297_vm4, %v11028_v54 }
 0x2b4   :  { %v1404_v55 = vpack.c.bf16 %v9813_v32, %v9812_v47  ;;  %v1293_v56 = vpop.f32.mrb[23].mxu1 }
 0x2b5   :  { %v1403_v13 = vpack.c.bf16 %v1293_v56, %v1290_v50 }
 0x2b9   :  { %9847 = vmatmul.mubr.msk.bf16.vlgmr.msra.gmra.mrb[52].mxu1 %vm1191_vm2, %v11012_v53 }
 0x2ba   :  { %v9816_v5 = vpop.f32.mrb[24].mxu1  ;;  %9851 = vmatpush3.bf16.msra.mxu1 %v1403_v13  ;;  %9852 = vmatprep.mubr.msk.bf16.mxu1 %vm11830_vm3, %v15299_v46 }
 0x2bb   :  { %v1306_v11 = vpop.f32.mrb[25].mxu1  ;;  %9856 = vmatprep.subr.bf16.mxu1 %v15299_v46 }
 0x2bc   :  { %v9817_v27 = vpop.f32.mrb[26].mxu1 }
 0x2bd   :  { %v1406_v9 = vpack.c.bf16 %v9817_v27, %v9816_v5  ;;  %v1309_v14 = vpop.f32.mrb[27].mxu1 }
 0x2be   :  { %v1405_v2 = vpack.c.bf16 %v1309_v14, %v1306_v11  ;;  %v2517_v14 = vsel %vm2297_vm4, %v11028_v54, 0 }
 0x2c1   :  { %9853 = vmatmul.mubr.msk.bf16.vlgmr.msra.gmra.mrb[56].mxu1 %vm1191_vm2, %v11013_v17 }
 0x2c2   :  { %v9820_v52 = vpop.f32.mrb[28].mxu1  ;;  %9857 = vmatpush3.bf16.msra.mxu1 %v1404_v55  ;;  %9858 = vmatprep.mubr.msk.bf16.mxu1 %vm11830_vm3, %v15299_v46 }
 0x2c3   :  { %v1322_v10 = vpop.f32.mrb[29].mxu1  ;;  %9862 = vmatprep.subr.bf16.mxu1 %v15299_v46 }
 0x2c4   :  { %v9821_v18 = vpop.f32.mrb[30].mxu1 }
 0x2c5   :  { %v1408_v3 = vpack.c.bf16 %v9821_v18, %v9820_v52  ;;  %v1325_v12 = vpop.f32.mrb[31].mxu1 }
 0x2c6   :  { %v1407_v20 = vpack.c.bf16 %v1325_v12, %v1322_v10 }
 0x2c9   :  { %9859 = vmatmul.mubr.msk.bf16.vlgmr.msra.gmra.mrb[60].mxu1 %vm1191_vm2, %v11014_v16 }
 0x2ca   :  { %9863 = vmatpush3.bf16.msra.mxu1 %v1405_v2  ;;  %9864 = vmatprep.mubr.msk.bf16.mxu1 %vm11830_vm3, %v15299_v46 }
 0x2cb   :  { %v9824_v48 = vpop.f32.mrb[32].mxu1  ;;  %9868 = vmatprep.subr.bf16.mxu1 %v15299_v46 }
 0x2cc   :  { %v1338_v23 = vpop.f32.mrb[33].mxu1 }
 0x2cd   :  { %v9825_v8 = vpop.f32.mrb[34].mxu1 }
 0x2ce   :  { %v1410_v22 = vpack.c.bf16 %v9825_v8, %v9824_v48  ;;  %v1341_v7 = vpop.f32.mrb[35].mxu1 }
 0x2cf   :  { %v1409_v43 = vpack.c.bf16 %v1341_v7, %v1338_v23 }
 0x2d1   :  { %9865 = vmatmul.mubr.msk.bf16.vlgmr.msra.gmra.mrb[64].mxu1 %vm1191_vm2, %v11015_v29 }
 0x2d2   :  { %9869 = vmatpush3.bf16.msra.mxu1 %v1406_v9  ;;  %9870 = vmatprep.mubr.msk.bf16.mxu1 %vm11830_vm3, %v15299_v46 }
 0x2d3   :  { %v9828_v62 = vpop.f32.mrb[36].mxu1  ;;  %9874 = vmatprep.subr.bf16.mxu1 %v15299_v46 }
 0x2d4   :  { %v1354_v24 = vpop.f32.mrb[37].mxu1 }
 0x2d5   :  { %v9829_v51 = vpop.f32.mrb[38].mxu1 }
 0x2d6   :  { %v1412_v21 = vpack.c.bf16 %v9829_v51, %v9828_v62  ;;  %v1357_v39 = vpop.f32.mrb[39].mxu1 }
 0x2d7   :  { %v1411_v30 = vpack.c.bf16 %v1357_v39, %v1354_v24 }
 0x2d9   :  { %9871 = vmatmul.mubr.msk.bf16.vlgmr.msra.gmra.mrb[68].mxu1 %vm1191_vm2, %v11016_v63 }
 0x2da   :  { %9875 = vmatpush3.bf16.msra.mxu1 %v1407_v20  ;;  %9876 = vmatprep.mubr.msk.bf16.mxu1 %vm11830_vm3, %v15299_v46 }
 0x2db   :  { %9880 = vmatprep.subr.bf16.mxu1 %v15299_v46 }
 0x2dc   :  { %v9832_v33 = vpop.f32.mrb[40].mxu1 }
 0x2dd   :  { %v1370_v26 = vpop.f32.mrb[41].mxu1 }
 0x2de   :  { %v9833_v0 = vpop.f32.mrb[42].mxu1 }
 0x2df   :  { %v1414_v34 = vpack.c.bf16 %v9833_v0, %v9832_v33  ;;  %v1373_v6 = vpop.f32.mrb[43].mxu1 }
 0x2e0   :  { %v1413_v1 = vpack.c.bf16 %v1373_v6, %v1370_v26 }
 0x2e1   :  { %9877 = vmatmul.mubr.msk.bf16.vlgmr.msra.gmra.mrb[72].mxu1 %vm1191_vm2, %v11017_v61 }
 0x2e2   :  { %9881 = vmatpush3.bf16.msra.mxu1 %v1408_v3  ;;  %9882 = vmatprep.mubr.msk.bf16.mxu1 %vm11830_vm3, %v15299_v46 }
 0x2e3   :  { %9886 = vmatprep.subr.bf16.mxu1 %v15299_v46 }
 0x2e4   :  { %v9836_v31 = vpop.f32.mrb[44].mxu1 }
 0x2e5   :  { %v1386_v42 = vpop.f32.mrb[45].mxu1 }
 0x2e6   :  { %v9837_v58 = vpop.f32.mrb[46].mxu1 }
 0x2e7   :  { %v1416_v49 = vpack.c.bf16 %v9837_v58, %v9836_v31  ;;  %v1389_v36 = vpop.f32.mrb[47].mxu1 }
 0x2e8   :  { %v1415_v37 = vpack.c.bf16 %v1389_v36, %v1386_v42 }
 0x2e9   :  { %9883 = vmatmul.mubr.msk.bf16.vlgmr.msra.gmra.mrb[76].mxu1 %vm1191_vm2, %v11018_v40 }
 0x2ea   :  { %9887 = vmatpush3.bf16.msra.mxu1 %v1409_v43  ;;  %9888 = vmatprep.mubr.msk.bf16.mxu1 %vm11830_vm3, %v15299_v46 }
 0x2eb   :  { %9892 = vmatprep.subr.bf16.mxu1 %v15299_v46 }
 0x2f1   :  { %9889 = vmatmul.mubr.msk.bf16.vlgmr.msra.gmra.mrb[80].mxu1 %vm1191_vm2, %v11019_v25 }
 0x2f2   :  { %9893 = vmatpush3.bf16.msra.mxu1 %v1410_v22  ;;  %9894 = vmatprep.mubr.msk.bf16.mxu1 %vm11830_vm3, %v15299_v46 }
 0x2f3   :  { %9898 = vmatprep.subr.bf16.mxu1 %v15299_v46 }
 0x2f9   :  { %9895 = vmatmul.mubr.msk.bf16.vlgmr.msra.gmra.mrb[84].mxu1 %vm1191_vm2, %v11020_v59 }
 0x2fa   :  { %9899 = vmatpush3.bf16.msra.mxu1 %v1411_v30  ;;  %9900 = vmatprep.mubr.msk.bf16.mxu1 %vm11830_vm3, %v15299_v46 }
 0x2fb   :  { %9904 = vmatprep.subr.bf16.mxu1 %v15299_v46 }
 0x301   :  { %9901 = vmatmul.mubr.msk.bf16.vlgmr.msra.gmra.mrb[88].mxu1 %vm1191_vm2, %v11021_v35 }
 0x302   :  { %9905 = vmatpush3.bf16.msra.mxu1 %v1412_v21  ;;  %9906 = vmatprep.mubr.msk.bf16.mxu1 %vm11830_vm3, %v15299_v46 }
 0x303   :  { %9910 = vmatprep.subr.bf16.mxu1 %v15299_v46 }
 0x309   :  { %9907 = vmatmul.mubr.msk.bf16.vlgmr.msra.gmra.mrb[92].mxu1 %vm1191_vm2, %v11022_v41 }
 0x30a   :  { %9911 = vmatpush3.bf16.msra.mxu1 %v1413_v1  ;;  %9912 = vmatprep.mubr.msk.bf16.mxu1 %vm11830_vm3, %v15299_v46 }
 0x30b   :  { %9916 = vmatprep.subr.bf16.mxu1 %v15299_v46 }
 0x311   :  { %9913 = vmatmul.mubr.msk.bf16.vlgmr.msra.gmra.mrb[96].mxu1 %vm1191_vm2, %v11023_v38 }
 0x312   :  { %9917 = vmatpush3.bf16.msra.mxu1 %v1414_v34  ;;  %9918 = vmatprep.mubr.msk.bf16.mxu1 %vm11830_vm3, %v15299_v46 }
 0x313   :  { %9922 = vmatprep.subr.bf16.mxu1 %v15299_v46 }
 0x319   :  { %9919 = vmatmul.mubr.msk.bf16.vlgmr.msra.gmra.mrb[100].mxu1 %vm1191_vm2, %v11024_v57 }
 0x31a   :  { %9923 = vmatpush3.bf16.msra.mxu1 %v1415_v37  ;;  %9924 = vmatprep.mubr.msk.bf16.mxu1 %vm11830_vm3, %v15299_v46  ;;  %v12514_v37 = vld [vmem:[%s15288_s3 + $0x10] sm:$0x1f]  }
 0x31b   :  { %9928 = vmatprep.subr.bf16.mxu1 %v15299_v46 }
 0x321   :  { %9925 = vmatmul.mubr.msk.bf16.vlgmr.msra.gmra.mrb[104].mxu1 %vm1191_vm2, %v11025_v28 }
 0x322   :  { %9929 = vmatpush3.bf16.msra.mxu1 %v1416_v49  ;;  %9930 = vmatprep.mubr.msk.bf16.mxu1 %vm11830_vm3, %v15299_v46 }
 0x329   :  { %9931 = vmatmul.mubr.msk.bf16.vlgmr.msra.gmra.mrb[108].mxu1 %vm1191_vm2, %v11026_v44 }
 0x384   :  { %v1459_v45 = vpop.f32.mrb[48].mxu1 }
 0x385   :  { %v9842_v4 = vpop.f32.mrb[49].mxu1  ;;  %v2201_v47 = vmax.f32 %v1459_v45, 0.0 }
 0x386   :  { %v1462_v19 = vpop.f32.mrb[50].mxu1 }
 0x387   :  { %v2202_v50 = vmax.f32 %v1462_v19, 0.0  ;;  %v9843_v32 = vpop.f32.mrb[51].mxu1 }
 0x389   :  { %v12480_v55 = vpack.c.bf16 %v2202_v50, %v2201_v47 }
 0x38c   :  { %v1508_v56 = vpop.f32.mrb[52].mxu1 }
 0x38d   :  { %v9848_v13 = vpop.f32.mrb[53].mxu1  ;;  %v2203_v5 = vmax.f32 %v1508_v56, 0.0 }
 0x38e   :  { %v1511_v53 = vpop.f32.mrb[54].mxu1 }
 0x38f   :  { %v2204_v11 = vmax.f32 %v1511_v53, 0.0  ;;  %v9849_v27 = vpop.f32.mrb[55].mxu1 }
 0x391   :  { %v12482_v9 = vpack.c.bf16 %v2204_v11, %v2203_v5 }
 0x393   :  { %9936 = vmatprep.mubr.msk.bf16.mxu0 %vm2254_vm5, %v12482_v9 }
 0x394   :  { %v1557_v17 = vpop.f32.mrb[56].mxu1  ;;  %9937 = vmatmul.mubr.msk.bf16.vlgmr.msra.gmra.mrb[32].mxu0 %vm2254_vm5, %v12480_v55 }
 0x395   :  { %v9854_v2 = vpop.f32.mrb[57].mxu1  ;;  %9940 = vmatprep.mubr.msk.bf16.mxu0 %vm2254_vm5, %v12482_v9  ;;  %9969 = vmatpush3.bf16.msra.mxu0 %v2517_v14  ;;  %v2205_v10 = vmax.f32 %v1557_v17, 0.0 }
 0x396   :  { %v1560_v52 = vpop.f32.mrb[58].mxu1  ;;  %10994 = vmatprep.subr.msk.bf16.mxu0 %vm2297_vm4, %v12514_v37 }
 0x397   :  { %v2206_v18 = vmax.f32 %v1560_v52, 0.0  ;;  %v9855_v3 = vpop.f32.mrb[59].mxu1 }
 0x399   :  { %v12491_v12 = vpack.c.bf16 %v2206_v18, %v2205_v10 }
 0x39c   :  { %v1606_v16 = vpop.f32.mrb[60].mxu1  ;;  %9941 = vmatmul.mubr.msk.bf16.gmra.mrb[36].mxu0 %vm2254_vm5, %v12491_v12 }
 0x39d   :  { %v9860_v20 = vpop.f32.mrb[61].mxu1  ;;  %v2207_v23 = vmax.f32 %v1606_v16, 0.0 }
 0x39e   :  { %v1609_v48 = vpop.f32.mrb[62].mxu1 }
 0x39f   :  { %v2208_v8 = vmax.f32 %v1609_v48, 0.0  ;;  %v9861_v29 = vpop.f32.mrb[63].mxu1 }
 0x3a1   :  { %v12495_v22 = vpack.c.bf16 %v2208_v8, %v2207_v23 }
 0x3a3   :  { %9944 = vmatprep.mubr.msk.bf16.mxu0 %vm2254_vm5, %v12495_v22 }
 0x3a4   :  { %v1655_v7 = vpop.f32.mrb[64].mxu1 }
 0x3a5   :  { %v9866_v43 = vpop.f32.mrb[65].mxu1  ;;  %v2209_v24 = vmax.f32 %v1655_v7, 0.0 }
 0x3a6   :  { %v1658_v62 = vpop.f32.mrb[66].mxu1 }
 0x3a7   :  { %v2210_v51 = vmax.f32 %v1658_v62, 0.0  ;;  %v9867_v63 = vpop.f32.mrb[67].mxu1 }
 0x3a9   :  { %v12499_v21 = vpack.c.bf16 %v2210_v51, %v2209_v24 }
 0x3ab   :  { %9945 = vmatmul.mubr.msk.bf16.gmra.mrb[40].mxu0 %vm2254_vm5, %v12499_v21 }
 0x3ac   :  { %v1704_v39 = vpop.f32.mrb[68].mxu1 }
 0x3ad   :  { %v9872_v30 = vpop.f32.mrb[69].mxu1  ;;  %v2211_v26 = vmax.f32 %v1704_v39, 0.0 }
 0x3ae   :  { %v1707_v33 = vpop.f32.mrb[70].mxu1 }
 0x3af   :  { %v2212_v61 = vmax.f32 %v1707_v33, 0.0  ;;  %v9873_v0 = vpop.f32.mrb[71].mxu1 }
 0x3b1   :  { %v12503_v34 = vpack.c.bf16 %v2212_v61, %v2211_v26 }
 0x3b3   :  { %9948 = vmatprep.mubr.msk.bf16.mxu0 %vm2254_vm5, %v12503_v34 }
 0x3b4   :  { %v1753_v6 = vpop.f32.mrb[72].mxu1 }
 0x3b5   :  { %v9878_v1 = vpop.f32.mrb[73].mxu1  ;;  %v2213_v42 = vmax.f32 %v1753_v6, 0.0 }
 0x3b6   :  { %v1756_v31 = vpop.f32.mrb[74].mxu1 }
 0x3b7   :  { %v2214_v40 = vmax.f32 %v1756_v31, 0.0  ;;  %v9879_v58 = vpop.f32.mrb[75].mxu1 }
 0x3b9   :  { %v12507_v49 = vpack.c.bf16 %v2214_v40, %v2213_v42 }
 0x3bb   :  { %9949 = vmatmul.mubr.msk.bf16.gmra.mrb[44].mxu0 %vm2254_vm5, %v12507_v49 }
 0x3bc   :  { %v1802_v36 = vpop.f32.mrb[76].mxu1 }
 0x3bd   :  { %v9884_v25 = vpop.f32.mrb[77].mxu1  ;;  %v2215_v35 = vmax.f32 %v1802_v36, 0.0 }
 0x3be   :  { %v1805_v59 = vpop.f32.mrb[78].mxu1 }
 0x3bf   :  { %v2216_v41 = vmax.f32 %v1805_v59, 0.0  ;;  %v9885_v38 = vpop.f32.mrb[79].mxu1 }
 0x3c1   :  { %v12518_v60 = vpack.c.bf16 %v2216_v41, %v2215_v35 }
 0x3c4   :  { %v1851_v15 = vpop.f32.mrb[80].mxu1 }
 0x3c5   :  { %v9890_v57 = vpop.f32.mrb[81].mxu1  ;;  %v2217_v44 = vmax.f32 %v1851_v15, 0.0 }
 0x3c6   :  { %v1854_v28 = vpop.f32.mrb[82].mxu1 }
 0x3c7   :  { %v2218_v54 = vmax.f32 %v1854_v28, 0.0  ;;  %v9891_v45 = vpop.f32.mrb[83].mxu1  ;;  %v2721_v28 = vsel %vm2297_vm4, %v12514_v37, 0 }
 0x3c9   :  { %v12520_v4 = vpack.c.bf16 %v2218_v54, %v2217_v44 }
 0x3cc   :  { %v1900_v19 = vpop.f32.mrb[84].mxu1 }
 0x3cd   :  { %v9896_v47 = vpop.f32.mrb[85].mxu1  ;;  %v2219_v32 = vmax.f32 %v1900_v19, 0.0 }
 0x3ce   :  { %v1903_v50 = vpop.f32.mrb[86].mxu1 }
 0x3cf   :  { %v2220_v56 = vmax.f32 %v1903_v50, 0.0  ;;  %v9897_v13 = vpop.f32.mrb[87].mxu1 }
 0x3d1   :  { %v12522_v53 = vpack.c.bf16 %v2220_v56, %v2219_v32 }
 0x3d3   :  { %9952 = vmatprep.mubr.msk.bf16.mxu0 %vm2254_vm5, %v12522_v53 }
 0x3d4   :  { %v1949_v5 = vpop.f32.mrb[88].mxu1  ;;  %9953 = vmatmul.mubr.msk.bf16.gmra.mrb[48].mxu0 %vm2254_vm5, %v12520_v4 }
 0x3d5   :  { %v9902_v11 = vpop.f32.mrb[89].mxu1  ;;  %9956 = vmatprep.mubr.msk.bf16.mxu0 %vm2254_vm5, %v12522_v53  ;;  %v2221_v14 = vmax.f32 %v1949_v5, 0.0 }
 0x3d6   :  { %v1952_v27 = vpop.f32.mrb[90].mxu1 }
 0x3d7   :  { %v2222_v17 = vmax.f32 %v1952_v27, 0.0  ;;  %v9903_v2 = vpop.f32.mrb[91].mxu1 }
 0x3d9   :  { %v12530_v52 = vpack.c.bf16 %v2222_v17, %v2221_v14 }
 0x3dc   :  { %v1998_v10 = vpop.f32.mrb[92].mxu1  ;;  %9957 = vmatmul.mubr.msk.bf16.gmra.mrb[52].mxu0 %vm2254_vm5, %v12530_v52 }
 0x3dd   :  { %v9908_v18 = vpop.f32.mrb[93].mxu1  ;;  %v2223_v16 = vmax.f32 %v1998_v10, 0.0 }
 0x3de   :  { %v2001_v3 = vpop.f32.mrb[94].mxu1 }
 0x3df   :  { %v2224_v20 = vmax.f32 %v2001_v3, 0.0  ;;  %v9909_v48 = vpop.f32.mrb[95].mxu1 }
 0x3e1   :  { %v2243_v23 = vpack.c.bf16 %v2224_v20, %v2223_v16 }
 0x3e3   :  { %9960 = vmatprep.mubr.msk.bf16.mxu0 %vm2254_vm5, %v2243_v23 }
 0x3e4   :  { %v2047_v8 = vpop.f32.mrb[96].mxu1 }
 0x3e5   :  { %v9914_v29 = vpop.f32.mrb[97].mxu1  ;;  %v2225_v43 = vmax.f32 %v2047_v8, 0.0 }
 0x3e6   :  { %v2050_v7 = vpop.f32.mrb[98].mxu1 }
 0x3e7   :  { %v2226_v62 = vmax.f32 %v2050_v7, 0.0  ;;  %v9915_v24 = vpop.f32.mrb[99].mxu1 }
 0x3e9   :  { %v2244_v51 = vpack.c.bf16 %v2226_v62, %v2225_v43 }
 0x3eb   :  { %9961 = vmatmul.mubr.msk.bf16.gmra.mrb[56].mxu0 %vm2254_vm5, %v2244_v51 }
 0x3ec   :  { %v2096_v63 = vpop.f32.mrb[100].mxu1 }
 0x3ed   :  { %v9920_v39 = vpop.f32.mrb[101].mxu1  ;;  %v2227_v33 = vmax.f32 %v2096_v63, 0.0 }
 0x3ee   :  { %v2099_v30 = vpop.f32.mrb[102].mxu1 }
 0x3ef   :  { %v2228_v26 = vmax.f32 %v2099_v30, 0.0  ;;  %v9921_v61 = vpop.f32.mrb[103].mxu1 }
 0x3f1   :  { %v2245_v0 = vpack.c.bf16 %v2228_v26, %v2227_v33 }
 0x3f3   :  { %9964 = vmatprep.mubr.msk.bf16.mxu0 %vm2254_vm5, %v2245_v0 }
 0x3f4   :  { %v2145_v6 = vpop.f32.mrb[104].mxu1 }
 0x3f5   :  { %v9926_v1 = vpop.f32.mrb[105].mxu1  ;;  %v2229_v42 = vmax.f32 %v2145_v6, 0.0 }
 0x3f6   :  { %v2148_v31 = vpop.f32.mrb[106].mxu1 }
 0x3f7   :  { %v2230_v40 = vmax.f32 %v2148_v31, 0.0  ;;  %v9927_v58 = vpop.f32.mrb[107].mxu1 }
 0x3f9   :  { %v2246_v36 = vpack.c.bf16 %v2230_v40, %v2229_v42 }
 0x3fb   :  { %9965 = vmatmul.mubr.msk.bf16.gmra.mrb[60].mxu0 %vm2254_vm5, %v2246_v36 }
 0x3fc   :  { %9970 = vmatprep.mubr.msk.bf16.mxu0 %vm2254_vm5, %v12480_v55  ;;  %v2194_v25 = vpop.f32.mrb[108].mxu1  ;;  %v12596_v55 = vld [vmem:[%s15285_s4 + $0x1] ss:$0 sm:$0xff] }
 0x3fd   :  { %v2231_v59 = vmax.f32 %v2194_v25, 0.0  ;;  %v9932_v35 = vpop.f32.mrb[109].mxu1 }
 0x3fe   :  { %v2197_v41 = vpop.f32.mrb[110].mxu1 }
 0x3ff   :  { %v2232_v38 = vmax.f32 %v2197_v41, 0.0  ;;  %v9933_v15 = vpop.f32.mrb[111].mxu1 }
 0x401   :  { %v2501_v57 = vpack.c.bf16 %v2232_v38, %v2231_v59 }
 0x403   :  { %9971 = vmatmul.mubr.msk.bf16.vlgmr.msra.gmra.mrb[32].mxu0 %vm2254_vm5, %v12482_v9 }
 0x404   :  { %9974 = vmatprep.mubr.msk.bf16.mxu0 %vm2254_vm5, %v12491_v12  ;;  %10003 = vmatpush3.bf16.msra.mxu0 %v2721_v28 }
 0x40b   :  { %9975 = vmatmul.mubr.msk.bf16.gmra.mrb[36].mxu0 %vm2254_vm5, %v12495_v22 }
 0x40c   :  { %9978 = vmatprep.mubr.msk.bf16.mxu0 %vm2254_vm5, %v12499_v21 }
 0x413   :  { %9979 = vmatmul.mubr.msk.bf16.gmra.mrb[40].mxu0 %vm2254_vm5, %v12503_v34 }
 0x414   :  { %9982 = vmatprep.mubr.msk.bf16.mxu0 %vm2254_vm5, %v12507_v49 }
 0x41b   :  { %9983 = vmatmul.mubr.msk.bf16.gmra.mrb[44].mxu0 %vm2254_vm5, %v12518_v60 }
 0x41c   :  { %9986 = vmatprep.mubr.msk.bf16.mxu0 %vm2254_vm5, %v12520_v4 }
 0x423   :  { %9987 = vmatmul.mubr.msk.bf16.gmra.mrb[48].mxu0 %vm2254_vm5, %v12522_v53 }
 0x424   :  { %9990 = vmatprep.mubr.msk.bf16.mxu0 %vm2254_vm5, %v12530_v52 }
 0x42b   :  { %9991 = vmatmul.mubr.msk.bf16.gmra.mrb[52].mxu0 %vm2254_vm5, %v2243_v23 }
 0x42c   :  { %9994 = vmatprep.mubr.msk.bf16.mxu0 %vm2254_vm5, %v2244_v51 }
 0x433   :  { %9995 = vmatmul.mubr.msk.bf16.gmra.mrb[56].mxu0 %vm2254_vm5, %v2245_v0 }
 0x434   :  { %9998 = vmatprep.mubr.msk.bf16.mxu0 %vm2254_vm5, %v2246_v36 }
 0x43b   :  { %9999 = vmatmul.mubr.msk.bf16.gmra.mrb[60].mxu0 %vm2254_vm5, %v2501_v57 }
 0x43c   :  { %10004 = vmatprep.mubr.msk.bf16.mxu0 %vm2254_vm5, %v12482_v9 }
 0x443   :  { %10005 = vmatmul.mubr.msk.bf16.vlgmr.msra.gmra.mrb[32].mxu0 %vm2254_vm5, %v12491_v12 }
 0x444   :  { %10008 = vmatprep.mubr.msk.bf16.mxu0 %vm2254_vm5, %v12495_v22 }
 0x44b   :  { %10009 = vmatmul.mubr.msk.bf16.gmra.mrb[36].mxu0 %vm2254_vm5, %v12499_v21 }
 0x44c   :  { %10012 = vmatprep.mubr.msk.bf16.mxu0 %vm2254_vm5, %v12503_v34 }
 0x453   :  { %10013 = vmatmul.mubr.msk.bf16.gmra.mrb[40].mxu0 %vm2254_vm5, %v12507_v49 }
 0x454   :  { %10016 = vmatprep.mubr.msk.bf16.mxu0 %vm2254_vm5, %v12518_v60 }
 0x45b   :  { %10017 = vmatmul.mubr.msk.bf16.gmra.mrb[44].mxu0 %vm2254_vm5, %v12507_v49 }
 0x45c   :  { %10020 = vmatprep.mubr.msk.bf16.mxu0 %vm2254_vm5, %v12522_v53 }
 0x463   :  { %10021 = vmatmul.mubr.msk.bf16.gmra.mrb[48].mxu0 %vm2254_vm5, %v12530_v52 }
 0x464   :  { %10024 = vmatprep.mubr.msk.bf16.mxu0 %vm2254_vm5, %v2243_v23 }
 0x46b   :  { %10025 = vmatmul.mubr.msk.bf16.gmra.mrb[52].mxu0 %vm2254_vm5, %v2244_v51 }
 0x46c   :  { %10028 = vmatprep.mubr.msk.bf16.mxu0 %vm2254_vm5, %v2245_v0 }
 0x473   :  { %10029 = vmatmul.mubr.msk.bf16.gmra.mrb[56].mxu0 %vm2254_vm5, %v2246_v36 }
 0x474   :  { %10032 = vmatprep.mubr.msk.bf16.mxu0 %vm2254_vm5, %v2501_v57 }
 0x47b   :  { %10033 = vmatmul.mubr.msk.bf16.gmra.mrb[60].mxu0 %vm2254_vm5, %v2246_v36 }
 0x516   :  { %v10006_v9 = vpop.f32.mrb[32].mxu0 }
 0x517   :  { %v12599_v12 = vadd.f32 %v10006_v9, %v12596_v55  ;;  %v2757_v22 = vpop.f32.mrb[33].mxu0 }
 0x518   :  { %v12602_v21 = vadd.f32 %v12596_v55, %v2757_v22  ;;  %v10007_v34 = vpop.f32.mrb[34].mxu0 }
 0x519   :  { %v8956_v49 = vmul.f32 -1.442695, %v12599_v12  ;;  %v12606_v37 = vadd.f32 %v10007_v34, %v12596_v55  ;;  %v2760_v60 = vpop.f32.mrb[35].mxu0 }
 0x51a   :  { %v8954_v44 = vmul.f32 -1.442695, %v12602_v21  ;;  %v12610_v54 = vadd.f32 %v12596_v55, %v2760_v60 }
 0x51b   :  { %11164 = vpow2.f32 %v8956_v49  ;;  %v8957_v45 = vmul.f32 -1.442695, %v12606_v37 }
 0x51c   :  { %11166 = vpow2.f32 %v8954_v44  ;;  %v8955_v4 = vmul.f32 -1.442695, %v12610_v54 }
 0x51d   :  { %11168 = vpow2.f32 %v8957_v45 }
 0x51e   :  { %11170 = vpow2.f32 %v8955_v4  ;;  %v10010_v19 = vpop.f32.mrb[36].mxu0 }
 0x51f   :  { %v12615_v47 = vadd.f32 %v10010_v19, %v12596_v55  ;;  %v2773_v50 = vpop.f32.mrb[37].mxu0 }
 0x520   :  { %v12618_v32 = vadd.f32 %v12596_v55, %v2773_v50  ;;  %v10011_v56 = vpop.f32.mrb[38].mxu0 }
 0x521   :  { %v8960_v13 = vmul.f32 -1.442695, %v12615_v47  ;;  %v12622_v53 = vadd.f32 %v10011_v56, %v12596_v55  ;;  %v2776_v5 = vpop.f32.mrb[39].mxu0 }
 0x522   :  { %v8958_v11 = vmul.f32 -1.442695, %v12618_v32  ;;  %v12626_v27 = vadd.f32 %v12596_v55, %v2776_v5 }
 0x523   :  { %11172 = vpow2.f32 %v8960_v13  ;;  %v8961_v14 = vmul.f32 -1.442695, %v12622_v53 }
 0x524   :  { %11174 = vpow2.f32 %v8958_v11  ;;  %v8959_v17 = vmul.f32 -1.442695, %v12626_v27 }
 0x525   :  { %v11165_v2 = vpop.eup %11164  ;;  %11176 = vpow2.f32 %v8961_v14 }
 0x526   :  { %v11167_v52 = vpop.eup %11166  ;;  %v3014_v10 = vadd.f32 1.0, %v11165_v2  ;;  %11178 = vpow2.f32 %v8959_v17  ;;  %v10014_v18 = vpop.f32.mrb[40].mxu0 }
 0x527   :  { %v11169_v3 = vpop.eup %11168  ;;  %v3012_v16 = vadd.f32 1.0, %v11167_v52  ;;  %v12631_v20 = vadd.f32 %v10014_v18, %v12596_v55  ;;  %v2789_v48 = vpop.f32.mrb[41].mxu0 }
 0x528   :  { %v11171_v23 = vpop.eup %11170  ;;  %11180 = vrcp.f32 %v3014_v10  ;;  %v3015_v8 = vadd.f32 1.0, %v11169_v3  ;;  %v12634_v29 = vadd.f32 %v12596_v55, %v2789_v48  ;;  %v10015_v7 = vpop.f32.mrb[42].mxu0 }
 0x529   :  { %11182 = vrcp.f32 %v3012_v16  ;;  %v3013_v43 = vadd.f32 1.0, %v11171_v23  ;;  %v8964_v62 = vmul.f32 -1.442695, %v12631_v20  ;;  %v12638_v24 = vadd.f32 %v10015_v7, %v12596_v55  ;;  %v2792_v51 = vpop.f32.mrb[43].mxu0 }
 0x52a   :  { %11184 = vrcp.f32 %v3015_v8  ;;  %v8962_v63 = vmul.f32 -1.442695, %v12634_v29  ;;  %v12642_v39 = vadd.f32 %v12596_v55, %v2792_v51 }
 0x52b   :  { %11186 = vrcp.f32 %v3013_v43  ;;  %v8965_v30 = vmul.f32 -1.442695, %v12638_v24 }
 0x52c   :  { %11188 = vpow2.f32 %v8964_v62  ;;  %v8963_v33 = vmul.f32 -1.442695, %v12642_v39 }
 0x52d   :  { %v11173_v26 = vpop.eup %11172  ;;  %11190 = vpow2.f32 %v8962_v63 }
 0x52e   :  { %v11175_v61 = vpop.eup %11174  ;;  %v3018_v0 = vadd.f32 1.0, %v11173_v26  ;;  %11192 = vpow2.f32 %v8965_v30  ;;  %v10018_v6 = vpop.f32.mrb[44].mxu0 }
 0x52f   :  { %v11177_v1 = vpop.eup %11176  ;;  %v3016_v31 = vadd.f32 1.0, %v11175_v61  ;;  %11194 = vpow2.f32 %v8963_v33  ;;  %v12647_v42 = vadd.f32 %v10018_v6, %v12596_v55  ;;  %v2805_v40 = vpop.f32.mrb[45].mxu0 }
 0x530   :  { %v11179_v58 = vpop.eup %11178  ;;  %11196 = vrcp.f32 %v3018_v0  ;;  %v3019_v36 = vadd.f32 1.0, %v11177_v1  ;;  %v12650_v25 = vadd.f32 %v12596_v55, %v2805_v40  ;;  %v10019_v59 = vpop.f32.mrb[46].mxu0 }
 0x531   :  { %11198 = vrcp.f32 %v3016_v31  ;;  %v3017_v35 = vadd.f32 1.0, %v11179_v58  ;;  %v8968_v41 = vmul.f32 -1.442695, %v12647_v42  ;;  %v12654_v38 = vadd.f32 %v10019_v59, %v12596_v55  ;;  %v2808_v15 = vpop.f32.mrb[47].mxu0 }
 0x532   :  { %v11181_v57 = vpop.eup %11180  ;;  %11200 = vrcp.f32 %v3019_v36  ;;  %v8966_v28 = vmul.f32 -1.442695, %v12650_v25  ;;  %v12658_v9 = vadd.f32 %v12596_v55, %v2808_v15 }
 0x533   :  { %v11183_v22 = vpop.eup %11182  ;;  %11202 = vrcp.f32 %v3017_v35  ;;  %v8969_v34 = vmul.f32 -1.442695, %v12654_v38  ;;  %3144 = vrot.lane.b32.xlu0 %v11181_v57, %s11828_s5 }
 0x534   :  { %v11185_v49 = vpop.eup %11184  ;;  %11204 = vpow2.f32 %v8968_v41  ;;  %v8967_v60 = vmul.f32 -1.442695, %v12658_v9 }
 0x535   :  { %v11187_v44 = vpop.eup %11186  ;;  %11206 = vpow2.f32 %v8966_v28  ;;  %3146 = vrot.lane.b32.xlu1 %v11185_v49, %s11828_s5 }
 0x536   :  { %v11189_v45 = vpop.eup %11188  ;;  %11208 = vpow2.f32 %v8969_v34  ;;  %v10022_v4 = vpop.f32.mrb[48].mxu0 }
 0x537   :  { %v11191_v19 = vpop.eup %11190  ;;  %v3022_v50 = vadd.f32 1.0, %v11189_v45  ;;  %11210 = vpow2.f32 %v8967_v60  ;;  %v12665_v56 = vadd.f32 %v10022_v4, %v12596_v55  ;;  %3140 = vrot.lane.b32.xlu0 %v11183_v22, %s11828_s5  ;;  %v2821_v13 = vpop.f32.mrb[49].mxu0 }
 0x538   :  { %v11193_v5 = vpop.eup %11192  ;;  %v3020_v11 = vadd.f32 1.0, %v11191_v19  ;;  %v12669_v14 = vadd.f32 %v12596_v55, %v2821_v13  ;;  %v10023_v17 = vpop.f32.mrb[50].mxu0 }
 0x539   :  { %v11195_v2 = vpop.eup %11194  ;;  %11212 = vrcp.f32 %v3022_v50  ;;  %v3023_v52 = vadd.f32 1.0, %v11193_v5  ;;  %v8972_v10 = vmul.f32 -1.442695, %v12665_v56  ;;  %v12673_v18 = vadd.f32 %v10023_v17, %v12596_v55  ;;  %3142 = vrot.lane.b32.xlu1 %v11187_v44, %s11828_s5  ;;  %v2824_v3 = vpop.f32.mrb[51].mxu0 }
 0x53a   :  { %v11197_v16 = vpop.eup %11196  ;;  %11214 = vrcp.f32 %v3020_v11  ;;  %v3021_v48 = vadd.f32 1.0, %v11195_v2  ;;  %v8970_v23 = vmul.f32 -1.442695, %v12669_v14  ;;  %v12678_v8 = vadd.f32 %v12596_v55, %v2824_v3 }
 0x53b   :  { %v11199_v7 = vpop.eup %11198  ;;  %11216 = vrcp.f32 %v3023_v52  ;;  %v8973_v43 = vmul.f32 -1.442695, %v12673_v18  ;;  %3152 = vrot.lane.b32.xlu0 %v11197_v16, %s11828_s5 }
 0x53c   :  { %v11201_v62 = vpop.eup %11200  ;;  %11218 = vrcp.f32 %v3021_v48  ;;  %v8971_v51 = vmul.f32 -1.442695, %v12678_v8 }
 0x53d   :  { %v11203_v63 = vpop.eup %11202  ;;  %11220 = vpow2.f32 %v8972_v10  ;;  %3154 = vrot.lane.b32.xlu1 %v11201_v62, %s11828_s5 }
 0x53e   :  { %v11205_v30 = vpop.eup %11204  ;;  %11222 = vpow2.f32 %v8970_v23  ;;  %v10026_v33 = vpop.f32.mrb[52].mxu0 }
 0x53f   :  { %v11207_v26 = vpop.eup %11206  ;;  %v3026_v61 = vadd.f32 1.0, %v11205_v30  ;;  %11224 = vpow2.f32 %v8973_v43  ;;  %v12685_v0 = vadd.f32 %v10026_v33, %v12596_v55  ;;  %3148 = vrot.lane.b32.xlu0 %v11199_v7, %s11828_s5  ;;  %v2837_v6 = vpop.f32.mrb[53].mxu0 }
 0x540   :  { %v11209_v1 = vpop.eup %11208  ;;  %v3024_v31 = vadd.f32 1.0, %v11207_v26  ;;  %11226 = vpow2.f32 %v8971_v51  ;;  %v12689_v40 = vadd.f32 %v12596_v55, %v2837_v6  ;;  %v10027_v58 = vpop.f32.mrb[54].mxu0 }
 0x541   :  { %v11211_v36 = vpop.eup %11210  ;;  %11228 = vrcp.f32 %v3026_v61  ;;  %v3027_v59 = vadd.f32 1.0, %v11209_v1  ;;  %v8976_v35 = vmul.f32 -1.442695, %v12685_v0  ;;  %v12693_v41 = vadd.f32 %v10027_v58, %v12596_v55  ;;  %3150 = vrot.lane.b32.xlu1 %v11203_v63, %s11828_s5  ;;  %v2840_v15 = vpop.f32.mrb[55].mxu0 }
 0x542   :  { %11230 = vrcp.f32 %v3024_v31  ;;  %v3025_v57 = vadd.f32 1.0, %v11211_v36  ;;  %v8974_v28 = vmul.f32 -1.442695, %v12689_v40  ;;  %v12698_v22 = vadd.f32 %v12596_v55, %v2840_v15 }
 0x543   :  { %v11213_v34 = vpop.eup %11212  ;;  %11232 = vrcp.f32 %v3027_v59  ;;  %v8977_v49 = vmul.f32 -1.442695, %v12693_v41 }
 0x544   :  { %v11215_v60 = vpop.eup %11214  ;;  %11234 = vrcp.f32 %v3025_v57  ;;  %v8975_v44 = vmul.f32 -1.442695, %v12698_v22  ;;  %3160 = vrot.lane.b32.xlu0 %v11213_v34, %s11828_s5 }
 0x545   :  { %v11217_v45 = vpop.eup %11216  ;;  %11236 = vpow2.f32 %v8976_v35 }
 0x546   :  { %v11219_v4 = vpop.eup %11218  ;;  %11238 = vpow2.f32 %v8974_v28  ;;  %3162 = vrot.lane.b32.xlu1 %v11217_v45, %s11828_s5  ;;  %v10030_v19 = vpop.f32.mrb[56].mxu0 }
 0x547   :  { %v11221_v50 = vpop.eup %11220  ;;  %11240 = vpow2.f32 %v8977_v49  ;;  %v12705_v13 = vadd.f32 %v10030_v19, %v12596_v55  ;;  %v2853_v5 = vpop.f32.mrb[57].mxu0 }
 0x548   :  { %v11223_v11 = vpop.eup %11222  ;;  %v3030_v17 = vadd.f32 1.0, %v11221_v50  ;;  %11242 = vpow2.f32 %v8975_v44  ;;  %3156 = vrot.lane.b32.xlu0 %v11215_v60, %s11828_s5  ;;  %v12709_v2 = vadd.f32 %v12596_v55, %v2853_v5  ;;  %v10031_v52 = vpop.f32.mrb[58].mxu0 }
 0x549   :  { %v11225_v10 = vpop.eup %11224  ;;  %v3028_v3 = vadd.f32 1.0, %v11223_v11  ;;  %v12712_v16 = vadd.f32 %v10031_v52, %v12596_v55  ;;  %v2856_v48 = vpop.f32.mrb[59].mxu0  ;;  %v8980_v43 = vmul.f32 -1.442695, %v12705_v13 }
 0x54a   :  { %v11227_v23 = vpop.eup %11226  ;;  %11244 = vrcp.f32 %v3030_v17  ;;  %v3031_v7 = vadd.f32 1.0, %v11225_v10  ;;  %3158 = vrot.lane.b32.xlu1 %v11219_v4, %s11828_s5  ;;  %v12717_v62 = vadd.f32 %v12596_v55, %v2856_v48  ;;  %v8978_v30 = vmul.f32 -1.442695, %v12709_v2 }
 0x54b   :  { %v11229_v51 = vpop.eup %11228  ;;  %11246 = vrcp.f32 %v3028_v3  ;;  %v3029_v63 = vadd.f32 1.0, %v11227_v23  ;;  %v8981_v26 = vmul.f32 -1.442695, %v12712_v16 }
 0x54c   :  { %v11231_v33 = vpop.eup %11230  ;;  %11248 = vrcp.f32 %v3031_v7  ;;  %3168 = vrot.lane.b32.xlu0 %v11229_v51, %s11828_s5  ;;  %v8979_v6 = vmul.f32 -1.442695, %v12717_v62 }
 0x54d   :  { %v11233_v61 = vpop.eup %11232  ;;  %11250 = vrcp.f32 %v3029_v63 }
 0x54e   :  { %v11235_v1 = vpop.eup %11234  ;;  %11252 = vpow2.f32 %v8980_v43  ;;  %3170 = vrot.lane.b32.xlu1 %v11233_v61, %s11828_s5  ;;  %v10034_v31 = vpop.f32.mrb[60].mxu0 }
 0x54f   :  { %v11237_v58 = vpop.eup %11236  ;;  %11254 = vpow2.f32 %v8978_v30  ;;  %v12725_v36 = vadd.f32 %v10034_v31, %v12596_v55  ;;  %v2869_v59 = vpop.f32.mrb[61].mxu0 }
 0x550   :  { %v11239_v35 = vpop.eup %11238  ;;  %v3034_v15 = vadd.f32 1.0, %v11237_v58  ;;  %11256 = vpow2.f32 %v8981_v26  ;;  %3164 = vrot.lane.b32.xlu0 %v11231_v33, %s11828_s5  ;;  %v12729_v57 = vadd.f32 %v12596_v55, %v2869_v59  ;;  %v10035_v28 = vpop.f32.mrb[62].mxu0 }
 0x551   :  { %v11241_v34 = vpop.eup %11240  ;;  %v3032_v49 = vadd.f32 1.0, %v11239_v35  ;;  %11258 = vpow2.f32 %v8979_v6  ;;  %v12732_v60 = vadd.f32 %v10035_v28, %v12596_v55  ;;  %v2872_v44 = vpop.f32.mrb[63].mxu0  ;;  %v8984_v19 = vmul.f32 -1.442695, %v12725_v36 }
 0x552   :  { %v11243_v45 = vpop.eup %11242  ;;  %11260 = vrcp.f32 %v3034_v15  ;;  %v3035_v4 = vadd.f32 1.0, %v11241_v34  ;;  %3166 = vrot.lane.b32.xlu1 %v11235_v1, %s11828_s5  ;;  %v12737_v50 = vadd.f32 %v12596_v55, %v2872_v44  ;;  %v8982_v11 = vmul.f32 -1.442695, %v12729_v57 }
 0x553   :  { %11262 = vrcp.f32 %v3032_v49  ;;  %v3033_v5 = vadd.f32 1.0, %v11243_v45  ;;  %v8985_v52 = vmul.f32 -1.442695, %v12732_v60 }
 0x554   :  { %v11245_v17 = vpop.eup %11244  ;;  %11264 = vrcp.f32 %v3035_v4  ;;  %v8983_v3 = vmul.f32 -1.442695, %v12737_v50 }
 0x555   :  { %v11247_v10 = vpop.eup %11246  ;;  %11266 = vrcp.f32 %v3033_v5  ;;  %3176 = vrot.lane.b32.xlu0 %v11245_v17, %s11828_s5 }
 0x556   :  { %v11249_v48 = vpop.eup %11248  ;;  %11268 = vpow2.f32 %v8984_v19 }
 0x557   :  { %v11251_v23 = vpop.eup %11250  ;;  %11270 = vpow2.f32 %v8982_v11  ;;  %3178 = vrot.lane.b32.xlu1 %v11249_v48, %s11828_s5 }
 0x558   :  { %v11253_v55 = vpop.eup %11252  ;;  %11272 = vpow2.f32 %v8985_v52 }
 0x559   :  { %v11255_v7 = vpop.eup %11254  ;;  %v3038_v43 = vadd.f32 1.0, %v11253_v55  ;;  %11274 = vpow2.f32 %v8983_v3  ;;  %3172 = vrot.lane.b32.xlu0 %v11247_v10, %s11828_s5 }
 0x55a   :  { %v11257_v51 = vpop.eup %11256  ;;  %v3036_v30 = vadd.f32 1.0, %v11255_v7 }
 0x55b   :  { %v11259_v63 = vpop.eup %11258  ;;  %11276 = vrcp.f32 %v3038_v43  ;;  %v3039_v33 = vadd.f32 1.0, %v11257_v51  ;;  %3174 = vrot.lane.b32.xlu1 %v11251_v23, %s11828_s5 }
 0x55c   :  { %v11261_v26 = vpop.eup %11260  ;;  %v3037_v6 = vadd.f32 1.0, %v11259_v63 }
 0x55d   :  { %v11263_v61 = vpop.eup %11262  ;;  %11278 = vrcp.f32 %v3039_v33  ;;  %3184 = vrot.lane.b32.xlu0 %v11261_v26, %s11828_s5 }
 0x55e   :  { %v11265_v1 = vpop.eup %11264  ;;  %11280 = vrcp.f32 %v3036_v30 }
 0x55f   :  { %v11267_v31 = vpop.eup %11266  ;;  %3186 = vrot.lane.b32.xlu1 %v11265_v1, %s11828_s5  ;;  %11282 = vrcp.f32 %v3037_v6 }
 0x560   :  { %v11269_v58 = vpop.eup %11268 }
 0x561   :  { %v11271_v59 = vpop.eup %11270  ;;  %v3042_v35 = vadd.f32 1.0, %v11269_v58  ;;  %3180 = vrot.lane.b32.xlu0 %v11263_v61, %s11828_s5 }
 0x562   :  { %v11273_v15 = vpop.eup %11272  ;;  %v3040_v34 = vadd.f32 1.0, %v11271_v59 }
 0x563   :  { %v11275_v28 = vpop.eup %11274  ;;  %11284 = vrcp.f32 %v3042_v35  ;;  %v3043_v49 = vadd.f32 1.0, %v11273_v15  ;;  %3182 = vrot.lane.b32.xlu1 %v11267_v31, %s11828_s5 }
 0x564   :  { %v3041_v45 = vadd.f32 1.0, %v11275_v28 }
 0x565   :  { %v11277_v44 = vpop.eup %11276  ;;  %11286 = vrcp.f32 %v3043_v49 }
 0x566   :  { %3192 = vrot.lane.b32.xlu0 %v11277_v44, %s11828_s5  ;;  %11288 = vrcp.f32 %v3040_v34 }
 0x567   :  { %v11279_v4 = vpop.eup %11278  ;;  %11290 = vrcp.f32 %v3041_v45 }
 0x568   :  { %3194 = vrot.lane.b32.xlu1 %v11279_v4, %s11828_s5  ;;  %v11281_v19 = vpop.eup %11280 }
 0x569   :  { %v11283_v5 = vpop.eup %11282 }
 0x56a   :  { %3188 = vrot.lane.b32.xlu0 %v11281_v19, %s11828_s5 }
 0x56c   :  { %3190 = vrot.lane.b32.xlu1 %v11283_v5, %s11828_s5 }
 0x56d   :  { %v11285_v11 = vpop.eup %11284 }
 0x56e   :  { %3200 = vrot.lane.b32.xlu0 %v11285_v11, %s11828_s5 }
 0x56f   :  { %v11287_v17 = vpop.eup %11286 }
 0x570   :  { %3202 = vrot.lane.b32.xlu1 %v11287_v17, %s11828_s5  ;;  %v11289_v52 = vpop.eup %11288 }
 0x571   :  { %v11291_v10 = vpop.eup %11290 }
 0x572   :  { %3196 = vrot.lane.b32.xlu0 %v11289_v52, %s11828_s5 }
 0x574   :  { %3198 = vrot.lane.b32.xlu1 %v11291_v10, %s11828_s5 }
 0x5a5   :  { %v3145_v3 = vpop.permute.xlu0 %3144 }
 0x5a6   :  { %v12759_v48 = vadd.f32 %v12599_v12, %v3145_v3 }
 0x5a7   :  { %v3147_v23 = vpop.permute.xlu1 %3146 }
 0x5a8   :  { %v15331_v55 = vmax.f32 %v12759_v48, 0.0  ;;  %v12763_v43 = vadd.f32 %v12606_v37, %v3147_v23 }
 0x5a9   :  { %v3141_v7 = vpop.permute.xlu0 %3140 }
 0x5aa   :  { %v12766_v51 = vadd.f32 %v12602_v21, %v3141_v7  ;;  %v3306_v63 = vsel %vm1191_vm2, %v15331_v55, 0.0  ;;  %v15328_v61 = vmax.f32 %v12763_v43, 0.0 }
 0x5ab   :  { %v3143_v30 = vpop.permute.xlu1 %3142  ;;  %3307 = vadd.xlane.f32.xlu0 %v3306_v63 }
 0x5ac   :  { %v15332_v33 = vmax.f32 %v12766_v51, 0.0  ;;  %v12773_v12 = vadd.f32 %v12610_v54, %v3143_v30  ;;  %v3309_v15 = vsel %vm1191_vm2, %v15328_v61, 0.0 }
 0x5ad   :  { %v3153_v26 = vpop.permute.xlu0 %3152 }
 0x5ae   :  { %v15329_v37 = vmax.f32 %v12773_v12, 0.0  ;;  %v12778_v6 = vadd.f32 %v12615_v47, %v3153_v26  ;;  %v3300_v21 = vsel %vm1191_vm2, %v15332_v33, 0.0 }
 0x5af   :  { %v3155_v1 = vpop.permute.xlu1 %3154  ;;  %3301 = vadd.xlane.f32.xlu0 %v3300_v21 }
 0x5b0   :  { %v15327_v31 = vmax.f32 %v12778_v6, 0.0  ;;  %v12785_v58 = vadd.f32 %v12622_v53, %v3155_v1  ;;  %v3303_v54 = vsel %vm1191_vm2, %v15329_v37, 0.0 }
 0x5b1   :  { %v3149_v59 = vpop.permute.xlu0 %3148  ;;  %3304 = vadd.xlane.f32.xlu1 %v3303_v54 }
 0x5b2   :  { %v15324_v47 = vmax.f32 %v12785_v58, 0.0  ;;  %v12792_v35 = vadd.f32 %v12618_v32, %v3149_v59  ;;  %v3318_v49 = vsel %vm1191_vm2, %v15327_v31, 0.0 }
 0x5b3   :  { %v3151_v28 = vpop.permute.xlu1 %3150  ;;  %3310 = vadd.xlane.f32.xlu0 %v3309_v15 }
 0x5b4   :  { %v15330_v53 = vmax.f32 %v12792_v35, 0.0  ;;  %v12799_v34 = vadd.f32 %v12626_v27, %v3151_v28  ;;  %v3321_v45 = vsel %vm1191_vm2, %v15324_v47, 0.0 }
 0x5b5   :  { %3319 = vadd.xlane.f32.xlu1 %v3318_v49 }
 0x5b6   :  { %v15326_v44 = vmax.f32 %v12799_v34, 0.0  ;;  %v3161_v32 = vpop.permute.xlu0 %3160  ;;  %v3312_v27 = vsel %vm1191_vm2, %v15330_v53, 0.0 }
 0x5b7   :  { %v12809_v4 = vadd.f32 %v12631_v20, %v3161_v32  ;;  %3322 = vadd.xlane.f32.xlu0 %v3321_v45 }
 0x5b8   :  { %v3163_v19 = vpop.permute.xlu1 %3162  ;;  %v3315_v52 = vsel %vm1191_vm2, %v15326_v44, 0.0 }
 0x5b9   :  { %v15323_v5 = vmax.f32 %v12809_v4, 0.0  ;;  %v12816_v11 = vadd.f32 %v12638_v24, %v3163_v19  ;;  %3313 = vadd.xlane.f32.xlu1 %v3312_v27 }
 0x5ba   :  { %v3157_v17 = vpop.permute.xlu0 %3156 }
 0x5bb   :  { %v15320_v20 = vmax.f32 %v12816_v11, 0.0  ;;  %v12823_v10 = vadd.f32 %v12634_v29, %v3157_v17  ;;  %3316 = vadd.xlane.f32.xlu0 %v3315_v52  ;;  %v3330_v23 = vsel %vm1191_vm2, %v15323_v5, 0.0 }
 0x5bc   :  { %v3159_v3 = vpop.permute.xlu1 %3158 }
 0x5bd   :  { %v15325_v24 = vmax.f32 %v12823_v10, 0.0  ;;  %v12830_v7 = vadd.f32 %v12642_v39, %v3159_v3  ;;  %3331 = vadd.xlane.f32.xlu1 %v3330_v23  ;;  %v3333_v30 = vsel %vm1191_vm2, %v15320_v20, 0.0 }
 0x5be   :  { %v3169_v63 = vpop.permute.xlu0 %3168 }
 0x5bf   :  { %v15322_v29 = vmax.f32 %v12830_v7, 0.0  ;;  %v12837_v26 = vadd.f32 %v12647_v42, %v3169_v63  ;;  %3334 = vadd.xlane.f32.xlu0 %v3333_v30  ;;  %v3324_v1 = vsel %vm1191_vm2, %v15325_v24, 0.0 }
 0x5c0   :  { %v3171_v21 = vpop.permute.xlu1 %3170 }
 0x5c1   :  { %v15318_v39 = vmax.f32 %v12837_v26, 0.0  ;;  %v12844_v54 = vadd.f32 %v12654_v38, %v3171_v21  ;;  %3325 = vadd.xlane.f32.xlu1 %v3324_v1  ;;  %v3327_v15 = vsel %vm1191_vm2, %v15322_v29, 0.0 }
 0x5c2   :  { %v3165_v59 = vpop.permute.xlu0 %3164 }
 0x5c3   :  { %v15317_v42 = vmax.f32 %v12844_v54, 0.0  ;;  %v12851_v28 = vadd.f32 %v12650_v25, %v3165_v59  ;;  %3328 = vadd.xlane.f32.xlu0 %v3327_v15  ;;  %v3342_v32 = vsel %vm1191_vm2, %v15318_v39, 0.0 }
 0x5c4   :  { %v3167_v49 = vpop.permute.xlu1 %3166 }
 0x5c5   :  { %v15321_v38 = vmax.f32 %v12851_v28, 0.0  ;;  %v12858_v45 = vadd.f32 %v12658_v9, %v3167_v49  ;;  %3343 = vadd.xlane.f32.xlu1 %v3342_v32  ;;  %v3345_v19 = vsel %vm1191_vm2, %v15317_v42, 0.0 }
 0x5c7   :  { %v15319_v27 = vmax.f32 %v12858_v45, 0.0  ;;  %v3177_v25 = vpop.permute.xlu0 %3176  ;;  %3346 = vadd.xlane.f32.xlu0 %v3345_v19  ;;  %v3336_v52 = vsel %vm1191_vm2, %v15321_v38, 0.0 }
 0x5c8   :  { %v12865_v17 = vadd.f32 %v12665_v56, %v3177_v25 }
 0x5c9   :  { %v3179_v3 = vpop.permute.xlu1 %3178  ;;  %3337 = vadd.xlane.f32.xlu1 %v3336_v52  ;;  %v3339_v63 = vsel %vm1191_vm2, %v15319_v27, 0.0 }
 0x5ca   :  { %v15313_v9 = vmax.f32 %v12865_v17, 0.0  ;;  %v12872_v23 = vadd.f32 %v12673_v18, %v3179_v3 }
 0x5cb   :  { %v3173_v30 = vpop.permute.xlu0 %3172  ;;  %3340 = vadd.xlane.f32.xlu0 %v3339_v63 }
 0x5cc   :  { %v15311_v56 = vmax.f32 %v12872_v23, 0.0  ;;  %v12879_v21 = vadd.f32 %v12669_v14, %v3173_v30  ;;  %v3354_v1 = vsel %vm1191_vm2, %v15313_v9, 0.0 }
 0x5cd   :  { %v3175_v59 = vpop.permute.xlu1 %3174  ;;  %3355 = vadd.xlane.f32.xlu1 %v3354_v1 }
 0x5ce   :  { %v15315_v18 = vmax.f32 %v12879_v21, 0.0  ;;  %v12886_v15 = vadd.f32 %v12678_v8, %v3175_v59  ;;  %v3357_v49 = vsel %vm1191_vm2, %v15311_v56, 0.0 }
 0x5cf   :  { %v3185_v32 = vpop.permute.xlu0 %3184  ;;  %3358 = vadd.xlane.f32.xlu0 %v3357_v49 }
 0x5d0   :  { %v15314_v14 = vmax.f32 %v12886_v15, 0.0  ;;  %v12893_v19 = vadd.f32 %v12685_v0, %v3185_v32  ;;  %v3348_v25 = vsel %vm1191_vm2, %v15315_v18, 0.0 }
 0x5d1   :  { %v3187_v52 = vpop.permute.xlu1 %3186  ;;  %3349 = vadd.xlane.f32.xlu1 %v3348_v25 }
 0x5d2   :  { %v15302_v8 = vmax.f32 %v12893_v19, 0.0  ;;  %v12900_v3 = vadd.f32 %v12693_v41, %v3187_v52  ;;  %v3351_v63 = vsel %vm1191_vm2, %v15314_v14, 0.0 }
 0x5d3   :  { %v3181_v30 = vpop.permute.xlu0 %3180  ;;  %3352 = vadd.xlane.f32.xlu0 %v3351_v63 }
 0x5d4   :  { %v15301_v0 = vmax.f32 %v12900_v3, 0.0  ;;  %v12907_v1 = vadd.f32 %v12689_v40, %v3181_v30  ;;  %v3366_v59 = vsel %vm1191_vm2, %v15302_v8, 0.0 }
 0x5d5   :  { %v3183_v49 = vpop.permute.xlu1 %3182  ;;  %3367 = vadd.xlane.f32.xlu1 %v3366_v59 }
 0x5d6   :  { %v15310_v41 = vmax.f32 %v12907_v1, 0.0  ;;  %v12914_v32 = vadd.f32 %v12698_v22, %v3183_v49  ;;  %v3369_v25 = vsel %vm1191_vm2, %v15301_v0, 0.0 }
 0x5d7   :  { %3370 = vadd.xlane.f32.xlu0 %v3369_v25 }
 0x5d8   :  { %v15303_v52 = vmax.f32 %v12914_v32, 0.0  ;;  %v3193_v40 = vpop.permute.xlu0 %3192  ;;  %v3360_v63 = vsel %vm1191_vm2, %v15310_v41, 0.0 }
 0x5d9   :  { %v12924_v30 = vadd.f32 %v12705_v13, %v3193_v40  ;;  %3361 = vadd.xlane.f32.xlu1 %v3360_v63  ;;  %v11831_v40 = vmov 0  }
 0x5da   :  { %v3195_v59 = vpop.permute.xlu1 %3194  ;;  %v3363_v22 = vsel %vm1191_vm2, %v15303_v52, 0.0  ;;  %11008 = vset.pattern.permute.xlu1 %v11831_v40  ;;  %11009 = vset.pattern.permute.xlu0 %v11831_v40 }
 0x5db   :  { %v15305_v49 = vmax.f32 %v12924_v30, 0.0  ;;  %v12931_v25 = vadd.f32 %v12712_v16, %v3195_v59  ;;  %3364 = vadd.xlane.f32.xlu0 %v3363_v22 }
 0x5dc   :  { %v3189_v46 = vpop.permute.xlu0 %3188 }
 0x5dd   :  { %v15304_v0 = vmax.f32 %v12931_v25, 0.0  ;;  %v12935_v8 = vadd.f32 %v12709_v2, %v3189_v46  ;;  %v3378_v13 = vsel %vm1191_vm2, %v15305_v49, 0.0 }
 0x5de   :  { %v3191_v63 = vpop.permute.xlu1 %3190  ;;  %3379 = vadd.xlane.f32.xlu1 %v3378_v13 }
 0x5df   :  { %v15306_v52 = vmax.f32 %v12935_v8, 0.0  ;;  %v12942_v16 = vadd.f32 %v12717_v62, %v3191_v63  ;;  %v3381_v59 = vsel %vm1191_vm2, %v15304_v0, 0.0 }
 0x5e0   :  { %v3201_v46 = vpop.permute.xlu0 %3200  ;;  %3382 = vadd.xlane.f32.xlu0 %v3381_v59 }
 0x5e1   :  { %v15307_v2 = vmax.f32 %v12942_v16, 0.0  ;;  %v12949_v22 = vadd.f32 %v12725_v36, %v3201_v46  ;;  %v3372_v13 = vsel %vm1191_vm2, %v15306_v52, 0.0 }
 0x5e2   :  { %v3203_v40 = vpop.permute.xlu1 %3202  ;;  %3373 = vadd.xlane.f32.xlu1 %v3372_v13 }
 0x5e3   :  { %v15308_v62 = vmax.f32 %v12949_v22, 0.0  ;;  %v3375_v63 = vsel %vm1191_vm2, %v15307_v2, 0.0  ;;  %v12965_v49 = vadd.f32 %v12732_v60, %v3203_v40 }
 0x5e4   :  { %v3197_v0 = vpop.permute.xlu0 %3196  ;;  %3376 = vadd.xlane.f32.xlu0 %v3375_v63 }
 0x5e5   :  { %v12959_v59 = vadd.f32 %v12729_v57, %v3197_v0  ;;  %v3390_v36 = vsel %vm1191_vm2, %v15308_v62, 0.0  ;;  %v15316_v0 = vmax.f32 %v12965_v49, 0.0 }
 0x5e6   :  { %v3199_v46 = vpop.permute.xlu1 %3198  ;;  %3391 = vadd.xlane.f32.xlu1 %v3390_v36 }
 0x5e7   :  { %v15309_v13 = vmax.f32 %v12959_v59, 0.0  ;;  %v12969_v52 = vadd.f32 %v12737_v50, %v3199_v46  ;;  %v3393_v60 = vsel %vm1191_vm2, %v15316_v0, 0.0  ;;  %v3657_v50 = vld [vmem:[%s15289_s6] sm:$0xff] }
 0x5e9   :  { %v15312_v2 = vmax.f32 %v12969_v52, 0.0  ;;  %v3384_v57 = vsel %vm1191_vm2, %v15309_v13, 0.0 }
 0x5ea   :  { %3385 = vadd.xlane.f32.xlu1 %v3384_v57 }
 0x5eb   :  { %v3387_v63 = vsel %vm1191_vm2, %v15312_v2, 0.0 }
 0x5ec   :  { %3388 = vadd.xlane.f32.xlu0 %v3387_v63 }
 0x5f0   :  { %3394 = vadd.xlane.f32.xlu0 %v3393_v60 }
 0x5fb   :  { %3661 = vperm.xlu1 %11008, %v3657_v50  }
 0x638   :  { %v3308_v40 = vpop.xlane.xlu0 %3307 }
 0x63c   :  { %v3302_v36 = vpop.xlane.xlu0 %3301 }
 0x63d   :  { %v3396_v18 = vadd.f32 %v3308_v40, %v3302_v36 }
 0x63e   :  { %v3305_v46 = vpop.xlane.xlu1 %3304 }
 0x640   :  { %v3311_v57 = vpop.xlane.xlu0 %3310 }
 0x641   :  { %v3397_v39 = vadd.f32 %v3311_v57, %v3305_v46 }
 0x642   :  { %v3320_v62 = vpop.xlane.xlu1 %3319 }
 0x644   :  { %v3323_v13 = vpop.xlane.xlu0 %3322 }
 0x646   :  { %v3314_v41 = vpop.xlane.xlu1 %3313 }
 0x647   :  { %v3398_v60 = vadd.f32 %v3396_v18, %v3314_v41 }
 0x648   :  { %v3317_v56 = vpop.xlane.xlu0 %3316 }
 0x649   :  { %v3399_v20 = vadd.f32 %v3397_v39, %v3317_v56  ;;  %v3400_v50 = vadd.f32 %v3398_v60, %v3320_v62 }
 0x64a   :  { %v3332_v2 = vpop.xlane.xlu1 %3331 }
 0x64b   :  { %v3401_v47 = vadd.f32 %v3399_v20, %v3323_v13 }
 0x64c   :  { %v3335_v63 = vpop.xlane.xlu0 %3334 }
 0x64e   :  { %v3326_v9 = vpop.xlane.xlu1 %3325 }
 0x64f   :  { %v3402_v29 = vadd.f32 %v3400_v50, %v3326_v9 }
 0x650   :  { %v3329_v14 = vpop.xlane.xlu0 %3328 }
 0x651   :  { %v3403_v44 = vadd.f32 %v3401_v47, %v3329_v14  ;;  %v3404_v31 = vadd.f32 %v3402_v29, %v3332_v2 }
 0x652   :  { %v3344_v0 = vpop.xlane.xlu1 %3343 }
 0x653   :  { %v3405_v55 = vadd.f32 %v3403_v44, %v3335_v63 }
 0x654   :  { %v3347_v42 = vpop.xlane.xlu0 %3346 }
 0x656   :  { %v3338_v27 = vpop.xlane.xlu1 %3337 }
 0x657   :  { %v3406_v37 = vadd.f32 %v3404_v31, %v3338_v27 }
 0x658   :  { %v3341_v38 = vpop.xlane.xlu0 %3340 }
 0x659   :  { %v3407_v40 = vadd.f32 %v3405_v55, %v3341_v38  ;;  %v3408_v36 = vadd.f32 %v3406_v37, %v3344_v0 }
 0x65a   :  { %v3356_v5 = vpop.xlane.xlu1 %3355 }
 0x65b   :  { %v3409_v57 = vadd.f32 %v3407_v40, %v3347_v42 }
 0x65c   :  { %v3359_v24 = vpop.xlane.xlu0 %3358 }
 0x65e   :  { %v3350_v61 = vpop.xlane.xlu1 %3349 }
 0x65f   :  { %v3410_v41 = vadd.f32 %v3408_v36, %v3350_v61  ;;  %v15380_v36 = vmax.f32 %v12759_v48, 0.0 }
 0x660   :  { %v3353_v53 = vpop.xlane.xlu0 %3352 }
 0x661   :  { %v3411_v56 = vadd.f32 %v3409_v57, %v3353_v53  ;;  %v3412_v62 = vadd.f32 %v3410_v41, %v3356_v5  ;;  %v15381_v57 = vmax.f32 %v12792_v35, 0.0 }
 0x662   :  { %v3368_v33 = vpop.xlane.xlu1 %3367 }
 0x663   :  { %v3413_v13 = vadd.f32 %v3411_v56, %v3359_v24  ;;  %v15379_v24 = vmax.f32 %v12766_v51, 0.0  ;;  %v15382_v51 = vmax.f32 %v12773_v12, 0.0  ;;  %v15384_v12 = vmax.f32 %v12778_v6, 0.0 }
 0x664   :  { %v3371_v18 = vpop.xlane.xlu0 %3370  ;;  %v15386_v6 = vmax.f32 %v12823_v10, 0.0  ;;  %v15388_v10 = vmax.f32 %v12809_v4, 0.0  ;;  %v15390_v4 = vmax.f32 %v12851_v28, 0.0 }
 0x666   :  { %v3362_v46 = vpop.xlane.xlu1 %3361 }
 0x667   :  { %v3414_v60 = vadd.f32 %v3412_v62, %v3362_v46 }
 0x668   :  { %v3365_v39 = vpop.xlane.xlu0 %3364 }
 0x669   :  { %v3415_v29 = vadd.f32 %v3413_v13, %v3365_v39  ;;  %v3416_v14 = vadd.f32 %v3414_v60, %v3368_v33 }
 0x66b   :  { %v3380_v9 = vpop.xlane.xlu1 %3379  ;;  %v3417_v2 = vadd.f32 %v3415_v29, %v3371_v18 }
 0x66d   :  { %v3383_v20 = vpop.xlane.xlu0 %3382 }
 0x66f   :  { %v3374_v47 = vpop.xlane.xlu1 %3373 }
 0x670   :  { %v3418_v31 = vadd.f32 %v3416_v14, %v3374_v47  ;;  %v15385_v14 = vmax.f32 %v12799_v34, 0.0  ;;  %v15387_v34 = vmax.f32 %v12785_v58, 0.0  ;;  %v15389_v58 = vmax.f32 %v12830_v7, 0.0 }
 0x671   :  { %v3377_v27 = vpop.xlane.xlu0 %3376  ;;  %v15391_v7 = vmax.f32 %v12816_v11, 0.0  ;;  %v15393_v11 = vmax.f32 %v12837_v26, 0.0  ;;  %v15395_v26 = vmax.f32 %v12879_v21, 0.0 }
 0x672   :  { %v3419_v55 = vadd.f32 %v3417_v2, %v3377_v27  ;;  %v3420_v37 = vadd.f32 %v3418_v31, %v3380_v9  ;;  %v15383_v9 = vmax.f32 %v12763_v43, 0.0 }
 0x673   :  { %v3392_v44 = vpop.xlane.xlu1 %3391 }
 0x674   :  { %v3421_v42 = vadd.f32 %v3419_v55, %v3383_v20 }
 0x677   :  { %v3386_v38 = vpop.xlane.xlu1 %3385 }
 0x678   :  { %v3422_v61 = vadd.f32 %v3420_v37, %v3386_v38 }
 0x679   :  { %v3389_v0 = vpop.xlane.xlu0 %3388 }
 0x67a   :  { %v3424_v63 = vadd.f32 %v3422_v61, %v3392_v44  ;;  %v3423_v53 = vadd.f32 %v3421_v42, %v3389_v0 }
 0x67c   :  { %v12985_v5 = vmul.f32 0.00390625, %v3424_v63 }
 0x67d   :  { %v3395_v50 = vpop.xlane.xlu0 %3394 }
 0x67e   :  { %v3425_v40 = vadd.f32 %v3423_v53, %v3395_v50  ;;  %v12990_v33 = vsub.f32 %v15379_v24, %v12985_v5  ;;  %v12995_v18 = vsub.f32 %v15380_v36, %v12985_v5  ;;  %v13004_v39 = vsub.f32 %v15381_v57, %v12985_v5 }
 0x67f   :  { %v13026_v13 = vsub.f32 %v15384_v12, %v12985_v5  ;;  %v13042_v44 = vsub.f32 %v15386_v6, %v12985_v5  ;;  %v13058_v0 = vsub.f32 %v15388_v10, %v12985_v5  ;;  %v13074_v24 = vsub.f32 %v15390_v4, %v12985_v5 }
 0x680   :  { %v12997_v41 = vmul.f32 0.00390625, %v3425_v40  ;;  %v3461_v46 = vmul.f32 %v12990_v33, %v12990_v33  ;;  %v3463_v48 = vmul.f32 %v12995_v18, %v12995_v18  ;;  %v3465_v20 = vmul.f32 %v13004_v39, %v13004_v39 }
 0x681   :  { %v3467_v27 = vmul.f32 %v13026_v13, %v13026_v13  ;;  %v3469_v61 = vmul.f32 %v13042_v44, %v13042_v44  ;;  %v3471_v40 = vmul.f32 %v13058_v0, %v13058_v0  ;;  %v3473_v28 = vmul.f32 %v13074_v24, %v13074_v24 }
 0x682   :  { %v3493_v56 = vsel %vm1191_vm2, %v3461_v46, 0.0  ;;  %v13010_v62 = vsub.f32 %v15382_v51, %v12997_v41  ;;  %v13017_v60 = vsub.f32 %v15383_v9, %v12997_v41  ;;  %v3499_v29 = vsel %vm1191_vm2, %v3463_v48, 0.0 }
 0x683   :  { %3494 = vadd.xlane.f32.xlu1 %v3493_v56  ;;  %v13035_v31 = vsub.f32 %v15385_v14, %v12997_v41  ;;  %v3505_v55 = vsel %vm1191_vm2, %v3465_v20, 0.0  ;;  %v13051_v38 = vsub.f32 %v15387_v34, %v12997_v41  ;;  %v3511_v63 = vsel %vm1191_vm2, %v3467_v27, 0.0 }
 0x684   :  { %v3462_v35 = vmul.f32 %v13010_v62, %v13010_v62  ;;  %v3464_v43 = vmul.f32 %v13017_v60, %v13017_v60  ;;  %v13067_v50 = vsub.f32 %v15389_v58, %v12997_v41  ;;  %v3517_v46 = vsel %vm1191_vm2, %v3469_v61, 0.0 }
 0x685   :  { %v3466_v37 = vmul.f32 %v13035_v31, %v13035_v31  ;;  %v3468_v53 = vmul.f32 %v13051_v38, %v13051_v38  ;;  %v13083_v56 = vsub.f32 %v15391_v7, %v12997_v41  ;;  %v3523_v51 = vsel %vm1191_vm2, %v3471_v40, 0.0 }
 0x686   :  { %v3496_v47 = vsel %vm1191_vm2, %v3462_v35, 0.0  ;;  %v3502_v2 = vsel %vm1191_vm2, %v3464_v43, 0.0  ;;  %v3470_v57 = vmul.f32 %v13067_v50, %v13067_v50  ;;  %v15392_v35 = vmax.f32 %v12858_v45, 0.0 }
 0x687   :  { %3497 = vadd.xlane.f32.xlu0 %v3496_v47  ;;  %3500 = vadd.xlane.f32.xlu1 %v3499_v29  ;;  %v3508_v42 = vsel %vm1191_vm2, %v3466_v37, 0.0  ;;  %v3514_v36 = vsel %vm1191_vm2, %v3468_v53, 0.0  ;;  %v3472_v9 = vmul.f32 %v13083_v56, %v13083_v56  ;;  %v13099_v12 = vsub.f32 %v15393_v11, %v12985_v5 }
 0x688   :  { %v3520_v48 = vsel %vm1191_vm2, %v3470_v57, 0.0  ;;  %v13094_v20 = vsub.f32 %v15392_v35, %v12997_v41  ;;  %v3529_v47 = vsel %vm1191_vm2, %v3473_v28, 0.0  ;;  %v15394_v29 = vmax.f32 %v12844_v54, 0.0 }
 0x689   :  { %v3526_v14 = vsel %vm1191_vm2, %v3472_v9, 0.0  ;;  %v3475_v27 = vmul.f32 %v13099_v12, %v13099_v12  ;;  %v13115_v6 = vsub.f32 %v15395_v26, %v12985_v5  ;;  %v15396_v54 = vmax.f32 %v12886_v15, 0.0 }
 0x68a   :  { %v13105_v43 = vsub.f32 %v15394_v29, %v12997_v41  ;;  %v3474_v45 = vmul.f32 %v13094_v20, %v13094_v20  ;;  %v15399_v40 = vmax.f32 %v12907_v1, 0.0  ;;  %v15401_v7 = vmax.f32 %v12914_v32, 0.0 }
 0x68b   :  { %3503 = vadd.xlane.f32.xlu0 %v3502_v2  ;;  %3506 = vadd.xlane.f32.xlu1 %v3505_v55  ;;  %v13120_v2 = vsub.f32 %v15396_v54, %v12997_v41  ;;  %v15397_v55 = vmax.f32 %v12865_v17, 0.0  ;;  %v3535_v61 = vsel %vm1191_vm2, %v3475_v27, 0.0  ;;  %v3477_v10 = vmul.f32 %v13115_v6, %v13115_v6 }
 0x68c   :  { %v3532_v34 = vsel %vm1191_vm2, %v3474_v45, 0.0  ;;  %v3476_v21 = vmul.f32 %v13105_v43, %v13105_v43  ;;  %v15398_v17 = vmax.f32 %v12872_v23, 0.0  ;;  %v13147_v4 = vsub.f32 %v15399_v40, %v12985_v5 }
 0x68d   :  { %v13125_v37 = vsub.f32 %v15397_v55, %v12985_v5  ;;  %v3478_v15 = vmul.f32 %v13120_v2, %v13120_v2  ;;  %v3541_v53 = vsel %vm1191_vm2, %v3477_v10, 0.0  ;;  %v15402_v1 = vmax.f32 %v12893_v19, 0.0 }
 0x68e   :  { %15400 = vst [vmem:[#allocation2_spill] sm:$0xff] %v13147_v4  ;;  %v3481_v57 = vmul.f32 %v13147_v4, %v13147_v4  ;;  %v15404_v9 = vmax.f32 %v12900_v3, 0.0  ;;  %v15406_v19 = vmax.f32 %v12935_v8, 0.0  ;;  %v15408_v3 = vmax.f32 %v12942_v16, 0.0 }
 0x68f   :  { %3509 = vadd.xlane.f32.xlu0 %v3508_v42  ;;  %3512 = vadd.xlane.f32.xlu1 %v3511_v63  ;;  %v13138_v42 = vsub.f32 %v15398_v17, %v12997_v41  ;;  %v3538_v63 = vsel %vm1191_vm2, %v3476_v21, 0.0  ;;  %v3479_v58 = vmul.f32 %v13125_v37, %v13125_v37  ;;  %v13163_v28 = vsub.f32 %v15402_v1, %v12985_v5 }
 0x690   :  { %v13169_v35 = vsub.f32 %v15404_v9, %v12997_v41  ;;  %v3553_v11 = vsel %vm1191_vm2, %v3481_v57, 0.0  ;;  %v13179_v29 = vsub.f32 %v15406_v19, %v12985_v5  ;;  %v15410_v45 = vmax.f32 %v12924_v30, 0.0  ;;  %v13257_v19 = vpop.permute.xlu1 %3661 }
 0x691   :  { %v3480_v23 = vmul.f32 %v13138_v42, %v13138_v42  ;;  %15403 = vst [vmem:[#allocation3_spill] sm:$0xff] %v13163_v28  ;;  %v15412_v30 = vmax.f32 %v12931_v25, 0.0  ;;  %v15415_v40 = vmax.f32 %v12969_v52, 0.0  ;;  %v15417_v52 = vmax.f32 %v12965_v49, 0.0  ;;  %v8986_v49 = vld [vmem:[%s15289_s6 + $0x10] sm:$0xff] }
 0x692   :  { %15405 = vst [vmem:[#allocation4_spill] sm:$0xff] %v13169_v35  ;;  %15407 = vst [vmem:[#allocation5_spill] sm:$0xff] %v13179_v29  ;;  %v13189_v27 = vsub.f32 %v15410_v45, %v12985_v5  ;;  %v3484_v8 = vmul.f32 %v13169_v35, %v13169_v35  ;;  %v3485_v55 = vmul.f32 %v13179_v29, %v13179_v29 }
 0x693   :  { %3515 = vadd.xlane.f32.xlu0 %v3514_v36  ;;  %3518 = vadd.xlane.f32.xlu1 %v3517_v46  ;;  %v3544_v36 = vsel %vm1191_vm2, %v3478_v15, 0.0  ;;  %v3547_v46 = vsel %vm1191_vm2, %v3479_v58, 0.0  ;;  %v15414_v15 = vmax.f32 %v12959_v59, 0.0  ;;  %v15416_v59 = vmax.f32 %v12949_v22, 0.0 }
 0x694   :  { %15411 = vst [vmem:[#allocation7_spill] sm:$0xff] %v13189_v27  ;;  %v3565_v21 = vsel %vm1191_vm2, %v3485_v55, 0.0  ;;  %v3487_v10 = vmul.f32 %v13189_v27, %v13189_v27 }
 0x695   :  { %v13211_v17 = vsub.f32 %v15414_v15, %v12985_v5  ;;  %v13262_v15 = vld [vmem:[%s15290_s7 + $0x8] sm:$0xff]  }
 0x697   :  { %3521 = vadd.xlane.f32.xlu0 %v3520_v48  ;;  %3524 = vadd.xlane.f32.xlu1 %v3523_v51  ;;  %v13158_v51 = vsub.f32 %v15401_v7, %v12997_v41  ;;  %v3550_v48 = vsel %vm1191_vm2, %v3480_v23, 0.0  ;;  %v3489_v58 = vmul.f32 %v13211_v17, %v13211_v17  ;;  %v13227_v23 = vsub.f32 %v15416_v59, %v12985_v5 }
 0x699   :  { %v3482_v32 = vmul.f32 %v13158_v51, %v13158_v51  ;;  %v3577_v57 = vsel %vm1191_vm2, %v3489_v58, 0.0  ;;  %v3491_v1 = vmul.f32 %v13227_v23, %v13227_v23 }
 0x69b   :  { %3527 = vadd.xlane.f32.xlu0 %v3526_v14  ;;  %3530 = vadd.xlane.f32.xlu1 %v3529_v47  ;;  %v3483_v47 = vmul.f32 %v13163_v28, %v13163_v28  ;;  %v13184_v14 = vsub.f32 %v15408_v3, %v12997_v41  ;;  %v3556_v26 = vsel %vm1191_vm2, %v3482_v32, 0.0  ;;  %v3583_v5 = vsel %vm1191_vm2, %v3491_v1, 0.0  ;;  %v3658_v32 = vld [vmem:[%s15289_s6 + $0x8] sm:$0xff] }
 0x69d   :  { %15409 = vst [vmem:[#allocation6_spill] sm:$0xff] %v13184_v14  ;;  %v3559_v54 = vsel %vm1191_vm2, %v3483_v47, 0.0  ;;  %v3486_v16 = vmul.f32 %v13184_v14, %v13184_v14  ;;  %v11030_v47 = vld [vmem:[%s15290_s7] sm:$0xff]  }
 0x69e   :  { %10036 = vmatprep.subr.bf16.mxu1 %v11030_v47 }
 0x69f   :  { %3533 = vadd.xlane.f32.xlu0 %v3532_v34  ;;  %3536 = vadd.xlane.f32.xlu1 %v3535_v61  ;;  %v13202_v34 = vsub.f32 %v15412_v30, %v12997_v41  ;;  %v3562_v61 = vsel %vm1191_vm2, %v3484_v8, 0.0 }
 0x6a0   :  { %10037 = vmatpush3.bf16.msra.mxu1 %v11030_v47 }
 0x6a1   :  { %15413 = vst [vmem:[#allocation8_spill] sm:$0xff] %v13202_v34  ;;  %v3488_v25 = vmul.f32 %v13202_v34, %v13202_v34  ;;  %10070 = vmatprep.subr.bf16.mxu1 %v13262_v15 }
 0x6a3   :  { %3539 = vadd.xlane.f32.xlu0 %v3538_v63  ;;  %3542 = vadd.xlane.f32.xlu1 %v3541_v53  ;;  %v3568_v63 = vsel %vm1191_vm2, %v3486_v16, 0.0  ;;  %v3571_v53 = vsel %vm1191_vm2, %v3487_v10, 0.0 }
 0x6a7   :  { %3545 = vadd.xlane.f32.xlu0 %v3544_v36  ;;  %3548 = vadd.xlane.f32.xlu1 %v3547_v46  ;;  %v13222_v36 = vsub.f32 %v15415_v40, %v12997_v41  ;;  %v3574_v46 = vsel %vm1191_vm2, %v3488_v25, 0.0 }
 0x6a9   :  { %v3490_v7 = vmul.f32 %v13222_v36, %v13222_v36 }
 0x6ab   :  { %3551 = vadd.xlane.f32.xlu0 %v3550_v48  ;;  %3554 = vadd.xlane.f32.xlu1 %v3553_v11  ;;  %v13238_v48 = vsub.f32 %v15417_v52, %v12997_v41  ;;  %v3580_v22 = vsel %vm1191_vm2, %v3490_v7, 0.0  ;;  %v8987_v41 = vld [vmem:[%s15289_s6 + $0x18] sm:$0xff] }
 0x6ad   :  { %v3492_v9 = vmul.f32 %v13238_v48, %v13238_v48 }
 0x6af   :  { %3557 = vadd.xlane.f32.xlu0 %v3556_v26  ;;  %3560 = vadd.xlane.f32.xlu1 %v3559_v54  ;;  %v3586_v11 = vsel %vm1191_vm2, %v3492_v9, 0.0 }
 0x6b3   :  { %3563 = vadd.xlane.f32.xlu0 %v3562_v61  ;;  %3566 = vadd.xlane.f32.xlu1 %v3565_v21 }
 0x6b7   :  { %3569 = vadd.xlane.f32.xlu0 %v3568_v63  ;;  %3572 = vadd.xlane.f32.xlu1 %v3571_v53 }
 0x6bb   :  { %3575 = vadd.xlane.f32.xlu0 %v3574_v46  ;;  %3578 = vadd.xlane.f32.xlu1 %v3577_v57 }
 0x6bf   :  { %3581 = vadd.xlane.f32.xlu0 %v3580_v22  ;;  %3584 = vadd.xlane.f32.xlu1 %v3583_v5 }
 0x6c3   :  { %3587 = vadd.xlane.f32.xlu0 %v3586_v11 }
 0x6d0   :  { %3706 = vperm.xlu1 %11008, %v8986_v49  }
 0x6d4   :  { %3711 = vperm.xlu1 %11008, %v8987_v41  }
 0x6d9   :  { %3666 = vperm.xlu0 %11009, %v3658_v32  }
 0x710   :  { %v3495_v3 = vpop.xlane.xlu1 %3494 }
 0x714   :  { %v3498_v45 = vpop.xlane.xlu0 %3497  ;;  %v3501_v26 = vpop.xlane.xlu1 %3500 }
 0x715   :  { %v3589_v46 = vadd.f32 %v3501_v26, %v3495_v3 }
 0x718   :  { %v3504_v54 = vpop.xlane.xlu0 %3503  ;;  %v3507_v8 = vpop.xlane.xlu1 %3506 }
 0x719   :  { %v3591_v57 = vadd.f32 %v3589_v46, %v3507_v8  ;;  %v3590_v52 = vadd.f32 %v3504_v54, %v3498_v45 }
 0x71c   :  { %v3510_v55 = vpop.xlane.xlu0 %3509  ;;  %v3513_v16 = vpop.xlane.xlu1 %3512 }
 0x71d   :  { %v3593_v22 = vadd.f32 %v3591_v57, %v3513_v16  ;;  %v3592_v5 = vadd.f32 %v3590_v52, %v3510_v55 }
 0x720   :  { %v3516_v30 = vpop.xlane.xlu0 %3515  ;;  %v3519_v61 = vpop.xlane.xlu1 %3518 }
 0x721   :  { %v3595_v9 = vadd.f32 %v3593_v22, %v3519_v61  ;;  %v3594_v41 = vadd.f32 %v3592_v5, %v3516_v30 }
 0x724   :  { %v3522_v21 = vpop.xlane.xlu0 %3521  ;;  %v3525_v10 = vpop.xlane.xlu1 %3524 }
 0x725   :  { %v3597_v32 = vadd.f32 %v3595_v9, %v3525_v10  ;;  %v3596_v47 = vadd.f32 %v3594_v41, %v3522_v21 }
 0x728   :  { %v3528_v63 = vpop.xlane.xlu0 %3527  ;;  %v3531_v25 = vpop.xlane.xlu1 %3530 }
 0x729   :  { %v3599_v27 = vadd.f32 %v3597_v32, %v3531_v25  ;;  %v3598_v14 = vadd.f32 %v3596_v47, %v3528_v63 }
 0x72c   :  { %v3534_v53 = vpop.xlane.xlu0 %3533  ;;  %v3537_v58 = vpop.xlane.xlu1 %3536 }
 0x72d   :  { %v3601_v28 = vadd.f32 %v3599_v27, %v3537_v58  ;;  %v3600_v4 = vadd.f32 %v3598_v14, %v3534_v53 }
 0x730   :  { %v3540_v40 = vpop.xlane.xlu0 %3539  ;;  %v3543_v59 = vpop.xlane.xlu1 %3542 }
 0x731   :  { %v3603_v35 = vadd.f32 %v3601_v28, %v3543_v59  ;;  %v3602_v8 = vadd.f32 %v3600_v4, %v3540_v40 }
 0x734   :  { %v3546_v7 = vpop.xlane.xlu0 %3545  ;;  %v3549_v1 = vpop.xlane.xlu1 %3548 }
 0x735   :  { %v3605_v46 = vadd.f32 %v3603_v35, %v3549_v1  ;;  %v3604_v45 = vadd.f32 %v3602_v8, %v3546_v7 }
 0x738   :  { %v3552_v11 = vpop.xlane.xlu0 %3551  ;;  %v3555_v49 = vpop.xlane.xlu1 %3554 }
 0x739   :  { %v3607_v54 = vadd.f32 %v3605_v46, %v3555_v49  ;;  %v3606_v61 = vadd.f32 %v3604_v45, %v3552_v11 }
 0x73c   :  { %v3558_v29 = vpop.xlane.xlu0 %3557  ;;  %v3561_v34 = vpop.xlane.xlu1 %3560 }
 0x73d   :  { %v3609_v57 = vadd.f32 %v3607_v54, %v3561_v34  ;;  %v3608_v30 = vadd.f32 %v3606_v61, %v3558_v29 }
 0x740   :  { %v3564_v3 = vpop.xlane.xlu0 %3563  ;;  %v3567_v26 = vpop.xlane.xlu1 %3566 }
 0x741   :  { %v3611_v10 = vadd.f32 %v3609_v57, %v3567_v26  ;;  %v3610_v52 = vadd.f32 %v3608_v30, %v3564_v3 }
 0x744   :  { %v3570_v55 = vpop.xlane.xlu0 %3569  ;;  %v3573_v16 = vpop.xlane.xlu1 %3572 }
 0x745   :  { %v3613_v22 = vadd.f32 %v3611_v10, %v3573_v16  ;;  %v3612_v63 = vadd.f32 %v3610_v52, %v3570_v55 }
 0x748   :  { %v3576_v21 = vpop.xlane.xlu0 %3575  ;;  %v3579_v25 = vpop.xlane.xlu1 %3578 }
 0x749   :  { %v3615_v27 = vadd.f32 %v3613_v22, %v3579_v25  ;;  %v3614_v53 = vadd.f32 %v3612_v63, %v3576_v21 }
 0x74c   :  { %v3582_v14 = vpop.xlane.xlu0 %3581  ;;  %v3585_v28 = vpop.xlane.xlu1 %3584 }
 0x74d   :  { %v3617_v58 = vadd.f32 %v3615_v27, %v3585_v28  ;;  %v3616_v4 = vadd.f32 %v3614_v53, %v3582_v14 }
 0x74f   :  { %v3619_v35 = vmul.f32 0.00390625, %v3617_v58 }
 0x750   :  { %v3588_v40 = vpop.xlane.xlu0 %3587  ;;  %v13271_v11 = vpop.permute.xlu1 %3706 }
 0x751   :  { %v3621_v59 = vadd.f32 1e-05, %v3619_v35  ;;  %v3618_v7 = vadd.f32 %v3616_v4, %v3588_v40 }
 0x753   :  { %11292 = vrsqrt.f32 %v3621_v59  ;;  %v3620_v1 = vmul.f32 0.00390625, %v3618_v7 }
 0x754   :  { %v13285_v8 = vpop.permute.xlu1 %3711 }
 0x755   :  { %v3622_v34 = vadd.f32 1e-05, %v3620_v1 }
 0x757   :  { %11294 = vrsqrt.f32 %v3622_v34 }
 0x758   :  { %v13275_v41 = vpop.permute.xlu0 %3666 }
 0x75d   :  { %v13265_v29 = vpop.eup %11292 }
 0x75e   :  { %v3627_v5 = vmul.f32 %v13265_v29, %v12995_v18  ;;  %v3625_v9 = vmul.f32 %v13265_v29, %v12990_v33  ;;  %v3629_v16 = vmul.f32 %v13265_v29, %v13004_v39  ;;  %v3631_v30 = vmul.f32 %v13265_v29, %v13026_v13 }
 0x75f   :  { %v3633_v21 = vmul.f32 %v13265_v29, %v13042_v44  ;;  %v3635_v14 = vmul.f32 %v13265_v29, %v13058_v0  ;;  %v3637_v4 = vmul.f32 %v13265_v29, %v13074_v24  ;;  %v3655_v34 = vmul.f32 %v13265_v29, %v13227_v23 }
 0x760   :  { %v3671_v32 = vmul.f32 %v13257_v19, %v3627_v5  ;;  %v3669_v26 = vmul.f32 %v13257_v19, %v3625_v9  ;;  %v3673_v39 = vmul.f32 %v13257_v19, %v3629_v16  ;;  %v3675_v13 = vmul.f32 %v13257_v19, %v3631_v30 }
 0x761   :  { %v13273_v49 = vpop.eup %11294  ;;  %v3677_v28 = vmul.f32 %v13257_v19, %v3633_v21  ;;  %v3679_v0 = vmul.f32 %v13257_v19, %v3635_v14 }
 0x762   :  { %v3628_v47 = vmul.f32 %v13273_v49, %v13017_v60  ;;  %v3626_v3 = vmul.f32 %v13273_v49, %v13010_v62  ;;  %v3716_v46 = vadd.f32 %v13271_v11, %v3671_v32  ;;  %v3630_v45 = vmul.f32 %v13273_v49, %v13035_v31 }
 0x763   :  { %v3714_v60 = vadd.f32 %v13271_v11, %v3669_v26  ;;  %v3632_v62 = vmul.f32 %v13273_v49, %v13051_v38  ;;  %v13310_v38 = vld [vmem:[%s15290_s7 + $0x10] sm:$0xff]   ;;  %v3634_v52 = vmul.f32 %v13273_v49, %v13067_v50  ;;  %v3636_v63 = vmul.f32 %v13273_v49, %v13083_v56 }
 0x764   :  { %v3672_v18 = vmul.f32 %v13275_v41, %v3628_v47  ;;  %v3670_v33 = vmul.f32 %v13275_v41, %v3626_v3  ;;  %v3674_v31 = vmul.f32 %v13275_v41, %v3630_v45  ;;  %v3718_v27 = vadd.f32 %v13271_v11, %v3673_v39 }
 0x765   :  { %v3676_v10 = vmul.f32 %v13275_v41, %v3632_v62  ;;  %v3720_v44 = vadd.f32 %v13271_v11, %v3675_v13  ;;  %v3678_v50 = vmul.f32 %v13275_v41, %v3634_v52  ;;  %v3680_v58 = vmul.f32 %v13275_v41, %v3636_v63 }
 0x766   :  { %v3717_v54 = vadd.f32 %v13285_v8, %v3672_v18  ;;  %v3715_v55 = vadd.f32 %v13285_v8, %v3670_v33  ;;  %v3719_v25 = vadd.f32 %v13285_v8, %v3674_v31  ;;  %v3653_v56 = vmul.f32 %v13265_v29, %v13211_v17 }
 0x767   :  { %v3721_v22 = vadd.f32 %v13285_v8, %v3676_v10  ;;  %v3654_v35 = vmul.f32 %v13273_v49, %v13222_v36  ;;  %v3722_v40 = vadd.f32 %v13271_v11, %v3677_v28  ;;  %v3639_v17 = vmul.f32 %v13265_v29, %v13099_v12 }
 0x768   :  { %v13297_v61 = vpack.c.bf16 %v3717_v54, %v3716_v46  ;;  %v13299_v57 = vpack.c.bf16 %v3715_v55, %v3714_v60  ;;  %v13333_v53 = vpack.c.bf16 %v3719_v25, %v3718_v27  ;;  %v3697_v59 = vmul.f32 %v13257_v19, %v3653_v56 }
 0x769   :  { %v3640_v7 = vmul.f32 %v13273_v49, %v13105_v43  ;;  %v3723_v1 = vadd.f32 %v13285_v8, %v3678_v50  ;;  %v3638_v24 = vmul.f32 %v13273_v49, %v13094_v20  ;;  %v3698_v36 = vmul.f32 %v13275_v41, %v3654_v35 }
 0x76a   :  { %10038 = vmatprep.mubr.msk.bf16.mxu1 %vm1191_vm2, %v13297_v61  ;;  %v3725_v5 = vadd.f32 %v13285_v8, %v3680_v58  ;;  %v3644_v9 = vmul.f32 %v13273_v49, %v13138_v42  ;;  %v3683_v12 = vmul.f32 %v13257_v19, %v3639_v17  ;;  %v3742_v43 = vadd.f32 %v13271_v11, %v3697_v59  ;;  %v15419_v58 = vld [vmem:[#allocation2_spill] sm:$0xff] }
 0x76b   :  { %10039 = vmatmul.mubr.msk.bf16.vlgmr.msra.gmra.mrb[112].mxu1 %vm1191_vm2, %v13299_v57  ;;  %v3684_v32 = vmul.f32 %v13275_v41, %v3640_v7  ;;  %v3743_v47 = vadd.f32 %v13285_v8, %v3698_v36  ;;  %v3656_v20 = vmul.f32 %v13273_v49, %v13238_v48  ;;  %v3699_v3 = vmul.f32 %v13257_v19, %v3655_v34  ;;  %v15422_v34 = vld [vmem:[#allocation8_spill] sm:$0xff] }
 0x76c   :  { %10042 = vmatprep.mubr.msk.bf16.mxu1 %vm1191_vm2, %v13297_v61  ;;  %10071 = vmatpush3.bf16.msra.mxu1 %v13262_v15  ;;  %v13336_v15 = vpack.c.bf16 %v3721_v22, %v3720_v44  ;;  %v3724_v23 = vadd.f32 %v13271_v11, %v3679_v0  ;;  %v3643_v26 = vmul.f32 %v13265_v29, %v13125_v37  ;;  %v15418_v44 = vld [vmem:[#allocation4_spill] sm:$0xff]  ;;  %v15420_v0 = vld [vmem:[#allocation3_spill] sm:$0xff] }
 0x76d   :  { %10104 = vmatprep.subr.bf16.mxu1 %v13310_v38  ;;  %v3728_v42 = vadd.f32 %v13271_v11, %v3683_v12  ;;  %v3729_v18 = vadd.f32 %v13285_v8, %v3684_v32  ;;  %v13377_v33 = vpack.c.bf16 %v3723_v1, %v3722_v40  ;;  %v3682_v46 = vmul.f32 %v13275_v41, %v3638_v24  ;;  %v15421_v1 = vld [vmem:[#allocation6_spill] sm:$0xff]  ;;  %v15423_v12 = vld [vmem:[#allocation5_spill] sm:$0xff] }
 0x76e   :  { %v13380_v45 = vpack.c.bf16 %v3743_v47, %v3742_v43  ;;  %v3700_v54 = vmul.f32 %v13275_v41, %v3656_v20  ;;  %v13383_v48 = vpack.c.bf16 %v3725_v5, %v3724_v23  ;;  %v3688_v60 = vmul.f32 %v13275_v41, %v3644_v9  ;;  %v15424_v47 = vld [vmem:[#allocation7_spill] sm:$0xff] }
 0x76f   :  { %v13386_v55 = vpack.c.bf16 %v3729_v18, %v3728_v42  ;;  %v3681_v37 = vmul.f32 %v13257_v19, %v3637_v4  ;;  %v3744_v62 = vadd.f32 %v13271_v11, %v3699_v3  ;;  %v3687_v30 = vmul.f32 %v13257_v19, %v3643_v26 }
 0x770   :  { %v3745_v16 = vadd.f32 %v13285_v8, %v3700_v54  ;;  %v3727_v31 = vadd.f32 %v13285_v8, %v3682_v46  ;;  %v3642_v10 = vmul.f32 %v13273_v49, %v13120_v2  ;;  %v3733_v13 = vadd.f32 %v13285_v8, %v3688_v60 }
 0x771   :  { %v3726_v21 = vadd.f32 %v13271_v11, %v3681_v37  ;;  %v3641_v25 = vmul.f32 %v13265_v29, %v13115_v6  ;;  %v3732_v52 = vadd.f32 %v13271_v11, %v3687_v30  ;;  %v3646_v6 = vmul.f32 %v13273_v49, %v13158_v51 }
 0x772   :  { %v13399_v39 = vpack.c.bf16 %v3745_v16, %v3744_v62  ;;  %v3686_v63 = vmul.f32 %v13275_v41, %v3642_v10  ;;  %v3648_v28 = vmul.f32 %v13273_v49, %v15418_v44  ;;  %v3645_v56 = vmul.f32 %v13265_v29, %v15419_v58 }
 0x773   :  { %10043 = vmatmul.mubr.msk.bf16.gmra.mrb[116].mxu1 %vm1191_vm2, %v13333_v53  ;;  %v13406_v22 = vpack.c.bf16 %v3727_v31, %v3726_v21  ;;  %v13409_v27 = vpack.c.bf16 %v3733_v13, %v3732_v52  ;;  %v3685_v2 = vmul.f32 %v13257_v19, %v3641_v25  ;;  %v3647_v4 = vmul.f32 %v13265_v29, %v15420_v0 }
 0x774   :  { %10046 = vmatprep.mubr.msk.bf16.mxu1 %vm1191_vm2, %v13336_v15  ;;  %v3731_v14 = vadd.f32 %v13285_v8, %v3686_v63  ;;  %v3690_v40 = vmul.f32 %v13275_v41, %v3646_v6  ;;  %v3692_v59 = vmul.f32 %v13275_v41, %v3648_v28  ;;  %v3689_v51 = vmul.f32 %v13257_v19, %v3645_v56 }
 0x775   :  { %v3730_v50 = vadd.f32 %v13271_v11, %v3685_v2  ;;  %v3691_v17 = vmul.f32 %v13257_v19, %v3647_v4  ;;  %v3650_v24 = vmul.f32 %v13273_v49, %v15421_v1  ;;  %v3652_v5 = vmul.f32 %v13273_v49, %v15422_v34 }
 0x776   :  { %v3735_v7 = vadd.f32 %v13285_v8, %v3690_v40  ;;  %v3737_v36 = vadd.f32 %v13285_v8, %v3692_v59  ;;  %v3734_v9 = vadd.f32 %v13271_v11, %v3689_v51  ;;  %v3649_v32 = vmul.f32 %v13265_v29, %v15423_v12 }
 0x777   :  { %v3757_v35 = vpack.c.bf16 %v3731_v14, %v3730_v50  ;;  %v3736_v43 = vadd.f32 %v13271_v11, %v3691_v17  ;;  %v3651_v20 = vmul.f32 %v13265_v29, %v15424_v47  ;;  %v3694_v23 = vmul.f32 %v13275_v41, %v3650_v24 }
 0x778   :  { %v3758_v3 = vpack.c.bf16 %v3735_v7, %v3734_v9  ;;  %v3696_v42 = vmul.f32 %v13275_v41, %v3652_v5  ;;  %v3693_v49 = vmul.f32 %v13257_v19, %v3649_v32 }
 0x779   :  { %v3759_v26 = vpack.c.bf16 %v3737_v36, %v3736_v43  ;;  %v3695_v18 = vmul.f32 %v13257_v19, %v3651_v20  ;;  %v3739_v46 = vadd.f32 %v13285_v8, %v3694_v23  ;;  %v15425_v19 = vmov 0.0  }
 0x77a   :  { %v3741_v54 = vadd.f32 %v13285_v8, %v3696_v42  ;;  %v3738_v29 = vadd.f32 %v13271_v11, %v3693_v49 }
 0x77b   :  { %10047 = vmatmul.mubr.msk.bf16.gmra.mrb[120].mxu1 %vm1191_vm2, %v13377_v33  ;;  %v3740_v60 = vadd.f32 %v13271_v11, %v3695_v18  ;;  %v13521_v11 = vld [vmem:[%s15291_s10] ss:$0 sm:$0xff] }
 0x77c   :  { %10050 = vmatprep.mubr.msk.bf16.mxu1 %vm1191_vm2, %v13383_v48  ;;  %v3760_v37 = vpack.c.bf16 %v3739_v46, %v3738_v29 }
 0x77d   :  { %v3761_v62 = vpack.c.bf16 %v3741_v54, %v3740_v60 }
 0x783   :  { %10051 = vmatmul.mubr.msk.bf16.gmra.mrb[124].mxu1 %vm1191_vm2, %v13406_v22 }
 0x784   :  { %10054 = vmatprep.mubr.msk.bf16.mxu1 %vm1191_vm2, %v13409_v27 }
 0x78b   :  { %10055 = vmatmul.mubr.msk.bf16.gmra.mrb[128].mxu1 %vm1191_vm2, %v3757_v35 }
 0x78c   :  { %10058 = vmatprep.mubr.msk.bf16.mxu1 %vm1191_vm2, %v13409_v27 }
 0x793   :  { %10059 = vmatmul.mubr.msk.bf16.gmra.mrb[132].mxu1 %vm1191_vm2, %v3758_v3 }
 0x794   :  { %10062 = vmatprep.mubr.msk.bf16.mxu1 %vm1191_vm2, %v3759_v26 }
 0x79b   :  { %10063 = vmatmul.mubr.msk.bf16.gmra.mrb[136].mxu1 %vm1191_vm2, %v3760_v37 }
 0x79c   :  { %10066 = vmatprep.mubr.msk.bf16.mxu1 %vm1191_vm2, %v3761_v62 }
 0x7a3   :  { %10067 = vmatmul.mubr.msk.bf16.gmra.mrb[140].mxu1 %vm1191_vm2, %v13380_v45 }
 0x7a4   :  { %10072 = vmatprep.mubr.msk.bf16.mxu1 %vm1191_vm2, %v13299_v57 }
 0x7ab   :  { %10073 = vmatmul.mubr.msk.bf16.vlgmr.msra.gmra.mrb[112].mxu1 %vm1191_vm2, %v13297_v61 }
 0x7ac   :  { %10076 = vmatprep.mubr.msk.bf16.mxu1 %vm1191_vm2, %v13333_v53  ;;  %10105 = vmatpush3.bf16.msra.mxu1 %v13310_v38 }
 0x7ad   :  { %10172 = vmatprep.subr.bf16.mxu1 %v15425_v19 }
 0x7b3   :  { %10077 = vmatmul.mubr.msk.bf16.gmra.mrb[116].mxu1 %vm1191_vm2, %v13336_v15 }
 0x7b4   :  { %10080 = vmatprep.mubr.msk.bf16.mxu1 %vm1191_vm2, %v13377_v33 }
 0x7bb   :  { %10081 = vmatmul.mubr.msk.bf16.gmra.mrb[120].mxu1 %vm1191_vm2, %v13383_v48 }
 0x7bc   :  { %10084 = vmatprep.mubr.msk.bf16.mxu1 %vm1191_vm2, %v13406_v22 }
 0x7c3   :  { %10085 = vmatmul.mubr.msk.bf16.gmra.mrb[124].mxu1 %vm1191_vm2, %v13386_v55 }
 0x7c4   :  { %10088 = vmatprep.mubr.msk.bf16.mxu1 %vm1191_vm2, %v3757_v35 }
 0x7cb   :  { %10089 = vmatmul.mubr.msk.bf16.gmra.mrb[128].mxu1 %vm1191_vm2, %v13409_v27 }
 0x7cc   :  { %10092 = vmatprep.mubr.msk.bf16.mxu1 %vm1191_vm2, %v3758_v3 }
 0x7d3   :  { %10093 = vmatmul.mubr.msk.bf16.gmra.mrb[132].mxu1 %vm1191_vm2, %v3759_v26 }
 0x7d4   :  { %10096 = vmatprep.mubr.msk.bf16.mxu1 %vm1191_vm2, %v3760_v37 }
 0x7db   :  { %10097 = vmatmul.mubr.msk.bf16.gmra.mrb[136].mxu1 %vm1191_vm2, %v3761_v62 }
 0x7dc   :  { %10100 = vmatprep.mubr.msk.bf16.mxu1 %vm1191_vm2, %v13380_v45 }
 0x7e3   :  { %10101 = vmatmul.mubr.msk.bf16.gmra.mrb[140].mxu1 %vm1191_vm2, %v13399_v39 }
 0x7e4   :  { %10106 = vmatprep.mubr.msk.bf16.mxu1 %vm1191_vm2, %v13297_v61 }
 0x7eb   :  { %10107 = vmatmul.mubr.msk.bf16.vlgmr.msra.gmra.mrb[112].mxu1 %vm1191_vm2, %v13333_v53 }
 0x7ec   :  { %10110 = vmatprep.mubr.msk.bf16.mxu1 %vm1191_vm2, %v13336_v15 }
 0x7f3   :  { %10111 = vmatmul.mubr.msk.bf16.gmra.mrb[116].mxu1 %vm1191_vm2, %v13377_v33 }
 0x7f4   :  { %10114 = vmatprep.mubr.msk.bf16.mxu1 %vm1191_vm2, %v13383_v48 }
 0x7fb   :  { %10115 = vmatmul.mubr.msk.bf16.gmra.mrb[120].mxu1 %vm1191_vm2, %v13406_v22 }
 0x7fc   :  { %10118 = vmatprep.mubr.msk.bf16.mxu1 %vm1191_vm2, %v13386_v55 }
 0x803   :  { %10119 = vmatmul.mubr.msk.bf16.gmra.mrb[124].mxu1 %vm1191_vm2, %v13406_v22 }
 0x804   :  { %10122 = vmatprep.mubr.msk.bf16.mxu1 %vm1191_vm2, %v13409_v27 }
 0x80b   :  { %10123 = vmatmul.mubr.msk.bf16.gmra.mrb[128].mxu1 %vm1191_vm2, %v3758_v3 }
 0x80c   :  { %10126 = vmatprep.mubr.msk.bf16.mxu1 %vm1191_vm2, %v3759_v26 }
 0x813   :  { %10127 = vmatmul.mubr.msk.bf16.gmra.mrb[132].mxu1 %vm1191_vm2, %v3760_v37 }
 0x814   :  { %10130 = vmatprep.mubr.msk.bf16.mxu1 %vm1191_vm2, %v3761_v62 }
 0x81b   :  { %10131 = vmatmul.mubr.msk.bf16.gmra.mrb[136].mxu1 %vm1191_vm2, %v13380_v45 }
 0x81c   :  { %10134 = vmatprep.mubr.msk.bf16.mxu1 %vm1191_vm2, %v13399_v39 }
 0x823   :  { %10135 = vmatmul.mubr.msk.bf16.gmra.mrb[140].mxu1 %vm1191_vm2, %v13380_v45 }
 0x824   :  { %10174 = vmatprep.mubr.msk.bf16.mxu1 %vm11830_vm3, %v15425_v19 }
 0x8be   :  { %v10108_v41 = vpop.f32.mrb[112].mxu1 }
 0x8bf   :  { %v13524_v8 = vadd.f32 %v10108_v41, %v13521_v11  ;;  %v4265_v61 = vpop.f32.mrb[113].mxu1 }
 0x8c0   :  { %v13527_v57 = vadd.f32 %v13521_v11, %v4265_v61  ;;  %v10109_v38 = vpop.f32.mrb[114].mxu1 }
 0x8c1   :  { %v9047_v53 = vmul.f32 -1.442695, %v13524_v8  ;;  %v13531_v15 = vadd.f32 %v10109_v38, %v13521_v11  ;;  %v4268_v33 = vpop.f32.mrb[115].mxu1 }
 0x8c2   :  { %v9045_v45 = vmul.f32 -1.442695, %v13527_v57  ;;  %v13535_v48 = vadd.f32 %v13521_v11, %v4268_v33 }
 0x8c3   :  { %11296 = vpow2.f32 %v9047_v53  ;;  %v9048_v55 = vmul.f32 -1.442695, %v13531_v15 }
 0x8c4   :  { %11298 = vpow2.f32 %v9045_v45  ;;  %v9046_v16 = vmul.f32 -1.442695, %v13535_v48 }
 0x8c6   :  { %11300 = vpow2.f32 %v9046_v16  ;;  %v10112_v30 = vpop.f32.mrb[116].mxu1 }
 0x8c7   :  { %v13540_v31 = vadd.f32 %v10112_v30, %v13521_v11  ;;  %v4281_v10 = vpop.f32.mrb[117].mxu1  ;;  %11302 = vpow2.f32 %v9048_v55  ;;  %v4824_v30 = vld [vmem:[%s15292_s11] sm:$0xf] }
 0x8c8   :  { %v13543_v39 = vadd.f32 %v13521_v11, %v4281_v10  ;;  %v10113_v13 = vpop.f32.mrb[118].mxu1  ;;  %10995 = vmatprep.subr.msk.bf16.mxu0 %vm176_vm0, %v4824_v30 }
 0x8c9   :  { %v9051_v21 = vmul.f32 -1.442695, %v13540_v31  ;;  %v13547_v25 = vadd.f32 %v10113_v13, %v13521_v11  ;;  %v4284_v52 = vpop.f32.mrb[119].mxu1 }
 0x8ca   :  { %v9049_v22 = vmul.f32 -1.442695, %v13543_v39  ;;  %v13551_v63 = vadd.f32 %v13521_v11, %v4284_v52 }
 0x8cb   :  { %11304 = vpow2.f32 %v9051_v21  ;;  %v9052_v27 = vmul.f32 -1.442695, %v13547_v25 }
 0x8cc   :  { %11306 = vpow2.f32 %v9049_v22  ;;  %v9050_v44 = vmul.f32 -1.442695, %v13551_v63  ;;  %v4874_v22 = vsel %vm176_vm0, %v4824_v30, 0 }
 0x8cd   :  { %v11297_v2 = vpop.eup %11296  ;;  %11308 = vpow2.f32 %v9052_v27  ;;  %10139 = vmatpush3.bf16.msra.mxu0 %v4874_v22 }
 0x8ce   :  { %v11299_v14 = vpop.eup %11298  ;;  %v4522_v6 = vadd.f32 1.0, %v11297_v2  ;;  %v10116_v28 = vpop.f32.mrb[120].mxu1  ;;  %10220 = vmatprep.subr.bf16.mxu0 %v15425_v19 }
 0x8cf   :  { %v4520_v50 = vadd.f32 1.0, %v11299_v14  ;;  %v13556_v58 = vadd.f32 %v10116_v28, %v13521_v11  ;;  %v4297_v56 = vpop.f32.mrb[121].mxu1 }
 0x8d0   :  { %v11301_v0 = vpop.eup %11300  ;;  %11310 = vrcp.f32 %v4522_v6  ;;  %v13559_v4 = vadd.f32 %v13521_v11, %v4297_v56  ;;  %v10117_v35 = vpop.f32.mrb[122].mxu1 }
 0x8d1   :  { %v9055_v40 = vmul.f32 -1.442695, %v13556_v58  ;;  %v4300_v59 = vpop.f32.mrb[123].mxu1  ;;  %v11303_v51 = vpop.eup %11302  ;;  %11312 = vpow2.f32 %v9050_v44  ;;  %v4521_v1 = vadd.f32 1.0, %v11301_v0  ;;  %v13567_v24 = vadd.f32 %v10117_v35, %v13521_v11 }
 0x8d2   :  { %v9053_v17 = vmul.f32 -1.442695, %v13559_v4  ;;  %v13564_v7 = vadd.f32 %v13521_v11, %v4300_v59  ;;  %11314 = vrcp.f32 %v4520_v50  ;;  %v4523_v34 = vadd.f32 1.0, %v11303_v51 }
 0x8d3   :  { %11316 = vpow2.f32 %v9055_v40  ;;  %v9056_v43 = vmul.f32 -1.442695, %v13567_v24 }
 0x8d4   :  { %11318 = vpow2.f32 %v9053_v17  ;;  %v9054_v9 = vmul.f32 -1.442695, %v13564_v7 }
 0x8d5   :  { %v11305_v36 = vpop.eup %11304  ;;  %11320 = vrcp.f32 %v4521_v1 }
 0x8d6   :  { %v4526_v5 = vadd.f32 1.0, %v11305_v36  ;;  %v10120_v12 = vpop.f32.mrb[124].mxu1  ;;  %v11307_v32 = vpop.eup %11306 }
 0x8d7   :  { %v13572_v47 = vadd.f32 %v10120_v12, %v13521_v11  ;;  %v4313_v20 = vpop.f32.mrb[125].mxu1  ;;  %v11309_v3 = vpop.eup %11308  ;;  %v4524_v46 = vadd.f32 1.0, %v11307_v32 }
 0x8d8   :  { %11322 = vrcp.f32 %v4526_v5  ;;  %v13575_v23 = vadd.f32 %v13521_v11, %v4313_v20  ;;  %v10121_v26 = vpop.f32.mrb[126].mxu1  ;;  %v4527_v60 = vadd.f32 1.0, %v11309_v3 }
 0x8d9   :  { %11324 = vrcp.f32 %v4523_v34  ;;  %v9059_v42 = vmul.f32 -1.442695, %v13572_v47  ;;  %v4316_v49 = vpop.f32.mrb[127].mxu1  ;;  %v13585_v45 = vadd.f32 %v10121_v26, %v13521_v11 }
 0x8da   :  { %v11311_v18 = vpop.eup %11310  ;;  %11326 = vpow2.f32 %v9054_v9  ;;  %v9057_v54 = vmul.f32 -1.442695, %v13575_v23  ;;  %v13580_v29 = vadd.f32 %v13521_v11, %v4316_v49 }
 0x8db   :  { %11328 = vpow2.f32 %v9056_v43  ;;  %4652 = vrot.lane.b32.xlu1 %v11311_v18, %s11832_s28  ;;  %v11313_v37 = vpop.eup %11312  ;;  %v9060_v56 = vmul.f32 -1.442695, %v13585_v45 }
 0x8dc   :  { %11330 = vpow2.f32 %v9059_v42  ;;  %v11315_v62 = vpop.eup %11314  ;;  %v9058_v41 = vmul.f32 -1.442695, %v13580_v29  ;;  %v4525_v33 = vadd.f32 1.0, %v11313_v37 }
 0x8dd   :  { %11332 = vpow2.f32 %v9057_v54  ;;  %v11317_v61 = vpop.eup %11316 }
 0x8de   :  { %11334 = vrcp.f32 %v4524_v46  ;;  %v10124_v38 = vpop.f32.mrb[128].mxu1  ;;  %v11319_v53 = vpop.eup %11318  ;;  %v4530_v10 = vadd.f32 1.0, %v11317_v61 }
 0x8df   :  { %11336 = vrcp.f32 %v4527_v60  ;;  %v13588_v55 = vadd.f32 %v10124_v38, %v13521_v11  ;;  %4648 = vrot.lane.b32.xlu1 %v11315_v62, %s11832_s28  ;;  %v4329_v16 = vpop.f32.mrb[129].mxu1  ;;  %v4528_v13 = vadd.f32 1.0, %v11319_v53  ;;  %v11321_v27 = vpop.eup %11320 }
 0x8e0   :  { %v13595_v21 = vadd.f32 %v13521_v11, %v4329_v16  ;;  %v10125_v52 = vpop.f32.mrb[130].mxu1  ;;  %11338 = vpow2.f32 %v9058_v41 }
 0x8e1   :  { %v9063_v2 = vmul.f32 -1.442695, %v13588_v55  ;;  %v4332_v14 = vpop.f32.mrb[131].mxu1  ;;  %11340 = vrcp.f32 %v4528_v13  ;;  %v13610_v36 = vadd.f32 %v10125_v52, %v13521_v11 }
 0x8e2   :  { %v11323_v6 = vpop.eup %11322  ;;  %v9061_v44 = vmul.f32 -1.442695, %v13595_v21  ;;  %v13602_v28 = vadd.f32 %v13521_v11, %v4332_v14  ;;  %11342 = vrcp.f32 %v4525_v33 }
 0x8e3   :  { %v11325_v50 = vpop.eup %11324  ;;  %4650 = vrot.lane.b32.xlu1 %v11321_v27, %s11832_s28  ;;  %4660 = vrot.lane.b32.xlu0 %v11323_v6, %s11832_s28  ;;  %11344 = vrcp.f32 %v4530_v10  ;;  %v9064_v54 = vmul.f32 -1.442695, %v13610_v36 }
 0x8e4   :  { %v11327_v0 = vpop.eup %11326  ;;  %v9062_v35 = vmul.f32 -1.442695, %v13602_v28  ;;  %11346 = vpow2.f32 %v9063_v2 }
 0x8e5   :  { %v11329_v40 = vpop.eup %11328  ;;  %11348 = vpow2.f32 %v9061_v44  ;;  %v4529_v1 = vadd.f32 1.0, %v11327_v0 }
 0x8e6   :  { %v11331_v59 = vpop.eup %11330  ;;  %v10128_v51 = vpop.f32.mrb[132].mxu1  ;;  %11350 = vpow2.f32 %v9060_v56  ;;  %v4531_v37 = vadd.f32 1.0, %v11329_v40 }
 0x8e7   :  { %v11333_v17 = vpop.eup %11332  ;;  %v13613_v34 = vadd.f32 %v10128_v51, %v13521_v11  ;;  %4654 = vrot.lane.b32.xlu1 %v11325_v50, %s11832_s28  ;;  %v4345_v5 = vpop.f32.mrb[133].mxu1  ;;  %v4534_v12 = vadd.f32 1.0, %v11331_v59  ;;  %11352 = vpow2.f32 %v9062_v35 }
 0x8e8   :  { %v11335_v9 = vpop.eup %11334  ;;  %v4532_v32 = vadd.f32 1.0, %v11333_v17  ;;  %v13617_v43 = vadd.f32 %v13521_v11, %v4345_v5  ;;  %v10129_v20 = vpop.f32.mrb[134].mxu1 }
 0x8e9   :  { %v11337_v3 = vpop.eup %11336  ;;  %v9067_v26 = vmul.f32 -1.442695, %v13613_v34  ;;  %v4348_v42 = vpop.f32.mrb[135].mxu1  ;;  %v13627_v62 = vadd.f32 %v10129_v20, %v13521_v11 }
 0x8ea   :  { %11354 = vrcp.f32 %v4532_v32  ;;  %v9065_v49 = vmul.f32 -1.442695, %v13617_v43  ;;  %v13622_v18 = vadd.f32 %v13521_v11, %v4348_v42  ;;  %v11339_v46 = vpop.eup %11338 }
 0x8eb   :  { %11356 = vrcp.f32 %v4529_v1  ;;  %4656 = vrot.lane.b32.xlu1 %v11335_v9, %s11832_s28  ;;  %v11341_v60 = vpop.eup %11340  ;;  %v4533_v53 = vadd.f32 1.0, %v11339_v46  ;;  %v9068_v52 = vmul.f32 -1.442695, %v13627_v62 }
 0x8ec   :  { %11358 = vrcp.f32 %v4534_v12  ;;  %v11343_v41 = vpop.eup %11342  ;;  %v9066_v61 = vmul.f32 -1.442695, %v13622_v18  ;;  %4664 = vrot.lane.b32.xlu0 %v11341_v60, %s11832_s28 }
 0x8ed   :  { %11360 = vpow2.f32 %v9067_v26  ;;  %v11345_v38 = vpop.eup %11344 }
 0x8ee   :  { %11362 = vpow2.f32 %v9065_v49  ;;  %v10132_v33 = vpop.f32.mrb[136].mxu1  ;;  %v11347_v16 = vpop.eup %11346 }
 0x8ef   :  { %11364 = vpow2.f32 %v9064_v54  ;;  %v13632_v30 = vadd.f32 %v10132_v33, %v13521_v11  ;;  %4658 = vrot.lane.b32.xlu1 %v11343_v41, %s11832_s28  ;;  %v4361_v10 = vpop.f32.mrb[137].mxu1  ;;  %v11349_v13 = vpop.eup %11348  ;;  %v4538_v14 = vadd.f32 1.0, %v11347_v16 }
 0x8f0   :  { %11366 = vrcp.f32 %v4531_v37  ;;  %v13637_v22 = vadd.f32 %v13521_v11, %v4361_v10  ;;  %v10133_v27 = vpop.f32.mrb[138].mxu1  ;;  %v11351_v2 = vpop.eup %11350  ;;  %v4536_v6 = vadd.f32 1.0, %v11349_v13  ;;  %4668 = vrot.lane.b32.xlu0 %v11345_v38, %s11832_s28 }
 0x8f1   :  { %11368 = vpow2.f32 %v9066_v61  ;;  %v13641_v44 = vadd.f32 %v10133_v27, %v13521_v11  ;;  %v4364_v50 = vpop.f32.mrb[139].mxu1  ;;  %v11353_v56 = vpop.eup %11352  ;;  %v9071_v0 = vmul.f32 -1.442695, %v13632_v30  ;;  %v4535_v51 = vadd.f32 1.0, %v11351_v2 }
 0x8f2   :  { %11370 = vrcp.f32 %v4533_v53  ;;  %v13645_v35 = vadd.f32 %v13521_v11, %v4364_v50  ;;  %v9069_v40 = vmul.f32 -1.442695, %v13637_v22  ;;  %v4537_v1 = vadd.f32 1.0, %v11353_v56 }
 0x8f3   :  { %11372 = vrcp.f32 %v4536_v6  ;;  %4662 = vrot.lane.b32.xlu1 %v11337_v3, %s11832_s28  ;;  %v9072_v42 = vmul.f32 -1.442695, %v13641_v44 }
 0x8f4   :  { %v11355_v59 = vpop.eup %11354  ;;  %11374 = vpow2.f32 %v9068_v52  ;;  %v9070_v9 = vmul.f32 -1.442695, %v13645_v35 }
 0x8f5   :  { %v11357_v17 = vpop.eup %11356  ;;  %11376 = vrcp.f32 %v4538_v14  ;;  %4672 = vrot.lane.b32.xlu0 %v11355_v59, %s11832_s28 }
 0x8f6   :  { %v11359_v5 = vpop.eup %11358  ;;  %11378 = vpow2.f32 %v9071_v0  ;;  %v10136_v12 = vpop.f32.mrb[140].mxu1 }
 0x8f7   :  { %v11361_v32 = vpop.eup %11360  ;;  %11380 = vpow2.f32 %v9069_v40  ;;  %v13652_v20 = vadd.f32 %v10136_v12, %v13521_v11  ;;  %4666 = vrot.lane.b32.xlu1 %v11357_v17, %s11832_s28  ;;  %v4377_v3 = vpop.f32.mrb[141].mxu1 }
 0x8f8   :  { %v11363_v26 = vpop.eup %11362  ;;  %11382 = vrcp.f32 %v4535_v51  ;;  %v13657_v49 = vadd.f32 %v13521_v11, %v4377_v3  ;;  %v10137_v46 = vpop.f32.mrb[142].mxu1  ;;  %v4542_v60 = vadd.f32 1.0, %v11361_v32 }
 0x8f9   :  { %v11365_v54 = vpop.eup %11364  ;;  %11384 = vrcp.f32 %v4537_v1  ;;  %v4540_v37 = vadd.f32 1.0, %v11363_v26  ;;  %4676 = vrot.lane.b32.xlu0 %v11359_v5, %s11832_s28  ;;  %v13661_v41 = vadd.f32 %v10137_v46, %v13521_v11  ;;  %v4380_v61 = vpop.f32.mrb[143].mxu1  ;;  %v9075_v53 = vmul.f32 -1.442695, %v13652_v20 }
 0x8fa   :  { %v11367_v38 = vpop.eup %11366  ;;  %11386 = vpow2.f32 %v9070_v9  ;;  %v13665_v33 = vadd.f32 %v13521_v11, %v4380_v61  ;;  %v9073_v10 = vmul.f32 -1.442695, %v13657_v49  ;;  %v4539_v52 = vadd.f32 1.0, %v11365_v54 }
 0x8fb   :  { %v11369_v16 = vpop.eup %11368  ;;  %11388 = vrcp.f32 %v4540_v37  ;;  %4670 = vrot.lane.b32.xlu1 %v11367_v38, %s11832_s28  ;;  %v9076_v17 = vmul.f32 -1.442695, %v13661_v41 }
 0x8fc   :  { %v11371_v13 = vpop.eup %11370  ;;  %11390 = vpow2.f32 %v9072_v42  ;;  %v4541_v14 = vadd.f32 1.0, %v11369_v16  ;;  %v9074_v11 = vmul.f32 -1.442695, %v13665_v33 }
 0x8fd   :  { %v11373_v27 = vpop.eup %11372  ;;  %11392 = vrcp.f32 %v4542_v60 }
 0x8fe   :  { %v11375_v2 = vpop.eup %11374  ;;  %11394 = vpow2.f32 %v9075_v53  ;;  %4680 = vrot.lane.b32.xlu0 %v11373_v27, %s11832_s28 }
 0x8ff   :  { %v11377_v6 = vpop.eup %11376  ;;  %11396 = vpow2.f32 %v9073_v10  ;;  %4674 = vrot.lane.b32.xlu1 %v11371_v13, %s11832_s28  ;;  %v4543_v40 = vadd.f32 1.0, %v11375_v2 }
 0x900   :  { %v11379_v50 = vpop.eup %11378  ;;  %11398 = vrcp.f32 %v4539_v52 }
 0x901   :  { %v11381_v56 = vpop.eup %11380  ;;  %11400 = vrcp.f32 %v4541_v14  ;;  %v4546_v5 = vadd.f32 1.0, %v11379_v50 }
 0x902   :  { %v11383_v0 = vpop.eup %11382  ;;  %v4544_v59 = vadd.f32 1.0, %v11381_v56  ;;  %4684 = vrot.lane.b32.xlu0 %v11377_v6, %s11832_s28  ;;  %11402 = vpow2.f32 %v9074_v11 }
 0x903   :  { %v11385_v51 = vpop.eup %11384  ;;  %4678 = vrot.lane.b32.xlu1 %v11383_v0, %s11832_s28 }
 0x904   :  { %v11387_v1 = vpop.eup %11386  ;;  %11404 = vrcp.f32 %v4544_v59 }
 0x905   :  { %v11389_v9 = vpop.eup %11388  ;;  %11406 = vrcp.f32 %v4543_v40  ;;  %v4545_v3 = vadd.f32 1.0, %v11387_v1 }
 0x906   :  { %v11391_v12 = vpop.eup %11390  ;;  %4688 = vrot.lane.b32.xlu0 %v11389_v9, %s11832_s28  ;;  %11408 = vpow2.f32 %v9076_v17 }
 0x907   :  { %v11393_v32 = vpop.eup %11392  ;;  %4682 = vrot.lane.b32.xlu1 %v11385_v51, %s11832_s28  ;;  %11410 = vrcp.f32 %v4546_v5  ;;  %v4547_v60 = vadd.f32 1.0, %v11391_v12 }
 0x908   :  { %v11395_v26 = vpop.eup %11394  ;;  %11412 = vrcp.f32 %v4545_v3 }
 0x909   :  { %v11397_v42 = vpop.eup %11396  ;;  %v4550_v61 = vadd.f32 1.0, %v11395_v26 }
 0x90a   :  { %v11399_v46 = vpop.eup %11398  ;;  %v4548_v54 = vadd.f32 1.0, %v11397_v42  ;;  %4692 = vrot.lane.b32.xlu0 %v11393_v32, %s11832_s28 }
 0x90b   :  { %4686 = vrot.lane.b32.xlu1 %v11399_v46, %s11832_s28  ;;  %v11401_v37 = vpop.eup %11400 }
 0x90c   :  { %11414 = vrcp.f32 %v4548_v54  ;;  %v11403_v38 = vpop.eup %11402 }
 0x90d   :  { %11416 = vrcp.f32 %v4547_v60  ;;  %v4549_v10 = vadd.f32 1.0, %v11403_v38 }
 0x90e   :  { %v11405_v53 = vpop.eup %11404  ;;  %11418 = vrcp.f32 %v4550_v61 }
 0x90f   :  { %4696 = vrot.lane.b32.xlu0 %v11405_v53, %s11832_s28  ;;  %4690 = vrot.lane.b32.xlu1 %v11401_v37, %s11832_s28  ;;  %v11407_v16 = vpop.eup %11406  ;;  %11420 = vrcp.f32 %v4549_v10 }
 0x910   :  { %v11409_v13 = vpop.eup %11408 }
 0x911   :  { %v11411_v52 = vpop.eup %11410  ;;  %v4551_v27 = vadd.f32 1.0, %v11409_v13 }
 0x912   :  { %v11413_v2 = vpop.eup %11412 }
 0x913   :  { %4700 = vrot.lane.b32.xlu0 %v11411_v52, %s11832_s28  ;;  %4694 = vrot.lane.b32.xlu1 %v11407_v16, %s11832_s28  ;;  %11422 = vrcp.f32 %v4551_v27 }
 0x916   :  { %v11415_v14 = vpop.eup %11414 }
 0x917   :  { %4704 = vrot.lane.b32.xlu0 %v11415_v14, %s11832_s28  ;;  %4698 = vrot.lane.b32.xlu1 %v11413_v2, %s11832_s28  ;;  %v11417_v6 = vpop.eup %11416 }
 0x918   :  { %v11419_v11 = vpop.eup %11418 }
 0x919   :  { %v11421_v50 = vpop.eup %11420 }
 0x91b   :  { %4708 = vrot.lane.b32.xlu0 %v11419_v11, %s11832_s28  ;;  %4702 = vrot.lane.b32.xlu1 %v11417_v6, %s11832_s28 }
 0x91d   :  { %v11423_v56 = vpop.eup %11422 }
 0x91f   :  { %4706 = vrot.lane.b32.xlu1 %v11421_v50, %s11832_s28 }
 0x923   :  { %4710 = vrot.lane.b32.xlu1 %v11423_v56, %s11832_s28 }
 0x94d   :  { %v4653_v0 = vpop.permute.xlu1 %4652 }
 0x94e   :  { %v4746_v1 = vadd.f32 %v13524_v8, %v4653_v0 }
 0x950   :  { %v4778_v42 = vmax.f32 %v4746_v1, 0.0 }
 0x951   :  { %v4649_v40 = vpop.permute.xlu1 %4648 }
 0x952   :  { %v4744_v59 = vadd.f32 %v13527_v57, %v4649_v40 }
 0x954   :  { %v4776_v5 = vmax.f32 %v4744_v59, 0.0 }
 0x955   :  { %v4651_v51 = vpop.permute.xlu1 %4650  ;;  %v4661_v26 = vpop.permute.xlu0 %4660 }
 0x956   :  { %v4745_v17 = vadd.f32 %v13535_v48, %v4651_v51  ;;  %v4750_v38 = vadd.f32 %v13540_v31, %v4661_v26 }
 0x958   :  { %v4777_v9 = vmax.f32 %v4745_v17, 0.0  ;;  %v4782_v27 = vmax.f32 %v4750_v38, 0.0 }
 0x959   :  { %v4655_v12 = vpop.permute.xlu1 %4654 }
 0x95a   :  { %v4808_v32 = vpack.c.bf16 %v4777_v9, %v4776_v5  ;;  %v4747_v3 = vadd.f32 %v13531_v15, %v4655_v12 }
 0x95c   :  { %v4779_v46 = vmax.f32 %v4747_v3, 0.0  ;;  %10140 = vmatprep.mubr.msk.bf16.mxu0 %vm133_vm1, %v4808_v32 }
 0x95d   :  { %v4657_v54 = vpop.permute.xlu1 %4656 }
 0x95e   :  { %v4809_v60 = vpack.c.bf16 %v4779_v46, %v4778_v42  ;;  %v4665_v37 = vpop.permute.xlu0 %4664  ;;  %v4748_v57 = vadd.f32 %v13543_v39, %v4657_v54 }
 0x95f   :  { %v4752_v2 = vadd.f32 %v13559_v4, %v4665_v37 }
 0x960   :  { %10141 = vmatmul.mubr.msk.bf16.vlgmr.msra.gmra.mrb[64].mxu0 %vm133_vm1, %v4809_v60  ;;  %v4780_v53 = vmax.f32 %v4748_v57, 0.0 }
 0x961   :  { %v4659_v48 = vpop.permute.xlu1 %4658  ;;  %v4784_v50 = vmax.f32 %v4752_v2, 0.0 }
 0x962   :  { %v4749_v8 = vadd.f32 %v13551_v63, %v4659_v48  ;;  %v4669_v61 = vpop.permute.xlu0 %4668 }
 0x963   :  { %v4754_v31 = vadd.f32 %v13556_v58, %v4669_v61 }
 0x964   :  { %v4781_v15 = vmax.f32 %v4749_v8, 0.0 }
 0x965   :  { %v4663_v16 = vpop.permute.xlu1 %4662  ;;  %v4786_v59 = vmax.f32 %v4754_v31, 0.0 }
 0x966   :  { %v4810_v10 = vpack.c.bf16 %v4781_v15, %v4780_v53  ;;  %v4751_v13 = vadd.f32 %v13547_v25, %v4663_v16 }
 0x967   :  { %v4673_v52 = vpop.permute.xlu0 %4672 }
 0x968   :  { %v4783_v14 = vmax.f32 %v4751_v13, 0.0  ;;  %10144 = vmatprep.mubr.msk.bf16.mxu0 %vm133_vm1, %v4810_v10  ;;  %v4756_v4 = vadd.f32 %v13575_v23, %v4673_v52 }
 0x969   :  { %v4667_v39 = vpop.permute.xlu1 %4666 }
 0x96a   :  { %v4811_v6 = vpack.c.bf16 %v4783_v14, %v4782_v27  ;;  %v4753_v63 = vadd.f32 %v13564_v7, %v4667_v39  ;;  %v4788_v9 = vmax.f32 %v4756_v4, 0.0 }
 0x96b   :  { %v4677_v11 = vpop.permute.xlu0 %4676 }
 0x96c   :  { %v4785_v56 = vmax.f32 %v4753_v63, 0.0  ;;  %10145 = vmatmul.mubr.msk.bf16.gmra.mrb[68].mxu0 %vm133_vm1, %v4811_v6  ;;  %v4758_v58 = vadd.f32 %v13572_v47, %v4677_v11 }
 0x96d   :  { %v4671_v0 = vpop.permute.xlu1 %4670 }
 0x96e   :  { %v4812_v25 = vpack.c.bf16 %v4785_v56, %v4784_v50  ;;  %v4755_v40 = vadd.f32 %v13567_v24, %v4671_v0  ;;  %v4790_v23 = vmax.f32 %v4758_v58, 0.0 }
 0x970   :  { %v4787_v51 = vmax.f32 %v4755_v40, 0.0  ;;  %v4681_v17 = vpop.permute.xlu0 %4680  ;;  %10148 = vmatprep.mubr.msk.bf16.mxu0 %vm133_vm1, %v4812_v25 }
 0x971   :  { %v4675_v1 = vpop.permute.xlu1 %4674  ;;  %v4760_v42 = vadd.f32 %v13595_v21, %v4681_v17 }
 0x972   :  { %v4813_v7 = vpack.c.bf16 %v4787_v51, %v4786_v59  ;;  %v4757_v5 = vadd.f32 %v13580_v29, %v4675_v1 }
 0x973   :  { %v4792_v47 = vmax.f32 %v4760_v42, 0.0 }
 0x974   :  { %v4789_v12 = vmax.f32 %v4757_v5, 0.0  ;;  %v4685_v32 = vpop.permute.xlu0 %4684  ;;  %10149 = vmatmul.mubr.msk.bf16.gmra.mrb[72].mxu0 %vm133_vm1, %v4813_v7 }
 0x975   :  { %v4679_v3 = vpop.permute.xlu1 %4678  ;;  %v4762_v57 = vadd.f32 %v13588_v55, %v4685_v32 }
 0x976   :  { %v4814_v24 = vpack.c.bf16 %v4789_v12, %v4788_v9  ;;  %v4759_v26 = vadd.f32 %v13585_v45, %v4679_v3 }
 0x977   :  { %v4794_v21 = vmax.f32 %v4762_v57, 0.0 }
 0x978   :  { %v4791_v46 = vmax.f32 %v4759_v26, 0.0  ;;  %v4689_v54 = vpop.permute.xlu0 %4688  ;;  %10152 = vmatprep.mubr.msk.bf16.mxu0 %vm133_vm1, %v4814_v24 }
 0x979   :  { %v4683_v60 = vpop.permute.xlu1 %4682  ;;  %v4764_v53 = vadd.f32 %v13617_v43, %v4689_v54 }
 0x97a   :  { %v4815_v29 = vpack.c.bf16 %v4791_v46, %v4790_v23  ;;  %v4761_v37 = vadd.f32 %v13602_v28, %v4683_v60 }
 0x97b   :  { %v4796_v55 = vmax.f32 %v4764_v53, 0.0 }
 0x97c   :  { %v4793_v48 = vmax.f32 %v4761_v37, 0.0  ;;  %v4693_v8 = vpop.permute.xlu0 %4692  ;;  %10153 = vmatmul.mubr.msk.bf16.gmra.mrb[76].mxu0 %vm133_vm1, %v4815_v29 }
 0x97d   :  { %v4687_v61 = vpop.permute.xlu1 %4686  ;;  %v4766_v52 = vadd.f32 %v13613_v34, %v4693_v8 }
 0x97e   :  { %v4816_v45 = vpack.c.bf16 %v4793_v48, %v4792_v47  ;;  %v4763_v38 = vadd.f32 %v13610_v36, %v4687_v61  ;;  %v11813_v47 = vld [vmem:[%s15287_s1 + $0x8] sm:$0xff]  }
 0x97f   :  { %v4798_v43 = vmax.f32 %v4766_v52, 0.0 }
 0x980   :  { %v4795_v15 = vmax.f32 %v4763_v38, 0.0  ;;  %10156 = vmatprep.mubr.msk.bf16.mxu0 %vm133_vm1, %v4816_v45 }
 0x981   :  { %v4697_v16 = vpop.permute.xlu0 %4696  ;;  %v4691_v10 = vpop.permute.xlu1 %4690 }
 0x982   :  { %v4817_v28 = vpack.c.bf16 %v4795_v15, %v4794_v21  ;;  %v4765_v13 = vadd.f32 %v13622_v18, %v4691_v10  ;;  %v4768_v6 = vadd.f32 %v13637_v22, %v4697_v16  ;;  %v11814_v21 = vld [vmem:[%s15287_s1 + $0x10] sm:$0xff]  }
 0x984   :  { %v4797_v27 = vmax.f32 %v4765_v13, 0.0  ;;  %10157 = vmatmul.mubr.msk.bf16.gmra.mrb[80].mxu0 %vm133_vm1, %v4817_v28  ;;  %v4800_v34 = vmax.f32 %v4768_v6, 0.0 }
 0x985   :  { %v4701_v2 = vpop.permute.xlu0 %4700  ;;  %v4695_v14 = vpop.permute.xlu1 %4694 }
 0x986   :  { %v4818_v36 = vpack.c.bf16 %v4797_v27, %v4796_v55  ;;  %v4767_v39 = vadd.f32 %v13627_v62, %v4695_v14  ;;  %v4770_v56 = vadd.f32 %v13632_v30, %v4701_v2  ;;  %v11815_v55 = vld [vmem:[%s15287_s1 + $0x18] sm:$0xff]  }
 0x988   :  { %v4799_v63 = vmax.f32 %v4767_v39, 0.0  ;;  %10160 = vmatprep.mubr.msk.bf16.mxu0 %vm133_vm1, %v4818_v36  ;;  %v4802_v59 = vmax.f32 %v4770_v56, 0.0  ;;  %v11818_v56 = vld [vmem:[%s15287_s1 + $0x28] sm:$0xff]  }
 0x989   :  { %v4699_v11 = vpop.permute.xlu1 %4698  ;;  %v4705_v31 = vpop.permute.xlu0 %4704 }
 0x98a   :  { %v4819_v50 = vpack.c.bf16 %v4799_v63, %v4798_v43  ;;  %v4769_v18 = vadd.f32 %v13645_v35, %v4699_v11  ;;  %v4772_v22 = vadd.f32 %v13657_v49, %v4705_v31  ;;  %v11816_v43 = vld [vmem:[%s15287_s1 + $0x20] sm:$0xff]  }
 0x98b   :  { %v11817_v11 = vld [vmem:[%s15287_s1 + $0x40] sm:$0xff]  }
 0x98c   :  { %v4801_v0 = vmax.f32 %v4769_v18, 0.0  ;;  %10161 = vmatmul.mubr.msk.bf16.gmra.mrb[84].mxu0 %vm133_vm1, %v4819_v50  ;;  %v4804_v7 = vmax.f32 %v4772_v22, 0.0 }
 0x98d   :  { %v4703_v25 = vpop.permute.xlu1 %4702  ;;  %v4709_v51 = vpop.permute.xlu0 %4708 }
 0x98e   :  { %v4820_v40 = vpack.c.bf16 %v4801_v0, %v4800_v34  ;;  %v4771_v62 = vadd.f32 %v13641_v44, %v4703_v25  ;;  %v4774_v30 = vadd.f32 %v13652_v20, %v4709_v51  ;;  %v11820_v51 = vld [vmem:[%s15287_s1 + $0x30] sm:$0xff]  }
 0x990   :  { %v4803_v4 = vmax.f32 %v4771_v62, 0.0  ;;  %10164 = vmatprep.mubr.msk.bf16.mxu0 %vm133_vm1, %v4820_v40  ;;  %v4806_v12 = vmax.f32 %v4774_v30, 0.0  ;;  %v11819_v40 = vld [vmem:[%s15287_s1 + $0x50] sm:$0xff]  }
 0x991   :  { %v4707_v17 = vpop.permute.xlu1 %4706 }
 0x992   :  { %v4821_v35 = vpack.c.bf16 %v4803_v4, %v4802_v59  ;;  %v4773_v1 = vadd.f32 %v13665_v33, %v4707_v17 }
 0x994   :  { %v4805_v5 = vmax.f32 %v4773_v1, 0.0  ;;  %10165 = vmatmul.mubr.msk.bf16.gmra.mrb[88].mxu0 %vm133_vm1, %v4821_v35  ;;  %v11821_v1 = vld [vmem:[%s15287_s1 + $0x60] sm:$0xff]  }
 0x995   :  { %v4711_v9 = vpop.permute.xlu1 %4710 }
 0x996   :  { %v4822_v58 = vpack.c.bf16 %v4805_v5, %v4804_v7  ;;  %v4775_v44 = vadd.f32 %v13661_v41, %v4711_v9  ;;  %v11812_v41 = vld [vmem:[%s15287_s1] sm:$0xff]  }
 0x998   :  { %v4807_v49 = vmax.f32 %v4775_v44, 0.0  ;;  %10168 = vmatprep.mubr.msk.bf16.mxu0 %vm133_vm1, %v4822_v58  ;;  %v11822_v58 = vld [vmem:[%s15287_s1 + $0x38] sm:$0xff]   ;;  %v11823_v44 = vld [vmem:[%s15287_s1 + $0x70] sm:$0xff]  }
 0x99a   :  { %v4823_v32 = vpack.c.bf16 %v4807_v49, %v4806_v12  ;;  %v11824_v12 = vld [vmem:[%s15287_s1 + $0x48] sm:$0xff]   ;;  %v11825_v49 = vld [vmem:[%s15287_s1 + $0x58] sm:$0xff]  }
 0x99c   :  { %10169 = vmatmul.mubr.msk.bf16.gmra.mrb[92].mxu0 %vm133_vm1, %v4823_v32  ;;  %v11826_v32 = vld [vmem:[%s15287_s1 + $0x68] sm:$0xff]  }
 0x99d   :  { %10222 = vmatprep.mubr.msk.bf16.mxu0 %vm11830_vm3, %v15425_v19 }
 0xa33   :  { %v10142_v33 = vpop.f32.mrb[64].mxu0 }
 0xa34   :  { %v4910_v3 = vpop.f32.mrb[65].mxu0 }
 0xa35   :  { %v10143_v20 = vpop.f32.mrb[66].mxu0 }
 0xa36   :  { %v5038_v24 = vpack.c.bf16 %v10143_v20, %v10142_v33  ;;  %v4913_v26 = vpop.f32.mrb[67].mxu0  ;;  %v11827_v33 = vld [vmem:[%s15287_s1 + $0x78] sm:$0xff]  }
 0xa37   :  { %v5037_v23 = vpack.c.bf16 %v4913_v26, %v4910_v3  ;;  %v11033_v3 = vld [vmem:[%s15293_s8] sm:$0x1f]  }
 0xa38   :  { %v5805_v20 = vsel %vm2297_vm4, %v11033_v3, 0 }
 0xa39   :  { %10173 = vmatpush3.bf16.msra.mxu1 %v5037_v23 }
 0xa3a   :  { %10178 = vmatprep.subr.bf16.mxu1 %v15425_v19 }
 0xa3c   :  { %10175 = vmatmul.mubr.msk.bf16.vlgmr.msra.gmra.mrb[144].mxu1 %vm1191_vm2, %v11812_v41 }
 0xa3d   :  { %10179 = vmatpush3.bf16.msra.mxu1 %v5038_v24  ;;  %10180 = vmatprep.mubr.msk.bf16.mxu1 %vm11830_vm3, %v15425_v19  ;;  %v11034_v24 = vld [vmem:[%s15293_s8 + $0x8] sm:$0x1f]  }
 0xa3e   :  { %10184 = vmatprep.subr.bf16.mxu1 %v15425_v19 }
 0xa3f   :  { %v10146_v42 = vpop.f32.mrb[68].mxu0 }
 0xa40   :  { %v4926_v46 = vpop.f32.mrb[69].mxu0 }
 0xa41   :  { %v10147_v54 = vpop.f32.mrb[70].mxu0 }
 0xa42   :  { %v5040_v60 = vpack.c.bf16 %v10147_v54, %v10146_v42  ;;  %v4929_v29 = vpop.f32.mrb[71].mxu0 }
 0xa43   :  { %v5039_v37 = vpack.c.bf16 %v4929_v29, %v4926_v46 }
 0xa44   :  { %10181 = vmatmul.mubr.msk.bf16.vlgmr.msra.gmra.mrb[148].mxu1 %vm1191_vm2, %v11813_v47 }
 0xa45   :  { %10185 = vmatpush3.bf16.msra.mxu1 %v5039_v37  ;;  %10186 = vmatprep.mubr.msk.bf16.mxu1 %vm11830_vm3, %v15425_v19 }
 0xa46   :  { %10190 = vmatprep.subr.bf16.mxu1 %v15425_v19 }
 0xa47   :  { %v10150_v57 = vpop.f32.mrb[72].mxu0 }
 0xa48   :  { %v4942_v48 = vpop.f32.mrb[73].mxu0 }
 0xa49   :  { %v10151_v8 = vpop.f32.mrb[74].mxu0 }
 0xa4a   :  { %v5042_v61 = vpack.c.bf16 %v10151_v8, %v10150_v57  ;;  %v4945_v45 = vpop.f32.mrb[75].mxu0 }
 0xa4b   :  { %v5041_v38 = vpack.c.bf16 %v4945_v45, %v4942_v48 }
 0xa4c   :  { %10187 = vmatmul.mubr.msk.bf16.vlgmr.msra.gmra.mrb[152].mxu1 %vm1191_vm2, %v11814_v21 }
 0xa4d   :  { %10191 = vmatpush3.bf16.msra.mxu1 %v5040_v60  ;;  %10192 = vmatprep.mubr.msk.bf16.mxu1 %vm11830_vm3, %v15425_v19 }
 0xa4e   :  { %10196 = vmatprep.subr.bf16.mxu1 %v15425_v19 }
 0xa4f   :  { %v10154_v53 = vpop.f32.mrb[76].mxu0 }
 0xa50   :  { %v4958_v15 = vpop.f32.mrb[77].mxu0 }
 0xa51   :  { %v10155_v16 = vpop.f32.mrb[78].mxu0 }
 0xa52   :  { %v5044_v10 = vpack.c.bf16 %v10155_v16, %v10154_v53  ;;  %v4961_v28 = vpop.f32.mrb[79].mxu0 }
 0xa53   :  { %v5043_v13 = vpack.c.bf16 %v4961_v28, %v4958_v15 }
 0xa54   :  { %10193 = vmatmul.mubr.msk.bf16.vlgmr.msra.gmra.mrb[156].mxu1 %vm1191_vm2, %v11815_v55 }
 0xa55   :  { %10197 = vmatpush3.bf16.msra.mxu1 %v5041_v38  ;;  %10198 = vmatprep.mubr.msk.bf16.mxu1 %vm11830_vm3, %v15425_v19 }
 0xa56   :  { %10202 = vmatprep.subr.bf16.mxu1 %v15425_v19 }
 0xa57   :  { %v10158_v52 = vpop.f32.mrb[80].mxu0 }
 0xa58   :  { %v4974_v27 = vpop.f32.mrb[81].mxu0 }
 0xa59   :  { %v10159_v2 = vpop.f32.mrb[82].mxu0 }
 0xa5a   :  { %v5046_v14 = vpack.c.bf16 %v10159_v2, %v10158_v52  ;;  %v4977_v36 = vpop.f32.mrb[83].mxu0 }
 0xa5b   :  { %v5045_v39 = vpack.c.bf16 %v4977_v36, %v4974_v27 }
 0xa5c   :  { %10199 = vmatmul.mubr.msk.bf16.vlgmr.msra.gmra.mrb[160].mxu1 %vm1191_vm2, %v11816_v43  ;;  %v13876_v43 = vld [vmem:[%s15293_s8 + $0x10] sm:$0x1f]  }
 0xa5d   :  { %10203 = vmatpush3.bf16.msra.mxu1 %v5042_v61  ;;  %10221 = vmatpush3.bf16.msra.mxu0 %v5045_v39  ;;  %v6023_v61 = vsel %vm2297_vm4, %v11034_v24, 0 }
 0xa5e   :  { %10204 = vmatprep.mubr.msk.bf16.mxu1 %vm11830_vm3, %v15425_v19  ;;  %10208 = vmatprep.subr.bf16.mxu1 %v15425_v19 }
 0xa5f   :  { %v10162_v6 = vpop.f32.mrb[84].mxu0  ;;  %10232 = vmatprep.subr.bf16.mxu0 %v15425_v19 }
 0xa60   :  { %v4990_v63 = vpop.f32.mrb[85].mxu0  ;;  %10223 = vmatmul.mubr.msk.bf16.vlgmr.msra.gmra.mrb[96].mxu0 %vm1191_vm2, %v11817_v11 }
 0xa61   :  { %v10163_v50 = vpop.f32.mrb[86].mxu0  ;;  %10234 = vmatprep.mubr.msk.bf16.mxu0 %vm11830_vm3, %v15425_v19 }
 0xa62   :  { %v5048_v18 = vpack.c.bf16 %v10163_v50, %v10162_v6  ;;  %v4993_v31 = vpop.f32.mrb[87].mxu0 }
 0xa63   :  { %v5047_v34 = vpack.c.bf16 %v4993_v31, %v4990_v63 }
 0xa64   :  { %10205 = vmatmul.mubr.msk.bf16.vlgmr.msra.gmra.mrb[164].mxu1 %vm1191_vm2, %v11818_v56 }
 0xa65   :  { %10209 = vmatpush3.bf16.msra.mxu1 %v5043_v13  ;;  %10233 = vmatpush3.bf16.msra.mxu0 %v5047_v34 }
 0xa66   :  { %10210 = vmatprep.mubr.msk.bf16.mxu1 %vm11830_vm3, %v15425_v19  ;;  %10214 = vmatprep.subr.bf16.mxu1 %v15425_v19 }
 0xa67   :  { %v10166_v0 = vpop.f32.mrb[88].mxu0  ;;  %10244 = vmatprep.subr.bf16.mxu0 %v15425_v19 }
 0xa68   :  { %v5006_v25 = vpop.f32.mrb[89].mxu0  ;;  %10235 = vmatmul.mubr.msk.bf16.vlgmr.msra.gmra.mrb[100].mxu0 %vm1191_vm2, %v11819_v40 }
 0xa69   :  { %v10167_v62 = vpop.f32.mrb[90].mxu0  ;;  %10246 = vmatprep.mubr.msk.bf16.mxu0 %vm11830_vm3, %v15425_v19 }
 0xa6a   :  { %v5050_v59 = vpack.c.bf16 %v10167_v62, %v10166_v0  ;;  %v5009_v22 = vpop.f32.mrb[91].mxu0 }
 0xa6b   :  { %v5049_v4 = vpack.c.bf16 %v5009_v22, %v5006_v25 }
 0xa6c   :  { %10211 = vmatmul.mubr.msk.bf16.vlgmr.msra.gmra.mrb[168].mxu1 %vm1191_vm2, %v11820_v51 }
 0xa6d   :  { %10215 = vmatpush3.bf16.msra.mxu1 %v5044_v10  ;;  %10245 = vmatpush3.bf16.msra.mxu0 %v5049_v4 }
 0xa6e   :  { %10216 = vmatprep.mubr.msk.bf16.mxu1 %vm11830_vm3, %v15425_v19  ;;  %10226 = vmatprep.subr.bf16.mxu1 %v15425_v19 }
 0xa6f   :  { %v10170_v17 = vpop.f32.mrb[92].mxu0  ;;  %10256 = vmatprep.subr.bf16.mxu0 %v15425_v19 }
 0xa70   :  { %v5022_v35 = vpop.f32.mrb[93].mxu0  ;;  %10247 = vmatmul.mubr.msk.bf16.vlgmr.msra.gmra.mrb[104].mxu0 %vm1191_vm2, %v11821_v1 }
 0xa71   :  { %v10171_v7 = vpop.f32.mrb[94].mxu0  ;;  %10258 = vmatprep.mubr.msk.bf16.mxu0 %vm11830_vm3, %v15425_v19 }
 0xa72   :  { %v5052_v30 = vpack.c.bf16 %v10171_v7, %v10170_v17  ;;  %v5025_v5 = vpop.f32.mrb[95].mxu0 }
 0xa73   :  { %v5051_v9 = vpack.c.bf16 %v5025_v5, %v5022_v35 }
 0xa74   :  { %10217 = vmatmul.mubr.msk.bf16.vlgmr.msra.gmra.mrb[172].mxu1 %vm1191_vm2, %v11822_v58 }
 0xa75   :  { %10227 = vmatpush3.bf16.msra.mxu1 %v5046_v14  ;;  %10257 = vmatpush3.bf16.msra.mxu0 %v5051_v9 }
 0xa76   :  { %10228 = vmatprep.mubr.msk.bf16.mxu1 %vm11830_vm3, %v15425_v19  ;;  %10238 = vmatprep.subr.bf16.mxu1 %v15425_v19 }
 0xa77   :  { %10996 = vmatprep.subr.msk.bf16.mxu0 %vm2297_vm4, %v11033_v3 }
 0xa78   :  { %10259 = vmatmul.mubr.msk.bf16.vlgmr.msra.gmra.mrb[108].mxu0 %vm1191_vm2, %v11823_v44 }
 0xa79   :  { %10269 = vmatpush3.bf16.msra.mxu0 %v5805_v20 }
 0xa7a   :  { %10997 = vmatprep.subr.msk.bf16.mxu0 %vm2297_vm4, %v11034_v24 }
 0xa7c   :  { %10229 = vmatmul.mubr.msk.bf16.vlgmr.msra.gmra.mrb[176].mxu1 %vm1191_vm2, %v11824_v12 }
 0xa7d   :  { %10239 = vmatpush3.bf16.msra.mxu1 %v5048_v18  ;;  %10240 = vmatprep.mubr.msk.bf16.mxu1 %vm11830_vm3, %v15425_v19 }
 0xa7e   :  { %10250 = vmatprep.subr.bf16.mxu1 %v15425_v19 }
 0xa84   :  { %10241 = vmatmul.mubr.msk.bf16.vlgmr.msra.gmra.mrb[180].mxu1 %vm1191_vm2, %v11825_v49 }
 0xa85   :  { %10251 = vmatpush3.bf16.msra.mxu1 %v5050_v59  ;;  %10252 = vmatprep.mubr.msk.bf16.mxu1 %vm11830_vm3, %v15425_v19 }
 0xa86   :  { %10262 = vmatprep.subr.bf16.mxu1 %v15425_v19 }
 0xa8c   :  { %10253 = vmatmul.mubr.msk.bf16.vlgmr.msra.gmra.mrb[184].mxu1 %vm1191_vm2, %v11826_v32 }
 0xa8d   :  { %10263 = vmatpush3.bf16.msra.mxu1 %v5052_v30  ;;  %10264 = vmatprep.mubr.msk.bf16.mxu1 %vm11830_vm3, %v15425_v19 }
 0xa94   :  { %10265 = vmatmul.mubr.msk.bf16.vlgmr.msra.gmra.mrb[188].mxu1 %vm1191_vm2, %v11827_v33 }
 0xb0f   :  { %v5087_v19 = vpop.f32.mrb[144].mxu1 }
 0xb10   :  { %v10176_v26 = vpop.f32.mrb[145].mxu1  ;;  %v5709_v41 = vmax.f32 %v5087_v19, 0.0 }
 0xb11   :  { %v5090_v23 = vpop.f32.mrb[146].mxu1 }
 0xb12   :  { %v5710_v42 = vmax.f32 %v5090_v23, 0.0  ;;  %v10177_v46 = vpop.f32.mrb[147].mxu1 }
 0xb14   :  { %v13854_v54 = vpack.c.bf16 %v5710_v42, %v5709_v41 }
 0xb17   :  { %v5128_v60 = vpop.f32.mrb[148].mxu1 }
 0xb18   :  { %v10182_v29 = vpop.f32.mrb[149].mxu1  ;;  %v5711_v47 = vmax.f32 %v5128_v60, 0.0 }
 0xb19   :  { %v5131_v37 = vpop.f32.mrb[150].mxu1 }
 0xb1a   :  { %v5712_v57 = vmax.f32 %v5131_v37, 0.0  ;;  %v10183_v48 = vpop.f32.mrb[151].mxu1 }
 0xb1c   :  { %v13856_v8 = vpack.c.bf16 %v5712_v57, %v5711_v47 }
 0xb1e   :  { %10270 = vmatprep.mubr.msk.bf16.mxu0 %vm2254_vm5, %v13856_v8 }
 0xb1f   :  { %v5169_v45 = vpop.f32.mrb[152].mxu1  ;;  %10271 = vmatmul.mubr.msk.bf16.vlgmr.msra.gmra.mrb[112].mxu0 %vm2254_vm5, %v13854_v54 }
 0xb20   :  { %v10188_v38 = vpop.f32.mrb[153].mxu1  ;;  %10274 = vmatprep.mubr.msk.bf16.mxu0 %vm2254_vm5, %v13856_v8  ;;  %10303 = vmatpush3.bf16.msra.mxu0 %v6023_v61  ;;  %v5713_v53 = vmax.f32 %v5169_v45, 0.0 }
 0xb21   :  { %v5172_v21 = vpop.f32.mrb[154].mxu1  ;;  %10998 = vmatprep.subr.msk.bf16.mxu0 %vm2297_vm4, %v13876_v43 }
 0xb22   :  { %v5714_v15 = vmax.f32 %v5172_v21, 0.0  ;;  %v10189_v16 = vpop.f32.mrb[155].mxu1 }
 0xb24   :  { %v13865_v10 = vpack.c.bf16 %v5714_v15, %v5713_v53 }
 0xb27   :  { %v5210_v28 = vpop.f32.mrb[156].mxu1  ;;  %10275 = vmatmul.mubr.msk.bf16.gmra.mrb[116].mxu0 %vm2254_vm5, %v13865_v10 }
 0xb28   :  { %v10194_v13 = vpop.f32.mrb[157].mxu1  ;;  %v5715_v52 = vmax.f32 %v5210_v28, 0.0 }
 0xb29   :  { %v5213_v55 = vpop.f32.mrb[158].mxu1 }
 0xb2a   :  { %v5716_v27 = vmax.f32 %v5213_v55, 0.0  ;;  %v10195_v2 = vpop.f32.mrb[159].mxu1 }
 0xb2c   :  { %v13869_v14 = vpack.c.bf16 %v5716_v27, %v5715_v52 }
 0xb2e   :  { %10278 = vmatprep.mubr.msk.bf16.mxu0 %vm2254_vm5, %v13869_v14 }
 0xb2f   :  { %v5251_v36 = vpop.f32.mrb[160].mxu1 }
 0xb30   :  { %v10200_v39 = vpop.f32.mrb[161].mxu1  ;;  %v5717_v63 = vmax.f32 %v5251_v36, 0.0 }
 0xb31   :  { %v5254_v6 = vpop.f32.mrb[162].mxu1 }
 0xb32   :  { %v5718_v11 = vmax.f32 %v5254_v6, 0.0  ;;  %v10201_v50 = vpop.f32.mrb[163].mxu1 }
 0xb33   :  { %v5415_v18 = vpop.f32.mrb[96].mxu0 }
 0xb34   :  { %v13880_v31 = vpack.c.bf16 %v5718_v11, %v5717_v63  ;;  %v5725_v34 = vmax.f32 %v5415_v18, 0.0  ;;  %v10224_v56 = vpop.f32.mrb[97].mxu0 }
 0xb35   :  { %v5418_v0 = vpop.f32.mrb[98].mxu0 }
 0xb36   :  { %10279 = vmatmul.mubr.msk.bf16.gmra.mrb[120].mxu0 %vm2254_vm5, %v13880_v31  ;;  %v5726_v25 = vmax.f32 %v5418_v0, 0.0  ;;  %v10225_v40 = vpop.f32.mrb[99].mxu0 }
 0xb37   :  { %v5292_v62 = vpop.f32.mrb[164].mxu1 }
 0xb38   :  { %v10206_v59 = vpop.f32.mrb[165].mxu1  ;;  %v13884_v22 = vpack.c.bf16 %v5726_v25, %v5725_v34  ;;  %v5719_v51 = vmax.f32 %v5292_v62, 0.0 }
 0xb39   :  { %v5295_v4 = vpop.f32.mrb[166].mxu1 }
 0xb3a   :  { %v5720_v17 = vmax.f32 %v5295_v4, 0.0  ;;  %v10207_v35 = vpop.f32.mrb[167].mxu1 }
 0xb3b   :  { %v5497_v1 = vpop.f32.mrb[100].mxu0 }
 0xb3c   :  { %v13886_v7 = vpack.c.bf16 %v5720_v17, %v5719_v51  ;;  %v5729_v30 = vmax.f32 %v5497_v1, 0.0  ;;  %v10236_v5 = vpop.f32.mrb[101].mxu0 }
 0xb3d   :  { %v5500_v9 = vpop.f32.mrb[102].mxu0 }
 0xb3e   :  { %10282 = vmatprep.mubr.msk.bf16.mxu0 %vm2254_vm5, %v13886_v7  ;;  %v5730_v58 = vmax.f32 %v5500_v9, 0.0  ;;  %v10237_v44 = vpop.f32.mrb[103].mxu0 }
 0xb3f   :  { %v5333_v12 = vpop.f32.mrb[168].mxu1 }
 0xb40   :  { %v10212_v49 = vpop.f32.mrb[169].mxu1  ;;  %v13890_v32 = vpack.c.bf16 %v5730_v58, %v5729_v30  ;;  %v5721_v3 = vmax.f32 %v5333_v12, 0.0 }
 0xb41   :  { %v5336_v33 = vpop.f32.mrb[170].mxu1  ;;  %v6227_v49 = vsel %vm2297_vm4, %v13876_v43, 0 }
 0xb42   :  { %v5722_v20 = vmax.f32 %v5336_v33, 0.0  ;;  %v10213_v24 = vpop.f32.mrb[171].mxu1 }
 0xb43   :  { %v5579_v19 = vpop.f32.mrb[104].mxu0 }
 0xb44   :  { %v13892_v26 = vpack.c.bf16 %v5722_v20, %v5721_v3  ;;  %v5733_v23 = vmax.f32 %v5579_v19, 0.0  ;;  %v10248_v41 = vpop.f32.mrb[105].mxu0 }
 0xb45   :  { %v5582_v42 = vpop.f32.mrb[106].mxu0 }
 0xb46   :  { %10283 = vmatmul.mubr.msk.bf16.gmra.mrb[124].mxu0 %vm2254_vm5, %v13892_v26  ;;  %v5734_v46 = vmax.f32 %v5582_v42, 0.0  ;;  %v10249_v60 = vpop.f32.mrb[107].mxu0 }
 0xb47   :  { %v5374_v29 = vpop.f32.mrb[172].mxu1 }
 0xb48   :  { %v10218_v37 = vpop.f32.mrb[173].mxu1  ;;  %v13896_v47 = vpack.c.bf16 %v5734_v46, %v5733_v23  ;;  %v5723_v48 = vmax.f32 %v5374_v29, 0.0 }
 0xb49   :  { %v5377_v57 = vpop.f32.mrb[174].mxu1 }
 0xb4a   :  { %v5724_v61 = vmax.f32 %v5377_v57, 0.0  ;;  %v10219_v45 = vpop.f32.mrb[175].mxu1 }
 0xb4b   :  { %v5661_v38 = vpop.f32.mrb[108].mxu0 }
 0xb4c   :  { %v13898_v21 = vpack.c.bf16 %v5724_v61, %v5723_v48  ;;  %v5737_v53 = vmax.f32 %v5661_v38, 0.0  ;;  %v10260_v15 = vpop.f32.mrb[109].mxu0 }
 0xb4d   :  { %v5664_v16 = vpop.f32.mrb[110].mxu0 }
 0xb4e   :  { %v5738_v28 = vmax.f32 %v5664_v16, 0.0  ;;  %v10261_v13 = vpop.f32.mrb[111].mxu0 }
 0xb4f   :  { %v5456_v55 = vpop.f32.mrb[176].mxu1 }
 0xb50   :  { %v10230_v52 = vpop.f32.mrb[177].mxu1  ;;  %v13900_v27 = vpack.c.bf16 %v5738_v28, %v5737_v53  ;;  %v5727_v36 = vmax.f32 %v5456_v55, 0.0 }
 0xb51   :  { %v5459_v2 = vpop.f32.mrb[178].mxu1 }
 0xb52   :  { %v5728_v39 = vmax.f32 %v5459_v2, 0.0  ;;  %v10231_v6 = vpop.f32.mrb[179].mxu1 }
 0xb54   :  { %v5748_v63 = vpack.c.bf16 %v5728_v39, %v5727_v36 }
 0xb56   :  { %10286 = vmatprep.mubr.msk.bf16.mxu0 %vm2254_vm5, %v5748_v63 }
 0xb57   :  { %10287 = vmatmul.mubr.msk.bf16.gmra.mrb[128].mxu0 %vm2254_vm5, %v13884_v22  ;;  %v5538_v11 = vpop.f32.mrb[180].mxu1 }
 0xb58   :  { %10290 = vmatprep.mubr.msk.bf16.mxu0 %vm2254_vm5, %v5748_v63  ;;  %v5731_v50 = vmax.f32 %v5538_v11, 0.0  ;;  %v10242_v18 = vpop.f32.mrb[181].mxu1 }
 0xb59   :  { %v5541_v34 = vpop.f32.mrb[182].mxu1 }
 0xb5a   :  { %v5732_v56 = vmax.f32 %v5541_v34, 0.0  ;;  %v10243_v0 = vpop.f32.mrb[183].mxu1 }
 0xb5c   :  { %v5751_v25 = vpack.c.bf16 %v5732_v56, %v5731_v50 }
 0xb5f   :  { %10291 = vmatmul.mubr.msk.bf16.gmra.mrb[132].mxu0 %vm2254_vm5, %v13890_v32  ;;  %v5620_v40 = vpop.f32.mrb[184].mxu1 }
 0xb60   :  { %10294 = vmatprep.mubr.msk.bf16.mxu0 %vm2254_vm5, %v5751_v25  ;;  %v5735_v62 = vmax.f32 %v5620_v40, 0.0  ;;  %v10254_v59 = vpop.f32.mrb[185].mxu1 }
 0xb61   :  { %v5623_v4 = vpop.f32.mrb[186].mxu1 }
 0xb62   :  { %v5736_v51 = vmax.f32 %v5623_v4, 0.0  ;;  %v10255_v17 = vpop.f32.mrb[187].mxu1 }
 0xb64   :  { %v5753_v35 = vpack.c.bf16 %v5736_v51, %v5735_v62 }
 0xb67   :  { %10295 = vmatmul.mubr.msk.bf16.gmra.mrb[136].mxu0 %vm2254_vm5, %v13896_v47  ;;  %v5702_v1 = vpop.f32.mrb[188].mxu1 }
 0xb68   :  { %10298 = vmatprep.mubr.msk.bf16.mxu0 %vm2254_vm5, %v5753_v35  ;;  %v5739_v30 = vmax.f32 %v5702_v1, 0.0  ;;  %v10266_v5 = vpop.f32.mrb[189].mxu1 }
 0xb69   :  { %v5705_v9 = vpop.f32.mrb[190].mxu1 }
 0xb6a   :  { %v5740_v58 = vmax.f32 %v5705_v9, 0.0  ;;  %v10267_v44 = vpop.f32.mrb[191].mxu1 }
 0xb6c   :  { %v6007_v12 = vpack.c.bf16 %v5740_v58, %v5739_v30 }
 0xb6f   :  { %10299 = vmatmul.mubr.msk.bf16.gmra.mrb[140].mxu0 %vm2254_vm5, %v13900_v27 }
 0xb70   :  { %10304 = vmatprep.mubr.msk.bf16.mxu0 %vm2254_vm5, %v13854_v54  ;;  %v13975_v54 = vld [vmem:[%s15291_s10 + $0x1] ss:$0 sm:$0xff] }
 0xb77   :  { %10305 = vmatmul.mubr.msk.bf16.vlgmr.msra.gmra.mrb[112].mxu0 %vm2254_vm5, %v13856_v8 }
 0xb78   :  { %10308 = vmatprep.mubr.msk.bf16.mxu0 %vm2254_vm5, %v13865_v10  ;;  %10337 = vmatpush3.bf16.msra.mxu0 %v6227_v49 }
 0xb7f   :  { %10309 = vmatmul.mubr.msk.bf16.gmra.mrb[116].mxu0 %vm2254_vm5, %v13869_v14 }
 0xb80   :  { %10312 = vmatprep.mubr.msk.bf16.mxu0 %vm2254_vm5, %v13880_v31 }
 0xb87   :  { %10313 = vmatmul.mubr.msk.bf16.gmra.mrb[120].mxu0 %vm2254_vm5, %v13886_v7 }
 0xb88   :  { %10316 = vmatprep.mubr.msk.bf16.mxu0 %vm2254_vm5, %v13892_v26 }
 0xb8f   :  { %10317 = vmatmul.mubr.msk.bf16.gmra.mrb[124].mxu0 %vm2254_vm5, %v13898_v21 }
 0xb90   :  { %10320 = vmatprep.mubr.msk.bf16.mxu0 %vm2254_vm5, %v13884_v22 }
 0xb97   :  { %10321 = vmatmul.mubr.msk.bf16.gmra.mrb[128].mxu0 %vm2254_vm5, %v5748_v63 }
 0xb98   :  { %10324 = vmatprep.mubr.msk.bf16.mxu0 %vm2254_vm5, %v13890_v32 }
 0xb9f   :  { %10325 = vmatmul.mubr.msk.bf16.gmra.mrb[132].mxu0 %vm2254_vm5, %v5751_v25 }
 0xba0   :  { %10328 = vmatprep.mubr.msk.bf16.mxu0 %vm2254_vm5, %v13896_v47 }
 0xba7   :  { %10329 = vmatmul.mubr.msk.bf16.gmra.mrb[136].mxu0 %vm2254_vm5, %v5753_v35 }
 0xba8   :  { %10332 = vmatprep.mubr.msk.bf16.mxu0 %vm2254_vm5, %v13900_v27 }
 0xbaf   :  { %10333 = vmatmul.mubr.msk.bf16.gmra.mrb[140].mxu0 %vm2254_vm5, %v6007_v12 }
 0xbb0   :  { %10338 = vmatprep.mubr.msk.bf16.mxu0 %vm2254_vm5, %v13856_v8 }
 0xbb7   :  { %10339 = vmatmul.mubr.msk.bf16.vlgmr.msra.gmra.mrb[112].mxu0 %vm2254_vm5, %v13865_v10 }
 0xbb8   :  { %10342 = vmatprep.mubr.msk.bf16.mxu0 %vm2254_vm5, %v13869_v14 }
 0xbbf   :  { %10343 = vmatmul.mubr.msk.bf16.gmra.mrb[116].mxu0 %vm2254_vm5, %v13880_v31 }
 0xbc0   :  { %10346 = vmatprep.mubr.msk.bf16.mxu0 %vm2254_vm5, %v13886_v7 }
 0xbc7   :  { %10347 = vmatmul.mubr.msk.bf16.gmra.mrb[120].mxu0 %vm2254_vm5, %v13892_v26 }
 0xbc8   :  { %10350 = vmatprep.mubr.msk.bf16.mxu0 %vm2254_vm5, %v13898_v21 }
 0xbcf   :  { %10351 = vmatmul.mubr.msk.bf16.gmra.mrb[124].mxu0 %vm2254_vm5, %v13892_v26 }
 0xbd0   :  { %10354 = vmatprep.mubr.msk.bf16.mxu0 %vm2254_vm5, %v5748_v63 }
 0xbd7   :  { %10355 = vmatmul.mubr.msk.bf16.gmra.mrb[128].mxu0 %vm2254_vm5, %v13890_v32 }
 0xbd8   :  { %10358 = vmatprep.mubr.msk.bf16.mxu0 %vm2254_vm5, %v5751_v25 }
 0xbdf   :  { %10359 = vmatmul.mubr.msk.bf16.gmra.mrb[132].mxu0 %vm2254_vm5, %v13896_v47 }
 0xbe0   :  { %10362 = vmatprep.mubr.msk.bf16.mxu0 %vm2254_vm5, %v5753_v35 }
 0xbe7   :  { %10363 = vmatmul.mubr.msk.bf16.gmra.mrb[136].mxu0 %vm2254_vm5, %v13900_v27 }
 0xbe8   :  { %10366 = vmatprep.mubr.msk.bf16.mxu0 %vm2254_vm5, %v6007_v12 }
 0xbef   :  { %10367 = vmatmul.mubr.msk.bf16.gmra.mrb[140].mxu0 %vm2254_vm5, %v13900_v27 }
 0xc8a   :  { %v10340_v8 = vpop.f32.mrb[112].mxu0 }
 0xc8b   :  { %v13978_v10 = vadd.f32 %v10340_v8, %v13975_v54  ;;  %v6263_v14 = vpop.f32.mrb[113].mxu0 }
 0xc8c   :  { %v13981_v43 = vadd.f32 %v13975_v54, %v6263_v14  ;;  %v10341_v31 = vpop.f32.mrb[114].mxu0 }
 0xc8d   :  { %v9167_v22 = vmul.f32 -1.442695, %v13978_v10  ;;  %v13985_v7 = vadd.f32 %v10341_v31, %v13975_v54  ;;  %v6266_v32 = vpop.f32.mrb[115].mxu0 }
 0xc8e   :  { %v9165_v33 = vmul.f32 -1.442695, %v13981_v43  ;;  %v13989_v3 = vadd.f32 %v13975_v54, %v6266_v32 }
 0xc8f   :  { %11424 = vpow2.f32 %v9167_v22  ;;  %v9168_v20 = vmul.f32 -1.442695, %v13985_v7 }
 0xc90   :  { %11426 = vpow2.f32 %v9165_v33  ;;  %v9166_v24 = vmul.f32 -1.442695, %v13989_v3 }
 0xc91   :  { %11428 = vpow2.f32 %v9168_v20 }
 0xc92   :  { %11430 = vpow2.f32 %v9166_v24  ;;  %v10344_v19 = vpop.f32.mrb[116].mxu0 }
 0xc93   :  { %v13994_v26 = vadd.f32 %v10344_v19, %v13975_v54  ;;  %v6279_v23 = vpop.f32.mrb[117].mxu0 }
 0xc94   :  { %v13997_v41 = vadd.f32 %v13975_v54, %v6279_v23  ;;  %v10345_v42 = vpop.f32.mrb[118].mxu0 }
 0xc95   :  { %v9171_v46 = vmul.f32 -1.442695, %v13994_v26  ;;  %v14001_v60 = vadd.f32 %v10345_v42, %v13975_v54  ;;  %v6282_v29 = vpop.f32.mrb[119].mxu0 }
 0xc96   :  { %v9169_v37 = vmul.f32 -1.442695, %v13997_v41  ;;  %v14005_v47 = vadd.f32 %v13975_v54, %v6282_v29 }
 0xc97   :  { %11432 = vpow2.f32 %v9171_v46  ;;  %v9172_v57 = vmul.f32 -1.442695, %v14001_v60 }
 0xc98   :  { %11434 = vpow2.f32 %v9169_v37  ;;  %v9170_v48 = vmul.f32 -1.442695, %v14005_v47 }
 0xc99   :  { %v11425_v61 = vpop.eup %11424  ;;  %11436 = vpow2.f32 %v9172_v57 }
 0xc9a   :  { %v11427_v45 = vpop.eup %11426  ;;  %v6520_v38 = vadd.f32 1.0, %v11425_v61  ;;  %11438 = vpow2.f32 %v9170_v48  ;;  %v10348_v21 = vpop.f32.mrb[120].mxu0 }
 0xc9b   :  { %v11429_v53 = vpop.eup %11428  ;;  %v6518_v15 = vadd.f32 1.0, %v11427_v45  ;;  %v14010_v16 = vadd.f32 %v10348_v21, %v13975_v54  ;;  %v6295_v28 = vpop.f32.mrb[121].mxu0 }
 0xc9c   :  { %v11431_v13 = vpop.eup %11430  ;;  %11440 = vrcp.f32 %v6520_v38  ;;  %v6521_v55 = vadd.f32 1.0, %v11429_v53  ;;  %v14013_v52 = vadd.f32 %v13975_v54, %v6295_v28  ;;  %v10349_v27 = vpop.f32.mrb[122].mxu0 }
 0xc9d   :  { %11442 = vrcp.f32 %v6518_v15  ;;  %v6519_v2 = vadd.f32 1.0, %v11431_v13  ;;  %v9175_v36 = vmul.f32 -1.442695, %v14010_v16  ;;  %v14017_v39 = vadd.f32 %v10349_v27, %v13975_v54  ;;  %v6298_v6 = vpop.f32.mrb[123].mxu0 }
 0xc9e   :  { %11444 = vrcp.f32 %v6521_v55  ;;  %v9173_v63 = vmul.f32 -1.442695, %v14013_v52  ;;  %v14021_v11 = vadd.f32 %v13975_v54, %v6298_v6 }
 0xc9f   :  { %11446 = vrcp.f32 %v6519_v2  ;;  %v9176_v50 = vmul.f32 -1.442695, %v14017_v39 }
 0xca0   :  { %11448 = vpow2.f32 %v9175_v36  ;;  %v9174_v18 = vmul.f32 -1.442695, %v14021_v11 }
 0xca1   :  { %v11433_v34 = vpop.eup %11432  ;;  %11450 = vpow2.f32 %v9173_v63 }
 0xca2   :  { %v11435_v56 = vpop.eup %11434  ;;  %v6524_v0 = vadd.f32 1.0, %v11433_v34  ;;  %11452 = vpow2.f32 %v9176_v50  ;;  %v10352_v25 = vpop.f32.mrb[124].mxu0 }
 0xca3   :  { %v11437_v40 = vpop.eup %11436  ;;  %v6522_v62 = vadd.f32 1.0, %v11435_v56  ;;  %11454 = vpow2.f32 %v9174_v18  ;;  %v14026_v59 = vadd.f32 %v10352_v25, %v13975_v54  ;;  %v6311_v4 = vpop.f32.mrb[125].mxu0 }
 0xca4   :  { %v11439_v51 = vpop.eup %11438  ;;  %11456 = vrcp.f32 %v6524_v0  ;;  %v6525_v17 = vadd.f32 1.0, %v11437_v40  ;;  %v14029_v35 = vadd.f32 %v13975_v54, %v6311_v4  ;;  %v10353_v1 = vpop.f32.mrb[126].mxu0 }
 0xca5   :  { %11458 = vrcp.f32 %v6522_v62  ;;  %v6523_v30 = vadd.f32 1.0, %v11439_v51  ;;  %v9179_v5 = vmul.f32 -1.442695, %v14026_v59  ;;  %v14033_v9 = vadd.f32 %v10353_v1, %v13975_v54  ;;  %v6314_v58 = vpop.f32.mrb[127].mxu0 }
 0xca6   :  { %v11441_v44 = vpop.eup %11440  ;;  %11460 = vrcp.f32 %v6525_v17  ;;  %v9177_v12 = vmul.f32 -1.442695, %v14029_v35  ;;  %v14037_v49 = vadd.f32 %v13975_v54, %v6314_v58 }
 0xca7   :  { %v11443_v8 = vpop.eup %11442  ;;  %11462 = vrcp.f32 %v6523_v30  ;;  %v9180_v14 = vmul.f32 -1.442695, %v14033_v9  ;;  %6650 = vrot.lane.b32.xlu0 %v11441_v44, %s11832_s28 }
 0xca8   :  { %v11445_v31 = vpop.eup %11444  ;;  %11464 = vpow2.f32 %v9179_v5  ;;  %v9178_v22 = vmul.f32 -1.442695, %v14037_v49 }
 0xca9   :  { %v11447_v32 = vpop.eup %11446  ;;  %11466 = vpow2.f32 %v9177_v12  ;;  %6652 = vrot.lane.b32.xlu1 %v11445_v31, %s11832_s28 }
 0xcaa   :  { %v11449_v33 = vpop.eup %11448  ;;  %11468 = vpow2.f32 %v9180_v14  ;;  %v10356_v20 = vpop.f32.mrb[128].mxu0 }
 0xcab   :  { %v11451_v24 = vpop.eup %11450  ;;  %v6528_v19 = vadd.f32 1.0, %v11449_v33  ;;  %11470 = vpow2.f32 %v9178_v22  ;;  %v14044_v23 = vadd.f32 %v10356_v20, %v13975_v54  ;;  %6646 = vrot.lane.b32.xlu0 %v11443_v8, %s11832_s28  ;;  %v6327_v42 = vpop.f32.mrb[129].mxu0 }
 0xcac   :  { %v11453_v46 = vpop.eup %11452  ;;  %v6526_v29 = vadd.f32 1.0, %v11451_v24  ;;  %v14048_v37 = vadd.f32 %v13975_v54, %v6327_v42  ;;  %v10357_v57 = vpop.f32.mrb[130].mxu0 }
 0xcad   :  { %v11455_v48 = vpop.eup %11454  ;;  %11472 = vrcp.f32 %v6528_v19  ;;  %v6529_v61 = vadd.f32 1.0, %v11453_v46  ;;  %v9183_v45 = vmul.f32 -1.442695, %v14044_v23  ;;  %v14052_v38 = vadd.f32 %v10357_v57, %v13975_v54  ;;  %6648 = vrot.lane.b32.xlu1 %v11447_v32, %s11832_s28  ;;  %v6330_v21 = vpop.f32.mrb[131].mxu0 }
 0xcae   :  { %v11457_v53 = vpop.eup %11456  ;;  %11474 = vrcp.f32 %v6526_v29  ;;  %v6527_v15 = vadd.f32 1.0, %v11455_v48  ;;  %v9181_v28 = vmul.f32 -1.442695, %v14048_v37  ;;  %v14057_v13 = vadd.f32 %v13975_v54, %v6330_v21 }
 0xcaf   :  { %v11459_v55 = vpop.eup %11458  ;;  %11476 = vrcp.f32 %v6529_v61  ;;  %v9184_v27 = vmul.f32 -1.442695, %v14052_v38  ;;  %6658 = vrot.lane.b32.xlu0 %v11457_v53, %s11832_s28 }
 0xcb0   :  { %v11461_v2 = vpop.eup %11460  ;;  %11478 = vrcp.f32 %v6527_v15  ;;  %v9182_v36 = vmul.f32 -1.442695, %v14057_v13 }
 0xcb1   :  { %v11463_v6 = vpop.eup %11462  ;;  %11480 = vpow2.f32 %v9183_v45  ;;  %6660 = vrot.lane.b32.xlu1 %v11461_v2, %s11832_s28 }
 0xcb2   :  { %v11465_v63 = vpop.eup %11464  ;;  %11482 = vpow2.f32 %v9181_v28  ;;  %v10360_v50 = vpop.f32.mrb[132].mxu0 }
 0xcb3   :  { %v11467_v18 = vpop.eup %11466  ;;  %v6532_v34 = vadd.f32 1.0, %v11465_v63  ;;  %11484 = vpow2.f32 %v9184_v27  ;;  %v14064_v56 = vadd.f32 %v10360_v50, %v13975_v54  ;;  %6654 = vrot.lane.b32.xlu0 %v11459_v55, %s11832_s28  ;;  %v6343_v0 = vpop.f32.mrb[133].mxu0 }
 0xcb4   :  { %v11469_v25 = vpop.eup %11468  ;;  %v6530_v40 = vadd.f32 1.0, %v11467_v18  ;;  %11486 = vpow2.f32 %v9182_v36  ;;  %v14068_v62 = vadd.f32 %v13975_v54, %v6343_v0  ;;  %v10361_v4 = vpop.f32.mrb[134].mxu0 }
 0xcb5   :  { %v11471_v51 = vpop.eup %11470  ;;  %11488 = vrcp.f32 %v6532_v34  ;;  %v6533_v17 = vadd.f32 1.0, %v11469_v25  ;;  %v9187_v1 = vmul.f32 -1.442695, %v14064_v56  ;;  %v14072_v30 = vadd.f32 %v10361_v4, %v13975_v54  ;;  %6656 = vrot.lane.b32.xlu1 %v11463_v6, %s11832_s28  ;;  %v6346_v5 = vpop.f32.mrb[135].mxu0 }
 0xcb6   :  { %11490 = vrcp.f32 %v6530_v40  ;;  %v6531_v58 = vadd.f32 1.0, %v11471_v51  ;;  %v9185_v44 = vmul.f32 -1.442695, %v14068_v62  ;;  %v14077_v12 = vadd.f32 %v13975_v54, %v6346_v5 }
 0xcb7   :  { %v11473_v8 = vpop.eup %11472  ;;  %11492 = vrcp.f32 %v6533_v17  ;;  %v9188_v14 = vmul.f32 -1.442695, %v14072_v30 }
 0xcb8   :  { %v11475_v31 = vpop.eup %11474  ;;  %11494 = vrcp.f32 %v6531_v58  ;;  %v9186_v22 = vmul.f32 -1.442695, %v14077_v12  ;;  %6666 = vrot.lane.b32.xlu0 %v11473_v8, %s11832_s28 }
 0xcb9   :  { %v11477_v32 = vpop.eup %11476  ;;  %11496 = vpow2.f32 %v9187_v1 }
 0xcba   :  { %v11479_v33 = vpop.eup %11478  ;;  %11498 = vpow2.f32 %v9185_v44  ;;  %6668 = vrot.lane.b32.xlu1 %v11477_v32, %s11832_s28  ;;  %v10364_v20 = vpop.f32.mrb[136].mxu0 }
 0xcbb   :  { %v11481_v24 = vpop.eup %11480  ;;  %11500 = vpow2.f32 %v9188_v14  ;;  %v14084_v19 = vadd.f32 %v10364_v20, %v13975_v54  ;;  %v6359_v42 = vpop.f32.mrb[137].mxu0 }
 0xcbc   :  { %v11483_v46 = vpop.eup %11482  ;;  %v6536_v29 = vadd.f32 1.0, %v11481_v24  ;;  %11502 = vpow2.f32 %v9186_v22  ;;  %6662 = vrot.lane.b32.xlu0 %v11475_v31, %s11832_s28  ;;  %v14088_v57 = vadd.f32 %v13975_v54, %v6359_v42  ;;  %v10365_v48 = vpop.f32.mrb[138].mxu0 }
 0xcbd   :  { %v11485_v61 = vpop.eup %11484  ;;  %v6534_v45 = vadd.f32 1.0, %v11483_v46  ;;  %v14091_v21 = vadd.f32 %v10365_v48, %v13975_v54  ;;  %v6362_v53 = vpop.f32.mrb[139].mxu0  ;;  %v9191_v55 = vmul.f32 -1.442695, %v14084_v19 }
 0xcbe   :  { %v11487_v15 = vpop.eup %11486  ;;  %11504 = vrcp.f32 %v6536_v29  ;;  %v6537_v28 = vadd.f32 1.0, %v11485_v61  ;;  %6664 = vrot.lane.b32.xlu1 %v11479_v33, %s11832_s28  ;;  %v14096_v27 = vadd.f32 %v13975_v54, %v6362_v53  ;;  %v9189_v6 = vmul.f32 -1.442695, %v14088_v57 }
 0xcbf   :  { %v11489_v2 = vpop.eup %11488  ;;  %11506 = vrcp.f32 %v6534_v45  ;;  %v6535_v36 = vadd.f32 1.0, %v11487_v15  ;;  %v9192_v50 = vmul.f32 -1.442695, %v14091_v21 }
 0xcc0   :  { %v11491_v63 = vpop.eup %11490  ;;  %11508 = vrcp.f32 %v6537_v28  ;;  %6674 = vrot.lane.b32.xlu0 %v11489_v2, %s11832_s28  ;;  %v9190_v34 = vmul.f32 -1.442695, %v14096_v27 }
 0xcc1   :  { %v11493_v18 = vpop.eup %11492  ;;  %11510 = vrcp.f32 %v6535_v36 }
 0xcc2   :  { %v11495_v0 = vpop.eup %11494  ;;  %11512 = vpow2.f32 %v9191_v55  ;;  %6676 = vrot.lane.b32.xlu1 %v11493_v18, %s11832_s28  ;;  %v10368_v25 = vpop.f32.mrb[140].mxu0 }
 0xcc3   :  { %v11497_v40 = vpop.eup %11496  ;;  %11514 = vpow2.f32 %v9189_v6  ;;  %v14104_v4 = vadd.f32 %v10368_v25, %v13975_v54  ;;  %v6375_v51 = vpop.f32.mrb[141].mxu0 }
 0xcc4   :  { %v11499_v17 = vpop.eup %11498  ;;  %v6540_v1 = vadd.f32 1.0, %v11497_v40  ;;  %11516 = vpow2.f32 %v9192_v50  ;;  %6670 = vrot.lane.b32.xlu0 %v11491_v63, %s11832_s28  ;;  %v14108_v5 = vadd.f32 %v13975_v54, %v6375_v51  ;;  %v10369_v58 = vpop.f32.mrb[142].mxu0 }
 0xcc5   :  { %v11501_v44 = vpop.eup %11500  ;;  %v6538_v8 = vadd.f32 1.0, %v11499_v17  ;;  %11518 = vpow2.f32 %v9190_v34  ;;  %v14111_v14 = vadd.f32 %v10369_v58, %v13975_v54  ;;  %v6378_v31 = vpop.f32.mrb[143].mxu0  ;;  %v9195_v33 = vmul.f32 -1.442695, %v14104_v4 }
 0xcc6   :  { %v11503_v22 = vpop.eup %11502  ;;  %11520 = vrcp.f32 %v6540_v1  ;;  %v6541_v32 = vadd.f32 1.0, %v11501_v44  ;;  %6672 = vrot.lane.b32.xlu1 %v11495_v0, %s11832_s28  ;;  %v14116_v20 = vadd.f32 %v13975_v54, %v6378_v31  ;;  %v9193_v42 = vmul.f32 -1.442695, %v14108_v5 }
 0xcc7   :  { %11522 = vrcp.f32 %v6538_v8  ;;  %v6539_v24 = vadd.f32 1.0, %v11503_v22  ;;  %v9196_v29 = vmul.f32 -1.442695, %v14111_v14 }
 0xcc8   :  { %v11505_v46 = vpop.eup %11504  ;;  %11524 = vrcp.f32 %v6541_v32  ;;  %v9194_v61 = vmul.f32 -1.442695, %v14116_v20 }
 0xcc9   :  { %v11507_v48 = vpop.eup %11506  ;;  %11526 = vrcp.f32 %v6539_v24  ;;  %6682 = vrot.lane.b32.xlu0 %v11505_v46, %s11832_s28 }
 0xcca   :  { %v11509_v45 = vpop.eup %11508  ;;  %11528 = vpow2.f32 %v9195_v33 }
 0xccb   :  { %v11511_v53 = vpop.eup %11510  ;;  %11530 = vpow2.f32 %v9193_v42  ;;  %6684 = vrot.lane.b32.xlu1 %v11509_v45, %s11832_s28 }
 0xccc   :  { %v11513_v54 = vpop.eup %11512  ;;  %11532 = vpow2.f32 %v9196_v29 }
 0xccd   :  { %v11515_v15 = vpop.eup %11514  ;;  %v6544_v28 = vadd.f32 1.0, %v11513_v54  ;;  %11534 = vpow2.f32 %v9194_v61  ;;  %6678 = vrot.lane.b32.xlu0 %v11507_v48, %s11832_s28 }
 0xcce   :  { %v11517_v55 = vpop.eup %11516  ;;  %v6542_v36 = vadd.f32 1.0, %v11515_v15 }
 0xccf   :  { %v11519_v2 = vpop.eup %11518  ;;  %11536 = vrcp.f32 %v6544_v28  ;;  %v6545_v6 = vadd.f32 1.0, %v11517_v55  ;;  %6680 = vrot.lane.b32.xlu1 %v11511_v53, %s11832_s28 }
 0xcd0   :  { %v11521_v63 = vpop.eup %11520  ;;  %v6543_v18 = vadd.f32 1.0, %v11519_v2 }
 0xcd1   :  { %v11523_v50 = vpop.eup %11522  ;;  %11538 = vrcp.f32 %v6545_v6  ;;  %6690 = vrot.lane.b32.xlu0 %v11521_v63, %s11832_s28 }
 0xcd2   :  { %v11525_v34 = vpop.eup %11524  ;;  %11540 = vrcp.f32 %v6542_v36 }
 0xcd3   :  { %v11527_v0 = vpop.eup %11526  ;;  %6692 = vrot.lane.b32.xlu1 %v11525_v34, %s11832_s28  ;;  %11542 = vrcp.f32 %v6543_v18 }
 0xcd4   :  { %v11529_v25 = vpop.eup %11528 }
 0xcd5   :  { %v11531_v40 = vpop.eup %11530  ;;  %v6548_v51 = vadd.f32 1.0, %v11529_v25  ;;  %6686 = vrot.lane.b32.xlu0 %v11523_v50, %s11832_s28 }
 0xcd6   :  { %v11533_v17 = vpop.eup %11532  ;;  %v6546_v58 = vadd.f32 1.0, %v11531_v40 }
 0xcd7   :  { %v11535_v1 = vpop.eup %11534  ;;  %11544 = vrcp.f32 %v6548_v51  ;;  %v6549_v44 = vadd.f32 1.0, %v11533_v17  ;;  %6688 = vrot.lane.b32.xlu1 %v11527_v0, %s11832_s28 }
 0xcd8   :  { %v6547_v31 = vadd.f32 1.0, %v11535_v1 }
 0xcd9   :  { %v11537_v8 = vpop.eup %11536  ;;  %11546 = vrcp.f32 %v6549_v44 }
 0xcda   :  { %6698 = vrot.lane.b32.xlu0 %v11537_v8, %s11832_s28  ;;  %11548 = vrcp.f32 %v6546_v58 }
 0xcdb   :  { %v11539_v22 = vpop.eup %11538  ;;  %11550 = vrcp.f32 %v6547_v31 }
 0xcdc   :  { %6700 = vrot.lane.b32.xlu1 %v11539_v22, %s11832_s28  ;;  %v11541_v32 = vpop.eup %11540 }
 0xcdd   :  { %v11543_v33 = vpop.eup %11542 }
 0xcde   :  { %6694 = vrot.lane.b32.xlu0 %v11541_v32, %s11832_s28 }
 0xce0   :  { %6696 = vrot.lane.b32.xlu1 %v11543_v33, %s11832_s28 }
 0xce1   :  { %v11545_v24 = vpop.eup %11544 }
 0xce2   :  { %6706 = vrot.lane.b32.xlu0 %v11545_v24, %s11832_s28 }
 0xce3   :  { %v11547_v42 = vpop.eup %11546 }
 0xce4   :  { %6708 = vrot.lane.b32.xlu1 %v11547_v42, %s11832_s28  ;;  %v11549_v46 = vpop.eup %11548 }
 0xce5   :  { %v11551_v29 = vpop.eup %11550 }
 0xce6   :  { %6702 = vrot.lane.b32.xlu0 %v11549_v46, %s11832_s28 }
 0xce8   :  { %6704 = vrot.lane.b32.xlu1 %v11551_v29, %s11832_s28 }
 0xd19   :  { %v6651_v48 = vpop.permute.xlu0 %6650 }
 0xd1a   :  { %v14138_v61 = vadd.f32 %v13978_v10, %v6651_v48 }
 0xd1b   :  { %v6653_v45 = vpop.permute.xlu1 %6652 }
 0xd1c   :  { %v15370_v53 = vmax.f32 %v14138_v61, 0.0  ;;  %v14142_v15 = vadd.f32 %v13985_v7, %v6653_v45 }
 0xd1d   :  { %v6647_v54 = vpop.permute.xlu0 %6646 }
 0xd1e   :  { %v14145_v28 = vadd.f32 %v13981_v43, %v6647_v54  ;;  %v6812_v55 = vsel %vm133_vm1, %v15370_v53, 0.0  ;;  %v15367_v63 = vmax.f32 %v14142_v15, 0.0 }
 0xd1f   :  { %v6649_v2 = vpop.permute.xlu1 %6648  ;;  %6813 = vadd.xlane.f32.xlu0 %v6812_v55 }
 0xd20   :  { %v15371_v36 = vmax.f32 %v14145_v28, 0.0  ;;  %v14152_v10 = vadd.f32 %v13989_v3, %v6649_v2  ;;  %v6815_v51 = vsel %vm133_vm1, %v15367_v63, 0.0 }
 0xd21   :  { %v6659_v6 = vpop.permute.xlu0 %6658 }
 0xd22   :  { %v15368_v7 = vmax.f32 %v14152_v10, 0.0  ;;  %v14157_v50 = vadd.f32 %v13994_v26, %v6659_v6  ;;  %v6806_v43 = vsel %vm133_vm1, %v15371_v36, 0.0 }
 0xd23   :  { %v6661_v18 = vpop.permute.xlu1 %6660  ;;  %6807 = vadd.xlane.f32.xlu0 %v6806_v43 }
 0xd24   :  { %v15366_v34 = vmax.f32 %v14157_v50, 0.0  ;;  %v14164_v0 = vadd.f32 %v14001_v60, %v6661_v18  ;;  %v6809_v3 = vsel %vm133_vm1, %v15368_v7, 0.0 }
 0xd25   :  { %v6655_v25 = vpop.permute.xlu0 %6654  ;;  %6810 = vadd.xlane.f32.xlu1 %v6809_v3 }
 0xd26   :  { %v15363_v26 = vmax.f32 %v14164_v0, 0.0  ;;  %v14171_v40 = vadd.f32 %v13997_v41, %v6655_v25  ;;  %v6824_v58 = vsel %vm133_vm1, %v15366_v34, 0.0 }
 0xd27   :  { %v6657_v17 = vpop.permute.xlu1 %6656  ;;  %6816 = vadd.xlane.f32.xlu0 %v6815_v51 }
 0xd28   :  { %v15369_v60 = vmax.f32 %v14171_v40, 0.0  ;;  %v14178_v1 = vadd.f32 %v14005_v47, %v6657_v17  ;;  %v6827_v8 = vsel %vm133_vm1, %v15363_v26, 0.0 }
 0xd29   :  { %6825 = vadd.xlane.f32.xlu1 %v6824_v58 }
 0xd2a   :  { %v15365_v44 = vmax.f32 %v14178_v1, 0.0  ;;  %v6667_v41 = vpop.permute.xlu0 %6666  ;;  %v6818_v47 = vsel %vm133_vm1, %v15369_v60, 0.0 }
 0xd2b   :  { %v14188_v31 = vadd.f32 %v14010_v16, %v6667_v41  ;;  %6828 = vadd.xlane.f32.xlu0 %v6827_v8 }
 0xd2c   :  { %v6669_v22 = vpop.permute.xlu1 %6668  ;;  %v6821_v42 = vsel %vm133_vm1, %v15365_v44, 0.0 }
 0xd2d   :  { %v15362_v32 = vmax.f32 %v14188_v31, 0.0  ;;  %v14195_v33 = vadd.f32 %v14017_v39, %v6669_v22  ;;  %6819 = vadd.xlane.f32.xlu1 %v6818_v47 }
 0xd2e   :  { %v6663_v24 = vpop.permute.xlu0 %6662 }
 0xd2f   :  { %v15359_v16 = vmax.f32 %v14195_v33, 0.0  ;;  %v14202_v46 = vadd.f32 %v14013_v52, %v6663_v24  ;;  %6822 = vadd.xlane.f32.xlu0 %v6821_v42  ;;  %v6836_v48 = vsel %vm133_vm1, %v15362_v32, 0.0 }
 0xd30   :  { %v6665_v29 = vpop.permute.xlu1 %6664 }
 0xd31   :  { %v15364_v39 = vmax.f32 %v14202_v46, 0.0  ;;  %v14209_v45 = vadd.f32 %v14021_v11, %v6665_v29  ;;  %6837 = vadd.xlane.f32.xlu1 %v6836_v48  ;;  %v6839_v55 = vsel %vm133_vm1, %v15359_v16, 0.0 }
 0xd32   :  { %v6675_v54 = vpop.permute.xlu0 %6674 }
 0xd33   :  { %v15361_v52 = vmax.f32 %v14209_v45, 0.0  ;;  %v14216_v2 = vadd.f32 %v14026_v59, %v6675_v54  ;;  %6840 = vadd.xlane.f32.xlu0 %v6839_v55  ;;  %v6830_v43 = vsel %vm133_vm1, %v15364_v39, 0.0 }
 0xd34   :  { %v6677_v6 = vpop.permute.xlu1 %6676 }
 0xd35   :  { %v15357_v11 = vmax.f32 %v14216_v2, 0.0  ;;  %v14223_v18 = vadd.f32 %v14033_v9, %v6677_v6  ;;  %6831 = vadd.xlane.f32.xlu1 %v6830_v43  ;;  %v6833_v25 = vsel %vm133_vm1, %v15361_v52, 0.0 }
 0xd36   :  { %v6671_v3 = vpop.permute.xlu0 %6670 }
 0xd37   :  { %v15356_v59 = vmax.f32 %v14223_v18, 0.0  ;;  %v14230_v51 = vadd.f32 %v14029_v35, %v6671_v3  ;;  %6834 = vadd.xlane.f32.xlu0 %v6833_v25  ;;  %v6848_v58 = vsel %vm133_vm1, %v15357_v11, 0.0 }
 0xd38   :  { %v6673_v17 = vpop.permute.xlu1 %6672 }
 0xd39   :  { %v15360_v9 = vmax.f32 %v14230_v51, 0.0  ;;  %v14237_v41 = vadd.f32 %v14037_v49, %v6673_v17  ;;  %6849 = vadd.xlane.f32.xlu1 %v6848_v58  ;;  %v6851_v8 = vsel %vm133_vm1, %v15356_v59, 0.0 }
 0xd3b   :  { %v15358_v22 = vmax.f32 %v14237_v41, 0.0  ;;  %v6683_v35 = vpop.permute.xlu0 %6682  ;;  %6852 = vadd.xlane.f32.xlu0 %v6851_v8  ;;  %v6842_v24 = vsel %vm133_vm1, %v15360_v9, 0.0 }
 0xd3c   :  { %v14244_v47 = vadd.f32 %v14044_v23, %v6683_v35 }
 0xd3d   :  { %v6685_v42 = vpop.permute.xlu1 %6684  ;;  %6843 = vadd.xlane.f32.xlu1 %v6842_v24  ;;  %v6845_v48 = vsel %vm133_vm1, %v15358_v22, 0.0 }
 0xd3e   :  { %v15352_v49 = vmax.f32 %v14244_v47, 0.0  ;;  %v14251_v29 = vadd.f32 %v14052_v38, %v6685_v42 }
 0xd3f   :  { %v6679_v54 = vpop.permute.xlu0 %6678  ;;  %6846 = vadd.xlane.f32.xlu0 %v6845_v48 }
 0xd40   :  { %v15350_v23 = vmax.f32 %v14251_v29, 0.0  ;;  %v14258_v55 = vadd.f32 %v14048_v37, %v6679_v54  ;;  %v6860_v6 = vsel %vm133_vm1, %v15352_v49, 0.0 }
 0xd41   :  { %v6681_v43 = vpop.permute.xlu1 %6680  ;;  %6861 = vadd.xlane.f32.xlu1 %v6860_v6 }
 0xd42   :  { %v15354_v38 = vmax.f32 %v14258_v55, 0.0  ;;  %v14265_v3 = vadd.f32 %v14057_v13, %v6681_v43  ;;  %v6863_v25 = vsel %vm133_vm1, %v15350_v23, 0.0 }
 0xd43   :  { %v6691_v17 = vpop.permute.xlu0 %6690  ;;  %6864 = vadd.xlane.f32.xlu0 %v6863_v25 }
 0xd44   :  { %v15353_v37 = vmax.f32 %v14265_v3, 0.0  ;;  %v14272_v58 = vadd.f32 %v14064_v56, %v6691_v17  ;;  %v6854_v8 = vsel %vm133_vm1, %v15354_v38, 0.0 }
 0xd45   :  { %v6693_v35 = vpop.permute.xlu1 %6692  ;;  %6855 = vadd.xlane.f32.xlu1 %v6854_v8 }
 0xd46   :  { %v15341_v13 = vmax.f32 %v14272_v58, 0.0  ;;  %v14279_v24 = vadd.f32 %v14072_v30, %v6693_v35  ;;  %v6857_v42 = vsel %vm133_vm1, %v15353_v37, 0.0 }
 0xd47   :  { %v6687_v48 = vpop.permute.xlu0 %6686  ;;  %6858 = vadd.xlane.f32.xlu0 %v6857_v42 }
 0xd48   :  { %v15340_v56 = vmax.f32 %v14279_v24, 0.0  ;;  %v14286_v54 = vadd.f32 %v14068_v62, %v6687_v48  ;;  %v6872_v6 = vsel %vm133_vm1, %v15341_v13, 0.0 }
 0xd49   :  { %v6689_v43 = vpop.permute.xlu1 %6688  ;;  %6873 = vadd.xlane.f32.xlu1 %v6872_v6 }
 0xd4a   :  { %v15349_v30 = vmax.f32 %v14286_v54, 0.0  ;;  %v14293_v25 = vadd.f32 %v14077_v12, %v6689_v43  ;;  %v6875_v17 = vsel %vm133_vm1, %v15340_v56, 0.0 }
 0xd4b   :  { %6876 = vadd.xlane.f32.xlu0 %v6875_v17 }
 0xd4c   :  { %v15342_v8 = vmax.f32 %v14293_v25, 0.0  ;;  %v6699_v62 = vpop.permute.xlu0 %6698  ;;  %v6866_v35 = vsel %vm133_vm1, %v15349_v30, 0.0 }
 0xd4d   :  { %v14303_v42 = vadd.f32 %v14084_v19, %v6699_v62  ;;  %6867 = vadd.xlane.f32.xlu1 %v6866_v35 }
 0xd4e   :  { %v6701_v48 = vpop.permute.xlu1 %6700  ;;  %v6869_v12 = vsel %vm133_vm1, %v15342_v8, 0.0 }
 0xd4f   :  { %v15344_v6 = vmax.f32 %v14303_v42, 0.0  ;;  %v14310_v43 = vadd.f32 %v14091_v21, %v6701_v48  ;;  %6870 = vadd.xlane.f32.xlu0 %v6869_v12 }
 0xd50   :  { %v6695_v17 = vpop.permute.xlu0 %6694 }
 0xd51   :  { %v15343_v56 = vmax.f32 %v14310_v43, 0.0  ;;  %v14314_v13 = vadd.f32 %v14088_v57, %v6695_v17  ;;  %v6884_v19 = vsel %vm133_vm1, %v15344_v6, 0.0 }
 0xd52   :  { %v6697_v62 = vpop.permute.xlu1 %6696  ;;  %6885 = vadd.xlane.f32.xlu1 %v6884_v19 }
 0xd53   :  { %v15345_v35 = vmax.f32 %v14314_v13, 0.0  ;;  %v14321_v8 = vadd.f32 %v14096_v27, %v6697_v62  ;;  %v6887_v21 = vsel %vm133_vm1, %v15343_v56, 0.0 }
 0xd54   :  { %v6707_v48 = vpop.permute.xlu0 %6706  ;;  %6888 = vadd.xlane.f32.xlu0 %v6887_v21 }
 0xd55   :  { %v15346_v57 = vmax.f32 %v14321_v8, 0.0  ;;  %v14328_v12 = vadd.f32 %v14104_v4, %v6707_v48  ;;  %v6878_v17 = vsel %vm133_vm1, %v15345_v35, 0.0 }
 0xd56   :  { %v6709_v19 = vpop.permute.xlu1 %6708  ;;  %6879 = vadd.xlane.f32.xlu1 %v6878_v17 }
 0xd57   :  { %v15347_v27 = vmax.f32 %v14328_v12, 0.0  ;;  %v6881_v62 = vsel %vm133_vm1, %v15346_v57, 0.0  ;;  %v14344_v6 = vadd.f32 %v14111_v14, %v6709_v19 }
 0xd58   :  { %v6703_v56 = vpop.permute.xlu0 %6702  ;;  %6882 = vadd.xlane.f32.xlu0 %v6881_v62 }
 0xd59   :  { %v14338_v21 = vadd.f32 %v14108_v5, %v6703_v56  ;;  %v6896_v4 = vsel %vm133_vm1, %v15347_v27, 0.0  ;;  %v15355_v56 = vmax.f32 %v14344_v6, 0.0 }
 0xd5a   :  { %v6705_v48 = vpop.permute.xlu1 %6704  ;;  %6897 = vadd.xlane.f32.xlu1 %v6896_v4 }
 0xd5b   :  { %v15348_v17 = vmax.f32 %v14338_v21, 0.0  ;;  %v14348_v35 = vadd.f32 %v14116_v20, %v6705_v48  ;;  %v6899_v14 = vsel %vm133_vm1, %v15355_v56, 0.0  ;;  %v7163_v20 = vld [vmem:[%s15294_s12] sm:$0xff] }
 0xd5d   :  { %v15351_v57 = vmax.f32 %v14348_v35, 0.0  ;;  %v6890_v5 = vsel %vm133_vm1, %v15348_v17, 0.0 }
 0xd5e   :  { %6891 = vadd.xlane.f32.xlu1 %v6890_v5 }
 0xd5f   :  { %v6893_v62 = vsel %vm133_vm1, %v15351_v57, 0.0 }
 0xd60   :  { %6894 = vadd.xlane.f32.xlu0 %v6893_v62 }
 0xd64   :  { %6900 = vadd.xlane.f32.xlu0 %v6899_v14 }
 0xd6f   :  { %7167 = vperm.xlu1 %11008, %v7163_v20  }
 0xdac   :  { %v6814_v19 = vpop.xlane.xlu0 %6813 }
 0xdb0   :  { %v6808_v4 = vpop.xlane.xlu0 %6807 }
 0xdb1   :  { %v6902_v38 = vadd.f32 %v6814_v19, %v6808_v4 }
 0xdb2   :  { %v6811_v48 = vpop.xlane.xlu1 %6810 }
 0xdb4   :  { %v6817_v5 = vpop.xlane.xlu0 %6816 }
 0xdb5   :  { %v6903_v11 = vadd.f32 %v6817_v5, %v6811_v48 }
 0xdb6   :  { %v6826_v27 = vpop.xlane.xlu1 %6825 }
 0xdb8   :  { %v6829_v17 = vpop.xlane.xlu0 %6828 }
 0xdba   :  { %v6820_v30 = vpop.xlane.xlu1 %6819 }
 0xdbb   :  { %v6904_v14 = vadd.f32 %v6902_v38, %v6820_v30 }
 0xdbc   :  { %v6823_v23 = vpop.xlane.xlu0 %6822 }
 0xdbd   :  { %v6905_v16 = vadd.f32 %v6903_v11, %v6823_v23  ;;  %v6906_v20 = vadd.f32 %v6904_v14, %v6826_v27 }
 0xdbe   :  { %v6838_v57 = vpop.xlane.xlu1 %6837 }
 0xdbf   :  { %v6907_v26 = vadd.f32 %v6905_v16, %v6829_v17 }
 0xdc0   :  { %v6841_v62 = vpop.xlane.xlu0 %6840 }
 0xdc2   :  { %v6832_v49 = vpop.xlane.xlu1 %6831 }
 0xdc3   :  { %v6908_v52 = vadd.f32 %v6906_v20, %v6832_v49 }
 0xdc4   :  { %v6835_v37 = vpop.xlane.xlu0 %6834 }
 0xdc5   :  { %v6909_v44 = vadd.f32 %v6907_v26, %v6835_v37  ;;  %v6910_v34 = vadd.f32 %v6908_v52, %v6838_v57 }
 0xdc6   :  { %v6850_v56 = vpop.xlane.xlu1 %6849 }
 0xdc7   :  { %v6911_v53 = vadd.f32 %v6909_v44, %v6841_v62 }
 0xdc8   :  { %v6853_v59 = vpop.xlane.xlu0 %6852 }
 0xdca   :  { %v6844_v22 = vpop.xlane.xlu1 %6843 }
 0xdcb   :  { %v6912_v7 = vadd.f32 %v6910_v34, %v6844_v22 }
 0xdcc   :  { %v6847_v9 = vpop.xlane.xlu0 %6846 }
 0xdcd   :  { %v6913_v19 = vadd.f32 %v6911_v53, %v6847_v9  ;;  %v6914_v4 = vadd.f32 %v6912_v7, %v6850_v56 }
 0xdce   :  { %v6862_v32 = vpop.xlane.xlu1 %6861 }
 0xdcf   :  { %v6915_v5 = vadd.f32 %v6913_v19, %v6853_v59 }
 0xdd0   :  { %v6865_v39 = vpop.xlane.xlu0 %6864 }
 0xdd2   :  { %v6856_v63 = vpop.xlane.xlu1 %6855 }
 0xdd3   :  { %v6916_v30 = vadd.f32 %v6914_v4, %v6856_v63  ;;  %v15427_v4 = vmax.f32 %v14138_v61, 0.0 }
 0xdd4   :  { %v6859_v60 = vpop.xlane.xlu0 %6858 }
 0xdd5   :  { %v6917_v23 = vadd.f32 %v6915_v5, %v6859_v60  ;;  %v6918_v27 = vadd.f32 %v6916_v30, %v6862_v32  ;;  %v15428_v5 = vmax.f32 %v14171_v40, 0.0 }
 0xdd6   :  { %v6874_v36 = vpop.xlane.xlu1 %6873 }
 0xdd7   :  { %v6919_v17 = vadd.f32 %v6917_v23, %v6865_v39  ;;  %v15426_v39 = vmax.f32 %v14145_v28, 0.0  ;;  %v15429_v28 = vmax.f32 %v14152_v10, 0.0  ;;  %v15431_v10 = vmax.f32 %v14157_v50, 0.0 }
 0xdd8   :  { %v6877_v38 = vpop.xlane.xlu0 %6876  ;;  %v15433_v50 = vmax.f32 %v14202_v46, 0.0  ;;  %v15435_v46 = vmax.f32 %v14188_v31, 0.0  ;;  %v15437_v31 = vmax.f32 %v14230_v51, 0.0 }
 0xdda   :  { %v6868_v48 = vpop.xlane.xlu1 %6867 }
 0xddb   :  { %v6920_v14 = vadd.f32 %v6918_v27, %v6868_v48 }
 0xddc   :  { %v6871_v11 = vpop.xlane.xlu0 %6870 }
 0xddd   :  { %v6921_v52 = vadd.f32 %v6919_v17, %v6871_v11  ;;  %v6922_v37 = vadd.f32 %v6920_v14, %v6874_v36 }
 0xddf   :  { %v6886_v49 = vpop.xlane.xlu1 %6885  ;;  %v6923_v57 = vadd.f32 %v6921_v52, %v6877_v38 }
 0xde1   :  { %v6889_v16 = vpop.xlane.xlu0 %6888 }
 0xde3   :  { %v6880_v26 = vpop.xlane.xlu1 %6879 }
 0xde4   :  { %v6924_v34 = vadd.f32 %v6922_v37, %v6880_v26  ;;  %v15432_v37 = vmax.f32 %v14178_v1, 0.0  ;;  %v15434_v1 = vmax.f32 %v14164_v0, 0.0  ;;  %v15436_v0 = vmax.f32 %v14209_v45, 0.0 }
 0xde5   :  { %v6883_v22 = vpop.xlane.xlu0 %6882  ;;  %v15438_v45 = vmax.f32 %v14195_v33, 0.0  ;;  %v15440_v33 = vmax.f32 %v14216_v2, 0.0  ;;  %v15442_v2 = vmax.f32 %v14258_v55, 0.0 }
 0xde6   :  { %v6925_v53 = vadd.f32 %v6923_v57, %v6883_v22  ;;  %v6926_v7 = vadd.f32 %v6924_v34, %v6886_v49  ;;  %v15430_v49 = vmax.f32 %v14142_v15, 0.0 }
 0xde7   :  { %v6898_v44 = vpop.xlane.xlu1 %6897 }
 0xde8   :  { %v6927_v59 = vadd.f32 %v6925_v53, %v6889_v16 }
 0xdeb   :  { %v6892_v9 = vpop.xlane.xlu1 %6891 }
 0xdec   :  { %v6928_v63 = vadd.f32 %v6926_v7, %v6892_v9 }
 0xded   :  { %v6895_v56 = vpop.xlane.xlu0 %6894 }
 0xdee   :  { %v6930_v62 = vadd.f32 %v6928_v63, %v6898_v44  ;;  %v6929_v60 = vadd.f32 %v6927_v59, %v6895_v56 }
 0xdf0   :  { %v14364_v32 = vmul.f32 0.0078125, %v6930_v62 }
 0xdf1   :  { %v6901_v20 = vpop.xlane.xlu0 %6900 }
 0xdf2   :  { %v6931_v19 = vadd.f32 %v6929_v60, %v6901_v20  ;;  %v14369_v36 = vsub.f32 %v15426_v39, %v14364_v32  ;;  %v14374_v38 = vsub.f32 %v15427_v4, %v14364_v32  ;;  %v14383_v11 = vsub.f32 %v15428_v5, %v14364_v32 }
 0xdf3   :  { %v14405_v17 = vsub.f32 %v15431_v10, %v14364_v32  ;;  %v14421_v44 = vsub.f32 %v15433_v50, %v14364_v32  ;;  %v14437_v56 = vsub.f32 %v15435_v46, %v14364_v32  ;;  %v14453_v39 = vsub.f32 %v15437_v31, %v14364_v32 }
 0xdf4   :  { %v14376_v30 = vmul.f32 0.0078125, %v6931_v19  ;;  %v6967_v48 = vmul.f32 %v14369_v36, %v14369_v36  ;;  %v6969_v61 = vmul.f32 %v14374_v38, %v14374_v38  ;;  %v6971_v16 = vmul.f32 %v14383_v11, %v14383_v11 }
 0xdf5   :  { %v6973_v22 = vmul.f32 %v14405_v17, %v14405_v17  ;;  %v6975_v63 = vmul.f32 %v14421_v44, %v14421_v44  ;;  %v6977_v19 = vmul.f32 %v14437_v56, %v14437_v56  ;;  %v6979_v51 = vmul.f32 %v14453_v39, %v14453_v39 }
 0xdf6   :  { %v6999_v23 = vsel %vm133_vm1, %v6967_v48, 0.0  ;;  %v14389_v27 = vsub.f32 %v15429_v28, %v14376_v30  ;;  %v14396_v14 = vsub.f32 %v15430_v49, %v14376_v30  ;;  %v7005_v52 = vsel %vm133_vm1, %v6969_v61, 0.0 }
 0xdf7   :  { %7000 = vadd.xlane.f32.xlu1 %v6999_v23  ;;  %v14414_v34 = vsub.f32 %v15432_v37, %v14376_v30  ;;  %v7011_v53 = vsel %vm133_vm1, %v6971_v16, 0.0  ;;  %v14430_v9 = vsub.f32 %v15434_v1, %v14376_v30  ;;  %v7017_v62 = vsel %vm133_vm1, %v6973_v22, 0.0 }
 0xdf8   :  { %v6968_v40 = vmul.f32 %v14389_v27, %v14389_v27  ;;  %v6970_v15 = vmul.f32 %v14396_v14, %v14396_v14  ;;  %v14446_v20 = vsub.f32 %v15436_v0, %v14376_v30  ;;  %v7023_v48 = vsel %vm133_vm1, %v6975_v63, 0.0 }
 0xdf9   :  { %v6972_v7 = vmul.f32 %v14414_v34, %v14414_v34  ;;  %v6974_v60 = vmul.f32 %v14430_v9, %v14430_v9  ;;  %v14462_v23 = vsub.f32 %v15438_v45, %v14376_v30  ;;  %v7029_v28 = vsel %vm133_vm1, %v6977_v19, 0.0 }
 0xdfa   :  { %v7002_v26 = vsel %vm133_vm1, %v6968_v40, 0.0  ;;  %v7008_v57 = vsel %vm133_vm1, %v6970_v15, 0.0  ;;  %v6976_v5 = vmul.f32 %v14446_v20, %v14446_v20  ;;  %v15439_v40 = vmax.f32 %v14237_v41, 0.0 }
 0xdfb   :  { %7003 = vadd.xlane.f32.xlu0 %v7002_v26  ;;  %7006 = vadd.xlane.f32.xlu1 %v7005_v52  ;;  %v7014_v59 = vsel %vm133_vm1, %v6972_v7, 0.0  ;;  %v7020_v4 = vsel %vm133_vm1, %v6974_v60, 0.0  ;;  %v6978_v49 = vmul.f32 %v14462_v23, %v14462_v23  ;;  %v14478_v10 = vsub.f32 %v15440_v33, %v14364_v32 }
 0xdfc   :  { %v7026_v61 = vsel %vm133_vm1, %v6976_v5, 0.0  ;;  %v14473_v16 = vsub.f32 %v15439_v40, %v14376_v30  ;;  %v7035_v26 = vsel %vm133_vm1, %v6979_v51, 0.0  ;;  %v15441_v52 = vmax.f32 %v14223_v18, 0.0 }
 0xdfd   :  { %v7032_v37 = vsel %vm133_vm1, %v6978_v49, 0.0  ;;  %v6981_v22 = vmul.f32 %v14478_v10, %v14478_v10  ;;  %v14494_v50 = vsub.f32 %v15442_v2, %v14364_v32  ;;  %v15443_v18 = vmax.f32 %v14265_v3, 0.0 }
 0xdfe   :  { %v14484_v15 = vsub.f32 %v15441_v52, %v14376_v30  ;;  %v6980_v41 = vmul.f32 %v14473_v16, %v14473_v16  ;;  %v15446_v19 = vmax.f32 %v14286_v54, 0.0  ;;  %v15448_v45 = vmax.f32 %v14293_v25, 0.0 }
 0xdff   :  { %7009 = vadd.xlane.f32.xlu0 %v7008_v57  ;;  %7012 = vadd.xlane.f32.xlu1 %v7011_v53  ;;  %v14499_v57 = vsub.f32 %v15443_v18, %v14376_v30  ;;  %v15444_v53 = vmax.f32 %v14244_v47, 0.0  ;;  %v7041_v63 = vsel %vm133_vm1, %v6981_v22, 0.0  ;;  %v6983_v46 = vmul.f32 %v14494_v50, %v14494_v50 }
 0xe00   :  { %v7038_v1 = vsel %vm133_vm1, %v6980_v41, 0.0  ;;  %v6982_v55 = vmul.f32 %v14484_v15, %v14484_v15  ;;  %v15445_v47 = vmax.f32 %v14251_v29, 0.0  ;;  %v14526_v31 = vsub.f32 %v15446_v19, %v14364_v32 }
 0xe01   :  { %v14504_v7 = vsub.f32 %v15444_v53, %v14364_v32  ;;  %v6984_v3 = vmul.f32 %v14499_v57, %v14499_v57  ;;  %v7047_v60 = vsel %vm133_vm1, %v6983_v46, 0.0  ;;  %v15449_v54 = vmax.f32 %v14272_v58, 0.0 }
 0xe02   :  { %15447 = vst [vmem:[#allocation4_spill] sm:$0xff] %v14526_v31  ;;  %v6987_v5 = vmul.f32 %v14526_v31, %v14526_v31  ;;  %v15451_v49 = vmax.f32 %v14279_v24, 0.0  ;;  %v15453_v58 = vmax.f32 %v14314_v13, 0.0  ;;  %v15455_v24 = vmax.f32 %v14321_v8, 0.0 }
 0xe03   :  { %7015 = vadd.xlane.f32.xlu0 %v7014_v59  ;;  %7018 = vadd.xlane.f32.xlu1 %v7017_v62  ;;  %v14517_v59 = vsub.f32 %v15445_v47, %v14376_v30  ;;  %v7044_v62 = vsel %vm133_vm1, %v6982_v55, 0.0  ;;  %v6985_v0 = vmul.f32 %v14504_v7, %v14504_v7  ;;  %v14542_v51 = vsub.f32 %v15449_v54, %v14364_v32 }
 0xe04   :  { %v14548_v40 = vsub.f32 %v15451_v49, %v14376_v30  ;;  %v7059_v33 = vsel %vm133_vm1, %v6987_v5, 0.0  ;;  %v14558_v52 = vsub.f32 %v15453_v58, %v14364_v32  ;;  %v15457_v41 = vmax.f32 %v14303_v42, 0.0 }
 0xe05   :  { %v6986_v29 = vmul.f32 %v14517_v59, %v14517_v59  ;;  %15450 = vst [vmem:[#allocation2_spill] sm:$0xff] %v14542_v51  ;;  %v15459_v42 = vmax.f32 %v14310_v43, 0.0  ;;  %v15462_v19 = vmax.f32 %v14348_v35, 0.0  ;;  %v15464_v35 = vmax.f32 %v14344_v6, 0.0  ;;  %v9197_v6 = vld [vmem:[%s15294_s12 + $0x10] sm:$0xff] }
 0xe06   :  { %15452 = vst [vmem:[#allocation3_spill] sm:$0xff] %v14548_v40  ;;  %15454 = vst [vmem:[#allocation6_spill] sm:$0xff] %v14558_v52  ;;  %v14568_v22 = vsub.f32 %v15457_v41, %v14364_v32  ;;  %v6990_v13 = vmul.f32 %v14548_v40, %v14548_v40  ;;  %v6991_v53 = vmul.f32 %v14558_v52, %v14558_v52 }
 0xe07   :  { %7021 = vadd.xlane.f32.xlu0 %v7020_v4  ;;  %7024 = vadd.xlane.f32.xlu1 %v7023_v48  ;;  %v7050_v4 = vsel %vm133_vm1, %v6984_v3, 0.0  ;;  %v7053_v48 = vsel %vm133_vm1, %v6985_v0, 0.0  ;;  %v15461_v3 = vmax.f32 %v14338_v21, 0.0  ;;  %v15463_v21 = vmax.f32 %v14328_v12, 0.0 }
 0xe08   :  { %15458 = vst [vmem:[#allocation5_spill] sm:$0xff] %v14568_v22  ;;  %v7071_v55 = vsel %vm133_vm1, %v6991_v53, 0.0  ;;  %v6993_v46 = vmul.f32 %v14568_v22, %v14568_v22 }
 0xe09   :  { %v14590_v47 = vsub.f32 %v15461_v3, %v14364_v32 }
 0xe0b   :  { %7027 = vadd.xlane.f32.xlu0 %v7026_v61  ;;  %7030 = vadd.xlane.f32.xlu1 %v7029_v28  ;;  %v14537_v28 = vsub.f32 %v15448_v45, %v14376_v30  ;;  %v7056_v61 = vsel %vm133_vm1, %v6986_v29, 0.0  ;;  %v6995_v0 = vmul.f32 %v14590_v47, %v14590_v47  ;;  %v14606_v29 = vsub.f32 %v15463_v21, %v14364_v32 }
 0xe0d   :  { %v6988_v25 = vmul.f32 %v14537_v28, %v14537_v28  ;;  %v7083_v5 = vsel %vm133_vm1, %v6995_v0, 0.0  ;;  %v6997_v54 = vmul.f32 %v14606_v29, %v14606_v29 }
 0xe0f   :  { %7033 = vadd.xlane.f32.xlu0 %v7032_v37  ;;  %7036 = vadd.xlane.f32.xlu1 %v7035_v26  ;;  %v6989_v26 = vmul.f32 %v14542_v51, %v14542_v51  ;;  %v14563_v37 = vsub.f32 %v15455_v24, %v14376_v30  ;;  %v7062_v2 = vsel %vm133_vm1, %v6988_v25, 0.0  ;;  %v7089_v32 = vsel %vm133_vm1, %v6997_v54, 0.0  ;;  %v7164_v25 = vld [vmem:[%s15294_s12 + $0x8] sm:$0xff]  ;;  %v14638_v24 = vpop.permute.xlu1 %7167 }
 0xe11   :  { %15456 = vst [vmem:[#allocation8_spill] sm:$0xff] %v14563_v37  ;;  %v7065_v18 = vsel %vm133_vm1, %v6989_v26, 0.0  ;;  %v6992_v8 = vmul.f32 %v14563_v37, %v14563_v37  ;;  %v7268_v26 = vld [vmem:[%s15295_s9] sm:$0xf] }
 0xe12   :  { %10999 = vmatprep.subr.msk.bf16.mxu1 %vm176_vm0, %v7268_v26  ;;  %v7312_v58 = vsel %vm176_vm0, %v7268_v26, 0 }
 0xe13   :  { %7039 = vadd.xlane.f32.xlu0 %v7038_v1  ;;  %7042 = vadd.xlane.f32.xlu1 %v7041_v63  ;;  %v14581_v1 = vsub.f32 %v15459_v42, %v14376_v30  ;;  %v7068_v63 = vsel %vm133_vm1, %v6990_v13, 0.0 }
 0xe14   :  { %10371 = vmatpush3.bf16.msra.mxu1 %v7312_v58 }
 0xe15   :  { %15460 = vst [vmem:[#allocation7_spill] sm:$0xff] %v14581_v1  ;;  %v6994_v43 = vmul.f32 %v14581_v1, %v14581_v1 }
 0xe17   :  { %7045 = vadd.xlane.f32.xlu0 %v7044_v62  ;;  %7048 = vadd.xlane.f32.xlu1 %v7047_v60  ;;  %v7074_v62 = vsel %vm133_vm1, %v6992_v8, 0.0  ;;  %v7077_v60 = vsel %vm133_vm1, %v6993_v46, 0.0 }
 0xe1b   :  { %7051 = vadd.xlane.f32.xlu0 %v7050_v4  ;;  %7054 = vadd.xlane.f32.xlu1 %v7053_v48  ;;  %v14601_v4 = vsub.f32 %v15462_v19, %v14376_v30  ;;  %v7080_v48 = vsel %vm133_vm1, %v6994_v43, 0.0 }
 0xe1d   :  { %v6996_v45 = vmul.f32 %v14601_v4, %v14601_v4 }
 0xe1f   :  { %7057 = vadd.xlane.f32.xlu0 %v7056_v61  ;;  %7060 = vadd.xlane.f32.xlu1 %v7059_v33  ;;  %v14617_v61 = vsub.f32 %v15464_v35, %v14376_v30  ;;  %v7086_v12 = vsel %vm133_vm1, %v6996_v45, 0.0  ;;  %v9198_v30 = vld [vmem:[%s15294_s12 + $0x18] sm:$0xff] }
 0xe21   :  { %v6998_v49 = vmul.f32 %v14617_v61, %v14617_v61 }
 0xe23   :  { %7063 = vadd.xlane.f32.xlu0 %v7062_v2  ;;  %7066 = vadd.xlane.f32.xlu1 %v7065_v18  ;;  %v7092_v33 = vsel %vm133_vm1, %v6998_v49, 0.0 }
 0xe27   :  { %7069 = vadd.xlane.f32.xlu0 %v7068_v63  ;;  %7072 = vadd.xlane.f32.xlu1 %v7071_v55 }
 0xe2b   :  { %7075 = vadd.xlane.f32.xlu0 %v7074_v62  ;;  %7078 = vadd.xlane.f32.xlu1 %v7077_v60  ;;  %v14643_v62 = vld [vmem:[%s15295_s9 + $0x4] sm:$0xf] }
 0xe2c   :  { %11000 = vmatprep.subr.msk.bf16.mxu1 %vm176_vm0, %v14643_v62 }
 0xe2f   :  { %7081 = vadd.xlane.f32.xlu0 %v7080_v48  ;;  %7084 = vadd.xlane.f32.xlu1 %v7083_v5 }
 0xe33   :  { %7087 = vadd.xlane.f32.xlu0 %v7086_v12  ;;  %7090 = vadd.xlane.f32.xlu1 %v7089_v32 }
 0xe37   :  { %7093 = vadd.xlane.f32.xlu0 %v7092_v33 }
 0xe44   :  { %7212 = vperm.xlu1 %11008, %v9197_v6  }
 0xe48   :  { %7217 = vperm.xlu1 %11008, %v9198_v30  }
 0xe4d   :  { %7172 = vperm.xlu0 %11009, %v7164_v25  }
 0xe84   :  { %v7001_v41 = vpop.xlane.xlu1 %7000 }
 0xe88   :  { %v7004_v2 = vpop.xlane.xlu0 %7003  ;;  %v7007_v18 = vpop.xlane.xlu1 %7006 }
 0xe89   :  { %v7095_v5 = vadd.f32 %v7007_v18, %v7001_v41 }
 0xe8c   :  { %v7010_v13 = vpop.xlane.xlu0 %7009  ;;  %v7013_v53 = vpop.xlane.xlu1 %7012 }
 0xe8d   :  { %v7097_v45 = vadd.f32 %v7095_v5, %v7013_v53  ;;  %v7096_v12 = vadd.f32 %v7010_v13, %v7004_v2 }
 0xe90   :  { %v7016_v8 = vpop.xlane.xlu0 %7015  ;;  %v7019_v42 = vpop.xlane.xlu1 %7018 }
 0xe91   :  { %v7099_v32 = vadd.f32 %v7097_v45, %v7019_v42  ;;  %v7098_v49 = vadd.f32 %v7096_v12, %v7016_v8 }
 0xe94   :  { %v7022_v63 = vpop.xlane.xlu0 %7021  ;;  %v7025_v55 = vpop.xlane.xlu1 %7024 }
 0xe95   :  { %v7101_v33 = vadd.f32 %v7099_v32, %v7025_v55  ;;  %v7100_v25 = vadd.f32 %v7098_v49, %v7022_v63 }
 0xe98   :  { %v7028_v46 = vpop.xlane.xlu0 %7027  ;;  %v7031_v3 = vpop.xlane.xlu1 %7030 }
 0xe99   :  { %v7103_v26 = vadd.f32 %v7101_v33, %v7031_v3  ;;  %v7102_v58 = vadd.f32 %v7100_v25, %v7028_v46 }
 0xe9c   :  { %v7034_v43 = vpop.xlane.xlu0 %7033  ;;  %v7037_v60 = vpop.xlane.xlu1 %7036 }
 0xe9d   :  { %v7105_v22 = vadd.f32 %v7103_v26, %v7037_v60  ;;  %v7104_v37 = vadd.f32 %v7102_v58, %v7034_v43 }
 0xea0   :  { %v7040_v0 = vpop.xlane.xlu0 %7039  ;;  %v7043_v19 = vpop.xlane.xlu1 %7042 }
 0xea1   :  { %v7107_v51 = vadd.f32 %v7105_v22, %v7043_v19  ;;  %v7106_v31 = vadd.f32 %v7104_v37, %v7040_v0 }
 0xea4   :  { %v7046_v21 = vpop.xlane.xlu0 %7045  ;;  %v7049_v48 = vpop.xlane.xlu1 %7048 }
 0xea5   :  { %v7109_v40 = vadd.f32 %v7107_v51, %v7049_v48  ;;  %v7108_v53 = vadd.f32 %v7106_v31, %v7046_v21 }
 0xea8   :  { %v7052_v54 = vpop.xlane.xlu0 %7051  ;;  %v7055_v35 = vpop.xlane.xlu1 %7054 }
 0xea9   :  { %v7111_v5 = vadd.f32 %v7109_v40, %v7055_v35  ;;  %v7110_v2 = vadd.f32 %v7108_v53, %v7052_v54 }
 0xeac   :  { %v7058_v6 = vpop.xlane.xlu0 %7057  ;;  %v7061_v30 = vpop.xlane.xlu1 %7060 }
 0xead   :  { %v7113_v13 = vadd.f32 %v7111_v5, %v7061_v30  ;;  %v7112_v55 = vadd.f32 %v7110_v2, %v7058_v6 }
 0xeb0   :  { %v7064_v52 = vpop.xlane.xlu0 %7063  ;;  %v7067_v1 = vpop.xlane.xlu1 %7066 }
 0xeb1   :  { %v7115_v45 = vadd.f32 %v7113_v13, %v7067_v1  ;;  %v7114_v63 = vadd.f32 %v7112_v55, %v7064_v52 }
 0xeb4   :  { %v7070_v41 = vpop.xlane.xlu0 %7069  ;;  %v7073_v18 = vpop.xlane.xlu1 %7072 }
 0xeb5   :  { %v7117_v3 = vadd.f32 %v7115_v45, %v7073_v18  ;;  %v7116_v12 = vadd.f32 %v7114_v63, %v7070_v41 }
 0xeb8   :  { %v7076_v8 = vpop.xlane.xlu0 %7075  ;;  %v7079_v42 = vpop.xlane.xlu1 %7078 }
 0xeb9   :  { %v7119_v32 = vadd.f32 %v7117_v3, %v7079_v42  ;;  %v7118_v43 = vadd.f32 %v7116_v12, %v7076_v8 }
 0xebc   :  { %v7082_v46 = vpop.xlane.xlu0 %7081  ;;  %v7085_v60 = vpop.xlane.xlu1 %7084 }
 0xebd   :  { %v7121_v22 = vadd.f32 %v7119_v32, %v7085_v60  ;;  %v7120_v0 = vadd.f32 %v7118_v43, %v7082_v46  ;;  %v14697_v46 = vld [vmem:[%s15295_s9 + $0x8] sm:$0xf] }
 0xec0   :  { %v7088_v37 = vpop.xlane.xlu0 %7087  ;;  %v7091_v51 = vpop.xlane.xlu1 %7090 }
 0xec1   :  { %v7123_v19 = vadd.f32 %v7121_v22, %v7091_v51  ;;  %v7122_v31 = vadd.f32 %v7120_v0, %v7088_v37 }
 0xec3   :  { %v7125_v40 = vmul.f32 0.0078125, %v7123_v19 }
 0xec4   :  { %v7094_v21 = vpop.xlane.xlu0 %7093  ;;  %v14653_v6 = vpop.permute.xlu1 %7212 }
 0xec5   :  { %v7127_v48 = vadd.f32 1e-05, %v7125_v40  ;;  %v7124_v54 = vadd.f32 %v7122_v31, %v7094_v21 }
 0xec7   :  { %11552 = vrsqrt.f32 %v7127_v48  ;;  %v7126_v35 = vmul.f32 0.0078125, %v7124_v54 }
 0xec8   :  { %v14667_v53 = vpop.permute.xlu1 %7217 }
 0xec9   :  { %v7128_v1 = vadd.f32 1e-05, %v7126_v35 }
 0xecb   :  { %11554 = vrsqrt.f32 %v7128_v1 }
 0xecc   :  { %v14663_v18 = vpop.permute.xlu0 %7172 }
 0xed1   :  { %v14647_v52 = vpop.eup %11552 }
 0xed2   :  { %v7133_v49 = vmul.f32 %v14647_v52, %v14374_v38  ;;  %v7131_v33 = vmul.f32 %v14647_v52, %v14369_v36  ;;  %v7135_v42 = vmul.f32 %v14647_v52, %v14383_v11  ;;  %v7137_v63 = vmul.f32 %v14647_v52, %v14405_v17 }
 0xed3   :  { %v7141_v37 = vmul.f32 %v14647_v52, %v14437_v56  ;;  %v7159_v31 = vmul.f32 %v14647_v52, %v14590_v47  ;;  %v7143_v40 = vmul.f32 %v14647_v52, %v14453_v39  ;;  %v7149_v21 = vmul.f32 %v14647_v52, %v14504_v7 }
 0xed4   :  { %v7177_v25 = vmul.f32 %v14638_v24, %v7133_v49  ;;  %v7175_v41 = vmul.f32 %v14638_v24, %v7131_v33  ;;  %v7179_v11 = vmul.f32 %v14638_v24, %v7135_v42  ;;  %v7181_v17 = vmul.f32 %v14638_v24, %v7137_v63 }
 0xed5   :  { %v14655_v30 = vpop.eup %11554  ;;  %v7185_v56 = vmul.f32 %v14638_v24, %v7141_v37  ;;  %v7203_v54 = vmul.f32 %v14638_v24, %v7159_v31  ;;  %v7145_v35 = vmul.f32 %v14647_v52, %v14478_v10  ;;  %v7161_v49 = vmul.f32 %v14647_v52, %v14606_v29 }
 0xed6   :  { %v7134_v26 = vmul.f32 %v14655_v30, %v14396_v14  ;;  %v7132_v58 = vmul.f32 %v14655_v30, %v14389_v27  ;;  %v7222_v5 = vadd.f32 %v14653_v6, %v7177_v25  ;;  %v7136_v2 = vmul.f32 %v14655_v30, %v14414_v34 }
 0xed7   :  { %v7220_v13 = vadd.f32 %v14653_v6, %v7175_v41  ;;  %v7138_v8 = vmul.f32 %v14655_v30, %v14430_v9  ;;  %v7524_v9 = vsel %vm176_vm0, %v14643_v62, 0  ;;  %v7139_v62 = vmul.f32 %v14647_v52, %v14421_v44 }
 0xed8   :  { %v7178_v38 = vmul.f32 %v14663_v18, %v7134_v26  ;;  %v7176_v36 = vmul.f32 %v14663_v18, %v7132_v58  ;;  %v7180_v34 = vmul.f32 %v14663_v18, %v7136_v2  ;;  %v7140_v12 = vmul.f32 %v14655_v30, %v14446_v20 }
 0xed9   :  { %v7182_v3 = vmul.f32 %v14663_v18, %v7138_v8  ;;  %v7142_v43 = vmul.f32 %v14655_v30, %v14462_v23  ;;  %v7224_v22 = vadd.f32 %v14653_v6, %v7179_v11  ;;  %v7226_v51 = vadd.f32 %v14653_v6, %v7181_v17 }
 0xeda   :  { %v7223_v14 = vadd.f32 %v14667_v53, %v7178_v38  ;;  %v7221_v27 = vadd.f32 %v14667_v53, %v7176_v36  ;;  %v7225_v60 = vadd.f32 %v14667_v53, %v7180_v34  ;;  %v7183_v20 = vmul.f32 %v14638_v24, %v7139_v62 }
 0xedb   :  { %v7227_v32 = vadd.f32 %v14667_v53, %v7182_v3  ;;  %v7184_v0 = vmul.f32 %v14663_v18, %v7140_v12  ;;  %v7186_v23 = vmul.f32 %v14663_v18, %v7142_v43  ;;  %v7160_v48 = vmul.f32 %v14655_v30, %v14601_v4 }
 0xedc   :  { %v14679_v55 = vpack.c.bf16 %v7223_v14, %v7222_v5  ;;  %v14681_v45 = vpack.c.bf16 %v7221_v27, %v7220_v13  ;;  %v14716_v44 = vpack.c.bf16 %v7225_v60, %v7224_v22  ;;  %v7144_v47 = vmul.f32 %v14655_v30, %v14473_v16 }
 0xedd   :  { %v14720_v19 = vpack.c.bf16 %v7227_v32, %v7226_v51  ;;  %v7146_v39 = vmul.f32 %v14655_v30, %v14484_v15  ;;  %v7228_v1 = vadd.f32 %v14653_v6, %v7183_v20  ;;  %v7229_v7 = vadd.f32 %v14667_v53, %v7184_v0  ;;  %v15465_v51 = vld [vmem:[#allocation3_spill] sm:$0xff] }
 0xede   :  { %10372 = vmatprep.mubr.msk.bf16.mxu1 %vm133_vm1, %v14679_v55  ;;  %v7204_v4 = vmul.f32 %v14663_v18, %v7160_v48  ;;  %v7231_v33 = vadd.f32 %v14667_v53, %v7186_v23  ;;  %v7150_v16 = vmul.f32 %v14655_v30, %v14517_v59  ;;  %v7189_v25 = vmul.f32 %v14638_v24, %v7145_v35  ;;  %v15466_v23 = vld [vmem:[#allocation4_spill] sm:$0xff] }
 0xedf   :  { %10373 = vmatmul.mubr.msk.bf16.vlgmr.msra.gmra.mrb[192].mxu1 %vm133_vm1, %v14681_v45  ;;  %v7190_v10 = vmul.f32 %v14663_v18, %v7146_v39  ;;  %v7248_v15 = vadd.f32 %v14653_v6, %v7203_v54  ;;  %v7162_v58 = vmul.f32 %v14655_v30, %v14617_v61  ;;  %v7205_v41 = vmul.f32 %v14638_v24, %v7161_v49  ;;  %v15468_v39 = vld [vmem:[#allocation8_spill] sm:$0xff] }
 0xee0   :  { %10376 = vmatprep.mubr.msk.bf16.mxu1 %vm133_vm1, %v14679_v55  ;;  %10405 = vmatpush3.bf16.msra.mxu1 %v7524_v9  ;;  %v7249_v26 = vadd.f32 %v14667_v53, %v7204_v4  ;;  %v7230_v29 = vadd.f32 %v14653_v6, %v7185_v56  ;;  %v7188_v38 = vmul.f32 %v14663_v18, %v7144_v47  ;;  %v15467_v56 = vld [vmem:[#allocation2_spill] sm:$0xff]  ;;  %v15469_v4 = vld [vmem:[#allocation7_spill] sm:$0xff] }
 0xee1   :  { %11001 = vmatprep.subr.msk.bf16.mxu1 %vm176_vm0, %v14697_v46  ;;  %v7234_v36 = vadd.f32 %v14653_v6, %v7189_v25  ;;  %v7235_v59 = vadd.f32 %v14667_v53, %v7190_v10  ;;  %v14762_v5 = vpack.c.bf16 %v7229_v7, %v7228_v1  ;;  %v7206_v14 = vmul.f32 %v14663_v18, %v7162_v58 }
 0xee2   :  { %v14764_v2 = vpack.c.bf16 %v7249_v26, %v7248_v15  ;;  %v7250_v13 = vadd.f32 %v14653_v6, %v7205_v41  ;;  %v14768_v27 = vpack.c.bf16 %v7231_v33, %v7230_v29  ;;  %v7194_v61 = vmul.f32 %v14663_v18, %v7150_v16  ;;  %v15470_v16 = vld [vmem:[#allocation6_spill] sm:$0xff]  ;;  %v15471_v15 = vld [vmem:[#allocation5_spill] sm:$0xff] }
 0xee3   :  { %v14771_v8 = vpack.c.bf16 %v7235_v59, %v7234_v36  ;;  %v7187_v42 = vmul.f32 %v14638_v24, %v7143_v40  ;;  %v7251_v63 = vadd.f32 %v14667_v53, %v7206_v14  ;;  %v7193_v34 = vmul.f32 %v14638_v24, %v7149_v21 }
 0xee4   :  { %v7233_v3 = vadd.f32 %v14667_v53, %v7188_v38  ;;  %v7148_v9 = vmul.f32 %v14655_v30, %v14499_v57  ;;  %v7239_v17 = vadd.f32 %v14667_v53, %v7194_v61  ;;  %v7147_v62 = vmul.f32 %v14647_v52, %v14494_v50 }
 0xee5   :  { %v14783_v11 = vpack.c.bf16 %v7251_v63, %v7250_v13  ;;  %v7232_v60 = vadd.f32 %v14653_v6, %v7187_v42  ;;  %v7238_v12 = vadd.f32 %v14653_v6, %v7193_v34  ;;  %v7152_v50 = vmul.f32 %v14655_v30, %v14537_v28 }
 0xee6   :  { %v7192_v43 = vmul.f32 %v14663_v18, %v7148_v9  ;;  %v7191_v57 = vmul.f32 %v14638_v24, %v7147_v62  ;;  %v7154_v20 = vmul.f32 %v14655_v30, %v15465_v51  ;;  %v7151_v31 = vmul.f32 %v14647_v52, %v15466_v23 }
 0xee7   :  { %10377 = vmatmul.mubr.msk.bf16.gmra.mrb[196].mxu1 %vm133_vm1, %v14716_v44  ;;  %v14790_v32 = vpack.c.bf16 %v7233_v3, %v7232_v60  ;;  %v14793_v22 = vpack.c.bf16 %v7239_v17, %v7238_v12  ;;  %v7153_v40 = vmul.f32 %v14647_v52, %v15467_v56  ;;  %v7196_v48 = vmul.f32 %v14663_v18, %v7152_v50 }
 0xee8   :  { %10380 = vmatprep.mubr.msk.bf16.mxu1 %vm133_vm1, %v14720_v19  ;;  %v7237_v37 = vadd.f32 %v14667_v53, %v7192_v43  ;;  %v7236_v0 = vadd.f32 %v14653_v6, %v7191_v57  ;;  %v7198_v47 = vmul.f32 %v14663_v18, %v7154_v20  ;;  %v7195_v28 = vmul.f32 %v14638_v24, %v7151_v31 }
 0xee9   :  { %v7197_v54 = vmul.f32 %v14638_v24, %v7153_v40  ;;  %v7241_v35 = vadd.f32 %v14667_v53, %v7196_v48  ;;  %v7156_v1 = vmul.f32 %v14655_v30, %v15468_v39  ;;  %v7158_v49 = vmul.f32 %v14655_v30, %v15469_v4 }
 0xeea   :  { %v7262_v21 = vpack.c.bf16 %v7237_v37, %v7236_v0  ;;  %v7243_v7 = vadd.f32 %v14667_v53, %v7198_v47  ;;  %v7240_v33 = vadd.f32 %v14653_v6, %v7195_v28  ;;  %v7155_v25 = vmul.f32 %v14647_v52, %v15470_v16 }
 0xeeb   :  { %v7242_v10 = vadd.f32 %v14653_v6, %v7197_v54  ;;  %v7157_v26 = vmul.f32 %v14647_v52, %v15471_v15  ;;  %v7200_v41 = vmul.f32 %v14663_v18, %v7156_v1  ;;  %v7202_v38 = vmul.f32 %v14663_v18, %v7158_v49 }
 0xeec   :  { %v7263_v58 = vpack.c.bf16 %v7241_v35, %v7240_v33  ;;  %v7199_v30 = vmul.f32 %v14638_v24, %v7155_v25 }
 0xeed   :  { %v7264_v29 = vpack.c.bf16 %v7243_v7, %v7242_v10  ;;  %v7201_v36 = vmul.f32 %v14638_v24, %v7157_v26  ;;  %v7245_v59 = vadd.f32 %v14667_v53, %v7200_v41  ;;  %v7247_v14 = vadd.f32 %v14667_v53, %v7202_v38 }
 0xeee   :  { %v7244_v52 = vadd.f32 %v14653_v6, %v7199_v30  ;;  %v7722_v24 = vsel %vm176_vm0, %v14697_v46, 0 }
 0xeef   :  { %10381 = vmatmul.mubr.msk.bf16.gmra.mrb[200].mxu1 %vm133_vm1, %v14762_v5  ;;  %v7246_v13 = vadd.f32 %v14653_v6, %v7201_v36  ;;  %v14903_v6 = vld [vmem:[%s15291_s10 + $0x2] ss:$0 sm:$0xff] }
 0xef0   :  { %10384 = vmatprep.mubr.msk.bf16.mxu1 %vm133_vm1, %v14768_v27  ;;  %v7265_v61 = vpack.c.bf16 %v7245_v59, %v7244_v52 }
 0xef1   :  { %v7266_v42 = vpack.c.bf16 %v7247_v14, %v7246_v13 }
 0xef7   :  { %10385 = vmatmul.mubr.msk.bf16.gmra.mrb[204].mxu1 %vm133_vm1, %v14790_v32 }
 0xef8   :  { %10388 = vmatprep.mubr.msk.bf16.mxu1 %vm133_vm1, %v14793_v22 }
 0xeff   :  { %10389 = vmatmul.mubr.msk.bf16.gmra.mrb[208].mxu1 %vm133_vm1, %v7262_v21 }
 0xf00   :  { %10392 = vmatprep.mubr.msk.bf16.mxu1 %vm133_vm1, %v14793_v22 }
 0xf07   :  { %10393 = vmatmul.mubr.msk.bf16.gmra.mrb[212].mxu1 %vm133_vm1, %v7263_v58 }
 0xf08   :  { %10396 = vmatprep.mubr.msk.bf16.mxu1 %vm133_vm1, %v7264_v29 }
 0xf0f   :  { %10397 = vmatmul.mubr.msk.bf16.gmra.mrb[216].mxu1 %vm133_vm1, %v7265_v61 }
 0xf10   :  { %10400 = vmatprep.mubr.msk.bf16.mxu1 %vm133_vm1, %v7266_v42 }
 0xf17   :  { %10401 = vmatmul.mubr.msk.bf16.gmra.mrb[220].mxu1 %vm133_vm1, %v14764_v2 }
 0xf18   :  { %10406 = vmatprep.mubr.msk.bf16.mxu1 %vm133_vm1, %v14681_v45 }
 0xf1f   :  { %10407 = vmatmul.mubr.msk.bf16.vlgmr.msra.gmra.mrb[192].mxu1 %vm133_vm1, %v14679_v55 }
 0xf20   :  { %10410 = vmatprep.mubr.msk.bf16.mxu1 %vm133_vm1, %v14716_v44  ;;  %10439 = vmatpush3.bf16.msra.mxu1 %v7722_v24 }
 0xf27   :  { %10411 = vmatmul.mubr.msk.bf16.gmra.mrb[196].mxu1 %vm133_vm1, %v14720_v19 }
 0xf28   :  { %10414 = vmatprep.mubr.msk.bf16.mxu1 %vm133_vm1, %v14762_v5 }
 0xf2f   :  { %10415 = vmatmul.mubr.msk.bf16.gmra.mrb[200].mxu1 %vm133_vm1, %v14768_v27 }
 0xf30   :  { %10418 = vmatprep.mubr.msk.bf16.mxu1 %vm133_vm1, %v14790_v32 }
 0xf37   :  { %10419 = vmatmul.mubr.msk.bf16.gmra.mrb[204].mxu1 %vm133_vm1, %v14771_v8 }
 0xf38   :  { %10422 = vmatprep.mubr.msk.bf16.mxu1 %vm133_vm1, %v7262_v21 }
 0xf3f   :  { %10423 = vmatmul.mubr.msk.bf16.gmra.mrb[208].mxu1 %vm133_vm1, %v14793_v22 }
 0xf40   :  { %10426 = vmatprep.mubr.msk.bf16.mxu1 %vm133_vm1, %v7263_v58 }
 0xf47   :  { %10427 = vmatmul.mubr.msk.bf16.gmra.mrb[212].mxu1 %vm133_vm1, %v7264_v29 }
 0xf48   :  { %10430 = vmatprep.mubr.msk.bf16.mxu1 %vm133_vm1, %v7265_v61 }
 0xf4f   :  { %10431 = vmatmul.mubr.msk.bf16.gmra.mrb[216].mxu1 %vm133_vm1, %v7266_v42 }
 0xf50   :  { %10434 = vmatprep.mubr.msk.bf16.mxu1 %vm133_vm1, %v14764_v2 }
 0xf57   :  { %10435 = vmatmul.mubr.msk.bf16.gmra.mrb[220].mxu1 %vm133_vm1, %v14783_v11 }
 0xf58   :  { %10440 = vmatprep.mubr.msk.bf16.mxu1 %vm133_vm1, %v14679_v55 }
 0xf5f   :  { %10441 = vmatmul.mubr.msk.bf16.vlgmr.msra.gmra.mrb[192].mxu1 %vm133_vm1, %v14716_v44 }
 0xf60   :  { %10444 = vmatprep.mubr.msk.bf16.mxu1 %vm133_vm1, %v14720_v19 }
 0xf67   :  { %10445 = vmatmul.mubr.msk.bf16.gmra.mrb[196].mxu1 %vm133_vm1, %v14762_v5 }
 0xf68   :  { %10448 = vmatprep.mubr.msk.bf16.mxu1 %vm133_vm1, %v14768_v27 }
 0xf6f   :  { %10449 = vmatmul.mubr.msk.bf16.gmra.mrb[200].mxu1 %vm133_vm1, %v14790_v32 }
 0xf70   :  { %10452 = vmatprep.mubr.msk.bf16.mxu1 %vm133_vm1, %v14771_v8 }
 0xf77   :  { %10453 = vmatmul.mubr.msk.bf16.gmra.mrb[204].mxu1 %vm133_vm1, %v14790_v32 }
 0xf78   :  { %10456 = vmatprep.mubr.msk.bf16.mxu1 %vm133_vm1, %v14793_v22 }
 0xf7f   :  { %10457 = vmatmul.mubr.msk.bf16.gmra.mrb[208].mxu1 %vm133_vm1, %v7263_v58 }
 0xf80   :  { %10460 = vmatprep.mubr.msk.bf16.mxu1 %vm133_vm1, %v7264_v29 }
 0xf87   :  { %10461 = vmatmul.mubr.msk.bf16.gmra.mrb[212].mxu1 %vm133_vm1, %v7265_v61 }
 0xf88   :  { %10464 = vmatprep.mubr.msk.bf16.mxu1 %vm133_vm1, %v7266_v42 }
 0xf8f   :  { %10465 = vmatmul.mubr.msk.bf16.gmra.mrb[216].mxu1 %vm133_vm1, %v14764_v2 }
 0xf90   :  { %10468 = vmatprep.mubr.msk.bf16.mxu1 %vm133_vm1, %v14783_v11 }
 0xf97   :  { %10469 = vmatmul.mubr.msk.bf16.gmra.mrb[220].mxu1 %vm133_vm1, %v14764_v2 }
0x1032   :  { %v10442_v18 = vpop.f32.mrb[192].mxu1 }
0x1033   :  { %v14906_v53 = vadd.f32 %v10442_v18, %v14903_v6  ;;  %v7758_v55 = vpop.f32.mrb[193].mxu1  ;;  %v8317_v18 = vld [vmem:[%s15296_s13] sm:$0xf] }
0x1034   :  { %v14909_v45 = vadd.f32 %v14903_v6, %v7758_v55  ;;  %v10443_v46 = vpop.f32.mrb[194].mxu1  ;;  %11002 = vmatprep.subr.msk.bf16.mxu0 %vm176_vm0, %v8317_v18 }
0x1035   :  { %v9253_v44 = vmul.f32 -1.442695, %v14906_v53  ;;  %v14913_v19 = vadd.f32 %v10443_v46, %v14903_v6  ;;  %v7761_v5 = vpop.f32.mrb[195].mxu1 }
0x1036   :  { %v9251_v2 = vmul.f32 -1.442695, %v14909_v45  ;;  %v14917_v27 = vadd.f32 %v14903_v6, %v7761_v5 }
0x1037   :  { %11556 = vpow2.f32 %v9253_v44  ;;  %v9254_v8 = vmul.f32 -1.442695, %v14913_v19  ;;  %v8374_v44 = vsel %vm176_vm0, %v8317_v18, 0 }
0x1038   :  { %11558 = vpow2.f32 %v9251_v2  ;;  %v9252_v63 = vmul.f32 -1.442695, %v14917_v27  ;;  %10473 = vmatpush3.bf16.msra.mxu0 %v8374_v44 }
0x1039   :  { %11560 = vpow2.f32 %v9254_v8 }
0x103a   :  { %11562 = vpow2.f32 %v9252_v63  ;;  %v10446_v34 = vpop.f32.mrb[196].mxu1 }
0x103b   :  { %v14922_v3 = vadd.f32 %v10446_v34, %v14903_v6  ;;  %v7774_v9 = vpop.f32.mrb[197].mxu1 }
0x103c   :  { %v14925_v11 = vadd.f32 %v14903_v6, %v7774_v9  ;;  %v10447_v17 = vpop.f32.mrb[198].mxu1 }
0x103d   :  { %v9257_v60 = vmul.f32 -1.442695, %v14922_v3  ;;  %v14929_v62 = vadd.f32 %v10447_v17, %v14903_v6  ;;  %v7777_v12 = vpop.f32.mrb[199].mxu1 }
0x103e   :  { %v9255_v32 = vmul.f32 -1.442695, %v14925_v11  ;;  %v14933_v43 = vadd.f32 %v14903_v6, %v7777_v12 }
0x103f   :  { %11564 = vpow2.f32 %v9257_v60  ;;  %v9258_v22 = vmul.f32 -1.442695, %v14929_v62 }
0x1040   :  { %11566 = vpow2.f32 %v9255_v32  ;;  %v9256_v57 = vmul.f32 -1.442695, %v14933_v43 }
0x1041   :  { %v11557_v37 = vpop.eup %11556  ;;  %11568 = vpow2.f32 %v9258_v22 }
0x1042   :  { %v11559_v50 = vpop.eup %11558  ;;  %v8015_v51 = vadd.f32 1.0, %v11557_v37  ;;  %11570 = vpow2.f32 %v9256_v57  ;;  %v10450_v20 = vpop.f32.mrb[200].mxu1 }
0x1043   :  { %v11561_v0 = vpop.eup %11560  ;;  %v8013_v23 = vadd.f32 1.0, %v11559_v50  ;;  %v14938_v31 = vadd.f32 %v10450_v20, %v14903_v6  ;;  %v7790_v56 = vpop.f32.mrb[201].mxu1 }
0x1044   :  { %v11563_v40 = vpop.eup %11562  ;;  %11572 = vrcp.f32 %v8015_v51  ;;  %v8016_v21 = vadd.f32 1.0, %v11561_v0  ;;  %v14941_v48 = vadd.f32 %v14903_v6, %v7790_v56  ;;  %v10451_v47 = vpop.f32.mrb[202].mxu1 }
0x1045   :  { %11574 = vrcp.f32 %v8013_v23  ;;  %v8014_v28 = vadd.f32 1.0, %v11563_v40  ;;  %v9261_v54 = vmul.f32 -1.442695, %v14938_v31  ;;  %v14945_v35 = vadd.f32 %v10451_v47, %v14903_v6  ;;  %v7793_v39 = vpop.f32.mrb[203].mxu1 }
0x1046   :  { %11576 = vrcp.f32 %v8016_v21  ;;  %v9259_v1 = vmul.f32 -1.442695, %v14941_v48  ;;  %v14949_v7 = vadd.f32 %v14903_v6, %v7793_v39 }
0x1047   :  { %11578 = vrcp.f32 %v8014_v28  ;;  %v9262_v4 = vmul.f32 -1.442695, %v14945_v35 }
0x1048   :  { %11580 = vpow2.f32 %v9261_v54  ;;  %v9260_v49 = vmul.f32 -1.442695, %v14949_v7 }
0x1049   :  { %v11565_v33 = vpop.eup %11564  ;;  %11582 = vpow2.f32 %v9259_v1 }
0x104a   :  { %v11567_v16 = vpop.eup %11566  ;;  %v8019_v25 = vadd.f32 1.0, %v11565_v33  ;;  %11584 = vpow2.f32 %v9262_v4  ;;  %v10454_v10 = vpop.f32.mrb[204].mxu1 }
0x104b   :  { %v11569_v15 = vpop.eup %11568  ;;  %v8017_v26 = vadd.f32 1.0, %v11567_v16  ;;  %11586 = vpow2.f32 %v9260_v49  ;;  %v14954_v58 = vadd.f32 %v10454_v10, %v14903_v6  ;;  %v7806_v41 = vpop.f32.mrb[205].mxu1 }
0x104c   :  { %v11571_v29 = vpop.eup %11570  ;;  %11588 = vrcp.f32 %v8019_v25  ;;  %v8020_v38 = vadd.f32 1.0, %v11569_v15  ;;  %v14957_v30 = vadd.f32 %v14903_v6, %v7806_v41  ;;  %v10455_v36 = vpop.f32.mrb[206].mxu1 }
0x104d   :  { %11590 = vrcp.f32 %v8017_v26  ;;  %v8018_v59 = vadd.f32 1.0, %v11571_v29  ;;  %v9265_v14 = vmul.f32 -1.442695, %v14954_v58  ;;  %v14961_v52 = vadd.f32 %v10455_v36, %v14903_v6  ;;  %v7809_v13 = vpop.f32.mrb[207].mxu1 }
0x104e   :  { %v11573_v61 = vpop.eup %11572  ;;  %11592 = vrcp.f32 %v8020_v38  ;;  %v9263_v42 = vmul.f32 -1.442695, %v14957_v30  ;;  %v14965_v24 = vadd.f32 %v14903_v6, %v7809_v13 }
0x104f   :  { %v11575_v55 = vpop.eup %11574  ;;  %11594 = vrcp.f32 %v8018_v59  ;;  %v9266_v46 = vmul.f32 -1.442695, %v14961_v52 }
0x1050   :  { %v11577_v5 = vpop.eup %11576  ;;  %11596 = vpow2.f32 %v9265_v14  ;;  %v9264_v2 = vmul.f32 -1.442695, %v14965_v24  ;;  %8141 = vrot.lane.b32.xlu0 %v11575_v55, %s11832_s28 }
0x1051   :  { %v11579_v8 = vpop.eup %11578  ;;  %11598 = vpow2.f32 %v9263_v42 }
0x1052   :  { %v11581_v63 = vpop.eup %11580  ;;  %11600 = vpow2.f32 %v9266_v46  ;;  %8143 = vrot.lane.b32.xlu1 %v11579_v8, %s11832_s28  ;;  %v10458_v34 = vpop.f32.mrb[208].mxu1 }
0x1053   :  { %v11583_v9 = vpop.eup %11582  ;;  %v8023_v17 = vadd.f32 1.0, %v11581_v63  ;;  %11602 = vpow2.f32 %v9264_v2  ;;  %v14977_v60 = vadd.f32 %v10458_v34, %v14903_v6  ;;  %v7822_v12 = vpop.f32.mrb[209].mxu1 }
0x1054   :  { %v11585_v32 = vpop.eup %11584  ;;  %v8021_v22 = vadd.f32 1.0, %v11583_v9  ;;  %v14980_v57 = vadd.f32 %v14903_v6, %v7822_v12  ;;  %8145 = vrot.lane.b32.xlu0 %v11573_v61, %s11832_s28  ;;  %v10459_v37 = vpop.f32.mrb[210].mxu1 }
0x1055   :  { %v11587_v50 = vpop.eup %11586  ;;  %11604 = vrcp.f32 %v8023_v17  ;;  %v8024_v51 = vadd.f32 1.0, %v11585_v32  ;;  %v9269_v20 = vmul.f32 -1.442695, %v14977_v60  ;;  %v14985_v0 = vadd.f32 %v10459_v37, %v14903_v6  ;;  %v7825_v23 = vpop.f32.mrb[211].mxu1 }
0x1056   :  { %v11589_v56 = vpop.eup %11588  ;;  %11606 = vrcp.f32 %v8021_v22  ;;  %v8022_v40 = vadd.f32 1.0, %v11587_v50  ;;  %v9267_v21 = vmul.f32 -1.442695, %v14980_v57  ;;  %v14989_v47 = vadd.f32 %v14903_v6, %v7825_v23  ;;  %8147 = vrot.lane.b32.xlu1 %v11577_v5, %s11832_s28 }
0x1057   :  { %v11591_v28 = vpop.eup %11590  ;;  %11608 = vrcp.f32 %v8024_v51  ;;  %v9270_v54 = vmul.f32 -1.442695, %v14985_v0 }
0x1058   :  { %v11593_v39 = vpop.eup %11592  ;;  %11610 = vrcp.f32 %v8022_v40  ;;  %v9268_v1 = vmul.f32 -1.442695, %v14989_v47  ;;  %8149 = vrot.lane.b32.xlu0 %v11591_v28, %s11832_s28 }
0x1059   :  { %v11595_v4 = vpop.eup %11594  ;;  %11612 = vpow2.f32 %v9269_v20 }
0x105a   :  { %v11597_v49 = vpop.eup %11596  ;;  %11614 = vpow2.f32 %v9267_v21  ;;  %8151 = vrot.lane.b32.xlu1 %v11595_v4, %s11832_s28  ;;  %v10462_v33 = vpop.f32.mrb[212].mxu1 }
0x105b   :  { %v11599_v16 = vpop.eup %11598  ;;  %v8027_v25 = vadd.f32 1.0, %v11597_v49  ;;  %11616 = vpow2.f32 %v9270_v54  ;;  %v14997_v10 = vadd.f32 %v10462_v33, %v14903_v6  ;;  %v7838_v15 = vpop.f32.mrb[213].mxu1 }
0x105c   :  { %v11601_v26 = vpop.eup %11600  ;;  %v8025_v41 = vadd.f32 1.0, %v11599_v16  ;;  %11618 = vpow2.f32 %v9268_v1  ;;  %v15000_v29 = vadd.f32 %v14903_v6, %v7838_v15  ;;  %8153 = vrot.lane.b32.xlu0 %v11589_v56, %s11832_s28  ;;  %v10463_v38 = vpop.f32.mrb[214].mxu1 }
0x105d   :  { %v11603_v36 = vpop.eup %11602  ;;  %11620 = vrcp.f32 %v8027_v25  ;;  %v8028_v59 = vadd.f32 1.0, %v11601_v26  ;;  %v9273_v14 = vmul.f32 -1.442695, %v14997_v10  ;;  %v15005_v13 = vadd.f32 %v10463_v38, %v14903_v6  ;;  %v7841_v61 = vpop.f32.mrb[215].mxu1 }
0x105e   :  { %11622 = vrcp.f32 %v8025_v41  ;;  %v8026_v42 = vadd.f32 1.0, %v11603_v36  ;;  %v9271_v18 = vmul.f32 -1.442695, %v15000_v29  ;;  %v15009_v55 = vadd.f32 %v14903_v6, %v7841_v61  ;;  %8155 = vrot.lane.b32.xlu1 %v11593_v39, %s11832_s28 }
0x105f   :  { %v11605_v46 = vpop.eup %11604  ;;  %11624 = vrcp.f32 %v8028_v59  ;;  %v9274_v44 = vmul.f32 -1.442695, %v15005_v13 }
0x1060   :  { %v11607_v5 = vpop.eup %11606  ;;  %11626 = vrcp.f32 %v8026_v42  ;;  %v9272_v2 = vmul.f32 -1.442695, %v15009_v55 }
0x1061   :  { %v11609_v8 = vpop.eup %11608  ;;  %11628 = vpow2.f32 %v9273_v14  ;;  %8157 = vrot.lane.b32.xlu0 %v11607_v5, %s11832_s28 }
0x1062   :  { %v11611_v63 = vpop.eup %11610  ;;  %11630 = vpow2.f32 %v9271_v18  ;;  %v10466_v34 = vpop.f32.mrb[216].mxu1 }
0x1063   :  { %v11613_v9 = vpop.eup %11612  ;;  %11632 = vpow2.f32 %v9274_v44  ;;  %8159 = vrot.lane.b32.xlu1 %v11611_v63, %s11832_s28  ;;  %v15017_v17 = vadd.f32 %v10466_v34, %v14903_v6  ;;  %v7854_v12 = vpop.f32.mrb[217].mxu1 }
0x1064   :  { %v11615_v32 = vpop.eup %11614  ;;  %v8031_v22 = vadd.f32 1.0, %v11613_v9  ;;  %11634 = vpow2.f32 %v9272_v2  ;;  %v15020_v37 = vadd.f32 %v14903_v6, %v7854_v12  ;;  %v10467_v50 = vpop.f32.mrb[218].mxu1 }
0x1065   :  { %v11617_v51 = vpop.eup %11616  ;;  %v8029_v20 = vadd.f32 1.0, %v11615_v32  ;;  %8161 = vrot.lane.b32.xlu0 %v11605_v46, %s11832_s28  ;;  %v15024_v23 = vadd.f32 %v10467_v50, %v14903_v6  ;;  %v7857_v56 = vpop.f32.mrb[219].mxu1  ;;  %v9277_v28 = vmul.f32 -1.442695, %v15017_v17 }
0x1066   :  { %v11619_v40 = vpop.eup %11618  ;;  %11636 = vrcp.f32 %v8031_v22  ;;  %v8032_v21 = vadd.f32 1.0, %v11617_v51  ;;  %v15028_v54 = vadd.f32 %v14903_v6, %v7857_v56  ;;  %v9275_v4 = vmul.f32 -1.442695, %v15020_v37 }
0x1067   :  { %v11621_v39 = vpop.eup %11620  ;;  %11638 = vrcp.f32 %v8029_v20  ;;  %v8030_v1 = vadd.f32 1.0, %v11619_v40  ;;  %8163 = vrot.lane.b32.xlu1 %v11609_v8, %s11832_s28  ;;  %v9278_v33 = vmul.f32 -1.442695, %v15024_v23 }
0x1068   :  { %v11623_v49 = vpop.eup %11622  ;;  %11640 = vrcp.f32 %v8032_v21  ;;  %v9276_v25 = vmul.f32 -1.442695, %v15028_v54 }
0x1069   :  { %v11625_v16 = vpop.eup %11624  ;;  %11642 = vrcp.f32 %v8030_v1  ;;  %8165 = vrot.lane.b32.xlu0 %v11623_v49, %s11832_s28 }
0x106a   :  { %v11627_v15 = vpop.eup %11626  ;;  %11644 = vpow2.f32 %v9277_v28  ;;  %v10470_v26 = vpop.f32.mrb[220].mxu1 }
0x106b   :  { %v11629_v41 = vpop.eup %11628  ;;  %11646 = vpow2.f32 %v9275_v4  ;;  %8167 = vrot.lane.b32.xlu1 %v11627_v15, %s11832_s28  ;;  %v15037_v38 = vadd.f32 %v10470_v26, %v14903_v6  ;;  %v7870_v36 = vpop.f32.mrb[221].mxu1 }
0x106c   :  { %v11631_v59 = vpop.eup %11630  ;;  %v8035_v14 = vadd.f32 1.0, %v11629_v41  ;;  %11648 = vpow2.f32 %v9278_v33  ;;  %v15040_v61 = vadd.f32 %v14903_v6, %v7870_v36  ;;  %v10471_v42 = vpop.f32.mrb[222].mxu1 }
0x106d   :  { %v11633_v18 = vpop.eup %11632  ;;  %v8033_v46 = vadd.f32 1.0, %v11631_v59  ;;  %11650 = vpow2.f32 %v9276_v25  ;;  %8169 = vrot.lane.b32.xlu0 %v11621_v39, %s11832_s28  ;;  %v15044_v44 = vadd.f32 %v10471_v42, %v14903_v6  ;;  %v7873_v5 = vpop.f32.mrb[223].mxu1  ;;  %v9281_v63 = vmul.f32 -1.442695, %v15037_v38 }
0x106e   :  { %v11635_v2 = vpop.eup %11634  ;;  %11652 = vrcp.f32 %v8035_v14  ;;  %v8036_v8 = vadd.f32 1.0, %v11633_v18  ;;  %v15048_v34 = vadd.f32 %v14903_v6, %v7873_v5  ;;  %v9279_v12 = vmul.f32 -1.442695, %v15040_v61 }
0x106f   :  { %11654 = vrcp.f32 %v8033_v46  ;;  %v8034_v9 = vadd.f32 1.0, %v11635_v2  ;;  %8171 = vrot.lane.b32.xlu1 %v11625_v16, %s11832_s28  ;;  %v9282_v22 = vmul.f32 -1.442695, %v15044_v44 }
0x1070   :  { %v11637_v32 = vpop.eup %11636  ;;  %11656 = vrcp.f32 %v8036_v8  ;;  %v9280_v51 = vmul.f32 -1.442695, %v15048_v34 }
0x1071   :  { %v11639_v50 = vpop.eup %11638  ;;  %11658 = vrcp.f32 %v8034_v9 }
0x1072   :  { %v11641_v20 = vpop.eup %11640  ;;  %11660 = vpow2.f32 %v9281_v63  ;;  %8173 = vrot.lane.b32.xlu0 %v11639_v50, %s11832_s28 }
0x1073   :  { %v11643_v6 = vpop.eup %11642  ;;  %11662 = vpow2.f32 %v9279_v12 }
0x1074   :  { %v11645_v56 = vpop.eup %11644  ;;  %11664 = vpow2.f32 %v9282_v22  ;;  %8175 = vrot.lane.b32.xlu1 %v11643_v6, %s11832_s28 }
0x1075   :  { %v11647_v40 = vpop.eup %11646  ;;  %11666 = vpow2.f32 %v9280_v51  ;;  %v8039_v4 = vadd.f32 1.0, %v11645_v56 }
0x1076   :  { %v11649_v21 = vpop.eup %11648  ;;  %v8037_v28 = vadd.f32 1.0, %v11647_v40  ;;  %8177 = vrot.lane.b32.xlu0 %v11637_v32, %s11832_s28 }
0x1077   :  { %v11651_v39 = vpop.eup %11650  ;;  %v8040_v25 = vadd.f32 1.0, %v11649_v21 }
0x1078   :  { %v11653_v1 = vpop.eup %11652  ;;  %11668 = vrcp.f32 %v8037_v28  ;;  %v8038_v49 = vadd.f32 1.0, %v11651_v39  ;;  %8179 = vrot.lane.b32.xlu1 %v11641_v20, %s11832_s28 }
0x1079   :  { %v11655_v33 = vpop.eup %11654 }
0x107a   :  { %v11657_v16 = vpop.eup %11656  ;;  %11670 = vrcp.f32 %v8038_v49  ;;  %8181 = vrot.lane.b32.xlu0 %v11655_v33, %s11832_s28 }
0x107b   :  { %v11659_v15 = vpop.eup %11658  ;;  %11672 = vrcp.f32 %v8039_v4 }
0x107c   :  { %v11661_v26 = vpop.eup %11660  ;;  %8183 = vrot.lane.b32.xlu1 %v11659_v15, %s11832_s28  ;;  %11674 = vrcp.f32 %v8040_v25 }
0x107d   :  { %v11663_v41 = vpop.eup %11662  ;;  %v8043_v42 = vadd.f32 1.0, %v11661_v26 }
0x107e   :  { %v11665_v36 = vpop.eup %11664  ;;  %v8041_v59 = vadd.f32 1.0, %v11663_v41  ;;  %8185 = vrot.lane.b32.xlu0 %v11653_v1, %s11832_s28 }
0x107f   :  { %v11667_v14 = vpop.eup %11666  ;;  %v8044_v5 = vadd.f32 1.0, %v11665_v36 }
0x1080   :  { %11676 = vrcp.f32 %v8041_v59  ;;  %v8042_v18 = vadd.f32 1.0, %v11667_v14  ;;  %8187 = vrot.lane.b32.xlu1 %v11657_v16, %s11832_s28 }
0x1082   :  { %v11669_v46 = vpop.eup %11668  ;;  %11678 = vrcp.f32 %v8042_v18 }
0x1083   :  { %8189 = vrot.lane.b32.xlu0 %v11669_v46, %s11832_s28  ;;  %11680 = vrcp.f32 %v8043_v42 }
0x1084   :  { %v11671_v2 = vpop.eup %11670  ;;  %11682 = vrcp.f32 %v8044_v5 }
0x1085   :  { %8191 = vrot.lane.b32.xlu1 %v11671_v2, %s11832_s28  ;;  %v11673_v8 = vpop.eup %11672 }
0x1086   :  { %v11675_v63 = vpop.eup %11674 }
0x1087   :  { %8193 = vrot.lane.b32.xlu0 %v11673_v8, %s11832_s28 }
0x1089   :  { %8195 = vrot.lane.b32.xlu1 %v11675_v63, %s11832_s28 }
0x108a   :  { %v11677_v9 = vpop.eup %11676 }
0x108b   :  { %8197 = vrot.lane.b32.xlu0 %v11677_v9, %s11832_s28 }
0x108c   :  { %v11679_v12 = vpop.eup %11678 }
0x108d   :  { %8199 = vrot.lane.b32.xlu1 %v11679_v12, %s11832_s28  ;;  %v11681_v32 = vpop.eup %11680 }
0x108e   :  { %v11683_v22 = vpop.eup %11682 }
0x108f   :  { %8201 = vrot.lane.b32.xlu0 %v11681_v32, %s11832_s28 }
0x1091   :  { %8203 = vrot.lane.b32.xlu1 %v11683_v22, %s11832_s28 }
0x10c2   :  { %v8142_v50 = vpop.permute.xlu0 %8141 }
0x10c3   :  { %v8237_v51 = vadd.f32 %v14909_v45, %v8142_v50 }
0x10c4   :  { %v8144_v20 = vpop.permute.xlu1 %8143 }
0x10c5   :  { %v8238_v6 = vadd.f32 %v14917_v27, %v8144_v20  ;;  %v8269_v40 = vmax.f32 %v8237_v51, 0.0 }
0x10c6   :  { %v8146_v56 = vpop.permute.xlu0 %8145 }
0x10c7   :  { %v8270_v21 = vmax.f32 %v8238_v6, 0.0  ;;  %v8239_v28 = vadd.f32 %v14906_v53, %v8146_v56 }
0x10c8   :  { %v8148_v39 = vpop.permute.xlu1 %8147 }
0x10c9   :  { %v8301_v1 = vpack.c.bf16 %v8270_v21, %v8269_v40  ;;  %v8240_v4 = vadd.f32 %v14913_v19, %v8148_v39  ;;  %v8271_v33 = vmax.f32 %v8239_v28, 0.0 }
0x10ca   :  { %v8150_v49 = vpop.permute.xlu0 %8149 }
0x10cb   :  { %v8272_v16 = vmax.f32 %v8240_v4, 0.0  ;;  %v8241_v25 = vadd.f32 %v14925_v11, %v8150_v49  ;;  %10474 = vmatprep.mubr.msk.bf16.mxu0 %vm133_vm1, %v8301_v1 }
0x10cc   :  { %v8152_v45 = vpop.permute.xlu1 %8151 }
0x10cd   :  { %v8302_v15 = vpack.c.bf16 %v8272_v16, %v8271_v33  ;;  %v8242_v27 = vadd.f32 %v14933_v43, %v8152_v45  ;;  %v8273_v41 = vmax.f32 %v8241_v25, 0.0 }
0x10ce   :  { %v8154_v26 = vpop.permute.xlu0 %8153 }
0x10cf   :  { %v8274_v36 = vmax.f32 %v8242_v27, 0.0  ;;  %v8243_v53 = vadd.f32 %v14922_v3, %v8154_v26  ;;  %10475 = vmatmul.mubr.msk.bf16.vlgmr.msra.gmra.mrb[144].mxu0 %vm133_vm1, %v8302_v15 }
0x10d0   :  { %v8156_v59 = vpop.permute.xlu1 %8155 }
0x10d1   :  { %v8303_v19 = vpack.c.bf16 %v8274_v36, %v8273_v41  ;;  %v8244_v14 = vadd.f32 %v14929_v62, %v8156_v59  ;;  %v8275_v42 = vmax.f32 %v8243_v53, 0.0 }
0x10d3   :  { %v8276_v18 = vmax.f32 %v8244_v14, 0.0  ;;  %v8158_v11 = vpop.permute.xlu0 %8157  ;;  %10478 = vmatprep.mubr.msk.bf16.mxu0 %vm133_vm1, %v8303_v19 }
0x10d4   :  { %v8245_v46 = vadd.f32 %v14941_v48, %v8158_v11 }
0x10d5   :  { %v8304_v5 = vpack.c.bf16 %v8276_v18, %v8275_v42  ;;  %v8160_v43 = vpop.permute.xlu1 %8159 }
0x10d6   :  { %v8246_v2 = vadd.f32 %v14949_v7, %v8160_v43  ;;  %v8277_v3 = vmax.f32 %v8245_v46, 0.0 }
0x10d7   :  { %v8162_v8 = vpop.permute.xlu0 %8161  ;;  %10479 = vmatmul.mubr.msk.bf16.gmra.mrb[148].mxu0 %vm133_vm1, %v8304_v5 }
0x10d8   :  { %v8278_v63 = vmax.f32 %v8246_v2, 0.0  ;;  %v8247_v9 = vadd.f32 %v14938_v31, %v8162_v8 }
0x10d9   :  { %v8164_v12 = vpop.permute.xlu1 %8163 }
0x10da   :  { %v8305_v62 = vpack.c.bf16 %v8278_v63, %v8277_v3  ;;  %v8248_v32 = vadd.f32 %v14945_v35, %v8164_v12  ;;  %v8279_v50 = vmax.f32 %v8247_v9, 0.0 }
0x10db   :  { %v8166_v22 = vpop.permute.xlu0 %8165 }
0x10dc   :  { %v8280_v51 = vmax.f32 %v8248_v32, 0.0  ;;  %v8249_v48 = vadd.f32 %v14957_v30, %v8166_v22  ;;  %10482 = vmatprep.mubr.msk.bf16.mxu0 %vm133_vm1, %v8305_v62 }
0x10dd   :  { %v8168_v20 = vpop.permute.xlu1 %8167 }
0x10de   :  { %v8306_v7 = vpack.c.bf16 %v8280_v51, %v8279_v50  ;;  %v8250_v6 = vadd.f32 %v14965_v24, %v8168_v20  ;;  %v8281_v40 = vmax.f32 %v8249_v48, 0.0 }
0x10df   :  { %v8170_v56 = vpop.permute.xlu0 %8169 }
0x10e0   :  { %v8282_v21 = vmax.f32 %v8250_v6, 0.0  ;;  %v8251_v31 = vadd.f32 %v14954_v58, %v8170_v56  ;;  %10483 = vmatmul.mubr.msk.bf16.gmra.mrb[152].mxu0 %vm133_vm1, %v8306_v7 }
0x10e1   :  { %v8172_v28 = vpop.permute.xlu1 %8171 }
0x10e2   :  { %v8307_v35 = vpack.c.bf16 %v8282_v21, %v8281_v40  ;;  %v8252_v39 = vadd.f32 %v14961_v52, %v8172_v28  ;;  %v8283_v1 = vmax.f32 %v8251_v31, 0.0 }
0x10e4   :  { %v8284_v4 = vmax.f32 %v8252_v39, 0.0  ;;  %v8174_v30 = vpop.permute.xlu0 %8173  ;;  %10486 = vmatprep.mubr.msk.bf16.mxu0 %vm133_vm1, %v8307_v35 }
0x10e5   :  { %v8253_v49 = vadd.f32 %v14980_v57, %v8174_v30 }
0x10e6   :  { %v8308_v33 = vpack.c.bf16 %v8284_v4, %v8283_v1  ;;  %v8176_v24 = vpop.permute.xlu1 %8175 }
0x10e7   :  { %v8254_v16 = vadd.f32 %v14989_v47, %v8176_v24  ;;  %v8285_v58 = vmax.f32 %v8253_v49, 0.0 }
0x10e8   :  { %v8178_v25 = vpop.permute.xlu0 %8177  ;;  %10487 = vmatmul.mubr.msk.bf16.gmra.mrb[156].mxu0 %vm133_vm1, %v8308_v33 }
0x10e9   :  { %v8286_v45 = vmax.f32 %v8254_v16, 0.0  ;;  %v8255_v15 = vadd.f32 %v14977_v60, %v8178_v25 }
0x10ea   :  { %v8180_v27 = vpop.permute.xlu1 %8179 }
0x10eb   :  { %v8309_v52 = vpack.c.bf16 %v8286_v45, %v8285_v58  ;;  %v8256_v26 = vadd.f32 %v14985_v0, %v8180_v27  ;;  %v8287_v36 = vmax.f32 %v8255_v15, 0.0 }
0x10ec   :  { %v8182_v41 = vpop.permute.xlu0 %8181 }
0x10ed   :  { %v8288_v53 = vmax.f32 %v8256_v26, 0.0  ;;  %v8257_v57 = vadd.f32 %v15000_v29, %v8182_v41  ;;  %10490 = vmatprep.mubr.msk.bf16.mxu0 %vm133_vm1, %v8309_v52 }
0x10ee   :  { %v8184_v59 = vpop.permute.xlu1 %8183 }
0x10ef   :  { %v8310_v47 = vpack.c.bf16 %v8288_v53, %v8287_v36  ;;  %v8258_v19 = vadd.f32 %v15009_v55, %v8184_v59  ;;  %v8289_v42 = vmax.f32 %v8257_v57, 0.0 }
0x10f0   :  { %v8186_v14 = vpop.permute.xlu0 %8185 }
0x10f1   :  { %v8290_v18 = vmax.f32 %v8258_v19, 0.0  ;;  %v8259_v60 = vadd.f32 %v14997_v10, %v8186_v14  ;;  %10491 = vmatmul.mubr.msk.bf16.gmra.mrb[160].mxu0 %vm133_vm1, %v8310_v47 }
0x10f2   :  { %v8188_v11 = vpop.permute.xlu1 %8187 }
0x10f3   :  { %v8311_v0 = vpack.c.bf16 %v8290_v18, %v8289_v42  ;;  %v8260_v46 = vadd.f32 %v15005_v13, %v8188_v11  ;;  %v8291_v5 = vmax.f32 %v8259_v60, 0.0 }
0x10f5   :  { %v8292_v43 = vmax.f32 %v8260_v46, 0.0  ;;  %v8190_v29 = vpop.permute.xlu0 %8189  ;;  %10494 = vmatprep.mubr.msk.bf16.mxu0 %vm133_vm1, %v8311_v0 }
0x10f6   :  { %v8261_v2 = vadd.f32 %v15020_v37, %v8190_v29 }
0x10f7   :  { %v8312_v8 = vpack.c.bf16 %v8292_v43, %v8291_v5  ;;  %v8192_v55 = vpop.permute.xlu1 %8191 }
0x10f8   :  { %v8262_v3 = vadd.f32 %v15028_v54, %v8192_v55  ;;  %v8293_v10 = vmax.f32 %v8261_v2, 0.0 }
0x10f9   :  { %v8194_v63 = vpop.permute.xlu0 %8193  ;;  %10495 = vmatmul.mubr.msk.bf16.gmra.mrb[164].mxu0 %vm133_vm1, %v8312_v8 }
0x10fa   :  { %v8294_v9 = vmax.f32 %v8262_v3, 0.0  ;;  %v8263_v12 = vadd.f32 %v15017_v17, %v8194_v63 }
0x10fb   :  { %v8196_v62 = vpop.permute.xlu1 %8195 }
0x10fc   :  { %v8313_v13 = vpack.c.bf16 %v8294_v9, %v8293_v10  ;;  %v8264_v32 = vadd.f32 %v15024_v23, %v8196_v62  ;;  %v8295_v50 = vmax.f32 %v8263_v12, 0.0 }
0x10fd   :  { %v8198_v22 = vpop.permute.xlu0 %8197 }
0x10fe   :  { %v8296_v51 = vmax.f32 %v8264_v32, 0.0  ;;  %v8265_v37 = vadd.f32 %v15040_v61, %v8198_v22  ;;  %10498 = vmatprep.mubr.msk.bf16.mxu0 %vm133_vm1, %v8313_v13 }
0x10ff   :  { %v8200_v48 = vpop.permute.xlu1 %8199 }
0x1100   :  { %v8314_v54 = vpack.c.bf16 %v8296_v51, %v8295_v50  ;;  %v8266_v20 = vadd.f32 %v15048_v34, %v8200_v48  ;;  %v8297_v6 = vmax.f32 %v8265_v37, 0.0  ;;  %v15121_v34 = vld [vmem:[%s15297_s14] ss:$0 sm:$0xff] }
0x1101   :  { %v8202_v7 = vpop.permute.xlu0 %8201 }
0x1102   :  { %v8298_v56 = vmax.f32 %v8266_v20, 0.0  ;;  %v8267_v17 = vadd.f32 %v15037_v38, %v8202_v7  ;;  %10499 = vmatmul.mubr.msk.bf16.gmra.mrb[168].mxu0 %vm133_vm1, %v8314_v54 }
0x1103   :  { %v8204_v40 = vpop.permute.xlu1 %8203 }
0x1104   :  { %v8315_v23 = vpack.c.bf16 %v8298_v56, %v8297_v6  ;;  %v8268_v21 = vadd.f32 %v15044_v44, %v8204_v40  ;;  %v8299_v31 = vmax.f32 %v8267_v17, 0.0 }
0x1106   :  { %v8300_v28 = vmax.f32 %v8268_v21, 0.0  ;;  %10502 = vmatprep.mubr.msk.bf16.mxu0 %vm133_vm1, %v8315_v23 }
0x1108   :  { %v8316_v61 = vpack.c.bf16 %v8300_v28, %v8299_v31 }
0x110a   :  { %10503 = vmatmul.mubr.msk.bf16.gmra.mrb[172].mxu0 %vm133_vm1, %v8316_v61 }
0x11a2   :  { %v10476_v35 = vpop.f32.mrb[144].mxu0 }
0x11a3   :  { %v8419_v38 = vadd.f32 %v10476_v35, %v15121_v34  ;;  %v8410_v39 = vpop.f32.mrb[145].mxu0 }
0x11a4   :  { %v8411_v1 = vadd.f32 %v15121_v34, %v8410_v39  ;;  %v10477_v4 = vpop.f32.mrb[146].mxu0 }
0x11a5   :  { %v9302_v44 = vmul.f32 -1.442695, %v8419_v38  ;;  %v8422_v30 = vadd.f32 %v10477_v4, %v15121_v34  ;;  %v8413_v49 = vpop.f32.mrb[147].mxu0 }
0x11a6   :  { %v9300_v33 = vmul.f32 -1.442695, %v8411_v1  ;;  %v8414_v24 = vadd.f32 %v15121_v34, %v8413_v49 }
0x11a7   :  { %11684 = vpow2.f32 %v9302_v44  ;;  %v9303_v16 = vmul.f32 -1.442695, %v8422_v30 }
0x11a8   :  { %11686 = vpow2.f32 %v9300_v33  ;;  %v9301_v25 = vmul.f32 -1.442695, %v8414_v24 }
0x11a9   :  { %11688 = vpow2.f32 %v9303_v16 }
0x11aa   :  { %11690 = vpow2.f32 %v9301_v25  ;;  %v10480_v58 = vpop.f32.mrb[148].mxu0 }
0x11ab   :  { %v8435_v45 = vadd.f32 %v10480_v58, %v15121_v34  ;;  %v8426_v15 = vpop.f32.mrb[149].mxu0 }
0x11ac   :  { %v8427_v27 = vadd.f32 %v15121_v34, %v8426_v15  ;;  %v10481_v52 = vpop.f32.mrb[150].mxu0 }
0x11ad   :  { %v9306_v26 = vmul.f32 -1.442695, %v8435_v45  ;;  %v8438_v41 = vadd.f32 %v10481_v52, %v15121_v34  ;;  %v8429_v36 = vpop.f32.mrb[151].mxu0 }
0x11ae   :  { %v9304_v53 = vmul.f32 -1.442695, %v8427_v27  ;;  %v8430_v57 = vadd.f32 %v15121_v34, %v8429_v36 }
0x11af   :  { %11692 = vpow2.f32 %v9306_v26  ;;  %v9307_v59 = vmul.f32 -1.442695, %v8438_v41 }
0x11b0   :  { %11694 = vpow2.f32 %v9304_v53  ;;  %v9305_v47 = vmul.f32 -1.442695, %v8430_v57 }
0x11b1   :  { %v11685_v19 = vpop.eup %11684  ;;  %11696 = vpow2.f32 %v9307_v59 }
0x11b2   :  { %v11687_v14 = vpop.eup %11686  ;;  %v8635_v42 = vadd.f32 1.0, %v11685_v19  ;;  %11698 = vpow2.f32 %v9305_v47 }
0x11b3   :  { %v11689_v18 = vpop.eup %11688  ;;  %v8633_v60 = vadd.f32 1.0, %v11687_v14  ;;  %v10484_v11 = vpop.f32.mrb[152].mxu0 }
0x11b4   :  { %v11691_v0 = vpop.eup %11690  ;;  %11700 = vrcp.f32 %v8635_v42  ;;  %v8636_v46 = vadd.f32 1.0, %v11689_v18  ;;  %v8451_v5 = vadd.f32 %v10484_v11, %v15121_v34  ;;  %v8442_v43 = vpop.f32.mrb[153].mxu0 }
0x11b5   :  { %11702 = vrcp.f32 %v8633_v60  ;;  %v8634_v29 = vadd.f32 1.0, %v11691_v0  ;;  %v8443_v2 = vadd.f32 %v15121_v34, %v8442_v43  ;;  %v10485_v8 = vpop.f32.mrb[154].mxu0 }
0x11b6   :  { %11704 = vrcp.f32 %v8636_v46  ;;  %v9310_v55 = vmul.f32 -1.442695, %v8451_v5  ;;  %v8454_v3 = vadd.f32 %v10485_v8, %v15121_v34  ;;  %v8445_v63 = vpop.f32.mrb[155].mxu0 }
0x11b7   :  { %11706 = vrcp.f32 %v8634_v29  ;;  %v9308_v10 = vmul.f32 -1.442695, %v8443_v2  ;;  %v8446_v9 = vadd.f32 %v15121_v34, %v8445_v63 }
0x11b8   :  { %11708 = vpow2.f32 %v9310_v55  ;;  %v9311_v12 = vmul.f32 -1.442695, %v8454_v3 }
0x11b9   :  { %v11693_v62 = vpop.eup %11692  ;;  %11710 = vpow2.f32 %v9308_v10  ;;  %v9309_v13 = vmul.f32 -1.442695, %v8446_v9 }
0x11ba   :  { %v11695_v32 = vpop.eup %11694  ;;  %v8639_v22 = vadd.f32 1.0, %v11693_v62  ;;  %11712 = vpow2.f32 %v9311_v12 }
0x11bb   :  { %v11697_v50 = vpop.eup %11696  ;;  %v8637_v51 = vadd.f32 1.0, %v11695_v32  ;;  %11714 = vpow2.f32 %v9309_v13  ;;  %v10488_v37 = vpop.f32.mrb[156].mxu0 }
0x11bc   :  { %v11699_v48 = vpop.eup %11698  ;;  %11716 = vrcp.f32 %v8639_v22  ;;  %v8640_v54 = vadd.f32 1.0, %v11697_v50  ;;  %v8467_v20 = vadd.f32 %v10488_v37, %v15121_v34  ;;  %v8458_v7 = vpop.f32.mrb[157].mxu0 }
0x11bd   :  { %11718 = vrcp.f32 %v8637_v51  ;;  %v8638_v6 = vadd.f32 1.0, %v11699_v48  ;;  %v8459_v56 = vadd.f32 %v15121_v34, %v8458_v7  ;;  %v10489_v17 = vpop.f32.mrb[158].mxu0 }
0x11be   :  { %v11701_v40 = vpop.eup %11700  ;;  %11720 = vrcp.f32 %v8640_v54  ;;  %v9314_v23 = vmul.f32 -1.442695, %v8467_v20  ;;  %v8470_v21 = vadd.f32 %v10489_v17, %v15121_v34  ;;  %v8461_v31 = vpop.f32.mrb[159].mxu0 }
0x11bf   :  { %v11703_v28 = vpop.eup %11702  ;;  %8731 = vst.msk [vmem:[%s15298_s15 + $0x10] sm:$0xff] %vm133_vm1, %v11701_v40  ;;  %11722 = vrcp.f32 %v8638_v6  ;;  %v9312_v61 = vmul.f32 -1.442695, %v8459_v56  ;;  %v8462_v35 = vadd.f32 %v15121_v34, %v8461_v31 }
0x11c0   :  { %v11705_v38 = vpop.eup %11704  ;;  %8729 = vst.msk [vmem:[%s15298_s15] sm:$0xff] %vm133_vm1, %v11703_v28  ;;  %11724 = vpow2.f32 %v9314_v23  ;;  %v9315_v39 = vmul.f32 -1.442695, %v8470_v21 }
0x11c1   :  { %v11707_v1 = vpop.eup %11706  ;;  %8732 = vst.msk [vmem:[%s15298_s15 + $0x18] sm:$0xff] %vm133_vm1, %v11705_v38  ;;  %11726 = vpow2.f32 %v9312_v61  ;;  %v9313_v4 = vmul.f32 -1.442695, %v8462_v35 }
0x11c2   :  { %v11709_v44 = vpop.eup %11708  ;;  %8730 = vst.msk [vmem:[%s15298_s15 + $0x8] sm:$0xff] %vm133_vm1, %v11707_v1  ;;  %11728 = vpow2.f32 %v9315_v39 }
0x11c3   :  { %v11711_v30 = vpop.eup %11710  ;;  %v8643_v49 = vadd.f32 1.0, %v11709_v44  ;;  %11730 = vpow2.f32 %v9313_v4 }
0x11c4   :  { %v11713_v33 = vpop.eup %11712  ;;  %v8641_v24 = vadd.f32 1.0, %v11711_v30  ;;  %v10492_v16 = vpop.f32.mrb[160].mxu0 }
0x11c5   :  { %v11715_v25 = vpop.eup %11714  ;;  %11732 = vrcp.f32 %v8643_v49  ;;  %v8644_v58 = vadd.f32 1.0, %v11713_v33  ;;  %v8483_v45 = vadd.f32 %v10492_v16, %v15121_v34  ;;  %v8474_v15 = vpop.f32.mrb[161].mxu0 }
0x11c6   :  { %v11717_v27 = vpop.eup %11716  ;;  %11734 = vrcp.f32 %v8641_v24  ;;  %v8642_v52 = vadd.f32 1.0, %v11715_v25  ;;  %v8475_v26 = vadd.f32 %v15121_v34, %v8474_v15  ;;  %v10493_v41 = vpop.f32.mrb[162].mxu0 }
0x11c7   :  { %v11719_v36 = vpop.eup %11718  ;;  %8735 = vst.msk [vmem:[%s15298_s15 + $0x30] sm:$0xff] %vm133_vm1, %v11717_v27  ;;  %11736 = vrcp.f32 %v8644_v58  ;;  %v9318_v53 = vmul.f32 -1.442695, %v8483_v45  ;;  %v8486_v57 = vadd.f32 %v10493_v41, %v15121_v34  ;;  %v8477_v59 = vpop.f32.mrb[163].mxu0 }
0x11c8   :  { %v11721_v47 = vpop.eup %11720  ;;  %8733 = vst.msk [vmem:[%s15298_s15 + $0x20] sm:$0xff] %vm133_vm1, %v11719_v36  ;;  %11738 = vrcp.f32 %v8642_v52  ;;  %v9316_v19 = vmul.f32 -1.442695, %v8475_v26  ;;  %v8478_v14 = vadd.f32 %v15121_v34, %v8477_v59 }
0x11c9   :  { %v11723_v42 = vpop.eup %11722  ;;  %8736 = vst.msk [vmem:[%s15298_s15 + $0x38] sm:$0xff] %vm133_vm1, %v11721_v47  ;;  %11740 = vpow2.f32 %v9318_v53  ;;  %v9319_v18 = vmul.f32 -1.442695, %v8486_v57 }
0x11ca   :  { %v11725_v60 = vpop.eup %11724  ;;  %8734 = vst.msk [vmem:[%s15298_s15 + $0x28] sm:$0xff] %vm133_vm1, %v11723_v42  ;;  %11742 = vpow2.f32 %v9316_v19  ;;  %v9317_v11 = vmul.f32 -1.442695, %v8478_v14 }
0x11cb   :  { %v11727_v0 = vpop.eup %11726  ;;  %v8647_v46 = vadd.f32 1.0, %v11725_v60  ;;  %11744 = vpow2.f32 %v9319_v18 }
0x11cc   :  { %v11729_v5 = vpop.eup %11728  ;;  %v8645_v43 = vadd.f32 1.0, %v11727_v0  ;;  %11746 = vpow2.f32 %v9317_v11  ;;  %v10496_v29 = vpop.f32.mrb[164].mxu0 }
0x11cd   :  { %v11731_v2 = vpop.eup %11730  ;;  %11748 = vrcp.f32 %v8647_v46  ;;  %v8648_v8 = vadd.f32 1.0, %v11729_v5  ;;  %v8499_v55 = vadd.f32 %v10496_v29, %v15121_v34  ;;  %v8490_v3 = vpop.f32.mrb[165].mxu0 }
0x11ce   :  { %11750 = vrcp.f32 %v8645_v43  ;;  %v8646_v63 = vadd.f32 1.0, %v11731_v2  ;;  %v8491_v10 = vadd.f32 %v15121_v34, %v8490_v3  ;;  %v10497_v9 = vpop.f32.mrb[166].mxu0 }
0x11cf   :  { %v11733_v12 = vpop.eup %11732  ;;  %11752 = vrcp.f32 %v8648_v8  ;;  %v9322_v62 = vmul.f32 -1.442695, %v8499_v55  ;;  %v8502_v13 = vadd.f32 %v10497_v9, %v15121_v34  ;;  %v8493_v32 = vpop.f32.mrb[167].mxu0 }
0x11d0   :  { %v11735_v22 = vpop.eup %11734  ;;  %8739 = vst.msk [vmem:[%s15298_s15 + $0x50] sm:$0xff] %vm133_vm1, %v11733_v12  ;;  %11754 = vrcp.f32 %v8646_v63  ;;  %v9320_v50 = vmul.f32 -1.442695, %v8491_v10  ;;  %v8494_v51 = vadd.f32 %v15121_v34, %v8493_v32 }
0x11d1   :  { %v11737_v37 = vpop.eup %11736  ;;  %8737 = vst.msk [vmem:[%s15298_s15 + $0x40] sm:$0xff] %vm133_vm1, %v11735_v22  ;;  %11756 = vpow2.f32 %v9322_v62  ;;  %v9323_v48 = vmul.f32 -1.442695, %v8502_v13 }
0x11d2   :  { %v11739_v54 = vpop.eup %11738  ;;  %8740 = vst.msk [vmem:[%s15298_s15 + $0x58] sm:$0xff] %vm133_vm1, %v11737_v37  ;;  %11758 = vpow2.f32 %v9320_v50  ;;  %v9321_v20 = vmul.f32 -1.442695, %v8494_v51 }
0x11d3   :  { %v11741_v7 = vpop.eup %11740  ;;  %8738 = vst.msk [vmem:[%s15298_s15 + $0x48] sm:$0xff] %vm133_vm1, %v11739_v54  ;;  %11760 = vpow2.f32 %v9323_v48 }
0x11d4   :  { %v11743_v6 = vpop.eup %11742  ;;  %v8651_v56 = vadd.f32 1.0, %v11741_v7  ;;  %11762 = vpow2.f32 %v9321_v20 }
0x11d5   :  { %v11745_v17 = vpop.eup %11744  ;;  %v8649_v40 = vadd.f32 1.0, %v11743_v6  ;;  %v10500_v23 = vpop.f32.mrb[168].mxu0 }
0x11d6   :  { %v11747_v21 = vpop.eup %11746  ;;  %11764 = vrcp.f32 %v8651_v56  ;;  %v8652_v31 = vadd.f32 1.0, %v11745_v17  ;;  %v8515_v28 = vadd.f32 %v10500_v23, %v15121_v34  ;;  %v8506_v61 = vpop.f32.mrb[169].mxu0 }
0x11d7   :  { %v11749_v35 = vpop.eup %11748  ;;  %11766 = vrcp.f32 %v8649_v40  ;;  %v8650_v38 = vadd.f32 1.0, %v11747_v21  ;;  %v8507_v39 = vadd.f32 %v15121_v34, %v8506_v61  ;;  %v10501_v1 = vpop.f32.mrb[170].mxu0 }
0x11d8   :  { %v11751_v4 = vpop.eup %11750  ;;  %8743 = vst.msk [vmem:[%s15298_s15 + $0x70] sm:$0xff] %vm133_vm1, %v11749_v35  ;;  %11768 = vrcp.f32 %v8652_v31  ;;  %v9326_v44 = vmul.f32 -1.442695, %v8515_v28  ;;  %v8518_v30 = vadd.f32 %v10501_v1, %v15121_v34  ;;  %v8509_v49 = vpop.f32.mrb[171].mxu0 }
0x11d9   :  { %v11753_v33 = vpop.eup %11752  ;;  %8741 = vst.msk [vmem:[%s15298_s15 + $0x60] sm:$0xff] %vm133_vm1, %v11751_v4  ;;  %11770 = vrcp.f32 %v8650_v38  ;;  %v9324_v24 = vmul.f32 -1.442695, %v8507_v39  ;;  %v8510_v16 = vadd.f32 %v15121_v34, %v8509_v49 }
0x11da   :  { %v11755_v25 = vpop.eup %11754  ;;  %8744 = vst.msk [vmem:[%s15298_s15 + $0x78] sm:$0xff] %vm133_vm1, %v11753_v33  ;;  %11772 = vpow2.f32 %v9326_v44  ;;  %v9327_v58 = vmul.f32 -1.442695, %v8518_v30 }
0x11db   :  { %v11757_v45 = vpop.eup %11756  ;;  %8742 = vst.msk [vmem:[%s15298_s15 + $0x68] sm:$0xff] %vm133_vm1, %v11755_v25  ;;  %11774 = vpow2.f32 %v9324_v24  ;;  %v9325_v15 = vmul.f32 -1.442695, %v8510_v16 }
0x11dc   :  { %v11759_v27 = vpop.eup %11758  ;;  %v8655_v52 = vadd.f32 1.0, %v11757_v45  ;;  %11776 = vpow2.f32 %v9327_v58 }
0x11dd   :  { %v11761_v26 = vpop.eup %11760  ;;  %v8653_v41 = vadd.f32 1.0, %v11759_v27  ;;  %11778 = vpow2.f32 %v9325_v15  ;;  %v10504_v36 = vpop.f32.mrb[172].mxu0 }
0x11de   :  { %v11763_v53 = vpop.eup %11762  ;;  %11780 = vrcp.f32 %v8655_v52  ;;  %v8656_v57 = vadd.f32 1.0, %v11761_v26  ;;  %v8531_v59 = vadd.f32 %v10504_v36, %v15121_v34  ;;  %v8522_v47 = vpop.f32.mrb[173].mxu0 }
0x11df   :  { %11782 = vrcp.f32 %v8653_v41  ;;  %v8654_v19 = vadd.f32 1.0, %v11763_v53  ;;  %v8523_v14 = vadd.f32 %v15121_v34, %v8522_v47  ;;  %v10505_v42 = vpop.f32.mrb[174].mxu0 }
0x11e0   :  { %v11765_v18 = vpop.eup %11764  ;;  %11784 = vrcp.f32 %v8656_v57  ;;  %v9330_v60 = vmul.f32 -1.442695, %v8531_v59  ;;  %v8534_v11 = vadd.f32 %v10505_v42, %v15121_v34  ;;  %v8525_v0 = vpop.f32.mrb[175].mxu0 }
0x11e1   :  { %v11767_v46 = vpop.eup %11766  ;;  %8747 = vst.msk [vmem:[%s15298_s15 + $0x90] sm:$0xff] %vm133_vm1, %v11765_v18  ;;  %11786 = vrcp.f32 %v8654_v19  ;;  %v9328_v5 = vmul.f32 -1.442695, %v8523_v14  ;;  %v8526_v43 = vadd.f32 %v15121_v34, %v8525_v0 }
0x11e2   :  { %v11769_v29 = vpop.eup %11768  ;;  %8745 = vst.msk [vmem:[%s15298_s15 + $0x80] sm:$0xff] %vm133_vm1, %v11767_v46  ;;  %11788 = vpow2.f32 %v9330_v60  ;;  %v9331_v2 = vmul.f32 -1.442695, %v8534_v11 }
0x11e3   :  { %v11771_v8 = vpop.eup %11770  ;;  %8748 = vst.msk [vmem:[%s15298_s15 + $0x98] sm:$0xff] %vm133_vm1, %v11769_v29  ;;  %11790 = vpow2.f32 %v9328_v5  ;;  %v9329_v55 = vmul.f32 -1.442695, %v8526_v43 }
0x11e4   :  { %v11773_v3 = vpop.eup %11772  ;;  %8746 = vst.msk [vmem:[%s15298_s15 + $0x88] sm:$0xff] %vm133_vm1, %v11771_v8  ;;  %11792 = vpow2.f32 %v9331_v2 }
0x11e5   :  { %v11775_v34 = vpop.eup %11774  ;;  %v8659_v63 = vadd.f32 1.0, %v11773_v3  ;;  %11794 = vpow2.f32 %v9329_v55 }
0x11e6   :  { %v11777_v10 = vpop.eup %11776  ;;  %v8657_v9 = vadd.f32 1.0, %v11775_v34 }
0x11e7   :  { %v11779_v12 = vpop.eup %11778  ;;  %11796 = vrcp.f32 %v8659_v63  ;;  %v8660_v62 = vadd.f32 1.0, %v11777_v10 }
0x11e8   :  { %v11781_v13 = vpop.eup %11780  ;;  %11798 = vrcp.f32 %v8657_v9  ;;  %v8658_v32 = vadd.f32 1.0, %v11779_v12 }
0x11e9   :  { %v11783_v22 = vpop.eup %11782  ;;  %8751 = vst.msk [vmem:[%s15298_s15 + $0xb0] sm:$0xff] %vm133_vm1, %v11781_v13  ;;  %11800 = vrcp.f32 %v8660_v62 }
0x11ea   :  { %v11785_v50 = vpop.eup %11784  ;;  %8749 = vst.msk [vmem:[%s15298_s15 + $0xa0] sm:$0xff] %vm133_vm1, %v11783_v22  ;;  %11802 = vrcp.f32 %v8658_v32 }
0x11eb   :  { %v11787_v51 = vpop.eup %11786  ;;  %8752 = vst.msk [vmem:[%s15298_s15 + $0xb8] sm:$0xff] %vm133_vm1, %v11785_v50 }
0x11ec   :  { %v11789_v37 = vpop.eup %11788  ;;  %8750 = vst.msk [vmem:[%s15298_s15 + $0xa8] sm:$0xff] %vm133_vm1, %v11787_v51 }
0x11ed   :  { %v11791_v48 = vpop.eup %11790  ;;  %v8663_v54 = vadd.f32 1.0, %v11789_v37 }
0x11ee   :  { %v11793_v20 = vpop.eup %11792  ;;  %v8661_v7 = vadd.f32 1.0, %v11791_v48 }
0x11ef   :  { %v11795_v6 = vpop.eup %11794  ;;  %11804 = vrcp.f32 %v8663_v54  ;;  %v8664_v56 = vadd.f32 1.0, %v11793_v20 }
0x11f0   :  { %11806 = vrcp.f32 %v8661_v7  ;;  %v8662_v17 = vadd.f32 1.0, %v11795_v6 }
0x11f1   :  { %v11797_v40 = vpop.eup %11796  ;;  %11808 = vrcp.f32 %v8664_v56 }
0x11f2   :  { %v11799_v23 = vpop.eup %11798  ;;  %8755 = vst.msk [vmem:[%s15298_s15 + $0xd0] sm:$0xff] %vm133_vm1, %v11797_v40  ;;  %11810 = vrcp.f32 %v8662_v17 }
0x11f3   :  { %v11801_v21 = vpop.eup %11800  ;;  %8753 = vst.msk [vmem:[%s15298_s15 + $0xc0] sm:$0xff] %vm133_vm1, %v11799_v23 }
0x11f4   :  { %v11803_v31 = vpop.eup %11802  ;;  %8756 = vst.msk [vmem:[%s15298_s15 + $0xd8] sm:$0xff] %vm133_vm1, %v11801_v21 }
0x11f5   :  { %8754 = vst.msk [vmem:[%s15298_s15 + $0xc8] sm:$0xff] %vm133_vm1, %v11803_v31 }
0x11f9   :  { %v11805_v28 = vpop.eup %11804 }
0x11fa   :  { %v11807_v61 = vpop.eup %11806  ;;  %8759 = vst.msk [vmem:[%s15298_s15 + $0xf0] sm:$0xff] %vm133_vm1, %v11805_v28 }
0x11fb   :  { %v11809_v35 = vpop.eup %11808  ;;  %8757 = vst.msk [vmem:[%s15298_s15 + $0xe0] sm:$0xff] %vm133_vm1, %v11807_v61 }
0x11fc   :  { %v11811_v38 = vpop.eup %11810  ;;  %8760 = vst.msk [vmem:[%s15298_s15 + $0xf8] sm:$0xff] %vm133_vm1, %v11809_v35 }
0x11fd   :  { %8758 = vst.msk [vmem:[%s15298_s15 + $0xe8] sm:$0xff] %vm133_vm1, %v11811_v38 }

</bundles_post_ra>
